<compile_context>
chip_gen: v5e
topology: v5e:2x2
jax: 0.10.0
libtpu: 0.0.40
codegen_flags: <defaults>
</compile_context>

<pallas_src>
import functools

import numpy as np
import jax
import jax.numpy as jnp
from jax.experimental import pallas as pl
from jax.experimental.pallas import tpu as pltpu

EPS = 1e-5
MM_DTYPE = jnp.bfloat16      # MXU operand dtype; accumulation/epilogue are f32


# --------------------------------------------------------------------------
# Host-side parameter packing (one-time; constants under jit).
# --------------------------------------------------------------------------

def _fold_bn(bias, gamma, beta, mean, var):
    s = gamma / np.sqrt(var + EPS)
    return s.astype(np.float32), ((bias - mean) * s + beta).astype(np.float32)


def _pack_conv_first(w):
    """Conv1d(1,16,64,stride=16,pad=24): 32 conv outputs per packed row.

    Row layout of the A operand: 560 consecutive padded input samples
    (512 of row v + first 48 of row v+1).  Output columns: 16 even conv
    positions first, then 16 odd ones (each a 16-channel block), so the
    MaxPool is max(left half, right half)."""
    cout, _, k = w.shape                       # (16, 1, 64)
    g, stride = 32, 16
    wb = np.zeros((stride * (g - 1) + k, g * cout), np.float32)
    wt = w[:, 0, :].T                          # (64, 16)
    for r in range(g):
        cb = r // 2 if r % 2 == 0 else g // 2 + r // 2
        wb[stride * r:stride * r + k, cb * cout:(cb + 1) * cout] = wt
    return wb


def _pack_conv_k3(w, g):
    """Stride-1 K=3 conv producing g conv outputs per packed row.

    A-row window = g+2 consecutive positions (prev pos | g positions | next
    pos), each a Cin-channel lane block.  Columns ordered evens|odds."""
    cout, cin, k = w.shape
    wb = np.zeros(((g + 2) * cin, g * cout), np.float32)
    for r in range(g):
        cb = r // 2 if r % 2 == 0 else g // 2 + r // 2
        for kk in range(k):
            q = r + kk
            wb[q * cin:(q + 1) * cin, cb * cout:(cb + 1) * cout] = w[:, :, kk].T
    return wb


def _pack_deconv(w, s, p, gin):
    """ConvTranspose1d packed weights: gin input positions/row -> s*gin output
    positions/row.  Window = gin + a + b positions starting at gin*v - a."""
    cin, cout, k = w.shape
    gout = s * gin
    a = (k - 1 - p) // s
    b = (s - 1 + p) // s
    q_n = gin + a + b
    wb = np.zeros((q_n * cin, gout * cout), np.float32)
    for r in range(gout):
        for q in range(q_n):
            kk = r + p + s * a - s * q
            if 0 <= kk < k:
                wb[q * cin:(q + 1) * cin, r * cout:(r + 1) * cout] = w[:, :, kk]
    return wb


def _pack_mask(rows, g, c, length):
    """1.0 on lane blocks holding valid sequence positions (< length)."""
    m = np.zeros((rows, g * c), np.float32)
    for v in range(rows):
        for r in range(g):
            if v * g + r < length:
                m[v, r * c:(r + 1) * c] = 1.0
    return m


def _sb(scale, shift, reps):
    return np.stack([np.tile(scale, reps), np.tile(shift, reps)]).astype(np.float32)


def make_params(key):
    """Deterministic PyTorch-layout parameters (numpy)."""
    keys = iter(jax.random.split(key, 128))

    def uniform(shape, fan_in):
        bound = 1.0 / np.sqrt(float(fan_in))
        return np.asarray(
            jax.random.uniform(next(keys), shape, jnp.float32, -bound, bound))

    def bn_init(c):
        g = 1.0 + 0.1 * np.asarray(jax.random.normal(next(keys), (c,), jnp.float32))
        b = 0.1 * np.asarray(jax.random.normal(next(keys), (c,), jnp.float32))
        m = 0.1 * np.asarray(jax.random.normal(next(keys), (c,), jnp.float32))
        v = 1.0 + 0.1 * np.abs(np.asarray(jax.random.normal(next(keys), (c,), jnp.float32)))
        return g, b, m, v

    params = {}
    conv_cfg = [(1, 16, 64), (16, 32, 3), (32, 64, 3), (64, 64, 3), (64, 64, 3)]
    params["conv"] = [(uniform((co, ci, k), ci * k), uniform((co,), ci * k), bn_init(co))
                      for ci, co, k in conv_cfg]
    params["enc"] = (uniform((100, 960), 960), uniform((100,), 960), bn_init(100))
    params["dec"] = (uniform((960, 100), 100), uniform((960,), 100))
    deconv_cfg = [(64, 64, 3), (64, 64, 3), (64, 32, 3), (32, 16, 3), (16, 1, 64)]
    params["deconv"] = [(uniform((ci, co, k), ci * k), uniform((co,), ci * k), bn_init(co))
                        for ci, co, k in deconv_cfg]
    return params


def prepare_params(params):
    """Build the 28 constant kernel operands (packed weights, folded BN, masks)."""
    consts = []

    # --- encoder convs: conv outputs per packed row ---
    conv_g = [32, 16, 8, 4, 2]
    for i, ((w, b, bnp), g) in enumerate(zip(params["conv"], conv_g)):
        scale, shift = _fold_bn(b, *bnp)
        wb = _pack_conv_first(w) if i == 0 else _pack_conv_k3(w, g)
        consts += [jnp.asarray(wb, MM_DTYPE), jnp.asarray(_sb(scale, shift, g))]

    # --- encoder Linear(960,100)+BN: rows permuted so that the row-major
    #     flatten of the (15 pos, 64 ch) activation matches torch.flatten(NCL).
    w_enc, b_enc, bnp = params["enc"]
    scale, shift = _fold_bn(b_enc, *bnp)
    we_p = w_enc.reshape(100, 64, 15).transpose(2, 1, 0).reshape(960, 100)
    consts += [jnp.asarray(we_p, MM_DTYPE), jnp.asarray(_sb(scale, shift, 1))]

    # --- decoder Linear(100,960): columns permuted to (pos, ch) order.
    w_dec, b_dec = params["dec"]
    wd_p = w_dec.reshape(64, 15, 100).transpose(2, 1, 0).reshape(100, 960)
    bd_p = b_dec.reshape(64, 15).T.reshape(1, 960).astype(np.float32)
    consts += [jnp.asarray(wd_p, MM_DTYPE), jnp.asarray(bd_p)]

    # --- decoder transpose convs: (stride, padding, gin, Lout) ---
    dec_cfg = [(2, 0, 1, 31), (2, 1, 2, 61), (2, 1, 4, 121), (2, 1, 8, 241),
               (16, 24, 16, 3856)]
    for i, ((w, b, bnp), (s, p, gin, lout)) in enumerate(zip(params["deconv"], dec_cfg)):
        _, cout, _ = w.shape
        scale, shift = _fold_bn(b, *bnp)
        gout = s * gin
        consts += [jnp.asarray(_pack_deconv(w, s, p, gin), MM_DTYPE),
                   jnp.asarray(_sb(scale, shift, gout))]
        if i < 4:  # ragged-end validity mask fed to the next layer
            consts.append(jnp.asarray(_pack_mask(16, gout, cout, lout)))
    return consts


# --------------------------------------------------------------------------
# The fused Pallas kernel: one grid step == one batch element, whole network.
# --------------------------------------------------------------------------

def _wdcnn_ae_kernel(
        x_ref,
        w1_ref, sb1_ref, w2_ref, sb2_ref, w3_ref, sb3_ref, w4_ref, sb4_ref,
        w5_ref, sb5_ref,
        we_ref, sbe_ref, wd_ref, bd_ref,
        wd1_ref, sbd1_ref, m1_ref,
        wd2_ref, sbd2_ref, m2_ref,
        wd3_ref, sbd3_ref, m3_ref,
        wd4_ref, sbd4_ref, m4_ref,
        wd5_ref, sbd5_ref,
        out_ref, lat_ref):
    f32 = jnp.float32

    def mm(a, w_ref):
        return jnp.dot(a.astype(MM_DTYPE), w_ref[...], preferred_element_type=f32)

    def bn(y, sb_ref):
        sb = sb_ref[...]
        return y * sb[0:1, :] + sb[1:2, :]

    def conv_pool(a, w_ref, sb_ref):
        # columns are ordered [even conv positions | odd conv positions]
        y = bn(mm(a, w_ref), sb_ref)
        n = y.shape[1] // 2
        return jnp.maximum(jnp.maximum(y[:, :n], y[:, n:]), 0.0)

    # ---------------------------- encoder ---------------------------------
    xr = x_ref[0]                                                 # (17, 512)
    a1 = jnp.concatenate([xr[0:16, :], xr[1:17, 0:48]], axis=1)   # (16, 560)
    h1 = conv_pool(a1, w1_ref, sb1_ref)          # (16, 256): 16 pos x 16 ch

    z256 = jnp.zeros((1, 256), f32)
    h1p = jnp.concatenate([z256, h1, z256], axis=0)               # (18, 256)
    a2 = jnp.concatenate([h1p[0:16, 240:256], h1p[1:17, :], h1p[2:18, 0:16]], axis=1)
    h2 = conv_pool(a2, w2_ref, sb2_ref)          # (16, 256): 8 pos x 32 ch

    h2p = jnp.concatenate([z256, h2, z256], axis=0)
    a3 = jnp.concatenate([h2p[0:16, 224:256], h2p[1:17, :], h2p[2:18, 0:32]], axis=1)
    h3 = conv_pool(a3, w3_ref, sb3_ref)          # (16, 256): 4 pos x 64 ch

    h3p = jnp.concatenate([z256, h3, z256], axis=0)
    a4 = jnp.concatenate([h3p[0:16, 192:256], h3p[1:17, :], h3p[2:18, 0:64]], axis=1)
    h4 = conv_pool(a4, w4_ref, sb4_ref)          # (16, 128): 2 pos x 64 ch

    a5 = jnp.concatenate([h4[0:15, :], h4[1:16, :]], axis=1)      # (15, 256)
    h5 = conv_pool(a5, w5_ref, sb5_ref)          # (15, 64): 1 pos x 64 ch

    # ------------------------- linear bottleneck --------------------------
    flat = jnp.concatenate([h5[l:l + 1, :] for l in range(15)], axis=1)  # (1, 960)
    lat = jnp.maximum(bn(mm(flat, we_ref), sbe_ref), 0.0)                # (1, 100)
    lat_ref[0] = lat.astype(lat_ref.dtype)

    dec = jnp.maximum(mm(lat, wd_ref) + bd_ref[...], 0.0)                # (1, 960)
    hd = jnp.concatenate([dec[:, 64 * l:64 * (l + 1)] for l in range(15)], axis=0)

    # ---------------------------- decoder ----------------------------------
    z64 = jnp.zeros((1, 64), f32)
    hdp = jnp.concatenate([z64, hd, z64], axis=0)                 # (17, 64)
    ad1 = jnp.concatenate([hdp[0:16, :], hdp[1:17, :]], axis=1)   # (16, 128)
    t1 = jnp.maximum(bn(mm(ad1, wd1_ref), sbd1_ref), 0.0) * m1_ref[...]   # 2 pos x 64

    z128 = jnp.zeros((1, 128), f32)
    t1p = jnp.concatenate([t1, z128], axis=0)                     # (17, 128)
    ad2 = jnp.concatenate([t1p[0:16, :], t1p[1:17, 0:64]], axis=1)        # (16, 192)
    t2 = jnp.maximum(bn(mm(ad2, wd2_ref), sbd2_ref), 0.0) * m2_ref[...]   # 4 pos x 64

    t2p = jnp.concatenate([t2, z256], axis=0)                     # (17, 256)
    ad3 = jnp.concatenate([t2p[0:16, :], t2p[1:17, 0:64]], axis=1)        # (16, 320)
    t3 = jnp.maximum(bn(mm(ad3, wd3_ref), sbd3_ref), 0.0) * m3_ref[...]   # 8 pos x 32

    t3p = jnp.concatenate([t3, z256], axis=0)                     # (17, 256)
    ad4 = jnp.concatenate([t3p[0:16, :], t3p[1:17, 0:32]], axis=1)        # (16, 288)
    t4 = jnp.maximum(bn(mm(ad4, wd4_ref), sbd4_ref), 0.0) * m4_ref[...]   # 16 pos x 16

    t4p = jnp.concatenate([z256, t4, z256], axis=0)               # (18, 256)
    ad5 = jnp.concatenate([t4p[0:16, 224:256], t4p[1:17, :], t4p[2:18, 0:32]], axis=1)
    y5 = bn(mm(ad5, wd5_ref), sbd5_ref)          # (16, 256): 256 pos x 1 ch, no ReLU
    out_ref[0] = y5.astype(out_ref.dtype)


# --------------------------------------------------------------------------
# Forward wrapper.
# --------------------------------------------------------------------------

def wdcnn_ae_forward(consts, x):
    """x: (B, 8192) -> (x_reconstructed (B, 1, 3856), latent (B, 100))."""
    B, L = x.shape
    assert L == 8192, L
    # Only XLA glue: pad (24 conv pad + tail zeros) and pack 512 samples/row.
    xin = jnp.pad(x.astype(jnp.float32), ((0, 0), (24, 488))).reshape(B, 17, 512)

    in_specs = [pl.BlockSpec((1, 17, 512), lambda b: (b, 0, 0))]
    in_specs += [pl.BlockSpec(c.shape, lambda b: (0, 0)) for c in consts]

    out_packed, latent = pl.pallas_call(
        _wdcnn_ae_kernel,
        out_shape=(jax.ShapeDtypeStruct((B, 16, 256), jnp.float32),
                   jax.ShapeDtypeStruct((B, 1, 100), jnp.float32)),
        grid_spec=pltpu.PrefetchScalarGridSpec(
            num_scalar_prefetch=0,
            grid=(B,),
            in_specs=in_specs,
            out_specs=(pl.BlockSpec((1, 16, 256), lambda b: (b, 0, 0)),
                       pl.BlockSpec((1, 1, 100), lambda b: (b, 0, 0))),
        ),
        compiler_params=pltpu.CompilerParams(
            dimension_semantics=("parallel",),
            vmem_limit_bytes=32 * 1024 * 1024),
    )(xin, *consts)

    x_rec = out_packed.reshape(B, 4096)[:, :3856].reshape(B, 1, 3856)
    return x_rec, latent.reshape(B, 100)


if __name__ == "__main__":
    key = jax.random.PRNGKey(0)
    pkey, xkey = jax.random.split(key)
    params = make_params(pkey)
    consts = prepare_params(params)

    # Input length must be 4096*2 = 8192 so that Linear(960, ...) matches.
    x = jax.random.normal(xkey, (2, 4096 * 2), jnp.float32)

    fwd = jax.jit(functools.partial(wdcnn_ae_forward, consts))
    x_rec, latent = fwd(x)
    jax.block_until_ready((x_rec, latent))

    assert x_rec.shape == (2, 1, 3856), x_rec.shape
    assert latent.shape == (2, 100), latent.shape
    assert bool(jnp.all(jnp.isfinite(x_rec))) and bool(jnp.all(jnp.isfinite(latent)))
    print("KERNEL_OK")
</pallas_src>

<mosaic_0001>
module attributes {stable_mosaic.version = 11 : i64} {
  func.func @_wdcnn_ae_kernel(%arg0: i32, %arg1: memref<1x17x512xf32, #tpu.memory_space<vmem>>, %arg2: memref<560x512xbf16, #tpu.memory_space<vmem>>, %arg3: memref<2x512xf32, #tpu.memory_space<vmem>>, %arg4: memref<288x512xbf16, #tpu.memory_space<vmem>>, %arg5: memref<2x512xf32, #tpu.memory_space<vmem>>, %arg6: memref<320x512xbf16, #tpu.memory_space<vmem>>, %arg7: memref<2x512xf32, #tpu.memory_space<vmem>>, %arg8: memref<384x256xbf16, #tpu.memory_space<vmem>>, %arg9: memref<2x256xf32, #tpu.memory_space<vmem>>, %arg10: memref<256x128xbf16, #tpu.memory_space<vmem>>, %arg11: memref<2x128xf32, #tpu.memory_space<vmem>>, %arg12: memref<960x100xbf16, #tpu.memory_space<vmem>>, %arg13: memref<2x100xf32, #tpu.memory_space<vmem>>, %arg14: memref<100x960xbf16, #tpu.memory_space<vmem>>, %arg15: memref<1x960xf32, #tpu.memory_space<vmem>>, %arg16: memref<128x128xbf16, #tpu.memory_space<vmem>>, %arg17: memref<2x128xf32, #tpu.memory_space<vmem>>, %arg18: memref<16x128xf32, #tpu.memory_space<vmem>>, %arg19: memref<192x256xbf16, #tpu.memory_space<vmem>>, %arg20: memref<2x256xf32, #tpu.memory_space<vmem>>, %arg21: memref<16x256xf32, #tpu.memory_space<vmem>>, %arg22: memref<320x256xbf16, #tpu.memory_space<vmem>>, %arg23: memref<2x256xf32, #tpu.memory_space<vmem>>, %arg24: memref<16x256xf32, #tpu.memory_space<vmem>>, %arg25: memref<288x256xbf16, #tpu.memory_space<vmem>>, %arg26: memref<2x256xf32, #tpu.memory_space<vmem>>, %arg27: memref<16x256xf32, #tpu.memory_space<vmem>>, %arg28: memref<320x256xbf16, #tpu.memory_space<vmem>>, %arg29: memref<2x256xf32, #tpu.memory_space<vmem>>, %arg30: memref<1x16x256xf32, #tpu.memory_space<vmem>>, %arg31: memref<1x1x100xf32, #tpu.memory_space<vmem>>) attributes {dimension_semantics = [#tpu.dimension_semantics<parallel>], iteration_bounds = array<i64: 2>, scalar_prefetch = 0 : i64, scratch_operands = 0 : i64, tpu.core_type = #tpu.core_type<tc>, window_params = [{transform_indices = @transform_0, window_bounds = array<i64: 1, 17, 512>}, {pipeline_mode = #tpu.pipeline_mode<synchronous>, transform_indices = @transform_1, window_bounds = array<i64: 560, 512>}, {pipeline_mode = #tpu.pipeline_mode<synchronous>, transform_indices = @transform_2, window_bounds = array<i64: 2, 512>}, {pipeline_mode = #tpu.pipeline_mode<synchronous>, transform_indices = @transform_3, window_bounds = array<i64: 288, 512>}, {pipeline_mode = #tpu.pipeline_mode<synchronous>, transform_indices = @transform_4, window_bounds = array<i64: 2, 512>}, {pipeline_mode = #tpu.pipeline_mode<synchronous>, transform_indices = @transform_5, window_bounds = array<i64: 320, 512>}, {pipeline_mode = #tpu.pipeline_mode<synchronous>, transform_indices = @transform_6, window_bounds = array<i64: 2, 512>}, {pipeline_mode = #tpu.pipeline_mode<synchronous>, transform_indices = @transform_7, window_bounds = array<i64: 384, 256>}, {pipeline_mode = #tpu.pipeline_mode<synchronous>, transform_indices = @transform_8, window_bounds = array<i64: 2, 256>}, {pipeline_mode = #tpu.pipeline_mode<synchronous>, transform_indices = @transform_9, window_bounds = array<i64: 256, 128>}, {pipeline_mode = #tpu.pipeline_mode<synchronous>, transform_indices = @transform_10, window_bounds = array<i64: 2, 128>}, {pipeline_mode = #tpu.pipeline_mode<synchronous>, transform_indices = @transform_11, window_bounds = array<i64: 960, 100>}, {pipeline_mode = #tpu.pipeline_mode<synchronous>, transform_indices = @transform_12, window_bounds = array<i64: 2, 100>}, {pipeline_mode = #tpu.pipeline_mode<synchronous>, transform_indices = @transform_13, window_bounds = array<i64: 100, 960>}, {pipeline_mode = #tpu.pipeline_mode<synchronous>, transform_indices = @transform_14, window_bounds = array<i64: 1, 960>}, {pipeline_mode = #tpu.pipeline_mode<synchronous>, transform_indices = @transform_15, window_bounds = array<i64: 128, 128>}, {pipeline_mode = #tpu.pipeline_mode<synchronous>, transform_indices = @transform_16, window_bounds = array<i64: 2, 128>}, {pipeline_mode = #tpu.pipeline_mode<synchronous>, transform_indices = @transform_17, window_bounds = array<i64: 16, 128>}, {pipeline_mode = #tpu.pipeline_mode<synchronous>, transform_indices = @transform_18, window_bounds = array<i64: 192, 256>}, {pipeline_mode = #tpu.pipeline_mode<synchronous>, transform_indices = @transform_19, window_bounds = array<i64: 2, 256>}, {pipeline_mode = #tpu.pipeline_mode<synchronous>, transform_indices = @transform_20, window_bounds = array<i64: 16, 256>}, {pipeline_mode = #tpu.pipeline_mode<synchronous>, transform_indices = @transform_21, window_bounds = array<i64: 320, 256>}, {pipeline_mode = #tpu.pipeline_mode<synchronous>, transform_indices = @transform_22, window_bounds = array<i64: 2, 256>}, {pipeline_mode = #tpu.pipeline_mode<synchronous>, transform_indices = @transform_23, window_bounds = array<i64: 16, 256>}, {pipeline_mode = #tpu.pipeline_mode<synchronous>, transform_indices = @transform_24, window_bounds = array<i64: 288, 256>}, {pipeline_mode = #tpu.pipeline_mode<synchronous>, transform_indices = @transform_25, window_bounds = array<i64: 2, 256>}, {pipeline_mode = #tpu.pipeline_mode<synchronous>, transform_indices = @transform_26, window_bounds = array<i64: 16, 256>}, {pipeline_mode = #tpu.pipeline_mode<synchronous>, transform_indices = @transform_27, window_bounds = array<i64: 320, 256>}, {pipeline_mode = #tpu.pipeline_mode<synchronous>, transform_indices = @transform_28, window_bounds = array<i64: 2, 256>}, {transform_indices = @transform_29, window_bounds = array<i64: 1, 16, 256>}, {transform_indices = @transform_30, window_bounds = array<i64: 1, 1, 100>}]} {
    %c0 = arith.constant 0 : index
    %c0_0 = arith.constant 0 : index
    %c0_1 = arith.constant 0 : index
    %0 = vector.load %arg1[%c0, %c0_0, %c0_1] : memref<1x17x512xf32, #tpu.memory_space<vmem>>, vector<1x17x512xf32>
    %1 = vector.shape_cast %0 : vector<1x17x512xf32> to vector<17x512xf32>
    %2 = vector.extract_strided_slice %1 {offsets = [0, 0], sizes = [16, 512], strides = [1, 1]} : vector<17x512xf32> to vector<16x512xf32>
    %3 = vector.extract_strided_slice %1 {offsets = [1, 0], sizes = [16, 48], strides = [1, 1]} : vector<17x512xf32> to vector<16x48xf32>
    %4 = tpu.concatenate %2, %3 in 1 : vector<16x512xf32>, vector<16x48xf32> -> vector<16x560xf32>
    %5 = arith.truncf %4 : vector<16x560xf32> to vector<16x560xbf16>
    %c0_2 = arith.constant 0 : index
    %c0_3 = arith.constant 0 : index
    %6 = vector.load %arg2[%c0_2, %c0_3] : memref<560x512xbf16, #tpu.memory_space<vmem>>, vector<560x512xbf16>
    %cst = arith.constant dense<0.000000e+00> : vector<16x512xf32>
    %7 = tpu.matmul %5, %6, %cst {dimension_numbers = #tpu.dot_dimension_numbers<[1], [0], [0], [1], [0, 0, 1, 1], [], []>} : vector<16x560xbf16>, vector<560x512xbf16>, vector<16x512xf32> -> vector<16x512xf32>
    %c0_4 = arith.constant 0 : index
    %c0_5 = arith.constant 0 : index
    %8 = vector.load %arg3[%c0_4, %c0_5] : memref<2x512xf32, #tpu.memory_space<vmem>>, vector<2x512xf32>
    %9 = vector.extract_strided_slice %8 {offsets = [0, 0], sizes = [1, 512], strides = [1, 1]} : vector<2x512xf32> to vector<1x512xf32>
    %10 = vector.broadcast %9 : vector<1x512xf32> to vector<16x512xf32>
    %11 = arith.mulf %7, %10 : vector<16x512xf32>
    %12 = vector.extract_strided_slice %8 {offsets = [1, 0], sizes = [1, 512], strides = [1, 1]} : vector<2x512xf32> to vector<1x512xf32>
    %13 = vector.broadcast %12 : vector<1x512xf32> to vector<16x512xf32>
    %14 = arith.addf %11, %13 : vector<16x512xf32>
    %15 = vector.extract_strided_slice %14 {offsets = [0, 0], sizes = [16, 256], strides = [1, 1]} : vector<16x512xf32> to vector<16x256xf32>
    %16 = vector.extract_strided_slice %14 {offsets = [0, 256], sizes = [16, 256], strides = [1, 1]} : vector<16x512xf32> to vector<16x256xf32>
    %17 = arith.maximumf %15, %16 : vector<16x256xf32>
    %cst_6 = arith.constant 0.000000e+00 : f32
    %18 = vector.broadcast %cst_6 : f32 to vector<16x256xf32>
    %19 = arith.maximumf %17, %18 : vector<16x256xf32>
    %cst_7 = arith.constant 0.000000e+00 : f32
    %20 = vector.broadcast %cst_7 : f32 to vector<1x256xf32>
    %21 = tpu.concatenate %20, %19, %20 in 0 : vector<1x256xf32>, vector<16x256xf32>, vector<1x256xf32> -> vector<18x256xf32>
    %22 = vector.extract_strided_slice %21 {offsets = [0, 240], sizes = [16, 16], strides = [1, 1]} : vector<18x256xf32> to vector<16x16xf32>
    %23 = vector.extract_strided_slice %21 {offsets = [1, 0], sizes = [16, 256], strides = [1, 1]} : vector<18x256xf32> to vector<16x256xf32>
    %24 = vector.extract_strided_slice %21 {offsets = [2, 0], sizes = [16, 16], strides = [1, 1]} : vector<18x256xf32> to vector<16x16xf32>
    %25 = tpu.concatenate %22, %23, %24 in 1 : vector<16x16xf32>, vector<16x256xf32>, vector<16x16xf32> -> vector<16x288xf32>
    %26 = arith.truncf %25 : vector<16x288xf32> to vector<16x288xbf16>
    %c0_8 = arith.constant 0 : index
    %c0_9 = arith.constant 0 : index
    %27 = vector.load %arg4[%c0_8, %c0_9] : memref<288x512xbf16, #tpu.memory_space<vmem>>, vector<288x512xbf16>
    %cst_10 = arith.constant dense<0.000000e+00> : vector<16x512xf32>
    %28 = tpu.matmul %26, %27, %cst_10 {dimension_numbers = #tpu.dot_dimension_numbers<[1], [0], [0], [1], [0, 0, 1, 1], [], []>} : vector<16x288xbf16>, vector<288x512xbf16>, vector<16x512xf32> -> vector<16x512xf32>
    %c0_11 = arith.constant 0 : index
    %c0_12 = arith.constant 0 : index
    %29 = vector.load %arg5[%c0_11, %c0_12] : memref<2x512xf32, #tpu.memory_space<vmem>>, vector<2x512xf32>
    %30 = vector.extract_strided_slice %29 {offsets = [0, 0], sizes = [1, 512], strides = [1, 1]} : vector<2x512xf32> to vector<1x512xf32>
    %31 = vector.broadcast %30 : vector<1x512xf32> to vector<16x512xf32>
    %32 = arith.mulf %28, %31 : vector<16x512xf32>
    %33 = vector.extract_strided_slice %29 {offsets = [1, 0], sizes = [1, 512], strides = [1, 1]} : vector<2x512xf32> to vector<1x512xf32>
    %34 = vector.broadcast %33 : vector<1x512xf32> to vector<16x512xf32>
    %35 = arith.addf %32, %34 : vector<16x512xf32>
    %36 = vector.extract_strided_slice %35 {offsets = [0, 0], sizes = [16, 256], strides = [1, 1]} : vector<16x512xf32> to vector<16x256xf32>
    %37 = vector.extract_strided_slice %35 {offsets = [0, 256], sizes = [16, 256], strides = [1, 1]} : vector<16x512xf32> to vector<16x256xf32>
    %38 = arith.maximumf %36, %37 : vector<16x256xf32>
    %cst_13 = arith.constant 0.000000e+00 : f32
    %39 = vector.broadcast %cst_13 : f32 to vector<16x256xf32>
    %40 = arith.maximumf %38, %39 : vector<16x256xf32>
    %41 = tpu.concatenate %20, %40, %20 in 0 : vector<1x256xf32>, vector<16x256xf32>, vector<1x256xf32> -> vector<18x256xf32>
    %42 = vector.extract_strided_slice %41 {offsets = [0, 224], sizes = [16, 32], strides = [1, 1]} : vector<18x256xf32> to vector<16x32xf32>
    %43 = vector.extract_strided_slice %41 {offsets = [1, 0], sizes = [16, 256], strides = [1, 1]} : vector<18x256xf32> to vector<16x256xf32>
    %44 = vector.extract_strided_slice %41 {offsets = [2, 0], sizes = [16, 32], strides = [1, 1]} : vector<18x256xf32> to vector<16x32xf32>
    %45 = tpu.concatenate %42, %43, %44 in 1 : vector<16x32xf32>, vector<16x256xf32>, vector<16x32xf32> -> vector<16x320xf32>
    %46 = arith.truncf %45 : vector<16x320xf32> to vector<16x320xbf16>
    %c0_14 = arith.constant 0 : index
    %c0_15 = arith.constant 0 : index
    %47 = vector.load %arg6[%c0_14, %c0_15] : memref<320x512xbf16, #tpu.memory_space<vmem>>, vector<320x512xbf16>
    %cst_16 = arith.constant dense<0.000000e+00> : vector<16x512xf32>
    %48 = tpu.matmul %46, %47, %cst_16 {dimension_numbers = #tpu.dot_dimension_numbers<[1], [0], [0], [1], [0, 0, 1, 1], [], []>} : vector<16x320xbf16>, vector<320x512xbf16>, vector<16x512xf32> -> vector<16x512xf32>
    %c0_17 = arith.constant 0 : index
    %c0_18 = arith.constant 0 : index
    %49 = vector.load %arg7[%c0_17, %c0_18] : memref<2x512xf32, #tpu.memory_space<vmem>>, vector<2x512xf32>
    %50 = vector.extract_strided_slice %49 {offsets = [0, 0], sizes = [1, 512], strides = [1, 1]} : vector<2x512xf32> to vector<1x512xf32>
    %51 = vector.broadcast %50 : vector<1x512xf32> to vector<16x512xf32>
    %52 = arith.mulf %48, %51 : vector<16x512xf32>
    %53 = vector.extract_strided_slice %49 {offsets = [1, 0], sizes = [1, 512], strides = [1, 1]} : vector<2x512xf32> to vector<1x512xf32>
    %54 = vector.broadcast %53 : vector<1x512xf32> to vector<16x512xf32>
    %55 = arith.addf %52, %54 : vector<16x512xf32>
    %56 = vector.extract_strided_slice %55 {offsets = [0, 0], sizes = [16, 256], strides = [1, 1]} : vector<16x512xf32> to vector<16x256xf32>
    %57 = vector.extract_strided_slice %55 {offsets = [0, 256], sizes = [16, 256], strides = [1, 1]} : vector<16x512xf32> to vector<16x256xf32>
    %58 = arith.maximumf %56, %57 : vector<16x256xf32>
    %cst_19 = arith.constant 0.000000e+00 : f32
    %59 = vector.broadcast %cst_19 : f32 to vector<16x256xf32>
    %60 = arith.maximumf %58, %59 : vector<16x256xf32>
    %61 = tpu.concatenate %20, %60, %20 in 0 : vector<1x256xf32>, vector<16x256xf32>, vector<1x256xf32> -> vector<18x256xf32>
    %62 = vector.extract_strided_slice %61 {offsets = [0, 192], sizes = [16, 64], strides = [1, 1]} : vector<18x256xf32> to vector<16x64xf32>
    %63 = vector.extract_strided_slice %61 {offsets = [1, 0], sizes = [16, 256], strides = [1, 1]} : vector<18x256xf32> to vector<16x256xf32>
    %64 = vector.extract_strided_slice %61 {offsets = [2, 0], sizes = [16, 64], strides = [1, 1]} : vector<18x256xf32> to vector<16x64xf32>
    %65 = tpu.concatenate %62, %63, %64 in 1 : vector<16x64xf32>, vector<16x256xf32>, vector<16x64xf32> -> vector<16x384xf32>
    %66 = arith.truncf %65 : vector<16x384xf32> to vector<16x384xbf16>
    %c0_20 = arith.constant 0 : index
    %c0_21 = arith.constant 0 : index
    %67 = vector.load %arg8[%c0_20, %c0_21] : memref<384x256xbf16, #tpu.memory_space<vmem>>, vector<384x256xbf16>
    %cst_22 = arith.constant dense<0.000000e+00> : vector<16x256xf32>
    %68 = tpu.matmul %66, %67, %cst_22 {dimension_numbers = #tpu.dot_dimension_numbers<[1], [0], [0], [1], [0, 0, 1, 1], [], []>} : vector<16x384xbf16>, vector<384x256xbf16>, vector<16x256xf32> -> vector<16x256xf32>
    %c0_23 = arith.constant 0 : index
    %c0_24 = arith.constant 0 : index
    %69 = vector.load %arg9[%c0_23, %c0_24] : memref<2x256xf32, #tpu.memory_space<vmem>>, vector<2x256xf32>
    %70 = vector.extract_strided_slice %69 {offsets = [0, 0], sizes = [1, 256], strides = [1, 1]} : vector<2x256xf32> to vector<1x256xf32>
    %71 = vector.broadcast %70 : vector<1x256xf32> to vector<16x256xf32>
    %72 = arith.mulf %68, %71 : vector<16x256xf32>
    %73 = vector.extract_strided_slice %69 {offsets = [1, 0], sizes = [1, 256], strides = [1, 1]} : vector<2x256xf32> to vector<1x256xf32>
    %74 = vector.broadcast %73 : vector<1x256xf32> to vector<16x256xf32>
    %75 = arith.addf %72, %74 : vector<16x256xf32>
    %76 = vector.extract_strided_slice %75 {offsets = [0, 0], sizes = [16, 128], strides = [1, 1]} : vector<16x256xf32> to vector<16x128xf32>
    %77 = vector.extract_strided_slice %75 {offsets = [0, 128], sizes = [16, 128], strides = [1, 1]} : vector<16x256xf32> to vector<16x128xf32>
    %78 = arith.maximumf %76, %77 : vector<16x128xf32>
    %cst_25 = arith.constant 0.000000e+00 : f32
    %79 = vector.broadcast %cst_25 : f32 to vector<16x128xf32>
    %80 = arith.maximumf %78, %79 : vector<16x128xf32>
    %81 = vector.extract_strided_slice %80 {offsets = [0, 0], sizes = [15, 128], strides = [1, 1]} : vector<16x128xf32> to vector<15x128xf32>
    %82 = vector.extract_strided_slice %80 {offsets = [1, 0], sizes = [15, 128], strides = [1, 1]} : vector<16x128xf32> to vector<15x128xf32>
    %83 = tpu.concatenate %81, %82 in 1 : vector<15x128xf32>, vector<15x128xf32> -> vector<15x256xf32>
    %84 = arith.truncf %83 : vector<15x256xf32> to vector<15x256xbf16>
    %c0_26 = arith.constant 0 : index
    %c0_27 = arith.constant 0 : index
    %85 = vector.load %arg10[%c0_26, %c0_27] : memref<256x128xbf16, #tpu.memory_space<vmem>>, vector<256x128xbf16>
    %cst_28 = arith.constant dense<0.000000e+00> : vector<15x128xf32>
    %86 = tpu.matmul %84, %85, %cst_28 {dimension_numbers = #tpu.dot_dimension_numbers<[1], [0], [0], [1], [0, 0, 1, 1], [], []>} : vector<15x256xbf16>, vector<256x128xbf16>, vector<15x128xf32> -> vector<15x128xf32>
    %c0_29 = arith.constant 0 : index
    %c0_30 = arith.constant 0 : index
    %87 = vector.load %arg11[%c0_29, %c0_30] : memref<2x128xf32, #tpu.memory_space<vmem>>, vector<2x128xf32>
    %88 = vector.extract_strided_slice %87 {offsets = [0, 0], sizes = [1, 128], strides = [1, 1]} : vector<2x128xf32> to vector<1x128xf32>
    %89 = vector.broadcast %88 : vector<1x128xf32> to vector<15x128xf32>
    %90 = arith.mulf %86, %89 : vector<15x128xf32>
    %91 = vector.extract_strided_slice %87 {offsets = [1, 0], sizes = [1, 128], strides = [1, 1]} : vector<2x128xf32> to vector<1x128xf32>
    %92 = vector.broadcast %91 : vector<1x128xf32> to vector<15x128xf32>
    %93 = arith.addf %90, %92 : vector<15x128xf32>
    %94 = vector.extract_strided_slice %93 {offsets = [0, 0], sizes = [15, 64], strides = [1, 1]} : vector<15x128xf32> to vector<15x64xf32>
    %95 = vector.extract_strided_slice %93 {offsets = [0, 64], sizes = [15, 64], strides = [1, 1]} : vector<15x128xf32> to vector<15x64xf32>
    %96 = arith.maximumf %94, %95 : vector<15x64xf32>
    %cst_31 = arith.constant 0.000000e+00 : f32
    %97 = vector.broadcast %cst_31 : f32 to vector<15x64xf32>
    %98 = arith.maximumf %96, %97 : vector<15x64xf32>
    %99 = vector.extract_strided_slice %98 {offsets = [0, 0], sizes = [1, 64], strides = [1, 1]} : vector<15x64xf32> to vector<1x64xf32>
    %100 = vector.extract_strided_slice %98 {offsets = [1, 0], sizes = [1, 64], strides = [1, 1]} : vector<15x64xf32> to vector<1x64xf32>
    %101 = vector.extract_strided_slice %98 {offsets = [2, 0], sizes = [1, 64], strides = [1, 1]} : vector<15x64xf32> to vector<1x64xf32>
    %102 = vector.extract_strided_slice %98 {offsets = [3, 0], sizes = [1, 64], strides = [1, 1]} : vector<15x64xf32> to vector<1x64xf32>
    %103 = vector.extract_strided_slice %98 {offsets = [4, 0], sizes = [1, 64], strides = [1, 1]} : vector<15x64xf32> to vector<1x64xf32>
    %104 = vector.extract_strided_slice %98 {offsets = [5, 0], sizes = [1, 64], strides = [1, 1]} : vector<15x64xf32> to vector<1x64xf32>
    %105 = vector.extract_strided_slice %98 {offsets = [6, 0], sizes = [1, 64], strides = [1, 1]} : vector<15x64xf32> to vector<1x64xf32>
    %106 = vector.extract_strided_slice %98 {offsets = [7, 0], sizes = [1, 64], strides = [1, 1]} : vector<15x64xf32> to vector<1x64xf32>
    %107 = vector.extract_strided_slice %98 {offsets = [8, 0], sizes = [1, 64], strides = [1, 1]} : vector<15x64xf32> to vector<1x64xf32>
    %108 = vector.extract_strided_slice %98 {offsets = [9, 0], sizes = [1, 64], strides = [1, 1]} : vector<15x64xf32> to vector<1x64xf32>
    %109 = vector.extract_strided_slice %98 {offsets = [10, 0], sizes = [1, 64], strides = [1, 1]} : vector<15x64xf32> to vector<1x64xf32>
    %110 = vector.extract_strided_slice %98 {offsets = [11, 0], sizes = [1, 64], strides = [1, 1]} : vector<15x64xf32> to vector<1x64xf32>
    %111 = vector.extract_strided_slice %98 {offsets = [12, 0], sizes = [1, 64], strides = [1, 1]} : vector<15x64xf32> to vector<1x64xf32>
    %112 = vector.extract_strided_slice %98 {offsets = [13, 0], sizes = [1, 64], strides = [1, 1]} : vector<15x64xf32> to vector<1x64xf32>
    %113 = vector.extract_strided_slice %98 {offsets = [14, 0], sizes = [1, 64], strides = [1, 1]} : vector<15x64xf32> to vector<1x64xf32>
    %114 = tpu.concatenate %99, %100, %101, %102, %103, %104, %105, %106, %107, %108, %109, %110, %111, %112, %113 in 1 : vector<1x64xf32>, vector<1x64xf32>, vector<1x64xf32>, vector<1x64xf32>, vector<1x64xf32>, vector<1x64xf32>, vector<1x64xf32>, vector<1x64xf32>, vector<1x64xf32>, vector<1x64xf32>, vector<1x64xf32>, vector<1x64xf32>, vector<1x64xf32>, vector<1x64xf32>, vector<1x64xf32> -> vector<1x960xf32>
    %115 = arith.truncf %114 : vector<1x960xf32> to vector<1x960xbf16>
    %c0_32 = arith.constant 0 : index
    %c0_33 = arith.constant 0 : index
    %116 = vector.load %arg12[%c0_32, %c0_33] : memref<960x100xbf16, #tpu.memory_space<vmem>>, vector<960x100xbf16>
    %cst_34 = arith.constant dense<0.000000e+00> : vector<1x100xf32>
    %117 = tpu.matmul %115, %116, %cst_34 {dimension_numbers = #tpu.dot_dimension_numbers<[1], [0], [0], [1], [0, 0, 1, 1], [], []>} : vector<1x960xbf16>, vector<960x100xbf16>, vector<1x100xf32> -> vector<1x100xf32>
    %c0_35 = arith.constant 0 : index
    %c0_36 = arith.constant 0 : index
    %118 = vector.load %arg13[%c0_35, %c0_36] : memref<2x100xf32, #tpu.memory_space<vmem>>, vector<2x100xf32>
    %119 = vector.extract_strided_slice %118 {offsets = [0, 0], sizes = [1, 100], strides = [1, 1]} : vector<2x100xf32> to vector<1x100xf32>
    %120 = arith.mulf %117, %119 : vector<1x100xf32>
    %121 = vector.extract_strided_slice %118 {offsets = [1, 0], sizes = [1, 100], strides = [1, 1]} : vector<2x100xf32> to vector<1x100xf32>
    %122 = arith.addf %120, %121 : vector<1x100xf32>
    %cst_37 = arith.constant 0.000000e+00 : f32
    %123 = vector.broadcast %cst_37 : f32 to vector<1x100xf32>
    %124 = arith.maximumf %122, %123 : vector<1x100xf32>
    %c0_38 = arith.constant 0 : index
    %c0_39 = arith.constant 0 : index
    %c0_40 = arith.constant 0 : index
    %125 = vector.load %arg31[%c0_38, %c0_39, %c0_40] : memref<1x1x100xf32, #tpu.memory_space<vmem>>, vector<1x1x100xf32>
    %126 = vector.shape_cast %125 : vector<1x1x100xf32> to vector<1x100xf32>
    %127 = vector.shape_cast %124 : vector<1x100xf32> to vector<1x1x100xf32>
    tpu.vector_store %arg31[%c0_38, %c0_39, %c0_40], %127 {strides = array<i32>} : memref<1x1x100xf32, #tpu.memory_space<vmem>>, vector<1x1x100xf32>,
    %128 = arith.truncf %124 : vector<1x100xf32> to vector<1x100xbf16>
    %c0_41 = arith.constant 0 : index
    %c0_42 = arith.constant 0 : index
    %129 = vector.load %arg14[%c0_41, %c0_42] : memref<100x960xbf16, #tpu.memory_space<vmem>>, vector<100x960xbf16>
    %cst_43 = arith.constant dense<0.000000e+00> : vector<1x960xf32>
    %130 = tpu.matmul %128, %129, %cst_43 {dimension_numbers = #tpu.dot_dimension_numbers<[1], [0], [0], [1], [0, 0, 1, 1], [], []>} : vector<1x100xbf16>, vector<100x960xbf16>, vector<1x960xf32> -> vector<1x960xf32>
    %c0_44 = arith.constant 0 : index
    %c0_45 = arith.constant 0 : index
    %131 = vector.load %arg15[%c0_44, %c0_45] : memref<1x960xf32, #tpu.memory_space<vmem>>, vector<1x960xf32>
    %132 = arith.addf %130, %131 : vector<1x960xf32>
    %cst_46 = arith.constant 0.000000e+00 : f32
    %133 = vector.broadcast %cst_46 : f32 to vector<1x960xf32>
    %134 = arith.maximumf %132, %133 : vector<1x960xf32>
    %135 = vector.extract_strided_slice %134 {offsets = [0, 0], sizes = [1, 64], strides = [1, 1]} : vector<1x960xf32> to vector<1x64xf32>
    %136 = vector.extract_strided_slice %134 {offsets = [0, 64], sizes = [1, 64], strides = [1, 1]} : vector<1x960xf32> to vector<1x64xf32>
    %137 = vector.extract_strided_slice %134 {offsets = [0, 128], sizes = [1, 64], strides = [1, 1]} : vector<1x960xf32> to vector<1x64xf32>
    %138 = vector.extract_strided_slice %134 {offsets = [0, 192], sizes = [1, 64], strides = [1, 1]} : vector<1x960xf32> to vector<1x64xf32>
    %139 = vector.extract_strided_slice %134 {offsets = [0, 256], sizes = [1, 64], strides = [1, 1]} : vector<1x960xf32> to vector<1x64xf32>
    %140 = vector.extract_strided_slice %134 {offsets = [0, 320], sizes = [1, 64], strides = [1, 1]} : vector<1x960xf32> to vector<1x64xf32>
    %141 = vector.extract_strided_slice %134 {offsets = [0, 384], sizes = [1, 64], strides = [1, 1]} : vector<1x960xf32> to vector<1x64xf32>
    %142 = vector.extract_strided_slice %134 {offsets = [0, 448], sizes = [1, 64], strides = [1, 1]} : vector<1x960xf32> to vector<1x64xf32>
    %143 = vector.extract_strided_slice %134 {offsets = [0, 512], sizes = [1, 64], strides = [1, 1]} : vector<1x960xf32> to vector<1x64xf32>
    %144 = vector.extract_strided_slice %134 {offsets = [0, 576], sizes = [1, 64], strides = [1, 1]} : vector<1x960xf32> to vector<1x64xf32>
    %145 = vector.extract_strided_slice %134 {offsets = [0, 640], sizes = [1, 64], strides = [1, 1]} : vector<1x960xf32> to vector<1x64xf32>
    %146 = vector.extract_strided_slice %134 {offsets = [0, 704], sizes = [1, 64], strides = [1, 1]} : vector<1x960xf32> to vector<1x64xf32>
    %147 = vector.extract_strided_slice %134 {offsets = [0, 768], sizes = [1, 64], strides = [1, 1]} : vector<1x960xf32> to vector<1x64xf32>
    %148 = vector.extract_strided_slice %134 {offsets = [0, 832], sizes = [1, 64], strides = [1, 1]} : vector<1x960xf32> to vector<1x64xf32>
    %149 = vector.extract_strided_slice %134 {offsets = [0, 896], sizes = [1, 64], strides = [1, 1]} : vector<1x960xf32> to vector<1x64xf32>
    %150 = tpu.concatenate %135, %136, %137, %138, %139, %140, %141, %142, %143, %144, %145, %146, %147, %148, %149 in 0 : vector<1x64xf32>, vector<1x64xf32>, vector<1x64xf32>, vector<1x64xf32>, vector<1x64xf32>, vector<1x64xf32>, vector<1x64xf32>, vector<1x64xf32>, vector<1x64xf32>, vector<1x64xf32>, vector<1x64xf32>, vector<1x64xf32>, vector<1x64xf32>, vector<1x64xf32>, vector<1x64xf32> -> vector<15x64xf32>
    %cst_47 = arith.constant 0.000000e+00 : f32
    %151 = vector.broadcast %cst_47 : f32 to vector<1x64xf32>
    %152 = tpu.concatenate %151, %150, %151 in 0 : vector<1x64xf32>, vector<15x64xf32>, vector<1x64xf32> -> vector<17x64xf32>
    %153 = vector.extract_strided_slice %152 {offsets = [0, 0], sizes = [16, 64], strides = [1, 1]} : vector<17x64xf32> to vector<16x64xf32>
    %154 = vector.extract_strided_slice %152 {offsets = [1, 0], sizes = [16, 64], strides = [1, 1]} : vector<17x64xf32> to vector<16x64xf32>
    %155 = tpu.concatenate %153, %154 in 1 : vector<16x64xf32>, vector<16x64xf32> -> vector<16x128xf32>
    %156 = arith.truncf %155 : vector<16x128xf32> to vector<16x128xbf16>
    %c0_48 = arith.constant 0 : index
    %c0_49 = arith.constant 0 : index
    %157 = vector.load %arg16[%c0_48, %c0_49] : memref<128x128xbf16, #tpu.memory_space<vmem>>, vector<128x128xbf16>
    %cst_50 = arith.constant dense<0.000000e+00> : vector<16x128xf32>
    %158 = tpu.matmul %156, %157, %cst_50 {dimension_numbers = #tpu.dot_dimension_numbers<[1], [0], [0], [1], [0, 0, 1, 1], [], []>} : vector<16x128xbf16>, vector<128x128xbf16>, vector<16x128xf32> -> vector<16x128xf32>
    %c0_51 = arith.constant 0 : index
    %c0_52 = arith.constant 0 : index
    %159 = vector.load %arg17[%c0_51, %c0_52] : memref<2x128xf32, #tpu.memory_space<vmem>>, vector<2x128xf32>
    %160 = vector.extract_strided_slice %159 {offsets = [0, 0], sizes = [1, 128], strides = [1, 1]} : vector<2x128xf32> to vector<1x128xf32>
    %161 = vector.broadcast %160 : vector<1x128xf32> to vector<16x128xf32>
    %162 = arith.mulf %158, %161 : vector<16x128xf32>
    %163 = vector.extract_strided_slice %159 {offsets = [1, 0], sizes = [1, 128], strides = [1, 1]} : vector<2x128xf32> to vector<1x128xf32>
    %164 = vector.broadcast %163 : vector<1x128xf32> to vector<16x128xf32>
    %165 = arith.addf %162, %164 : vector<16x128xf32>
    %cst_53 = arith.constant 0.000000e+00 : f32
    %166 = vector.broadcast %cst_53 : f32 to vector<16x128xf32>
    %167 = arith.maximumf %165, %166 : vector<16x128xf32>
    %c0_54 = arith.constant 0 : index
    %c0_55 = arith.constant 0 : index
    %168 = vector.load %arg18[%c0_54, %c0_55] : memref<16x128xf32, #tpu.memory_space<vmem>>, vector<16x128xf32>
    %169 = arith.mulf %167, %168 : vector<16x128xf32>
    %cst_56 = arith.constant 0.000000e+00 : f32
    %170 = vector.broadcast %cst_56 : f32 to vector<1x128xf32>
    %171 = tpu.concatenate %169, %170 in 0 : vector<16x128xf32>, vector<1x128xf32> -> vector<17x128xf32>
    %172 = vector.extract_strided_slice %171 {offsets = [0, 0], sizes = [16, 128], strides = [1, 1]} : vector<17x128xf32> to vector<16x128xf32>
    %173 = vector.extract_strided_slice %171 {offsets = [1, 0], sizes = [16, 64], strides = [1, 1]} : vector<17x128xf32> to vector<16x64xf32>
    %174 = tpu.concatenate %172, %173 in 1 : vector<16x128xf32>, vector<16x64xf32> -> vector<16x192xf32>
    %175 = arith.truncf %174 : vector<16x192xf32> to vector<16x192xbf16>
    %c0_57 = arith.constant 0 : index
    %c0_58 = arith.constant 0 : index
    %176 = vector.load %arg19[%c0_57, %c0_58] : memref<192x256xbf16, #tpu.memory_space<vmem>>, vector<192x256xbf16>
    %cst_59 = arith.constant dense<0.000000e+00> : vector<16x256xf32>
    %177 = tpu.matmul %175, %176, %cst_59 {dimension_numbers = #tpu.dot_dimension_numbers<[1], [0], [0], [1], [0, 0, 1, 1], [], []>} : vector<16x192xbf16>, vector<192x256xbf16>, vector<16x256xf32> -> vector<16x256xf32>
    %c0_60 = arith.constant 0 : index
    %c0_61 = arith.constant 0 : index
    %178 = vector.load %arg20[%c0_60, %c0_61] : memref<2x256xf32, #tpu.memory_space<vmem>>, vector<2x256xf32>
    %179 = vector.extract_strided_slice %178 {offsets = [0, 0], sizes = [1, 256], strides = [1, 1]} : vector<2x256xf32> to vector<1x256xf32>
    %180 = vector.broadcast %179 : vector<1x256xf32> to vector<16x256xf32>
    %181 = arith.mulf %177, %180 : vector<16x256xf32>
    %182 = vector.extract_strided_slice %178 {offsets = [1, 0], sizes = [1, 256], strides = [1, 1]} : vector<2x256xf32> to vector<1x256xf32>
    %183 = vector.broadcast %182 : vector<1x256xf32> to vector<16x256xf32>
    %184 = arith.addf %181, %183 : vector<16x256xf32>
    %cst_62 = arith.constant 0.000000e+00 : f32
    %185 = vector.broadcast %cst_62 : f32 to vector<16x256xf32>
    %186 = arith.maximumf %184, %185 : vector<16x256xf32>
    %c0_63 = arith.constant 0 : index
    %c0_64 = arith.constant 0 : index
    %187 = vector.load %arg21[%c0_63, %c0_64] : memref<16x256xf32, #tpu.memory_space<vmem>>, vector<16x256xf32>
    %188 = arith.mulf %186, %187 : vector<16x256xf32>
    %189 = tpu.concatenate %188, %20 in 0 : vector<16x256xf32>, vector<1x256xf32> -> vector<17x256xf32>
    %190 = vector.extract_strided_slice %189 {offsets = [0, 0], sizes = [16, 256], strides = [1, 1]} : vector<17x256xf32> to vector<16x256xf32>
    %191 = vector.extract_strided_slice %189 {offsets = [1, 0], sizes = [16, 64], strides = [1, 1]} : vector<17x256xf32> to vector<16x64xf32>
    %192 = tpu.concatenate %190, %191 in 1 : vector<16x256xf32>, vector<16x64xf32> -> vector<16x320xf32>
    %193 = arith.truncf %192 : vector<16x320xf32> to vector<16x320xbf16>
    %c0_65 = arith.constant 0 : index
    %c0_66 = arith.constant 0 : index
    %194 = vector.load %arg22[%c0_65, %c0_66] : memref<320x256xbf16, #tpu.memory_space<vmem>>, vector<320x256xbf16>
    %cst_67 = arith.constant dense<0.000000e+00> : vector<16x256xf32>
    %195 = tpu.matmul %193, %194, %cst_67 {dimension_numbers = #tpu.dot_dimension_numbers<[1], [0], [0], [1], [0, 0, 1, 1], [], []>} : vector<16x320xbf16>, vector<320x256xbf16>, vector<16x256xf32> -> vector<16x256xf32>
    %c0_68 = arith.constant 0 : index
    %c0_69 = arith.constant 0 : index
    %196 = vector.load %arg23[%c0_68, %c0_69] : memref<2x256xf32, #tpu.memory_space<vmem>>, vector<2x256xf32>
    %197 = vector.extract_strided_slice %196 {offsets = [0, 0], sizes = [1, 256], strides = [1, 1]} : vector<2x256xf32> to vector<1x256xf32>
    %198 = vector.broadcast %197 : vector<1x256xf32> to vector<16x256xf32>
    %199 = arith.mulf %195, %198 : vector<16x256xf32>
    %200 = vector.extract_strided_slice %196 {offsets = [1, 0], sizes = [1, 256], strides = [1, 1]} : vector<2x256xf32> to vector<1x256xf32>
    %201 = vector.broadcast %200 : vector<1x256xf32> to vector<16x256xf32>
    %202 = arith.addf %199, %201 : vector<16x256xf32>
    %cst_70 = arith.constant 0.000000e+00 : f32
    %203 = vector.broadcast %cst_70 : f32 to vector<16x256xf32>
    %204 = arith.maximumf %202, %203 : vector<16x256xf32>
    %c0_71 = arith.constant 0 : index
    %c0_72 = arith.constant 0 : index
    %205 = vector.load %arg24[%c0_71, %c0_72] : memref<16x256xf32, #tpu.memory_space<vmem>>, vector<16x256xf32>
    %206 = arith.mulf %204, %205 : vector<16x256xf32>
    %207 = tpu.concatenate %206, %20 in 0 : vector<16x256xf32>, vector<1x256xf32> -> vector<17x256xf32>
    %208 = vector.extract_strided_slice %207 {offsets = [0, 0], sizes = [16, 256], strides = [1, 1]} : vector<17x256xf32> to vector<16x256xf32>
    %209 = vector.extract_strided_slice %207 {offsets = [1, 0], sizes = [16, 32], strides = [1, 1]} : vector<17x256xf32> to vector<16x32xf32>
    %210 = tpu.concatenate %208, %209 in 1 : vector<16x256xf32>, vector<16x32xf32> -> vector<16x288xf32>
    %211 = arith.truncf %210 : vector<16x288xf32> to vector<16x288xbf16>
    %c0_73 = arith.constant 0 : index
    %c0_74 = arith.constant 0 : index
    %212 = vector.load %arg25[%c0_73, %c0_74] : memref<288x256xbf16, #tpu.memory_space<vmem>>, vector<288x256xbf16>
    %cst_75 = arith.constant dense<0.000000e+00> : vector<16x256xf32>
    %213 = tpu.matmul %211, %212, %cst_75 {dimension_numbers = #tpu.dot_dimension_numbers<[1], [0], [0], [1], [0, 0, 1, 1], [], []>} : vector<16x288xbf16>, vector<288x256xbf16>, vector<16x256xf32> -> vector<16x256xf32>
    %c0_76 = arith.constant 0 : index
    %c0_77 = arith.constant 0 : index
    %214 = vector.load %arg26[%c0_76, %c0_77] : memref<2x256xf32, #tpu.memory_space<vmem>>, vector<2x256xf32>
    %215 = vector.extract_strided_slice %214 {offsets = [0, 0], sizes = [1, 256], strides = [1, 1]} : vector<2x256xf32> to vector<1x256xf32>
    %216 = vector.broadcast %215 : vector<1x256xf32> to vector<16x256xf32>
    %217 = arith.mulf %213, %216 : vector<16x256xf32>
    %218 = vector.extract_strided_slice %214 {offsets = [1, 0], sizes = [1, 256], strides = [1, 1]} : vector<2x256xf32> to vector<1x256xf32>
    %219 = vector.broadcast %218 : vector<1x256xf32> to vector<16x256xf32>
    %220 = arith.addf %217, %219 : vector<16x256xf32>
    %cst_78 = arith.constant 0.000000e+00 : f32
    %221 = vector.broadcast %cst_78 : f32 to vector<16x256xf32>
    %222 = arith.maximumf %220, %221 : vector<16x256xf32>
    %c0_79 = arith.constant 0 : index
    %c0_80 = arith.constant 0 : index
    %223 = vector.load %arg27[%c0_79, %c0_80] : memref<16x256xf32, #tpu.memory_space<vmem>>, vector<16x256xf32>
    %224 = arith.mulf %222, %223 : vector<16x256xf32>
    %225 = tpu.concatenate %20, %224, %20 in 0 : vector<1x256xf32>, vector<16x256xf32>, vector<1x256xf32> -> vector<18x256xf32>
    %226 = vector.extract_strided_slice %225 {offsets = [0, 224], sizes = [16, 32], strides = [1, 1]} : vector<18x256xf32> to vector<16x32xf32>
    %227 = vector.extract_strided_slice %225 {offsets = [1, 0], sizes = [16, 256], strides = [1, 1]} : vector<18x256xf32> to vector<16x256xf32>
    %228 = vector.extract_strided_slice %225 {offsets = [2, 0], sizes = [16, 32], strides = [1, 1]} : vector<18x256xf32> to vector<16x32xf32>
    %229 = tpu.concatenate %226, %227, %228 in 1 : vector<16x32xf32>, vector<16x256xf32>, vector<16x32xf32> -> vector<16x320xf32>
    %230 = arith.truncf %229 : vector<16x320xf32> to vector<16x320xbf16>
    %c0_81 = arith.constant 0 : index
    %c0_82 = arith.constant 0 : index
    %231 = vector.load %arg28[%c0_81, %c0_82] : memref<320x256xbf16, #tpu.memory_space<vmem>>, vector<320x256xbf16>
    %cst_83 = arith.constant dense<0.000000e+00> : vector<16x256xf32>
    %232 = tpu.matmul %230, %231, %cst_83 {dimension_numbers = #tpu.dot_dimension_numbers<[1], [0], [0], [1], [0, 0, 1, 1], [], []>} : vector<16x320xbf16>, vector<320x256xbf16>, vector<16x256xf32> -> vector<16x256xf32>
    %c0_84 = arith.constant 0 : index
    %c0_85 = arith.constant 0 : index
    %233 = vector.load %arg29[%c0_84, %c0_85] : memref<2x256xf32, #tpu.memory_space<vmem>>, vector<2x256xf32>
    %234 = vector.extract_strided_slice %233 {offsets = [0, 0], sizes = [1, 256], strides = [1, 1]} : vector<2x256xf32> to vector<1x256xf32>
    %235 = vector.broadcast %234 : vector<1x256xf32> to vector<16x256xf32>
    %236 = arith.mulf %232, %235 : vector<16x256xf32>
    %237 = vector.extract_strided_slice %233 {offsets = [1, 0], sizes = [1, 256], strides = [1, 1]} : vector<2x256xf32> to vector<1x256xf32>
    %238 = vector.broadcast %237 : vector<1x256xf32> to vector<16x256xf32>
    %239 = arith.addf %236, %238 : vector<16x256xf32>
    %c0_86 = arith.constant 0 : index
    %c0_87 = arith.constant 0 : index
    %c0_88 = arith.constant 0 : index
    %240 = vector.load %arg30[%c0_86, %c0_87, %c0_88] : memref<1x16x256xf32, #tpu.memory_space<vmem>>, vector<1x16x256xf32>
    %241 = vector.shape_cast %240 : vector<1x16x256xf32> to vector<16x256xf32>
    %242 = vector.shape_cast %239 : vector<16x256xf32> to vector<1x16x256xf32>
    tpu.vector_store %arg30[%c0_86, %c0_87, %c0_88], %242 {strides = array<i32>} : memref<1x16x256xf32, #tpu.memory_space<vmem>>, vector<1x16x256xf32>,
    return
  }
  func.func @transform_0(%arg0: i32) -> (i32, i32, i32) {
    %c0_i32 = arith.constant 0 : i32
    %c0_i32_0 = arith.constant 0 : i32
    %c0_i32_1 = arith.constant 0 : i32
    return %arg0, %c0_i32, %c0_i32_0 : i32, i32, i32
  }
  func.func @transform_1(%arg0: i32) -> (i32, i32) {
    %c0_i32 = arith.constant 0 : i32
    %c0_i32_0 = arith.constant 0 : i32
    %c0_i32_1 = arith.constant 0 : i32
    return %c0_i32, %c0_i32_0 : i32, i32
  }
  func.func @transform_2(%arg0: i32) -> (i32, i32) {
    %c0_i32 = arith.constant 0 : i32
    %c0_i32_0 = arith.constant 0 : i32
    %c0_i32_1 = arith.constant 0 : i32
    return %c0_i32, %c0_i32_0 : i32, i32
  }
  func.func @transform_3(%arg0: i32) -> (i32, i32) {
    %c0_i32 = arith.constant 0 : i32
    %c0_i32_0 = arith.constant 0 : i32
    %c0_i32_1 = arith.constant 0 : i32
    return %c0_i32, %c0_i32_0 : i32, i32
  }
  func.func @transform_4(%arg0: i32) -> (i32, i32) {
    %c0_i32 = arith.constant 0 : i32
    %c0_i32_0 = arith.constant 0 : i32
    %c0_i32_1 = arith.constant 0 : i32
    return %c0_i32, %c0_i32_0 : i32, i32
  }
  func.func @transform_5(%arg0: i32) -> (i32, i32) {
    %c0_i32 = arith.constant 0 : i32
    %c0_i32_0 = arith.constant 0 : i32
    %c0_i32_1 = arith.constant 0 : i32
    return %c0_i32, %c0_i32_0 : i32, i32
  }
  func.func @transform_6(%arg0: i32) -> (i32, i32) {
    %c0_i32 = arith.constant 0 : i32
    %c0_i32_0 = arith.constant 0 : i32
    %c0_i32_1 = arith.constant 0 : i32
    return %c0_i32, %c0_i32_0 : i32, i32
  }
  func.func @transform_7(%arg0: i32) -> (i32, i32) {
    %c0_i32 = arith.constant 0 : i32
    %c0_i32_0 = arith.constant 0 : i32
    %c0_i32_1 = arith.constant 0 : i32
    return %c0_i32, %c0_i32_0 : i32, i32
  }
  func.func @transform_8(%arg0: i32) -> (i32, i32) {
    %c0_i32 = arith.constant 0 : i32
    %c0_i32_0 = arith.constant 0 : i32
    %c0_i32_1 = arith.constant 0 : i32
    return %c0_i32, %c0_i32_0 : i32, i32
  }
  func.func @transform_9(%arg0: i32) -> (i32, i32) {
    %c0_i32 = arith.constant 0 : i32
    %c0_i32_0 = arith.constant 0 : i32
    %c0_i32_1 = arith.constant 0 : i32
    return %c0_i32, %c0_i32_0 : i32, i32
  }
  func.func @transform_10(%arg0: i32) -> (i32, i32) {
    %c0_i32 = arith.constant 0 : i32
    %c0_i32_0 = arith.constant 0 : i32
    %c0_i32_1 = arith.constant 0 : i32
    return %c0_i32, %c0_i32_0 : i32, i32
  }
  func.func @transform_11(%arg0: i32) -> (i32, i32) {
    %c0_i32 = arith.constant 0 : i32
    %c0_i32_0 = arith.constant 0 : i32
    %c0_i32_1 = arith.constant 0 : i32
    return %c0_i32, %c0_i32_0 : i32, i32
  }
  func.func @transform_12(%arg0: i32) -> (i32, i32) {
    %c0_i32 = arith.constant 0 : i32
    %c0_i32_0 = arith.constant 0 : i32
    %c0_i32_1 = arith.constant 0 : i32
    return %c0_i32, %c0_i32_0 : i32, i32
  }
  func.func @transform_13(%arg0: i32) -> (i32, i32) {
    %c0_i32 = arith.constant 0 : i32
    %c0_i32_0 = arith.constant 0 : i32
    %c0_i32_1 = arith.constant 0 : i32
    return %c0_i32, %c0_i32_0 : i32, i32
  }
  func.func @transform_14(%arg0: i32) -> (i32, i32) {
    %c0_i32 = arith.constant 0 : i32
    %c0_i32_0 = arith.constant 0 : i32
    %c0_i32_1 = arith.constant 0 : i32
    return %c0_i32, %c0_i32_0 : i32, i32
  }
  func.func @transform_15(%arg0: i32) -> (i32, i32) {
    %c0_i32 = arith.constant 0 : i32
    %c0_i32_0 = arith.constant 0 : i32
    %c0_i32_1 = arith.constant 0 : i32
    return %c0_i32, %c0_i32_0 : i32, i32
  }
  func.func @transform_16(%arg0: i32) -> (i32, i32) {
    %c0_i32 = arith.constant 0 : i32
    %c0_i32_0 = arith.constant 0 : i32
    %c0_i32_1 = arith.constant 0 : i32
    return %c0_i32, %c0_i32_0 : i32, i32
  }
  func.func @transform_17(%arg0: i32) -> (i32, i32) {
    %c0_i32 = arith.constant 0 : i32
    %c0_i32_0 = arith.constant 0 : i32
    %c0_i32_1 = arith.constant 0 : i32
    return %c0_i32, %c0_i32_0 : i32, i32
  }
  func.func @transform_18(%arg0: i32) -> (i32, i32) {
    %c0_i32 = arith.constant 0 : i32
    %c0_i32_0 = arith.constant 0 : i32
    %c0_i32_1 = arith.constant 0 : i32
    return %c0_i32, %c0_i32_0 : i32, i32
  }
  func.func @transform_19(%arg0: i32) -> (i32, i32) {
    %c0_i32 = arith.constant 0 : i32
    %c0_i32_0 = arith.constant 0 : i32
    %c0_i32_1 = arith.constant 0 : i32
    return %c0_i32, %c0_i32_0 : i32, i32
  }
  func.func @transform_20(%arg0: i32) -> (i32, i32) {
    %c0_i32 = arith.constant 0 : i32
    %c0_i32_0 = arith.constant 0 : i32
    %c0_i32_1 = arith.constant 0 : i32
    return %c0_i32, %c0_i32_0 : i32, i32
  }
  func.func @transform_21(%arg0: i32) -> (i32, i32) {
    %c0_i32 = arith.constant 0 : i32
    %c0_i32_0 = arith.constant 0 : i32
    %c0_i32_1 = arith.constant 0 : i32
    return %c0_i32, %c0_i32_0 : i32, i32
  }
  func.func @transform_22(%arg0: i32) -> (i32, i32) {
    %c0_i32 = arith.constant 0 : i32
    %c0_i32_0 = arith.constant 0 : i32
    %c0_i32_1 = arith.constant 0 : i32
    return %c0_i32, %c0_i32_0 : i32, i32
  }
  func.func @transform_23(%arg0: i32) -> (i32, i32) {
    %c0_i32 = arith.constant 0 : i32
    %c0_i32_0 = arith.constant 0 : i32
    %c0_i32_1 = arith.constant 0 : i32
    return %c0_i32, %c0_i32_0 : i32, i32
  }
  func.func @transform_24(%arg0: i32) -> (i32, i32) {
    %c0_i32 = arith.constant 0 : i32
    %c0_i32_0 = arith.constant 0 : i32
    %c0_i32_1 = arith.constant 0 : i32
    return %c0_i32, %c0_i32_0 : i32, i32
  }
  func.func @transform_25(%arg0: i32) -> (i32, i32) {
    %c0_i32 = arith.constant 0 : i32
    %c0_i32_0 = arith.constant 0 : i32
    %c0_i32_1 = arith.constant 0 : i32
    return %c0_i32, %c0_i32_0 : i32, i32
  }
  func.func @transform_26(%arg0: i32) -> (i32, i32) {
    %c0_i32 = arith.constant 0 : i32
    %c0_i32_0 = arith.constant 0 : i32
    %c0_i32_1 = arith.constant 0 : i32
    return %c0_i32, %c0_i32_0 : i32, i32
  }
  func.func @transform_27(%arg0: i32) -> (i32, i32) {
    %c0_i32 = arith.constant 0 : i32
    %c0_i32_0 = arith.constant 0 : i32
    %c0_i32_1 = arith.constant 0 : i32
    return %c0_i32, %c0_i32_0 : i32, i32
  }
  func.func @transform_28(%arg0: i32) -> (i32, i32) {
    %c0_i32 = arith.constant 0 : i32
    %c0_i32_0 = arith.constant 0 : i32
    %c0_i32_1 = arith.constant 0 : i32
    return %c0_i32, %c0_i32_0 : i32, i32
  }
  func.func @transform_29(%arg0: i32) -> (i32, i32, i32) {
    %c0_i32 = arith.constant 0 : i32
    %c0_i32_0 = arith.constant 0 : i32
    %c0_i32_1 = arith.constant 0 : i32
    return %arg0, %c0_i32, %c0_i32_0 : i32, i32, i32
  }
  func.func @transform_30(%arg0: i32) -> (i32, i32, i32) {
    %c0_i32 = arith.constant 0 : i32
    %c0_i32_0 = arith.constant 0 : i32
    %c0_i32_1 = arith.constant 0 : i32
    return %arg0, %c0_i32, %c0_i32_0 : i32, i32, i32
  }
}

</mosaic_0001>

<bundles_post_ra>
// kernel: wdcnn_ae_forward.1
= control target key start
LH: loop header
LB: loop body
LE: loop exit
PB: predicated region body
PF: predicated region fallthrough
CT: control target
= control target key end

     0   :  { %s12078_s6 = smov 1   ;;  %s12079_s10 = smov 2   ;;  %s13275_s0 = inlined_call_operand.smem [shape: u32[31], index: -1, kind: input, shape index: {}] }
   0x1   :  { %s12153_s5 = sld [smem:[%s13275_s0]]   ;;  %s12080_s14 = smov 3  }
   0x2   :  { %s12158_s9 = sld [smem:[%s13275_s0 + %s12078_s6]]   ;;  %s12081_s18 = smov 4  }
   0x3   :  { %s12163_s13 = sld [smem:[%s13275_s0 + %s12079_s10]]   ;;  %s12082_s22 = smov 5  }
   0x4   :  { %s12168_s17 = sld [smem:[%s13275_s0 + %s12080_s14]]   ;;  %s12083_s26 = smov 6  }
   0x5   :  { %s12173_s21 = sld [smem:[%s13275_s0 + %s12081_s18]]   ;;  %s12084_s30 = smov 7  }
   0x6   :  { %s12178_s25 = sld [smem:[%s13275_s0 + %s12082_s22]]   ;;  %s12085_s4 = smov 8  }
   0x7   :  { %13316 = sst [smem:[#allocation56_spill]] %s12153_s5  ;;  %s12086_s10 = smov 9  }
   0x8   :  { %13317 = sst [smem:[#allocation57_spill]] %s12158_s9  ;;  %s12087_s15 = smov 10  }
   0x9   :  { %13318 = sst [smem:[#allocation58_spill]] %s12163_s13  ;;  %s12088_s20 = smov 11  }
   0xa   :  { %13319 = sst [smem:[#allocation59_spill]] %s12168_s17  ;;  %s12090_s1 = smov 13  }
   0xb   :  { %s12183_s29 = sld [smem:[%s13275_s0 + %s12083_s26]]   ;;  %s12089_s26 = smov 12  }
   0xc   :  { %s12188_s3 = sld [smem:[%s13275_s0 + %s12084_s30]]   ;;  %s12091_s7 = smov 14  }
   0xd   :  { %s12193_s8 = sld [smem:[%s13275_s0 + %s12085_s4]]   ;;  %s12093_s22 = smov 16  }
   0xe   :  { %s12198_s14 = sld [smem:[%s13275_s0 + %s12086_s10]]   ;;  %s12094_s28 = smov 17  }
   0xf   :  { %s12203_s19 = sld [smem:[%s13275_s0 + %s12087_s15]]   ;;  %s12092_s15 = smov 15  }
  0x10   :  { %s12208_s24 = sld [smem:[%s13275_s0 + %s12088_s20]]  }
  0x11   :  { %13320 = sst [smem:[#allocation60_spill]] %s12183_s29 }
  0x12   :  { %13321 = sst [smem:[#allocation61_spill]] %s12188_s3 }
  0x13   :  { %13322 = sst [smem:[#allocation62_spill]] %s12193_s8 }
  0x14   :  { %s12213_s30 = sld [smem:[%s13275_s0 + %s12089_s26]]  }
  0x15   :  { %13323 = sst [smem:[#allocation63_spill]] %s12203_s19 }
  0x16   :  { %s12218_s6 = sld [smem:[%s13275_s0 + %s12090_s1]]  }
  0x17   :  { %s12223_s12 = sld [smem:[%s13275_s0 + %s12091_s7]]   ;;  %s12095_s7 = smov 18  }
  0x18   :  { %s12228_s20 = sld [smem:[%s13275_s0 + %s12092_s15]]   ;;  %s12096_s15 = smov 19  }
  0x19   :  { %s12233_s27 = sld [smem:[%s13275_s0 + %s12093_s22]]   ;;  %s12097_s22 = smov 20  }
  0x1a   :  { %13324 = sst [smem:[#allocation64_spill]] %s12213_s30 }
  0x1b   :  { %s12238_s4 = sld [smem:[%s13275_s0 + %s12094_s28]]   ;;  %s12098_s28 = smov 21  }
  0x1c   :  { %13325 = sst [smem:[#allocation65_spill]] %s12218_s6 }
  0x1d   :  { %13326 = sst [smem:[#allocation66_spill]] %s12223_s12 }
  0x1e   :  { %s12243_s17 = sld [smem:[%s13275_s0 + %s12095_s7]]   ;;  %s12099_s7 = smov 22  }
  0x1f   :  { %13327 = sst [smem:[#allocation67_spill]] %s12233_s27 }
  0x20   :  { %s12248_s5 = sld [smem:[%s13275_s0 + %s12096_s15]]   ;;  %s12100_s15 = smov 23  }
  0x21   :  { %13328 = sst [smem:[#allocation68_spill]] %s12238_s4 }
  0x22   :  { %s12253_s27 = sld [smem:[%s13275_s0 + %s12097_s22]]   ;;  %s12101_s22 = smov 24  }
  0x23   :  { %s12258_s12 = sld [smem:[%s13275_s0 + %s12098_s28]]   ;;  %s12102_s28 = smov 25  }
  0x24   :  { %13329 = sst [smem:[#allocation69_spill]] %s12243_s17 }
  0x25   :  { %s12263_s17 = sld [smem:[%s13275_s0 + %s12099_s7]]   ;;  %s12103_s7 = smov 26  }
  0x26   :  { %13330 = sst [smem:[#allocation70_spill]] %s12248_s5 }
  0x27   :  { %s12268_s30 = sld [smem:[%s13275_s0 + %s12100_s15]]   ;;  %s12104_s15 = smov 27  }
  0x28   :  { %13331 = sst [smem:[#allocation71_spill]] %s12253_s27 }
  0x29   :  { %13332 = sst [smem:[#allocation72_spill]] %s12258_s12 }
  0x2a   :  { %s12273_s27 = sld [smem:[%s13275_s0 + %s12101_s22]]   ;;  %s12105_s22 = smov 28  }
  0x2b   :  { %13333 = sst [smem:[#allocation73_spill]] %s12263_s17 }
  0x2c   :  { %s12278_s19 = sld [smem:[%s13275_s0 + %s12102_s28]]   ;;  %s12106_s28 = smov 29  }
  0x2d   :  { %s12283_s17 = sld [smem:[%s13275_s0 + %s12103_s7]]   ;;  %s12107_s7 = smov 30  }
  0x2e   :  { %s12288_s8 = sld [smem:[%s13275_s0 + %s12104_s15]]  }
  0x2f   :  { %s12298_s29 = sld [smem:[%s13275_s0 + %s12106_s28]]  }
  0x30   :  { %13334 = sst [smem:[#allocation74_spill]] %s12273_s27 }
  0x31   :  { %s12293_s27 = sld [smem:[%s13275_s0 + %s12105_s22]]  }
  0x33   :  { %13335 = sst [smem:[#allocation75_spill]] %s12283_s17 }
  0x34   :  { %s12303_s17 = sld [smem:[%s13275_s0 + %s12107_s7]]  }
  0x35   :  { %13336 = sst [smem:[#allocation76_spill]] %s12298_s29 }
  0x36   :  { %67 = vsyncpa [#allocation3], 0 }
  0x37   :  { %68 = vsyncpa [#allocation6], 0 }
  0x38   :  { %69 = vsyncpa [#allocation9], 0 }
  0x39   :  { %70 = vsyncpa [#allocation12], 0 }
  0x3a   :  { %71 = vsyncpa [#allocation15], 0 }
  0x3b   :  { %72 = vsyncpa [#allocation18], 0 }
  0x3c   :  { %73 = vsyncpa [#allocation21], 0 }
  0x3d   :  { %74 = vsyncpa [#allocation24], 0 }
  0x3e   :  { %75 = vsyncpa [#allocation27], 0 }
  0x3f   :  { %76 = vsyncpa [#allocation30], 0 }
  0x40   :  { %77 = vsyncpa [#allocation33], 0 }
  0x41   :  { %78 = vsyncpa [#allocation36], 0 }
  0x42   :  { %79 = vsyncpa [#allocation39], 0 }
  0x43   :  { %80 = vsyncpa [#allocation4], 0 }
  0x44   :  { %82 = vsyncpa [#allocation4 + $0x1], 0  ;;  %s12305_s15 = smov 0   ;;  %s12307_s16 = smov 0  }
  0x45   :  { %s12309_s0 = smov 0   ;;  %s12311_s18 = smov 0  }
  0x46 LB: > { %s13337_s12 = sld [smem:[#allocation72_spill]]  ;;  %s12326_s22 = sadd.s32 4294967295, %s12076_s18   ;;  %s12072_s0 = sphi %s12309_s0, %s13379_s0   ;;  %s12068_s16 = sphi %s12307_s16, %s13381_s16   ;;  %s12064_s15 = sphi %s12305_s15, %s13380_s15   ;;  %s12076_s18 = sphi %s12311_s18, %s13377_s18  }
  0x47   : > { %s13338_s9 = sld [smem:[#allocation57_spill]]  ;;  %s7756_s23 = sadd.s32 4294967294, %s12076_s18  }
  0x48   : > { %s13339_s6 = sld [smem:[#allocation65_spill]]  ;;  %s12330_s26 = sadd.s32 1, %s12076_s18  }
  0x49   : > { %s13340_s5 = sld [smem:[#allocation70_spill]]  ;;  %s735_s28 = sadd.s32 1, %s12072_s0 }
  0x4a   : > { %s13341_s4 = sld [smem:[#allocation68_spill]]  ;;  %s732_s1 = ssub.s32 %s12076_s18, %s12330_s26 }
  0x4b   : > { %s13342_s3 = sld [smem:[#allocation61_spill]]  ;;  %p745_p0 = scmp.ne.s32.totalorder %s12072_s0, %s12068_s16 }
  0x4c   : > { %s13343_s13 = sld [smem:[#allocation58_spill]]  ;;  %p733_p1 = scmp.eq.s32.totalorder %s732_s1, 0 }
  0x4d   : > { %13344 = sst [smem:[#allocation77_spill]] %s12064_s15  ;;  %p746_p2 = scmp.eq.s32.totalorder %s12326_s22, 1 }
  0x4e   : > { %13345 = sst [smem:[#allocation78_spill]] %s12072_s0  ;;  %p751_p3 = scmp.ne.s32.totalorder %s12068_s16, %s12064_s15 }
  0x4f   : > { %13346 = sst [smem:[#allocation79_spill]] %s12076_s18  ;;  %p752_p4 = scmp.eq.s32.totalorder %s7756_s23, 1 }
  0x50   : > { %13347 = sst [smem:[#allocation80_spill]] %s12330_s26  ;;  %p12343_p5 = por %p746_p2, %p745_p0 }
  0x51   : > { %s12341_s2 = scalar_select %p733_p1, %s12072_s0, %s735_s28  }
  0x52   : > { %p12347_p6 = por %p752_p4, %p751_p3  ;;  %p7757_p7 = scmp.ge.s32.totalorder %s12076_s18, 1 }
  0x53   : > { %13348 = sst [smem:[#allocation81_spill]] %s12341_s2  ;;  %p759_p8 = scmp.lt.s32.totalorder %s12076_s18, 3 }
  0x54   : > { %s13350_s10 = scalar_select %p12347_p6, 1, 0 }
  0x55   : > { %p12353_p9 = pnand %p7757_p7, %p759_p8 }
  0x56   : > { %13351 = sst [smem:[#allocation82_spill]] %s13350_s10  ;;  %p11012_p10 = scmp.eq.s32.totalorder (!%p12353_p9), %s12326_s22, 0 }
  0x57   : > { %763 = sbr.rel (%p12353_p9) target bundleno = 419 (0x1a3), region = 12  ;;  %s785_s23 = sshll.u32 (!%p12353_p9), %s13343_s13, 4  ;;  %s786_s23 = int_to_ptr.hbm [resolvable:$true] %s785_s23 }
  0x58   : > { %s12108_s28 = smov (!%p12353_p9), [#allocation5]   ;;  %s11262_s2 = sshra.s32 (!%p12353_p9), %s786_s23, 4  ;;  %s11263_s2 = int_to_ptr.hbm [resolvable:$true] %s11262_s2 }
  0x59   : > { %s787_s1 = sshll.u32 (!%p12353_p9), %s12108_s28, 4  ;;  %s11264_s0 = scalar_lea.hbm (!%p12353_p9), %s11263_s2, 8  ;;  %s788_s1 = int_to_ptr.vmem [resolvable:$true] %s787_s1 }
  0x5a   : > { %p11265_p11 = scmp.ne.s32.totalorder (!%p12353_p9), %s11263_s2, %s11264_s0  ;;  %s11268_s26 = scalar_lea.hbm (!%p12353_p9), %s13343_s13, 8 }
  0x5b   : > { %p11269_p0 = scmp.lt.s32.totalorder (!%p12353_p9), %s11263_s2, %s13343_s13  ;;  %p11270_p1 = scmp.lt.s32.totalorder (!%p12353_p9), %s11268_s26, %s11264_s0 }
  0x5c   : > { %p11266_p12 = pnand %p11265_p11, %p11012_p10 }
  0x5d   : > { %p11271_p2 = por %p11270_p1, %p11269_p0 }
  0x5e   : > { %p11267_p13 = pneg %p11266_p12 }
  0x60   : > { %p11272_p3 = pnand %p11271_p2, %p11267_p13 }
  0x62   : > { %11275 = shalt.err (!%p11272_p3)
}
  0x63   : > { %10909 = dma.hbm_to_vmem [thread:$0]  (%p11012_p10), %s786_s23, 128, %s788_s1, [#allocation6]  }
  0x64   : > { %s811_s28 = sshll.u32 %s12178_s25, 4  ;;  %s12109_s10 = smov [#allocation8]   ;;  %s812_s28 = int_to_ptr.hbm [resolvable:$true] %s811_s28 }
  0x65   : > { %s813_s15 = sshll.u32 %s12109_s10, 4  ;;  %s837_s18 = sshll.u32 %s13342_s3, 4  ;;  %s814_s15 = int_to_ptr.vmem [resolvable:$true] %s813_s15  ;;  %s838_s18 = int_to_ptr.hbm [resolvable:$true] %s837_s18 }
  0x66   : > { %s11290_s29 = sshra.s32 %s812_s28, 4  ;;  %s11296_s26 = scalar_lea.hbm %s12178_s25, 640  ;;  %s11291_s29 = int_to_ptr.hbm [resolvable:$true] %s11290_s29 }
  0x67   : > { %s11292_s0 = scalar_lea.hbm %s11291_s29, 640  ;;  %p11297_p11 = scmp.lt.s32.totalorder %s11291_s29, %s12178_s25 }
  0x68   : > { %p11293_p4 = scmp.ne.s32.totalorder %s11291_s29, %s11292_s0  ;;  %p11298_p12 = scmp.lt.s32.totalorder %s11296_s26, %s11292_s0 }
  0x6a   : > { %p11294_p7 = pnand %p11293_p4, %p11012_p10  ;;  %p11299_p13 = por %p11298_p12, %p11297_p11 }
  0x6c   : > { %p11295_p8 = pneg %p11294_p7 }
  0x6e   : > { %p11300_p0 = pnand %p11299_p13, %p11295_p8 }
  0x70   : > { %11303 = shalt.err (!%p11300_p0)
}
  0x71   : > { %s13295_s2 = smov 256   ;;  %s13297_s10 = smov 16  }
  0x72   : > { %10913 = dma.hbm_to_vmem [thread:$0]  (%p11012_p10), %s812_s28, 10240, %s814_s15, [#allocation9], %s13295_s2, %s13295_s2, %s13297_s10  }
  0x73   : > { %s12112_s23 = smov [#allocation11]   ;;  %s11318_s29 = sshra.s32 %s838_s18, 4  ;;  %s11319_s29 = int_to_ptr.hbm [resolvable:$true] %s11318_s29 }
  0x74   : > { %s839_s1 = sshll.u32 %s12112_s23, 4  ;;  %s11320_s0 = scalar_lea.hbm %s11319_s29, 384  ;;  %s840_s1 = int_to_ptr.vmem [resolvable:$true] %s839_s1 }
  0x75   : > { %p11321_p1 = scmp.ne.s32.totalorder %s11319_s29, %s11320_s0  ;;  %s11324_s26 = scalar_lea.hbm %s13342_s3, 384 }
  0x76   : > { %p11325_p4 = scmp.lt.s32.totalorder %s11319_s29, %s13342_s3  ;;  %p11326_p7 = scmp.lt.s32.totalorder %s11324_s26, %s11320_s0 }
  0x77   : > { %p11322_p2 = pnand %p11321_p1, %p11012_p10 }
  0x78   : > { %p11327_p8 = por %p11326_p7, %p11325_p4 }
  0x79   : > { %p11323_p3 = pneg %p11322_p2 }
  0x7b   : > { %p11328_p11 = pnand %p11327_p8, %p11323_p3 }
  0x7d   : > { %11331 = shalt.err (!%p11328_p11)
}
  0x7e   : > { %s13299_s13 = smov 128   ;;  %s13301_s15 = smov 8  }
  0x7f   : > { %10917 = dma.hbm_to_vmem [thread:$0]  (%p11012_p10), %s838_s18, 6144, %s840_s1, [#allocation12], %s13299_s13, %s13299_s13, %s13301_s15  }
  0x80   : > { %s863_s28 = sshll.u32 %s12198_s14, 4  ;;  %s12115_s23 = smov [#allocation14]   ;;  %s864_s28 = int_to_ptr.hbm [resolvable:$true] %s863_s28 }
  0x81   : > { %s865_s29 = sshll.u32 %s12115_s23, 4  ;;  %s889_s0 = sshll.u32 %s12208_s24, 4  ;;  %s866_s29 = int_to_ptr.vmem [resolvable:$true] %s865_s29  ;;  %s890_s0 = int_to_ptr.hbm [resolvable:$true] %s889_s0 }
  0x82   : > { %s11346_s26 = sshra.s32 %s864_s28, 4  ;;  %s11352_s10 = scalar_lea.hbm %s12198_s14, 128  ;;  %s11347_s26 = int_to_ptr.hbm [resolvable:$true] %s11346_s26 }
  0x83   : > { %s11348_s2 = scalar_lea.hbm %s11347_s26, 128  ;;  %p11353_p1 = scmp.lt.s32.totalorder %s11347_s26, %s12198_s14 }
  0x84   : > { %p11349_p12 = scmp.ne.s32.totalorder %s11347_s26, %s11348_s2  ;;  %p11354_p2 = scmp.lt.s32.totalorder %s11352_s10, %s11348_s2 }
  0x86   : > { %p11350_p13 = pnand %p11349_p12, %p11012_p10  ;;  %p11355_p3 = por %p11354_p2, %p11353_p1 }
  0x88   : > { %p11351_p0 = pneg %p11350_p13 }
  0x8a   : > { %p11356_p4 = pnand %p11355_p3, %p11351_p0 }
  0x8c   : > { %11359 = shalt.err (!%p11356_p4)
}
  0x8d   : > { %s13304_s18 = smov 64   ;;  %s12117_s1 = smov 4  }
  0x8e   : > { %10921 = dma.hbm_to_vmem [thread:$0]  (%p11012_p10), %s864_s28, 2048, %s866_s29, [#allocation15], %s13304_s18, %s13304_s18, %s12117_s1  }
  0x8f   : > { %s12118_s23 = smov [#allocation17]   ;;  %s915_s26 = sshll.u32 %s13339_s6, 4  ;;  %s12399_s26 = int_to_ptr.hbm [resolvable:$true] %s915_s26 }
  0x90   : > { %s891_s13 = sshll.u32 %s12118_s23, 4  ;;  %s11374_s2 = sshra.s32 %s890_s0, 4  ;;  %s892_s13 = int_to_ptr.vmem [resolvable:$true] %s891_s13  ;;  %s11375_s2 = int_to_ptr.hbm [resolvable:$true] %s11374_s2 }
  0x91   : > { %s11376_s10 = scalar_lea.hbm %s11375_s2, 480  ;;  %s11380_s15 = scalar_lea.hbm %s12208_s24, 480 }
  0x92   : > { %p11377_p7 = scmp.ne.s32.totalorder %s11375_s2, %s11376_s10  ;;  %p11381_p12 = scmp.lt.s32.totalorder %s11375_s2, %s12208_s24 }
  0x93   : > { %p11382_p13 = scmp.lt.s32.totalorder %s11380_s15, %s11376_s10 }
  0x94   : > { %p11378_p8 = pnand %p11377_p7, %p11012_p10 }
  0x95   : > { %p11383_p0 = por %p11382_p13, %p11381_p12 }
  0x96   : > { %p11379_p11 = pneg %p11378_p8 }
  0x98   : > { %p11384_p1 = pnand %p11383_p0, %p11379_p11 }
  0x9a   : > { %11387 = shalt.err (!%p11384_p1)
}
  0x9b   : > { %10925 = dma.hbm_to_vmem [thread:$0]  (%p11012_p10), %s890_s0, 7680, %s892_s13, [#allocation18], %s13304_s18, %s13304_s18, %s12117_s1  }
  0x9c   : > { %s12119_s28 = smov [#allocation20]   ;;  %s941_s23 = sshll.u32 %s12228_s20, 4  ;;  %s942_s23 = int_to_ptr.hbm [resolvable:$true] %s941_s23 }
  0x9d   : > { %s917_s29 = sshll.u32 %s12119_s28, 4  ;;  %s11402_s2 = sshra.s32 %s12399_s26, 4  ;;  %s918_s29 = int_to_ptr.vmem [resolvable:$true] %s917_s29  ;;  %s11403_s2 = int_to_ptr.hbm [resolvable:$true] %s11402_s2 }
  0x9e   : > { %s11404_s15 = scalar_lea.hbm %s11403_s2, 416  ;;  %s11408_s10 = scalar_lea.hbm %s13339_s6, 416 }
  0x9f   : > { %p11405_p2 = scmp.ne.s32.totalorder %s11403_s2, %s11404_s15  ;;  %p11409_p7 = scmp.lt.s32.totalorder %s11403_s2, %s13339_s6 }
  0xa0   : > { %p11410_p8 = scmp.lt.s32.totalorder %s11408_s10, %s11404_s15 }
  0xa1   : > { %p11406_p3 = pnand %p11405_p2, %p11012_p10 }
  0xa2   : > { %p11411_p11 = por %p11410_p8, %p11409_p7 }
  0xa3   : > { %p11407_p4 = pneg %p11406_p3 }
  0xa5   : > { %p11412_p12 = pnand %p11411_p11, %p11407_p4 }
  0xa7   : > { %11415 = shalt.err (!%p11412_p12)
}
  0xa8   : > { %s12120_s3 = smov 512   ;;  %s12121_s13 = smov 32  }
  0xa9   : > { %10929 = dma.hbm_to_vmem [thread:$0]  (%p11012_p10), %s12399_s26, 6656, %s918_s29, [#allocation21], %s12120_s3, %s12120_s3, %s12121_s13  }
  0xaa   : > { %s12122_s0 = smov [#allocation23]   ;;  %s967_s18 = sshll.u32 %s13341_s4, 4  ;;  %s12420_s18 = int_to_ptr.hbm [resolvable:$true] %s967_s18 }
  0xab   : > { %s943_s28 = sshll.u32 %s12122_s0, 4  ;;  %s11430_s2 = sshra.s32 %s942_s23, 4  ;;  %s944_s28 = int_to_ptr.vmem [resolvable:$true] %s943_s28  ;;  %s11431_s2 = int_to_ptr.hbm [resolvable:$true] %s11430_s2 }
  0xac   : > { %s11432_s15 = scalar_lea.hbm %s11431_s2, 64  ;;  %s11436_s10 = scalar_lea.hbm %s12228_s20, 64 }
  0xad   : > { %p11433_p13 = scmp.ne.s32.totalorder %s11431_s2, %s11432_s15  ;;  %p11437_p2 = scmp.lt.s32.totalorder %s11431_s2, %s12228_s20 }
  0xae   : > { %p11438_p3 = scmp.lt.s32.totalorder %s11436_s10, %s11432_s15 }
  0xaf   : > { %p11434_p0 = pnand %p11433_p13, %p11012_p10 }
  0xb0   : > { %p11439_p4 = por %p11438_p3, %p11437_p2 }
  0xb1   : > { %p11435_p1 = pneg %p11434_p0 }
  0xb3   : > { %p11440_p7 = pnand %p11439_p4, %p11435_p1 }
  0xb5   : > { %11443 = shalt.err (!%p11440_p7)
}
  0xb6   : > { %s13353_s3 = smov 64   ;;  %s996_s26 = sshll.u32 %s13340_s5, 4  ;;  %s12432_s26 = int_to_ptr.hbm [resolvable:$true] %s996_s26 }
  0xb7   : > { %10933 = dma.hbm_to_vmem [thread:$0]  (%p11012_p10), %s942_s23, 1024, %s944_s28, [#allocation24], %s13353_s3, %s13353_s3, %s12117_s1  }
  0xb8   : > { %s12123_s29 = smov [#allocation26]   ;;  %s11458_s0 = sshra.s32 %s12420_s18, 4  ;;  %s11459_s0 = int_to_ptr.hbm [resolvable:$true] %s11458_s0 }
  0xb9   : > { %s969_s13 = sshll.u32 %s12123_s29, 4  ;;  %s11460_s2 = scalar_lea.hbm %s11459_s0, 16  ;;  %s970_s13 = int_to_ptr.vmem [resolvable:$true] %s969_s13 }
  0xba   : > { %p11461_p8 = scmp.ne.s32.totalorder %s11459_s0, %s11460_s2  ;;  %s11464_s15 = scalar_lea.hbm %s13341_s4, 16 }
  0xbb   : > { %p11465_p13 = scmp.lt.s32.totalorder %s11459_s0, %s13341_s4  ;;  %p11466_p0 = scmp.lt.s32.totalorder %s11464_s15, %s11460_s2 }
  0xbc   : > { %p11462_p11 = pnand %p11461_p8, %p11012_p10 }
  0xbd   : > { %p11467_p1 = por %p11466_p0, %p11465_p13 }
  0xbe   : > { %p11463_p12 = pneg %p11462_p11 }
  0xc0   : > { %p11468_p2 = pnand %p11467_p1, %p11463_p12 }
  0xc2   : > { %11471 = shalt.err (!%p11468_p2)
}
  0xc3   : > { %s13354_s1 = smov 8   ;;  %s13355_s23 = smov 128  }
  0xc4   : > { %10937 = dma.hbm_to_vmem [thread:$0]  (%p11012_p10), %s12420_s18, 256, %s970_s13, [#allocation27], %s13355_s23, %s13355_s23, %s13354_s1  }
  0xc5   : > { %s12124_s28 = smov [#allocation29]   ;;  %s1021_s3 = sshll.u32 %s13337_s12, 4  ;;  %s12446_s3 = int_to_ptr.hbm [resolvable:$true] %s1021_s3 }
  0xc6   : > { %s998_s10 = sshll.u32 %s12124_s28, 4  ;;  %s11486_s29 = sshra.s32 %s12432_s26, 4  ;;  %s999_s10 = int_to_ptr.vmem [resolvable:$true] %s998_s10  ;;  %s11487_s29 = int_to_ptr.hbm [resolvable:$true] %s11486_s29 }
  0xc7   : > { %s11488_s0 = scalar_lea.hbm %s11487_s29, 4  ;;  %s11492_s2 = scalar_lea.hbm %s13340_s5, 4 }
  0xc8   : > { %p11489_p3 = scmp.ne.s32.totalorder %s11487_s29, %s11488_s0  ;;  %p11493_p8 = scmp.lt.s32.totalorder %s11487_s29, %s13340_s5 }
  0xc9   : > { %p11494_p11 = scmp.lt.s32.totalorder %s11492_s2, %s11488_s0 }
  0xca   : > { %p11490_p4 = pnand %p11489_p3, %p11012_p10 }
  0xcb   : > { %p11495_p12 = por %p11494_p11, %p11493_p8 }
  0xcc   : > { %p11491_p7 = pneg %p11490_p4 }
  0xce   : > { %p11496_p13 = pnand %p11495_p12, %p11491_p7 }
  0xd0   : > { %11499 = shalt.err (!%p11496_p13)
}
  0xd1   : > { %10941 = dma.hbm_to_vmem [thread:$0]  (%p11012_p10), %s12432_s26, 64, %s999_s10, [#allocation30]  }
  0xd2   : > { %s1047_s18 = sshll.u32 %s12268_s30, 4  ;;  %s12125_s13 = smov [#allocation32]   ;;  %s12457_s18 = int_to_ptr.hbm [resolvable:$true] %s1047_s18 }
  0xd3   : > { %s1023_s15 = sshll.u32 %s12125_s13, 4  ;;  %s11514_s28 = sshra.s32 %s12446_s3, 4  ;;  %s1024_s15 = int_to_ptr.vmem [resolvable:$true] %s1023_s15  ;;  %s11515_s28 = int_to_ptr.hbm [resolvable:$true] %s11514_s28 }
  0xd4   : > { %s11516_s29 = scalar_lea.hbm %s11515_s28, 320  ;;  %s11520_s0 = scalar_lea.hbm %s13337_s12, 320 }
  0xd5   : > { %p11517_p0 = scmp.ne.s32.totalorder %s11515_s28, %s11516_s29  ;;  %p11521_p3 = scmp.lt.s32.totalorder %s11515_s28, %s13337_s12 }
  0xd6   : > { %p11522_p4 = scmp.lt.s32.totalorder %s11520_s0, %s11516_s29 }
  0xd7   : > { %p11518_p1 = pnand %p11517_p0, %p11012_p10 }
  0xd8   : > { %p11523_p7 = por %p11522_p4, %p11521_p3 }
  0xd9   : > { %p11519_p2 = pneg %p11518_p1 }
  0xdb   : > { %p11524_p8 = pnand %p11523_p7, %p11519_p2 }
  0xdd   : > { %11527 = shalt.err (!%p11524_p8)
}
  0xde   : > { %10945 = dma.hbm_to_vmem [thread:$0]  (%p11012_p10), %s12446_s3, 5120, %s1024_s15, [#allocation33], %s13355_s23, %s13355_s23, %s13354_s1  }
  0xdf   : > { %s12126_s26 = smov [#allocation35]   ;;  %s1076_s2 = sshll.u32 %s12278_s19, 4  ;;  %s12471_s2 = int_to_ptr.hbm [resolvable:$true] %s1076_s2 }
  0xe0   : > { %s1049_s10 = sshll.u32 %s12126_s26, 4  ;;  %s11542_s13 = sshra.s32 %s12457_s18, 4  ;;  %s1050_s10 = int_to_ptr.vmem [resolvable:$true] %s1049_s10  ;;  %s11543_s13 = int_to_ptr.hbm [resolvable:$true] %s11542_s13 }
  0xe1   : > { %s11544_s28 = scalar_lea.hbm %s11543_s13, 32  ;;  %s11548_s29 = scalar_lea.hbm %s12268_s30, 32 }
  0xe2   : > { %p11545_p11 = scmp.ne.s32.totalorder %s11543_s13, %s11544_s28  ;;  %p11549_p0 = scmp.lt.s32.totalorder %s11543_s13, %s12268_s30 }
  0xe3   : > { %p11550_p1 = scmp.lt.s32.totalorder %s11548_s29, %s11544_s28 }
  0xe4   : > { %p11546_p12 = pnand %p11545_p11, %p11012_p10 }
  0xe5   : > { %p11551_p2 = por %p11550_p1, %p11549_p0 }
  0xe6   : > { %p11547_p13 = pneg %p11546_p12 }
  0xe8   : > { %p11552_p3 = pnand %p11551_p2, %p11547_p13 }
  0xea   : > { %11555 = shalt.err (!%p11552_p3)
}
  0xeb   : > { %s13356_s3 = smov 16   ;;  %s13357_s15 = smov 256  }
  0xec   : > { %10949 = dma.hbm_to_vmem [thread:$0]  (%p11012_p10), %s12457_s18, 512, %s1050_s10, [#allocation36], %s13357_s15, %s13357_s15, %s13356_s3  }
  0xed   : > { %s12127_s0 = smov [#allocation38]   ;;  %s770_s4 = sshll.u32 %s13338_s9, 4  ;;  %s12485_s4 = int_to_ptr.hbm [resolvable:$true] %s770_s4 }
  0xee   : > { %s1078_s26 = sshll.u32 %s12127_s0, 4  ;;  %s11570_s13 = sshra.s32 %s12471_s2, 4  ;;  %s1079_s26 = int_to_ptr.vmem [resolvable:$true] %s1078_s26  ;;  %s11571_s13 = int_to_ptr.hbm [resolvable:$true] %s11570_s13 }
  0xef   : > { %s11572_s28 = scalar_lea.hbm %s11571_s13, 4  ;;  %s11576_s29 = scalar_lea.hbm %s12278_s19, 4 }
  0xf0   : > { %p11573_p4 = scmp.ne.s32.totalorder %s11571_s13, %s11572_s28  ;;  %p11577_p11 = scmp.lt.s32.totalorder %s11571_s13, %s12278_s19 }
  0xf1   : > { %p11578_p12 = scmp.lt.s32.totalorder %s11576_s29, %s11572_s28 }
  0xf2   : > { %p11574_p7 = pnand %p11573_p4, %p11012_p10 }
  0xf3   : > { %p11579_p13 = por %p11578_p12, %p11577_p11 }
  0xf4   : > { %p11575_p8 = pneg %p11574_p7 }
  0xf6   : > { %p11580_p0 = pnand %p11579_p13, %p11575_p8 }
  0xf8   : > { %11583 = shalt.err (!%p11580_p0)
}
  0xf9   : > { %10953 = dma.hbm_to_vmem [thread:$0]  (%p11012_p10), %s12471_s2, 64, %s1079_s26, [#allocation39]  }
  0xfa   : > { %s800_s18 = sshll.u32 %s12173_s21, 4  ;;  %s12128_s10 = smov [#allocation2]   ;;  %s12496_s18 = int_to_ptr.hbm [resolvable:$true] %s800_s18 }
  0xfb   : > { %s772_s0 = sshll.u32 %s12128_s10, 4  ;;  %s11598_s13 = sshra.s32 %s12485_s4, 4  ;;  %s773_s0 = int_to_ptr.vmem [resolvable:$true] %s772_s0  ;;  %s11599_s13 = int_to_ptr.hbm [resolvable:$true] %s11598_s13 }
  0xfc   : > { %s11600_s28 = scalar_lea.hbm %s11599_s13, 1120  ;;  %s11604_s29 = scalar_lea.hbm %s13338_s9, 1120 }
  0xfd   : > { %p11601_p1 = scmp.ne.s32.totalorder %s11599_s13, %s11600_s28  ;;  %p11605_p4 = scmp.lt.s32.totalorder %s11599_s13, %s13338_s9 }
  0xfe   : > { %p11606_p7 = scmp.lt.s32.totalorder %s11604_s29, %s11600_s28 }
  0xff   : > { %p11602_p2 = pnand %p11601_p1, %p11012_p10 }
 0x100   : > { %p11607_p8 = por %p11606_p7, %p11605_p4 }
 0x101   : > { %p11603_p3 = pneg %p11602_p2 }
 0x103   : > { %p11608_p11 = pnand %p11607_p8, %p11603_p3 }
 0x105   : > { %11611 = shalt.err (!%p11608_p11)
}
 0x106   : > { %s13358_s2 = sld [smem:[#allocation60_spill]]  ;;  %s12129_s26 = smov [#allocation7]  }
 0x107   : > { %10907 = dma.hbm_to_vmem [thread:$0]  (%p11012_p10), %s12485_s4, 17920, %s773_s0, [#allocation3], %s13357_s15, %s13357_s15, %s13356_s3  }
 0x108   : > { %s802_s10 = sshll.u32 %s12129_s26, 4  ;;  %s11626_s13 = sshra.s32 %s12496_s18, 4  ;;  %s803_s10 = int_to_ptr.vmem [resolvable:$true] %s802_s10  ;;  %s11627_s13 = int_to_ptr.hbm [resolvable:$true] %s11626_s13 }
 0x109   : > { %s11628_s28 = scalar_lea.hbm %s11627_s13, 8  ;;  %s11632_s29 = scalar_lea.hbm %s12173_s21, 8 }
 0x10a   : > { %p11629_p12 = scmp.ne.s32.totalorder %s11627_s13, %s11628_s28  ;;  %p11633_p1 = scmp.lt.s32.totalorder %s11627_s13, %s12173_s21 }
 0x10b   : > { %p11634_p2 = scmp.lt.s32.totalorder %s11632_s29, %s11628_s28 }
 0x10c   : > { %s826_s5 = sshll.u32 %s13358_s2, 4  ;;  %p11630_p13 = pnand %p11629_p12, %p11012_p10  ;;  %s12510_s5 = int_to_ptr.hbm [resolvable:$true] %s826_s5 }
 0x10d   : > { %p11635_p3 = por %p11634_p2, %p11633_p1 }
 0x10e   : > { %p11631_p0 = pneg %p11630_p13 }
 0x110   : > { %p11636_p4 = pnand %p11635_p3, %p11631_p0 }
 0x112   : > { %11639 = shalt.err (!%p11636_p4)
}
 0x113   : > { %s13359_s4 = sld [smem:[#allocation62_spill]]  ;;  %s12130_s26 = smov [#allocation10]  }
 0x114   : > { %10911 = dma.hbm_to_vmem [thread:$0]  (%p11012_p10), %s12496_s18, 128, %s803_s10, [#allocation6]  }
 0x115   : > { %s828_s6 = sshll.u32 %s12130_s26, 4  ;;  %s11654_s13 = sshra.s32 %s12510_s5, 4  ;;  %s829_s6 = int_to_ptr.vmem [resolvable:$true] %s828_s6  ;;  %s11655_s13 = int_to_ptr.hbm [resolvable:$true] %s11654_s13 }
 0x116   : > { %s11656_s28 = scalar_lea.hbm %s11655_s13, 8  ;;  %s11660_s29 = scalar_lea.hbm %s13358_s2, 8 }
 0x117   : > { %p11657_p7 = scmp.ne.s32.totalorder %s11655_s13, %s11656_s28  ;;  %p11661_p12 = scmp.lt.s32.totalorder %s11655_s13, %s13358_s2 }
 0x118   : > { %p11662_p13 = scmp.lt.s32.totalorder %s11660_s29, %s11656_s28 }
 0x119   : > { %s852_s0 = sshll.u32 %s13359_s4, 4  ;;  %p11658_p8 = pnand %p11657_p7, %p11012_p10  ;;  %s12521_s0 = int_to_ptr.hbm [resolvable:$true] %s852_s0 }
 0x11a   : > { %p11663_p0 = por %p11662_p13, %p11661_p12 }
 0x11b   : > { %p11659_p11 = pneg %p11658_p8 }
 0x11d   : > { %p11664_p1 = pnand %p11663_p0, %p11659_p11 }
 0x11f   : > { %11667 = shalt.err (!%p11664_p1)
}
 0x120   : > { %s13360_s18 = sld [smem:[#allocation63_spill]]  ;;  %s12131_s26 = smov [#allocation13]  }
 0x121   : > { %10915 = dma.hbm_to_vmem [thread:$0]  (%p11012_p10), %s12510_s5, 128, %s829_s6, [#allocation9]  }
 0x122   : > { %s854_s9 = sshll.u32 %s12131_s26, 4  ;;  %s11682_s13 = sshra.s32 %s12521_s0, 4  ;;  %s855_s9 = int_to_ptr.vmem [resolvable:$true] %s854_s9  ;;  %s11683_s13 = int_to_ptr.hbm [resolvable:$true] %s11682_s13 }
 0x123   : > { %s11684_s28 = scalar_lea.hbm %s11683_s13, 4  ;;  %s11688_s29 = scalar_lea.hbm %s13359_s4, 4 }
 0x124   : > { %p11685_p2 = scmp.ne.s32.totalorder %s11683_s13, %s11684_s28  ;;  %p11689_p7 = scmp.lt.s32.totalorder %s11683_s13, %s13359_s4 }
 0x125   : > { %p11690_p8 = scmp.lt.s32.totalorder %s11688_s29, %s11684_s28 }
 0x126   : > { %s13361_s10 = smov %s13360_s18  ;;  %s878_s12 = sshll.u32 %s13360_s18, 4  ;;  %s12532_s12 = int_to_ptr.hbm [resolvable:$true] %s878_s12 }
 0x127   : > { %p11686_p3 = pnand %p11685_p2, %p11012_p10  ;;  %p11691_p11 = por %p11690_p8, %p11689_p7 }
 0x129   : > { %p11687_p4 = pneg %p11686_p3 }
 0x12b   : > { %p11692_p12 = pnand %p11691_p11, %p11687_p4 }
 0x12d   : > { %11695 = shalt.err (!%p11692_p12)
}
 0x12e   : > { %s13362_s5 = sld [smem:[#allocation64_spill]]  ;;  %s12132_s18 = smov [#allocation16]  }
 0x12f   : > { %10919 = dma.hbm_to_vmem [thread:$0]  (%p11012_p10), %s12521_s0, 64, %s855_s9, [#allocation12]  }
 0x130   : > { %s880_s26 = sshll.u32 %s12132_s18, 4  ;;  %s11710_s13 = sshra.s32 %s12532_s12, 4  ;;  %s881_s26 = int_to_ptr.vmem [resolvable:$true] %s880_s26  ;;  %s11711_s13 = int_to_ptr.hbm [resolvable:$true] %s11710_s13 }
 0x131   : > { %s11712_s28 = scalar_lea.hbm %s11711_s13, 2  ;;  %s11716_s29 = scalar_lea.hbm %s13361_s10, 2 }
 0x132   : > { %p11713_p13 = scmp.ne.s32.totalorder %s11711_s13, %s11712_s28  ;;  %p11717_p2 = scmp.lt.s32.totalorder %s11711_s13, %s13361_s10 }
 0x133   : > { %p11718_p3 = scmp.lt.s32.totalorder %s11716_s29, %s11712_s28 }
 0x134   : > { %s904_s6 = sshll.u32 %s13362_s5, 4  ;;  %p11714_p0 = pnand %p11713_p13, %p11012_p10  ;;  %s12543_s6 = int_to_ptr.hbm [resolvable:$true] %s904_s6 }
 0x135   : > { %p11719_p4 = por %p11718_p3, %p11717_p2 }
 0x136   : > { %p11715_p1 = pneg %p11714_p0 }
 0x138   : > { %p11720_p7 = pnand %p11719_p4, %p11715_p1 }
 0x13a   : > { %11723 = shalt.err (!%p11720_p7)
}
 0x13b   : > { %s13363_s9 = sld [smem:[#allocation66_spill]]  ;;  %s12133_s0 = smov [#allocation19]  }
 0x13c   : > { %10923 = dma.hbm_to_vmem [thread:$0]  (%p11012_p10), %s12532_s12, 32, %s881_s26, [#allocation15]  }
 0x13d   : > { %s906_s18 = sshll.u32 %s12133_s0, 4  ;;  %s11738_s13 = sshra.s32 %s12543_s6, 4  ;;  %s907_s18 = int_to_ptr.vmem [resolvable:$true] %s906_s18  ;;  %s11739_s13 = int_to_ptr.hbm [resolvable:$true] %s11738_s13 }
 0x13e   : > { %s11740_s28 = scalar_lea.hbm %s11739_s13, 2  ;;  %s11744_s29 = scalar_lea.hbm %s13362_s5, 2 }
 0x13f   : > { %p11741_p8 = scmp.ne.s32.totalorder %s11739_s13, %s11740_s28  ;;  %p11745_p13 = scmp.lt.s32.totalorder %s11739_s13, %s13362_s5 }
 0x140   : > { %p11746_p0 = scmp.lt.s32.totalorder %s11744_s29, %s11740_s28 }
 0x141   : > { %s930_s2 = sshll.u32 %s13363_s9, 4  ;;  %p11742_p11 = pnand %p11741_p8, %p11012_p10  ;;  %s12554_s2 = int_to_ptr.hbm [resolvable:$true] %s930_s2 }
 0x142   : > { %p11747_p1 = por %p11746_p0, %p11745_p13 }
 0x143   : > { %p11743_p12 = pneg %p11742_p11 }
 0x145   : > { %p11748_p2 = pnand %p11747_p1, %p11743_p12 }
 0x147   : > { %11751 = shalt.err (!%p11748_p2)
}
 0x148   : > { %s13364_s12 = sld [smem:[#allocation67_spill]]  ;;  %s12134_s0 = smov [#allocation22]  }
 0x149   : > { %10927 = dma.hbm_to_vmem [thread:$0]  (%p11012_p10), %s12543_s6, 32, %s907_s18, [#allocation18]  }
 0x14a   : > { %s932_s4 = sshll.u32 %s12134_s0, 4  ;;  %s11766_s13 = sshra.s32 %s12554_s2, 4  ;;  %s933_s4 = int_to_ptr.vmem [resolvable:$true] %s932_s4  ;;  %s11767_s13 = int_to_ptr.hbm [resolvable:$true] %s11766_s13 }
 0x14b   : > { %s11768_s28 = scalar_lea.hbm %s11767_s13, 8  ;;  %s11772_s29 = scalar_lea.hbm %s13363_s9, 8 }
 0x14c   : > { %p11769_p3 = scmp.ne.s32.totalorder %s11767_s13, %s11768_s28  ;;  %p11773_p8 = scmp.lt.s32.totalorder %s11767_s13, %s13363_s9 }
 0x14d   : > { %p11774_p11 = scmp.lt.s32.totalorder %s11772_s29, %s11768_s28 }
 0x14e   : > { %s956_s26 = sshll.u32 %s13364_s12, 4  ;;  %p11770_p4 = pnand %p11769_p3, %p11012_p10  ;;  %s12565_s26 = int_to_ptr.hbm [resolvable:$true] %s956_s26 }
 0x14f   : > { %p11775_p12 = por %p11774_p11, %p11773_p8 }
 0x150   : > { %p11771_p7 = pneg %p11770_p4 }
 0x152   : > { %p11776_p13 = pnand %p11775_p12, %p11771_p7 }
 0x154   : > { %11779 = shalt.err (!%p11776_p13)
}
 0x155   : > { %s13365_s6 = sld [smem:[#allocation69_spill]]  ;;  %s12135_s18 = smov [#allocation25]  }
 0x156   : > { %10931 = dma.hbm_to_vmem [thread:$0]  (%p11012_p10), %s12554_s2, 128, %s933_s4, [#allocation21]  }
 0x157   : > { %s958_s0 = sshll.u32 %s12135_s18, 4  ;;  %s11794_s13 = sshra.s32 %s12565_s26, 4  ;;  %s959_s0 = int_to_ptr.vmem [resolvable:$true] %s958_s0  ;;  %s11795_s13 = int_to_ptr.hbm [resolvable:$true] %s11794_s13 }
 0x158   : > { %s11796_s28 = scalar_lea.hbm %s11795_s13, 2  ;;  %s11800_s29 = scalar_lea.hbm %s13364_s12, 2 }
 0x159   : > { %p11797_p0 = scmp.ne.s32.totalorder %s11795_s13, %s11796_s28  ;;  %p11801_p3 = scmp.lt.s32.totalorder %s11795_s13, %s13364_s12 }
 0x15a   : > { %p11802_p4 = scmp.lt.s32.totalorder %s11800_s29, %s11796_s28 }
 0x15b   : > { %s981_s5 = sshll.u32 %s13365_s6, 4  ;;  %p11798_p1 = pnand %p11797_p0, %p11012_p10  ;;  %s12576_s5 = int_to_ptr.hbm [resolvable:$true] %s981_s5 }
 0x15c   : > { %p11803_p7 = por %p11802_p4, %p11801_p3 }
 0x15d   : > { %p11799_p2 = pneg %p11798_p1 }
 0x15f   : > { %p11804_p8 = pnand %p11803_p7, %p11799_p2 }
 0x161   : > { %11807 = shalt.err (!%p11804_p8)
}
 0x162   : > { %s13366_s2 = sld [smem:[#allocation71_spill]]  ;;  %s12136_s18 = smov [#allocation28]  }
 0x163   : > { %10935 = dma.hbm_to_vmem [thread:$0]  (%p11012_p10), %s12565_s26, 32, %s959_s0, [#allocation24]  }
 0x164   : > { %s983_s9 = sshll.u32 %s12136_s18, 4  ;;  %s11822_s13 = sshra.s32 %s12576_s5, 4  ;;  %s984_s9 = int_to_ptr.vmem [resolvable:$true] %s983_s9  ;;  %s11823_s13 = int_to_ptr.hbm [resolvable:$true] %s11822_s13 }
 0x165   : > { %s11824_s28 = scalar_lea.hbm %s11823_s13, 192  ;;  %s11828_s29 = scalar_lea.hbm %s13365_s6, 192 }
 0x166   : > { %p11825_p11 = scmp.ne.s32.totalorder %s11823_s13, %s11824_s28  ;;  %p11829_p0 = scmp.lt.s32.totalorder %s11823_s13, %s13365_s6 }
 0x167   : > { %p11830_p1 = scmp.lt.s32.totalorder %s11828_s29, %s11824_s28 }
 0x168   : > { %s1007_s4 = sshll.u32 %s13366_s2, 4  ;;  %p11826_p12 = pnand %p11825_p11, %p11012_p10  ;;  %s12587_s4 = int_to_ptr.hbm [resolvable:$true] %s1007_s4 }
 0x169   : > { %p11831_p2 = por %p11830_p1, %p11829_p0 }
 0x16a   : > { %p11827_p13 = pneg %p11826_p12 }
 0x16c   : > { %p11832_p3 = pnand %p11831_p2, %p11827_p13 }
 0x16e   : > { %11835 = shalt.err (!%p11832_p3)
}
 0x16f   : > { %s13367_s26 = sld [smem:[#allocation73_spill]]  ;;  %s12137_s0 = smov [#allocation31]  }
 0x170   : > { %10939 = dma.hbm_to_vmem [thread:$0]  (%p11012_p10), %s12576_s5, 3072, %s984_s9, [#allocation27], %s13355_s23, %s13355_s23, %s13354_s1  }
 0x171   : > { %s1009_s18 = sshll.u32 %s12137_s0, 4  ;;  %s11850_s13 = sshra.s32 %s12587_s4, 4  ;;  %s1010_s18 = int_to_ptr.vmem [resolvable:$true] %s1009_s18  ;;  %s11851_s13 = int_to_ptr.hbm [resolvable:$true] %s11850_s13 }
 0x172   : > { %s11852_s28 = scalar_lea.hbm %s11851_s13, 32  ;;  %s11856_s29 = scalar_lea.hbm %s13366_s2, 32 }
 0x173   : > { %p11853_p4 = scmp.ne.s32.totalorder %s11851_s13, %s11852_s28  ;;  %p11857_p11 = scmp.lt.s32.totalorder %s11851_s13, %s13366_s2 }
 0x174   : > { %p11858_p12 = scmp.lt.s32.totalorder %s11856_s29, %s11852_s28 }
 0x175   : > { %s1036_s10 = sshll.u32 %s13367_s26, 4  ;;  %p11854_p7 = pnand %p11853_p4, %p11012_p10  ;;  %s12601_s10 = int_to_ptr.hbm [resolvable:$true] %s1036_s10 }
 0x176   : > { %p11859_p13 = por %p11858_p12, %p11857_p11 }
 0x177   : > { %p11855_p8 = pneg %p11854_p7 }
 0x179   : > { %p11860_p0 = pnand %p11859_p13, %p11855_p8 }
 0x17b   : > { %11863 = shalt.err (!%p11860_p0)
}
 0x17c   : > { %s13368_s5 = sld [smem:[#allocation74_spill]]  ;;  %s12138_s0 = smov [#allocation34]  }
 0x17d   : > { %10943 = dma.hbm_to_vmem [thread:$0]  (%p11012_p10), %s12587_s4, 512, %s1010_s18, [#allocation30], %s13357_s15, %s13357_s15, %s13356_s3  }
 0x17e   : > { %s1038_s6 = sshll.u32 %s12138_s0, 4  ;;  %s11878_s13 = sshra.s32 %s12601_s10, 4  ;;  %s1039_s6 = int_to_ptr.vmem [resolvable:$true] %s1038_s6  ;;  %s11879_s13 = int_to_ptr.hbm [resolvable:$true] %s11878_s13 }
 0x17f   : > { %s11880_s28 = scalar_lea.hbm %s11879_s13, 4  ;;  %s11884_s29 = scalar_lea.hbm %s13367_s26, 4 }
 0x180   : > { %p11881_p1 = scmp.ne.s32.totalorder %s11879_s13, %s11880_s28  ;;  %p11885_p4 = scmp.lt.s32.totalorder %s11879_s13, %s13367_s26 }
 0x181   : > { %p11886_p7 = scmp.lt.s32.totalorder %s11884_s29, %s11880_s28 }
 0x182   : > { %s1061_s9 = sshll.u32 %s13368_s5, 4  ;;  %p11882_p2 = pnand %p11881_p1, %p11012_p10  ;;  %s12615_s9 = int_to_ptr.hbm [resolvable:$true] %s1061_s9 }
 0x183   : > { %p11887_p8 = por %p11886_p7, %p11885_p4 }
 0x184   : > { %p11883_p3 = pneg %p11882_p2 }
 0x186   : > { %p11888_p11 = pnand %p11887_p8, %p11883_p3 }
 0x188   : > { %11891 = shalt.err (!%p11888_p11)
}
 0x189   : > { %10947 = dma.hbm_to_vmem [thread:$0]  (%p11012_p10), %s12601_s10, 64, %s1039_s6, [#allocation33]  }
 0x18a   : > { %s12139_s3 = smov [#allocation37]   ;;  %s1090_s4 = sshll.u32 %s12288_s8, 4  ;;  %s1091_s4 = int_to_ptr.hbm [resolvable:$true] %s1090_s4 }
 0x18b   : > { %s1063_s15 = sshll.u32 %s12139_s3, 4  ;;  %s11906_s18 = sshra.s32 %s12615_s9, 4  ;;  %s1064_s15 = int_to_ptr.vmem [resolvable:$true] %s1063_s15  ;;  %s11907_s18 = int_to_ptr.hbm [resolvable:$true] %s11906_s18 }
 0x18c   : > { %s11908_s0 = scalar_lea.hbm %s11907_s18, 288  ;;  %s11912_s13 = scalar_lea.hbm %s13368_s5, 288 }
 0x18d   : > { %p11909_p12 = scmp.ne.s32.totalorder %s11907_s18, %s11908_s0  ;;  %p11913_p1 = scmp.lt.s32.totalorder %s11907_s18, %s13368_s5 }
 0x18e   : > { %p11914_p2 = scmp.lt.s32.totalorder %s11912_s13, %s11908_s0 }
 0x18f   : > { %p11910_p13 = pnand %p11909_p12, %p11012_p10 }
 0x190   : > { %p11915_p3 = por %p11914_p2, %p11913_p1 }
 0x191   : > { %p11911_p0 = pneg %p11910_p13 }
 0x193   : > { %p11916_p4 = pnand %p11915_p3, %p11911_p0 }
 0x195   : > { %11919 = shalt.err (!%p11916_p4)
}
 0x196   : > { %10951 = dma.hbm_to_vmem [thread:$0]  (%p11012_p10), %s12615_s9, 4608, %s1064_s15, [#allocation36], %s13355_s23, %s13355_s23, %s13354_s1  }
 0x197   : > { %s12140_s10 = smov [#allocation40]   ;;  %s11934_s28 = sshra.s32 %s1091_s4, 4  ;;  %s11935_s28 = int_to_ptr.hbm [resolvable:$true] %s11934_s28 }
 0x198   : > { %s1092_s6 = sshll.u32 %s12140_s10, 4  ;;  %s11936_s29 = scalar_lea.hbm %s11935_s28, 320  ;;  %s1093_s6 = int_to_ptr.vmem [resolvable:$true] %s1092_s6 }
 0x199   : > { %p11937_p7 = scmp.ne.s32.totalorder %s11935_s28, %s11936_s29  ;;  %s11940_s3 = scalar_lea.hbm %s12288_s8, 320 }
 0x19a   : > { %p11941_p12 = scmp.lt.s32.totalorder %s11935_s28, %s12288_s8  ;;  %p11942_p13 = scmp.lt.s32.totalorder %s11940_s3, %s11936_s29 }
 0x19b   : > { %p11938_p8 = pnand %p11937_p7, %p11012_p10 }
 0x19c   : > { %p11943_p0 = por %p11942_p13, %p11941_p12 }
 0x19d   : > { %p11939_p11 = pneg %p11938_p8 }
 0x19f   : > { %p11944_p1 = pnand %p11943_p0, %p11939_p11 }
 0x1a1   : > { %11947 = shalt.err (!%p11944_p1)
}
 0x1a2   : > { %10955 = dma.hbm_to_vmem [thread:$0]  (%p11012_p10), %s1091_s4, 5120, %s1093_s6, [#allocation39], %s13355_s23, %s13355_s23, %s13354_s1  }
 0x1a3 PF: > { %1119 = sbr.rel (%p12353_p9) target bundleno = 3545 (0xdd9), region = 136  ;;  %p11037_p2 = scmp.eq.s32.totalorder (!%p12353_p9), %s12326_s22, 0 }
 0x1a8   : > { %12007 = dma.done.wait (%p11037_p2), [#allocation3], 17920  }
 0x1a9   : > { %12009 = vsyncadd (%p11037_p2), [#allocation3], 4294949376 }
 0x1aa   : > { %12011 = dma.done.wait (%p11037_p2), [#allocation6], 256  }
 0x1ab   : > { %12013 = vsyncadd (%p11037_p2), [#allocation6], 4294967040 }
 0x1ac   : > { %12015 = dma.done.wait (%p11037_p2), [#allocation9], 10368  }
 0x1ad   : > { %12017 = vsyncadd (%p11037_p2), [#allocation9], 4294956928 }
 0x1ae   : > { %12019 = dma.done.wait (%p11037_p2), [#allocation12], 6208  }
 0x1af   : > { %12021 = vsyncadd (%p11037_p2), [#allocation12], 4294961088 }
 0x1b0   : > { %12023 = dma.done.wait (%p11037_p2), [#allocation15], 2080  }
 0x1b1   : > { %12025 = vsyncadd (%p11037_p2), [#allocation15], 4294965216 }
 0x1b2   : > { %12027 = dma.done.wait (%p11037_p2), [#allocation18], 7712  }
 0x1b3   : > { %12029 = vsyncadd (%p11037_p2), [#allocation18], 4294959584 }
 0x1b4   : > { %12031 = dma.done.wait (%p11037_p2), [#allocation21], 6784  }
 0x1b5   : > { %12033 = vsyncadd (%p11037_p2), [#allocation21], 4294960512 }
 0x1b6   : > { %12035 = dma.done.wait (%p11037_p2), [#allocation24], 1056  }
 0x1b7   : > { %12037 = vsyncadd (%p11037_p2), [#allocation24], 4294966240 }
 0x1b8   : > { %12039 = dma.done.wait (%p11037_p2), [#allocation27], 3328  }
 0x1b9   : > { %12041 = vsyncadd (%p11037_p2), [#allocation27], 4294963968 }
 0x1ba   : > { %12043 = dma.done.wait (%p11037_p2), [#allocation30], 576  }
 0x1bb   : > { %12045 = vsyncadd (%p11037_p2), [#allocation30], 4294966720 }
 0x1bc   : > { %12047 = dma.done.wait (%p11037_p2), [#allocation33], 5184  }
 0x1bd   : > { %12049 = vsyncadd (%p11037_p2), [#allocation33], 4294962112 }
 0x1be   : > { %12051 = dma.done.wait (%p11037_p2), [#allocation36], 5120  }
 0x1bf   : > { %12053 = vsyncadd (%p11037_p2), [#allocation36], 4294962176 }
 0x1c0   : > { %12055 = dma.done.wait (%p11037_p2), [#allocation39], 5184  }
 0x1c1   : > { %12057 = vsyncadd (%p11037_p2), [#allocation39], 4294962112  ;;  %v7927_v0 = vld [vmem:[#allocation2 + $0xe0] sm:$0xf]  ;;  %v10323_v1 = vld [vmem:[#allocation2 + $0xec] sm:$0xf0]  ;;  %s7402_s29 = scalar_lea.hbm %s12303_s17, %s12326_s22 }
 0x1c2   : > { %v8055_v2 = vld [vmem:[#allocation2 + $0x1e0] sm:$0xf]  ;;  %v7928_v3 = vor.u32 %v10323_v1, %v7927_v0  ;;  %v10355_v4 = vld [vmem:[#allocation2 + $0x1ec] sm:$0xf0]  ;;  %p1322_p9 = scmp.lt.s32.totalorder %s12326_s22, 1  ;;  %s13369_s23 = sld [smem:[#allocation56_spill]] }
 0x1c3   : > { %v8183_v5 = vld [vmem:[#allocation2 + $0x2e0] sm:$0xf]  ;;  %v10387_v6 = vld [vmem:[#allocation2 + $0x2ec] sm:$0xf0]  ;;  %v8056_v7 = vor.u32 %v10355_v4, %v8055_v2  ;;  %vm1345_vm0 = vcmask 1046528   ;;  %vm2198_vm1 = vcmask 392192  }
 0x1c4   : > { %v8184_v8 = vor.u32 %v10387_v6, %v8183_v5  ;;  %v8311_v9 = vld [vmem:[#allocation2 + $0x3e0] sm:$0xf]  ;;  %v10419_v10 = vld [vmem:[#allocation2 + $0x3ec] sm:$0xf0]  ;;  %2202 = vmatpush.bf16.msra.mxu0 %v7928_v3  ;;  %s12705_s11 = scalar_select %p1322_p9, %s12326_s22, 1  ;;  %vm2536_vm2 = vcmask 1040384  }
 0x1c5   : > { %v7911_v11 = vld [vmem:[#allocation2 + $0xc0] sm:$0xf]  ;;  %v8312_v12 = vor.u32 %v10419_v10, %v8311_v9  ;;  %v10319_v13 = vld [vmem:[#allocation2 + $0xcc] sm:$0xf0]  ;;  %2216 = vmatpush.bf16.msra.mxu1 %v8056_v7  ;;  %s13370_s15 = sld [smem:[#allocation59_spill]]  ;;  %s12141_s18 = smov 16  }
 0x1c6   : > { %v8039_v14 = vld [vmem:[#allocation2 + $0x1c0] sm:$0xf]  ;;  %v10351_v15 = vld [vmem:[#allocation2 + $0x1cc] sm:$0xf0]  ;;  %2230 = vmatpush.bf16.msra.mxu2 %v8184_v8  ;;  %v7912_v16 = vor.u32 %v10319_v13, %v7911_v11  ;;  %s10905_s1 = smul.u32 96, %s12705_s11  ;;  %vm2588_vm3 = vcmask 1045504  }
 0x1c7   : > { %v8040_v17 = vor.u32 %v10351_v15, %v8039_v14  ;;  %v8167_v18 = vld [vmem:[#allocation2 + $0x2c0] sm:$0xf]  ;;  %v10383_v19 = vld [vmem:[#allocation2 + $0x2cc] sm:$0xf0]  ;;  %2244 = vmatpush.bf16.msra.mxu3 %v8312_v12  ;;  %vm2579_vm4 = vcmask 130048   ;;  %vm3039_vm5 = vcmask 261120  }
 0x1c8   : > { %v8295_v20 = vld [vmem:[#allocation2 + $0x3c0] sm:$0xf]  ;;  %v8168_v21 = vor.u32 %v10383_v19, %v8167_v18  ;;  %v10415_v22 = vld [vmem:[#allocation2 + $0x3cc] sm:$0xf0]  ;;  %2203 = vmatpush.bf16.msra.mxu0 %v7912_v16  ;;  %s12711_s9 = scalar_lea.vmem %s13369_s23, %s10905_s1  ;;  %s12142_s0 = smov 32   ;;  %vm3813_vm6 = vcmask 523264  }
 0x1c9   : > { %v7895_v23 = vld [vmem:[#allocation2 + $0xa0] sm:$0xf]  ;;  %v10315_v24 = vld [vmem:[#allocation2 + $0xac] sm:$0xf0]  ;;  %v8296_v25 = vor.u32 %v10415_v22, %v8295_v20  ;;  %2217 = vmatpush.bf16.msra.mxu1 %v8040_v17  ;;  %s12143_s13 = smov 64   ;;  %vm5677_vm7 = vcmask 1041408  }
 0x1ca   : > { %v8023_v26 = vld [vmem:[#allocation2 + $0x1a0] sm:$0xf]  ;;  %v10347_v27 = vld [vmem:[#allocation2 + $0x1ac] sm:$0xf0]  ;;  %v7896_v29 = vor.u32 %v10315_v24, %v7895_v23  ;;  %2231 = vmatpush.bf16.msra.mxu2 %v8168_v21  ;;  %s1320_s10 = sand.u32 1, %s12068_s16   ;;  %vm5340_vm8 = vcmask 811008  }
 0x1cb   : > { %v8151_v28 = vld [vmem:[#allocation2 + $0x2a0] sm:$0xf]  ;;  %v10379_v30 = vld [vmem:[#allocation2 + $0x2ac] sm:$0xf0]  ;;  %v8024_v33 = vor.u32 %v10347_v27, %v8023_v26  ;;  %2245 = vmatpush.bf16.msra.mxu3 %v8296_v25  ;;  %s13371_s4 = smov %s13370_s15  ;;  %vm5673_vm9 = vcmask 818176   ;;  %s13165_s6 = scalar_lea.vmem [#allocation41], %s1320_s10 }
 0x1cc   : > { %v8279_v31 = vld [vmem:[#allocation2 + $0x3a0] sm:$0xf]  ;;  %v10411_v32 = vld [vmem:[#allocation2 + $0x3ac] sm:$0xf0]  ;;  %v8152_v34 = vor.u32 %v10379_v30, %v8151_v28  ;;  %2204 = vmatpush.bf16.msra.mxu0 %v7896_v29  ;;  %v10321_v30 = vld [vmem:[#allocation2 + $0xe4] sm:$0xf] }
 0x1cd   : > { %v7879_v35 = vld [vmem:[#allocation2 + $0x80] sm:$0xf]  ;;  %v10311_v36 = vld [vmem:[#allocation2 + $0x8c] sm:$0xf0]  ;;  %v8280_v38 = vor.u32 %v10411_v32, %v8279_v31  ;;  %2218 = vmatpush.bf16.msra.mxu1 %v8024_v33  ;;  %v7929_v31 = vld [vmem:[#allocation2 + $0xf0] sm:$0xf0] }
 0x1ce   : > { %v8007_v37 = vld [vmem:[#allocation2 + $0x180] sm:$0xf]  ;;  %v10343_v39 = vld [vmem:[#allocation2 + $0x18c] sm:$0xf0]  ;;  %v7880_v44 = vor.u32 %v10311_v36, %v7879_v35  ;;  %2232 = vmatpush.bf16.msra.mxu2 %v8152_v34  ;;  %v10353_v32 = vld [vmem:[#allocation2 + $0x1e4] sm:$0xf] }
 0x1cf   : > { %v8135_v40 = vld [vmem:[#allocation2 + $0x280] sm:$0xf]  ;;  %v10375_v41 = vld [vmem:[#allocation2 + $0x28c] sm:$0xf0]  ;;  %v8008_v45 = vor.u32 %v10343_v39, %v8007_v37  ;;  %2246 = vmatpush.bf16.msra.mxu3 %v8280_v38  ;;  %v8057_v33 = vld [vmem:[#allocation2 + $0x1f0] sm:$0xf0] }
 0x1d0   : > { %v8263_v42 = vld [vmem:[#allocation2 + $0x380] sm:$0xf]  ;;  %v10407_v43 = vld [vmem:[#allocation2 + $0x38c] sm:$0xf0]  ;;  %v8136_v46 = vor.u32 %v10375_v41, %v8135_v40  ;;  %2205 = vmatpush.bf16.msra.mxu0 %v7880_v44  ;;  %v10385_v34 = vld [vmem:[#allocation2 + $0x2e4] sm:$0xf] }
 0x1d1   : > { %v7863_v47 = vld [vmem:[#allocation2 + $0x60] sm:$0xf]  ;;  %v10307_v48 = vld [vmem:[#allocation2 + $0x6c] sm:$0xf0]  ;;  %v8264_v50 = vor.u32 %v10407_v43, %v8263_v42  ;;  %2219 = vmatpush.bf16.msra.mxu1 %v8008_v45  ;;  %v8185_v36 = vld [vmem:[#allocation2 + $0x2f0] sm:$0xf0] }
 0x1d2   : > { %v7991_v49 = vld [vmem:[#allocation2 + $0x160] sm:$0xf]  ;;  %v10339_v51 = vld [vmem:[#allocation2 + $0x16c] sm:$0xf0]  ;;  %v7864_v56 = vor.u32 %v10307_v48, %v7863_v47  ;;  %2233 = vmatpush.bf16.msra.mxu2 %v8136_v46  ;;  %v1336_v47 = vld [vmem:[%s12711_s9 + $0x18] sm:$0xff]  ;;  %vm5864_vm10 = vcmask 1042432  }
 0x1d3   : > { %v8119_v52 = vld [vmem:[#allocation2 + $0x260] sm:$0xf]  ;;  %v10371_v53 = vld [vmem:[#allocation2 + $0x26c] sm:$0xf0]  ;;  %v7992_v57 = vor.u32 %v10339_v51, %v7991_v49  ;;  %2247 = vmatpush.bf16.msra.mxu3 %v8264_v50  ;;  %v1340_v48 = vld [vmem:[%s12711_s9 + $0x38] sm:$0xff]  ;;  %v7932_v49 = vor.u32 %v10321_v30, %v7929_v31  ;;  %v8060_v50 = vor.u32 %v10353_v32, %v8057_v33  ;;  %vm5866_vm11 = vcmask 1043456  }
 0x1d4   : > { %v8247_v54 = vld [vmem:[#allocation2 + $0x360] sm:$0xf]  ;;  %v10403_v55 = vld [vmem:[#allocation2 + $0x36c] sm:$0xf0]  ;;  %v8120_v58 = vor.u32 %v10371_v53, %v8119_v52  ;;  %2206 = vmatpush.bf16.msra.mxu0 %v7864_v56  ;;  %v10317_v51 = vld [vmem:[#allocation2 + $0xc4] sm:$0xf] }
 0x1d5   : > { %v7847_v59 = vld [vmem:[#allocation2 + $0x40] sm:$0xf]  ;;  %v10303_v60 = vld [vmem:[#allocation2 + $0x4c] sm:$0xf0]  ;;  %v8248_v62 = vor.u32 %v10403_v55, %v8247_v54  ;;  %2220 = vmatpush.bf16.msra.mxu1 %v7992_v57  ;;  %v1334_v52 = vld [vmem:[%s12711_s9 + $0x8] sm:$0xff]  ;;  %v8188_v54 = vor.u32 %v10385_v34, %v8185_v36  ;;  %vm5868_vm12 = vcmask 1044480  }
 0x1d6   : > { %v7975_v61 = vld [vmem:[#allocation2 + $0x140] sm:$0xf]  ;;  %v10335_v63 = vld [vmem:[#allocation2 + $0x14c] sm:$0xf0]  ;;  %v7848_v4 = vor.u32 %v10303_v60, %v7847_v59  ;;  %2234 = vmatpush.bf16.msra.mxu2 %v8120_v58  ;;  %v1338_v53 = vld [vmem:[%s12711_s9 + $0x28] sm:$0xff]  ;;  %s13372_s28 = sld [smem:[#allocation75_spill]] }
 0x1d7   : > { %v8103_v0 = vld [vmem:[#allocation2 + $0x240] sm:$0xf]  ;;  %v10367_v1 = vld [vmem:[#allocation2 + $0x24c] sm:$0xf0]  ;;  %v7976_v6 = vor.u32 %v10335_v63, %v7975_v61  ;;  %2248 = vmatpush.bf16.msra.mxu3 %v8248_v62  ;;  %v7913_v56 = vld [vmem:[#allocation2 + $0xd0] sm:$0xf0]  ;;  %v12731_v62 = vpack.c.bf16 %v1340_v48, %v1336_v47 }
 0x1d8   : > { %v8231_v2 = vld [vmem:[#allocation2 + $0x340] sm:$0xf]  ;;  %v10399_v3 = vld [vmem:[#allocation2 + $0x34c] sm:$0xf0]  ;;  %v8104_v7 = vor.u32 %v10367_v1, %v8103_v0  ;;  %2207 = vmatpush.bf16.msra.mxu0 %v7848_v4  ;;  %v10349_v57 = vld [vmem:[#allocation2 + $0x1c4] sm:$0xf]  ;;  %v12733_v0 = vpack.c.bf16 %v1338_v53, %v1334_v52 }
 0x1d9   : > { %v7831_v5 = vld [vmem:[#allocation2 + $0x20] sm:$0xf]  ;;  %v10299_v8 = vld [vmem:[#allocation2 + $0x2c] sm:$0xf0]  ;;  %v8232_v11 = vor.u32 %v10399_v3, %v8231_v2  ;;  %2221 = vmatpush.bf16.msra.mxu1 %v7976_v6  ;;  %v8041_v58 = vld [vmem:[#allocation2 + $0x1d0] sm:$0xf0]  ;;  %v7916_v2 = vor.u32 %v10317_v51, %v7913_v56 }
 0x1da   : > { %v7959_v9 = vld [vmem:[#allocation2 + $0x120] sm:$0xf]  ;;  %v10331_v10 = vld [vmem:[#allocation2 + $0x12c] sm:$0xf0]  ;;  %v7832_v18 = vor.u32 %v10299_v8, %v7831_v5  ;;  %2235 = vmatpush.bf16.msra.mxu2 %v8104_v7  ;;  %v10381_v60 = vld [vmem:[#allocation2 + $0x2c4] sm:$0xf]  ;;  %v8044_v3 = vor.u32 %v10349_v57, %v8041_v58 }
 0x1db   : > { %v8087_v12 = vld [vmem:[#allocation2 + $0x220] sm:$0xf]  ;;  %v10363_v13 = vld [vmem:[#allocation2 + $0x22c] sm:$0xf0]  ;;  %v7960_v23 = vor.u32 %v10331_v10, %v7959_v9  ;;  %2249 = vmatpush.bf16.msra.mxu3 %v8232_v11  ;;  %v8169_v61 = vld [vmem:[#allocation2 + $0x2d0] sm:$0xf0] }
 0x1dc   : > { %v8215_v14 = vld [vmem:[#allocation2 + $0x320] sm:$0xf]  ;;  %v10395_v15 = vld [vmem:[#allocation2 + $0x32c] sm:$0xf0]  ;;  %v8088_v24 = vor.u32 %v10363_v13, %v8087_v12  ;;  %2208 = vmatpush.bf16.msra.mxu0 %v7832_v18  ;;  %v10313_v5 = vld [vmem:[#allocation2 + $0xa4] sm:$0xf]  ;;  %v8172_v7 = vor.u32 %v10381_v60, %v8169_v61 }
 0x1dd   : > { %v7815_v16 = vld [vmem:[#allocation2] sm:$0xf]  ;;  %v10295_v17 = vld [vmem:[#allocation2 + $0xc] sm:$0xf0]  ;;  %v8216_v28 = vor.u32 %v10395_v15, %v8215_v14  ;;  %2222 = vmatpush.bf16.msra.mxu1 %v7960_v23  ;;  %v7897_v6 = vld [vmem:[#allocation2 + $0xb0] sm:$0xf0] }
 0x1de   : > { %v7943_v19 = vld [vmem:[#allocation2 + $0x100] sm:$0xf]  ;;  %v10327_v20 = vld [vmem:[#allocation2 + $0x10c] sm:$0xf0]  ;;  %v7816_v35 = vor.u32 %v10295_v17, %v7815_v16  ;;  %2236 = vmatpush.bf16.msra.mxu2 %v8088_v24  ;;  %v10345_v8 = vld [vmem:[#allocation2 + $0x1a4] sm:$0xf]  ;;  %v7900_v15 = vor.u32 %v10313_v5, %v7897_v6 }
 0x1df   : > { %v8071_v21 = vld [vmem:[#allocation2 + $0x200] sm:$0xf]  ;;  %v10359_v22 = vld [vmem:[#allocation2 + $0x20c] sm:$0xf0]  ;;  %v7944_v39 = vor.u32 %v10327_v20, %v7943_v19  ;;  %2250 = vmatpush.bf16.msra.mxu3 %v8216_v28  ;;  %v8025_v9 = vld [vmem:[#allocation2 + $0x1b0] sm:$0xf0] }
 0x1e0   : > { %v8199_v25 = vld [vmem:[#allocation2 + $0x300] sm:$0xf]  ;;  %v10391_v26 = vld [vmem:[#allocation2 + $0x30c] sm:$0xf0]  ;;  %v8072_v40 = vor.u32 %v10359_v22, %v8071_v21  ;;  %2209 = vmatpush.bf16.msra.mxu0 %v7816_v35  ;;  %v10377_v10 = vld [vmem:[#allocation2 + $0x2a4] sm:$0xf]  ;;  %v8028_v16 = vor.u32 %v10345_v8, %v8025_v9 }
 0x1e1   : > { %v8359_v27 = vld [vmem:[#allocation2 + $0x440] sm:$0xf]  ;;  %v10431_v29 = vld [vmem:[#allocation2 + $0x44c] sm:$0xf0]  ;;  %v8200_v44 = vor.u32 %v10391_v26, %v8199_v25  ;;  %2223 = vmatpush.bf16.msra.mxu1 %v7944_v39  ;;  %v8153_v11 = vld [vmem:[#allocation2 + $0x2b0] sm:$0xf0] }
 0x1e2   : > { %v12714_v37 = vld [vmem:[%s12711_s9] sm:$0xff]  ;;  %v1335_v41 = vld [vmem:[%s12711_s9 + $0x10] sm:$0xff]  ;;  %v8360_v45 = vor.u32 %v10431_v29, %v8359_v27  ;;  %2237 = vmatpush.bf16.msra.mxu2 %v8072_v40  ;;  %v8156_v20 = vor.u32 %v10377_v10, %v8153_v11  ;;  %s7404_s3 = sshll.u32 %s13165_s6, 4  ;;  %s7406_s1 = sshll.u32 %s7402_s29, 4  ;;  %s7405_s3 = int_to_ptr.vmem [resolvable:$true] %s7404_s3  ;;  %s7407_s1 = int_to_ptr.hbm [resolvable:$true] %s7406_s1 }
 0x1e3   : > { %v12717_v38 = vld [vmem:[%s12711_s9 + $0x20] sm:$0xff]  ;;  %v1339_v42 = vld [vmem:[%s12711_s9 + $0x30] sm:$0xff]  ;;  %2251 = vmatpush.bf16.msra.mxu3 %v8200_v44  ;;  %v1346_v28 = vrot.slane %v12714_v37, 1  ;;  %s7391_s23 = scalar_lea.sflag [#allocation4], %s1320_s10 }
 0x1e4   : > { %v8343_v43 = vld [vmem:[#allocation2 + $0x420] sm:$0xf]  ;;  %v10427_v46 = vld [vmem:[#allocation2 + $0x42c] sm:$0xf0]  ;;  %v12727_v55 = vpack.c.bf16 %v12717_v38, %v12714_v37  ;;  %v12729_v59 = vpack.c.bf16 %v1339_v42, %v1335_v41  ;;  %2263 = vmatpush.bf16.msrb.mxu0 %v8360_v45  ;;  %v10417_v12 = vld [vmem:[#allocation2 + $0x3e4] sm:$0xf]  ;;  %2224 = vmatmul.bf16.vlgmr.msra.gmra.mxu1 %v12733_v0 }
 0x1e5   : > { %v8344_v63 = vor.u32 %v10427_v46, %v8343_v43  ;;  %v8327_v1 = vld [vmem:[#allocation2 + $0x400] sm:$0xf]  ;;  %2272 = vmatpush.bf16.msrb.mxu1 %v7932_v49  ;;  %v10423_v4 = vld [vmem:[#allocation2 + $0x40c] sm:$0xf0]  ;;  %v8313_v13 = vld [vmem:[#allocation2 + $0x3f0] sm:$0xf0] }
 0x1e6   : > { %2286 = vmatpush.bf16.msrb.mxu2 %v8060_v50  ;;  %2210 = vmatmul.bf16.vlgmr.msra.gmra.mxu0 %v12727_v55  ;;  %v8328_v14 = vor.u32 %v10423_v4, %v8327_v1  ;;  %v10309_v17 = vld [vmem:[#allocation2 + $0x84] sm:$0xf]  ;;  %v7881_v18 = vld [vmem:[#allocation2 + $0x90] sm:$0xf0]  ;;  %v1341_v19 = vld [vmem:[%s12711_s9 + $0x40] sm:$0x1]  ;;  %v8316_v21 = vor.u32 %v10417_v12, %v8313_v13 }
 0x1e7   : > { %2300 = vmatpush.bf16.msrb.mxu3 %v8188_v54  ;;  %2238 = vmatmul.bf16.vlgmr.msra.gmra.mxu2 %v12729_v59  ;;  %v10341_v22 = vld [vmem:[#allocation2 + $0x184] sm:$0xf]  ;;  %v8009_v23 = vld [vmem:[#allocation2 + $0x190] sm:$0xf0]  ;;  %v1347_v29 = vrot.slane %v12717_v38, 1  ;;  %v1349_v30 = vrot.slane %v1341_v19, 1  ;;  %v7884_v31 = vor.u32 %v10309_v17, %v7881_v18 }
 0x1e8   : > { %2252 = vmatmul.bf16.vlgmr.msra.gmra.mxu3 %v12731_v62  ;;  %2264 = vmatpush.bf16.msrb.mxu0 %v8344_v63  ;;  %v10373_v24 = vld [vmem:[#allocation2 + $0x284] sm:$0xf]  ;;  %v8137_v25 = vld [vmem:[#allocation2 + $0x290] sm:$0xf0]  ;;  %v8012_v32 = vor.u32 %v10341_v22, %v8009_v23  ;;  %v7935_v22 = vld [vmem:[#allocation2 + $0xe8] sm:$0xf] }
 0x1e9   : > { %2273 = vmatpush.bf16.msrb.mxu1 %v7916_v2  ;;  %v10413_v26 = vld [vmem:[#allocation2 + $0x3c4] sm:$0xf]  ;;  %v8297_v27 = vld [vmem:[#allocation2 + $0x3d0] sm:$0xf0]  ;;  %v8140_v35 = vor.u32 %v10373_v24, %v8137_v25  ;;  %v1348_v38 = vsel %vm1345_vm0, %v1346_v28, %v1347_v29  ;;  %v1350_v44 = vsel %vm1345_vm0, %v1347_v29, %v1349_v30  ;;  %v10324_v23 = vld [vmem:[#allocation2 + $0xf4] sm:$0xf0] }
 0x1ea   : > { %2287 = vmatpush.bf16.msrb.mxu2 %v8044_v3  ;;  %v10305_v33 = vld [vmem:[#allocation2 + $0x64] sm:$0xf]  ;;  %v7865_v34 = vld [vmem:[#allocation2 + $0x70] sm:$0xf0]  ;;  %v8300_v36 = vor.u32 %v10413_v26, %v8297_v27  ;;  %v12744_v54 = vpack.c.bf16 %v1350_v44, %v1348_v38  ;;  %v8063_v24 = vld [vmem:[#allocation2 + $0x1e8] sm:$0xf] }
 0x1eb   : > { %2301 = vmatpush.bf16.msrb.mxu3 %v8172_v7  ;;  %v10337_v39 = vld [vmem:[#allocation2 + $0x164] sm:$0xf]  ;;  %v7993_v40 = vld [vmem:[#allocation2 + $0x170] sm:$0xf0]  ;;  %v7868_v45 = vor.u32 %v10305_v33, %v7865_v34  ;;  %v10356_v25 = vld [vmem:[#allocation2 + $0x1f4] sm:$0xf0] }
 0x1ec   : > { %2265 = vmatpush.bf16.msrb.mxu0 %v8328_v14  ;;  %v10369_v41 = vld [vmem:[#allocation2 + $0x264] sm:$0xf]  ;;  %v8121_v42 = vld [vmem:[#allocation2 + $0x270] sm:$0xf0]  ;;  %v7996_v46 = vor.u32 %v10337_v39, %v7993_v40  ;;  %v8064_v33 = vor.u32 %v10356_v25, %v8063_v24  ;;  %v10320_v40 = vld [vmem:[#allocation2 + $0xd4] sm:$0xf0] }
 0x1ed   : > { %2274 = vmatpush.bf16.msrb.mxu1 %v7900_v15  ;;  %v10409_v37 = vld [vmem:[#allocation2 + $0x3a4] sm:$0xf]  ;;  %v8281_v43 = vld [vmem:[#allocation2 + $0x3b0] sm:$0xf0]  ;;  %v8124_v49 = vor.u32 %v10369_v41, %v8121_v42  ;;  %v8047_v41 = vld [vmem:[#allocation2 + $0x1c8] sm:$0xf] }
 0x1ee   : > { %2288 = vmatpush.bf16.msrb.mxu2 %v8028_v16  ;;  %v10301_v47 = vld [vmem:[#allocation2 + $0x44] sm:$0xf]  ;;  %v7849_v48 = vld [vmem:[#allocation2 + $0x50] sm:$0xf0]  ;;  %v8284_v50 = vor.u32 %v10409_v37, %v8281_v43  ;;  %v10352_v42 = vld [vmem:[#allocation2 + $0x1d4] sm:$0xf0] }
 0x1ef   : > { %2302 = vmatpush.bf16.msrb.mxu3 %v8156_v20  ;;  %v10333_v51 = vld [vmem:[#allocation2 + $0x144] sm:$0xf]  ;;  %v7977_v52 = vld [vmem:[#allocation2 + $0x150] sm:$0xf0]  ;;  %v7852_v60 = vor.u32 %v10301_v47, %v7849_v48  ;;  %v7903_v48 = vld [vmem:[#allocation2 + $0xa8] sm:$0xf] }
 0x1f0   : > { %2314 = vmatpush.bf16.msra.mxu0 %v8316_v21  ;;  %v10365_v53 = vld [vmem:[#allocation2 + $0x244] sm:$0xf]  ;;  %v8105_v56 = vld [vmem:[#allocation2 + $0x250] sm:$0xf0]  ;;  %v7980_v61 = vor.u32 %v10333_v51, %v7977_v52  ;;  %v8031_v51 = vld [vmem:[#allocation2 + $0x1a8] sm:$0xf] }
 0x1f1   : > { %2275 = vmatpush.bf16.msrb.mxu1 %v7884_v31  ;;  %v10405_v57 = vld [vmem:[#allocation2 + $0x384] sm:$0xf]  ;;  %v8265_v58 = vld [vmem:[#allocation2 + $0x390] sm:$0xf0]  ;;  %v8108_v2 = vor.u32 %v10365_v53, %v8105_v56  ;;  %v10348_v52 = vld [vmem:[#allocation2 + $0x1b4] sm:$0xf0] }
 0x1f2   : > { %2289 = vmatpush.bf16.msrb.mxu2 %v8012_v32  ;;  %v10297_v63 = vld [vmem:[#allocation2 + $0x24] sm:$0xf]  ;;  %v7833_v1 = vld [vmem:[#allocation2 + $0x30] sm:$0xf0]  ;;  %v8268_v3 = vor.u32 %v10405_v57, %v8265_v58  ;;  %v7936_v32 = vor.u32 %v10324_v23, %v7935_v22  ;;  %v8191_v57 = vld [vmem:[#allocation2 + $0x2e8] sm:$0xf] }
 0x1f3   : > { %2303 = vmatpush.bf16.msrb.mxu3 %v8140_v35  ;;  %v10329_v4 = vld [vmem:[#allocation2 + $0x124] sm:$0xf]  ;;  %v7961_v5 = vld [vmem:[#allocation2 + $0x130] sm:$0xf0]  ;;  %v7836_v10 = vor.u32 %v10297_v63, %v7833_v1  ;;  %v10388_v58 = vld [vmem:[#allocation2 + $0x2f4] sm:$0xf0] }
 0x1f4   : > { %2315 = vmatpush.bf16.msra.mxu0 %v8300_v36  ;;  %v10361_v6 = vld [vmem:[#allocation2 + $0x224] sm:$0xf]  ;;  %v8089_v7 = vld [vmem:[#allocation2 + $0x230] sm:$0xf0]  ;;  %v7964_v11 = vor.u32 %v10329_v4, %v7961_v5  ;;  %v7919_v36 = vld [vmem:[#allocation2 + $0xc8] sm:$0xf]  ;;  %v8192_v5 = vor.u32 %v10388_v58, %v8191_v57 }
 0x1f5   : > { %2276 = vmatpush.bf16.msrb.mxu1 %v7868_v45  ;;  %v10401_v8 = vld [vmem:[#allocation2 + $0x364] sm:$0xf]  ;;  %v8249_v9 = vld [vmem:[#allocation2 + $0x370] sm:$0xf0]  ;;  %v8092_v15 = vor.u32 %v10361_v6, %v8089_v7  ;;  %v7920_v45 = vor.u32 %v10320_v40, %v7919_v36  ;;  %v10420_v63 = vld [vmem:[#allocation2 + $0x3f4] sm:$0xf0] }
 0x1f6   : > { %2290 = vmatpush.bf16.msrb.mxu2 %v7996_v46  ;;  %8373 = vmatmul.msk.bf16.vlgmr.msrb.gmra.mxu0 %vm2198_vm1, %v12744_v54  ;;  %v10293_v12 = vld [vmem:[#allocation2 + $0x4] sm:$0xf]  ;;  %v7817_v13 = vld [vmem:[#allocation2 + $0x10] sm:$0xf0]  ;;  %v8252_v16 = vor.u32 %v10401_v8, %v8249_v9  ;;  %v8048_v46 = vor.u32 %v10352_v42, %v8047_v41  ;;  %v10312_v6 = vld [vmem:[#allocation2 + $0x94] sm:$0xf0] }
 0x1f7   : > { %2304 = vmatpush.bf16.msrb.mxu3 %v8124_v49  ;;  %v10325_v14 = vld [vmem:[#allocation2 + $0x104] sm:$0xf]  ;;  %v7945_v17 = vld [vmem:[#allocation2 + $0x110] sm:$0xf0]  ;;  %v7820_v26 = vor.u32 %v10293_v12, %v7817_v13  ;;  %v10316_v49 = vld [vmem:[#allocation2 + $0xb4] sm:$0xf0] }
 0x1f8   : > { %2316 = vmatpush.bf16.msra.mxu0 %v8284_v50  ;;  %v10357_v18 = vld [vmem:[#allocation2 + $0x204] sm:$0xf]  ;;  %v8073_v19 = vld [vmem:[#allocation2 + $0x210] sm:$0xf0]  ;;  %v7948_v27 = vor.u32 %v10325_v14, %v7945_v17  ;;  %v7904_v1 = vor.u32 %v10316_v49, %v7903_v48  ;;  %v8015_v7 = vld [vmem:[#allocation2 + $0x188] sm:$0xf] }
 0x1f9   : > { %2277 = vmatpush.bf16.msrb.mxu1 %v7852_v60  ;;  %v10397_v20 = vld [vmem:[#allocation2 + $0x344] sm:$0xf]  ;;  %v8233_v21 = vld [vmem:[#allocation2 + $0x350] sm:$0xf0]  ;;  %v8076_v30 = vor.u32 %v10357_v18, %v8073_v19  ;;  %v10344_v8 = vld [vmem:[#allocation2 + $0x194] sm:$0xf0] }
 0x1fa   : > { %2291 = vmatpush.bf16.msrb.mxu2 %v7980_v61  ;;  %v10429_v28 = vld [vmem:[#allocation2 + $0x444] sm:$0xf]  ;;  %v8361_v29 = vld [vmem:[#allocation2 + $0x450] sm:$0xf0]  ;;  %v8236_v31 = vor.u32 %v10397_v20, %v8233_v21  ;;  %v8319_v61 = vld [vmem:[#allocation2 + $0x3e8] sm:$0xf] }
 0x1fb   : > { %2305 = vmatpush.bf16.msrb.mxu3 %v8108_v2  ;;  %v10393_v34 = vld [vmem:[#allocation2 + $0x324] sm:$0xf]  ;;  %v8217_v35 = vld [vmem:[#allocation2 + $0x330] sm:$0xf0]  ;;  %v8364_v39 = vor.u32 %v10429_v28, %v8361_v29  ;;  %v8032_v2 = vor.u32 %v10348_v52, %v8031_v51  ;;  %v8320_v9 = vor.u32 %v10420_v63, %v8319_v61  ;;  %v8303_v12 = vld [vmem:[#allocation2 + $0x3c8] sm:$0xf] }
 0x1fc   : > { %2317 = vmatpush.bf16.msra.mxu0 %v8268_v3  ;;  %v10425_v37 = vld [vmem:[#allocation2 + $0x424] sm:$0xf]  ;;  %v8345_v43 = vld [vmem:[#allocation2 + $0x430] sm:$0xf0]  ;;  %v8220_v38 = vor.u32 %v10393_v34, %v8217_v35  ;;  %v7887_v3 = vld [vmem:[#allocation2 + $0x88] sm:$0xf] }
 0x1fd   : > { %2278 = vmatpush.bf16.msrb.mxu1 %v7836_v10  ;;  %v10389_v44 = vld [vmem:[#allocation2 + $0x304] sm:$0xf]  ;;  %v8201_v47 = vld [vmem:[#allocation2 + $0x310] sm:$0xf0]  ;;  %v8348_v50 = vor.u32 %v10425_v37, %v8345_v43  ;;  %v8175_v10 = vld [vmem:[#allocation2 + $0x2c8] sm:$0xf]  ;;  %v7888_v14 = vor.u32 %v10312_v6, %v7887_v3 }
 0x1fe   : > { %2292 = vmatpush.bf16.msrb.mxu2 %v7964_v11  ;;  %v10421_v53 = vld [vmem:[#allocation2 + $0x404] sm:$0xf]  ;;  %v8329_v56 = vld [vmem:[#allocation2 + $0x410] sm:$0xf0]  ;;  %v8204_v60 = vor.u32 %v10389_v44, %v8201_v47  ;;  %v10384_v11 = vld [vmem:[#allocation2 + $0x2d4] sm:$0xf0] }
 0x1ff   : > { %2306 = vmatpush.bf16.msrb.mxu3 %v8092_v15  ;;  %v8332_v4 = vor.u32 %v10421_v53, %v8329_v56  ;;  %v10416_v13 = vld [vmem:[#allocation2 + $0x3d4] sm:$0xf0]  ;;  %v8016_v15 = vor.u32 %v10344_v8, %v8015_v7  ;;  %v8176_v17 = vor.u32 %v10384_v11, %v8175_v10  ;;  %v7999_v19 = vld [vmem:[#allocation2 + $0x168] sm:$0xf]  ;;  %v10322_v3 = vld [vmem:[#allocation2 + $0xec] sm:$0xf] }
 0x200   : > { %2318 = vmatpush.bf16.msra.mxu0 %v8252_v16  ;;  %v7871_v16 = vld [vmem:[#allocation2 + $0x68] sm:$0xf]  ;;  %v10308_v18 = vld [vmem:[#allocation2 + $0x74] sm:$0xf0]  ;;  %v8304_v21 = vor.u32 %v10416_v13, %v8303_v12  ;;  %s11976_s9 = sshra.s32 %s7407_s1, 4  ;;  %s11977_s9 = int_to_ptr.hbm [resolvable:$true] %s11976_s9 }
 0x201   : > { %2279 = vmatpush.bf16.msrb.mxu1 %v7820_v26  ;;  %v10340_v20 = vld [vmem:[#allocation2 + $0x174] sm:$0xf0]  ;;  %v8159_v22 = vld [vmem:[#allocation2 + $0x2a8] sm:$0xf]  ;;  %v7872_v24 = vor.u32 %v10308_v18, %v7871_v16  ;;  %v7921_v18 = vld [vmem:[#allocation2 + $0xd8] sm:$0xf0]  ;;  %p11983_p7 = scmp.lt.s32.totalorder %s11977_s9, %s12303_s17 }
 0x202   : > { %2293 = vmatpush.bf16.msrb.mxu2 %v7948_v27  ;;  %v10380_v23 = vld [vmem:[#allocation2 + $0x2b4] sm:$0xf0]  ;;  %v8000_v25 = vor.u32 %v10340_v20, %v7999_v19  ;;  %v8287_v26 = vld [vmem:[#allocation2 + $0x3a8] sm:$0xf] }
 0x203   : > { %2307 = vmatpush.bf16.msrb.mxu3 %v8076_v30  ;;  %v10412_v27 = vld [vmem:[#allocation2 + $0x3b4] sm:$0xf0]  ;;  %v7855_v28 = vld [vmem:[#allocation2 + $0x48] sm:$0xf]  ;;  %v8160_v29 = vor.u32 %v10380_v23, %v8159_v22 }
 0x204   : > { %2319 = vmatpush.bf16.msra.mxu0 %v8236_v31  ;;  %2280 = vmatmul.bf16.vlgmr.msrb.gmra.mxu1 %v12727_v55  ;;  %v10304_v30 = vld [vmem:[#allocation2 + $0x54] sm:$0xf0]  ;;  %v7983_v31 = vld [vmem:[#allocation2 + $0x148] sm:$0xf]  ;;  %v8288_v35 = vor.u32 %v10412_v27, %v8287_v26 }
 0x205   : > { %2333 = vmatpush.bf16.msra.mxu1 %v8364_v39  ;;  %2294 = vmatmul.bf16.vlgmr.msrb.gmra.mxu2 %v12733_v0  ;;  %v10376_v34 = vld [vmem:[#allocation2 + $0x294] sm:$0xf0]  ;;  %v7856_v36 = vor.u32 %v10304_v30, %v7855_v28  ;;  %v8271_v40 = vld [vmem:[#allocation2 + $0x388] sm:$0xf]  ;;  %v10314_v28 = vld [vmem:[#allocation2 + $0xac] sm:$0xf] }
 0x206   : > { %2342 = vmatpush.bf16.msra.mxu2 %v7936_v32  ;;  %2308 = vmatmul.bf16.vlgmr.msrb.gmra.mxu3 %v12729_v59  ;;  %v10336_v32 = vld [vmem:[#allocation2 + $0x154] sm:$0xf0]  ;;  %v7839_v42 = vld [vmem:[#allocation2 + $0x28] sm:$0xf] }
 0x207   : > { %2356 = vmatpush.bf16.msra.mxu3 %v8064_v33  ;;  %v8143_v33 = vld [vmem:[#allocation2 + $0x288] sm:$0xf]  ;;  %v7984_v39 = vor.u32 %v10336_v32, %v7983_v31  ;;  %v10408_v41 = vld [vmem:[#allocation2 + $0x394] sm:$0xf0]  ;;  %v10354_v32 = vld [vmem:[#allocation2 + $0x1ec] sm:$0xf] }
 0x208   : > { %2320 = vmatpush.bf16.msra.mxu0 %v8220_v38  ;;  %v8144_v37 = vor.u32 %v10376_v34, %v8143_v33  ;;  %v10300_v43 = vld [vmem:[#allocation2 + $0x34] sm:$0xf0]  ;;  %v7967_v38 = vld [vmem:[#allocation2 + $0x128] sm:$0xf]  ;;  %v8272_v47 = vor.u32 %v10408_v41, %v8271_v40  ;;  %v8065_v33 = vld [vmem:[#allocation2 + $0x1f8] sm:$0xf0] }
 0x209   : > { %2334 = vmatpush.bf16.msra.mxu1 %v8348_v50  ;;  %v10332_v44 = vld [vmem:[#allocation2 + $0x134] sm:$0xf0]  ;;  %v8255_v48 = vld [vmem:[#allocation2 + $0x368] sm:$0xf]  ;;  %v7840_v49 = vor.u32 %v10300_v43, %v7839_v42  ;;  %v10386_v41 = vld [vmem:[#allocation2 + $0x2ec] sm:$0xf]  ;;  %v8068_v43 = vor.u32 %v10354_v32, %v8065_v33 }
 0x20a   : > { %2343 = vmatpush.bf16.msra.mxu2 %v7920_v45  ;;  %v8127_v45 = vld [vmem:[#allocation2 + $0x268] sm:$0xf]  ;;  %v7968_v50 = vor.u32 %v10332_v44, %v7967_v38  ;;  %v10404_v51 = vld [vmem:[#allocation2 + $0x374] sm:$0xf0]  ;;  %v8193_v42 = vld [vmem:[#allocation2 + $0x2f8] sm:$0xf0] }
 0x20b   : > { %2357 = vmatpush.bf16.msra.mxu3 %v8048_v46  ;;  %v10372_v46 = vld [vmem:[#allocation2 + $0x274] sm:$0xf0]  ;;  %v7823_v52 = vld [vmem:[#allocation2 + $0x8] sm:$0xf]  ;;  %v10310_v38 = vld [vmem:[#allocation2 + $0x8c] sm:$0xf] }
 0x20c   : > { %2321 = vmatpush.bf16.msra.mxu0 %v8204_v60  ;;  %v10296_v53 = vld [vmem:[#allocation2 + $0x14] sm:$0xf0]  ;;  %v8128_v56 = vor.u32 %v10372_v46, %v8127_v45  ;;  %v7951_v57 = vld [vmem:[#allocation2 + $0x108] sm:$0xf]  ;;  %v7889_v46 = vld [vmem:[#allocation2 + $0x98] sm:$0xf0] }
 0x20d   : > { %2335 = vmatpush.bf16.msra.mxu1 %v8332_v4  ;;  %v10328_v58 = vld [vmem:[#allocation2 + $0x114] sm:$0xf0]  ;;  %v8111_v60 = vld [vmem:[#allocation2 + $0x248] sm:$0xf]  ;;  %v7937_v4 = vld [vmem:[#allocation2 + $0xf8] sm:$0xf0] }
 0x20e   : > { %2344 = vmatpush.bf16.msra.mxu2 %v7904_v1  ;;  %v10368_v61 = vld [vmem:[#allocation2 + $0x254] sm:$0xf0]  ;;  %v8367_v63 = vld [vmem:[#allocation2 + $0x448] sm:$0xf]  ;;  %v7952_v6 = vor.u32 %v10328_v58, %v7951_v57  ;;  %v7940_v12 = vor.u32 %v10322_v3, %v7937_v4  ;;  %v10306_v58 = vld [vmem:[#allocation2 + $0x6c] sm:$0xf] }
 0x20f   : > { %2358 = vmatpush.bf16.msra.mxu3 %v8032_v2  ;;  %2322 = vmatmul.bf16.vlgmr.msra.gmra.mxu0 %v12731_v62  ;;  %v10432_v1 = vld [vmem:[#allocation2 + $0x454] sm:$0xf0]  ;;  %v8256_v2 = vor.u32 %v10404_v51, %v8255_v48  ;;  %v8239_v7 = vld [vmem:[#allocation2 + $0x348] sm:$0xf]  ;;  %v8049_v48 = vld [vmem:[#allocation2 + $0x1d8] sm:$0xf0] }
 0x210   : > { %2370 = vmatpush.bf16.msrb.mxu0 %v8192_v5  ;;  %v7824_v5 = vor.u32 %v10296_v53, %v7823_v52  ;;  %v10400_v8 = vld [vmem:[#allocation2 + $0x354] sm:$0xf0]  ;;  %v8368_v10 = vor.u32 %v10432_v1, %v8367_v63  ;;  %v8095_v11 = vld [vmem:[#allocation2 + $0x228] sm:$0xf]  ;;  %v8305_v51 = vld [vmem:[#allocation2 + $0x3d8] sm:$0xf0] }
 0x211   : > { %2384 = vmatpush.bf16.msrb.mxu1 %v8320_v9  ;;  %v8112_v9 = vor.u32 %v10368_v61, %v8111_v60  ;;  %v10364_v13 = vld [vmem:[#allocation2 + $0x234] sm:$0xf0]  ;;  %v8240_v16 = vor.u32 %v10400_v8, %v8239_v7  ;;  %v8223_v19 = vld [vmem:[#allocation2 + $0x328] sm:$0xf]  ;;  %v10382_v52 = vld [vmem:[#allocation2 + $0x2cc] sm:$0xf] }
 0x212   : > { %2345 = vmatpush.bf16.msra.mxu2 %v7888_v14  ;;  %v8351_v14 = vld [vmem:[#allocation2 + $0x428] sm:$0xf]  ;;  %v10396_v20 = vld [vmem:[#allocation2 + $0x334] sm:$0xf0]  ;;  %v8177_v53 = vld [vmem:[#allocation2 + $0x2d8] sm:$0xf0] }
 0x213   : > { %2359 = vmatpush.bf16.msra.mxu3 %v8016_v15  ;;  %v10428_v15 = vld [vmem:[#allocation2 + $0x434] sm:$0xf0]  ;;  %v8079_v23 = vld [vmem:[#allocation2 + $0x208] sm:$0xf]  ;;  %v8224_v30 = vor.u32 %v10396_v20, %v8223_v19  ;;  %v7873_v61 = vld [vmem:[#allocation2 + $0x78] sm:$0xf0] }
 0x214   : > { %2371 = vmatpush.bf16.msrb.mxu0 %v8176_v17  ;;  %8374 = vmatmul.msk.bf16.vlgmr.msra.gmra.mxu1 %vm2198_vm1, %v12744_v54  ;;  %v10318_v17 = vld [vmem:[#allocation2 + $0xcc] sm:$0xf]  ;;  %v8352_v22 = vor.u32 %v10428_v15, %v8351_v14  ;;  %v10424_v27 = vld [vmem:[#allocation2 + $0x414] sm:$0xf0]  ;;  %v8207_v31 = vld [vmem:[#allocation2 + $0x308] sm:$0xf]  ;;  %v7876_v7 = vor.u32 %v10306_v58, %v7873_v61 }
 0x215   : > { %2385 = vmatpush.bf16.msrb.mxu1 %v8304_v21  ;;  %v8096_v21 = vor.u32 %v10364_v13, %v8095_v11  ;;  %v7924_v26 = vor.u32 %v10318_v17, %v7921_v18  ;;  %v10392_v34 = vld [vmem:[#allocation2 + $0x314] sm:$0xf0]  ;;  %v10346_v63 = vld [vmem:[#allocation2 + $0x1ac] sm:$0xf]  ;;  %v8033_v1 = vld [vmem:[#allocation2 + $0x1b8] sm:$0xf0] }
 0x216   : > { %2346 = vmatpush.bf16.msra.mxu2 %v7872_v24  ;;  %v10360_v24 = vld [vmem:[#allocation2 + $0x214] sm:$0xf0]  ;;  %v8208_v44 = vor.u32 %v10392_v34, %v8207_v31  ;;  %v10410_v3 = vld [vmem:[#allocation2 + $0x3ac] sm:$0xf]  ;;  %v8289_v4 = vld [vmem:[#allocation2 + $0x3b8] sm:$0xf0]  ;;  %v8036_v8 = vor.u32 %v10346_v63, %v8033_v1 }
 0x217   : > { %2360 = vmatpush.bf16.msra.mxu3 %v8000_v25  ;;  %v8335_v25 = vld [vmem:[#allocation2 + $0x408] sm:$0xf]  ;;  %v7857_v11 = vld [vmem:[#allocation2 + $0x58] sm:$0xf0]  ;;  %v10406_v15 = vld [vmem:[#allocation2 + $0x38c] sm:$0xf] }
 0x218   : > { %2372 = vmatpush.bf16.msrb.mxu0 %v8160_v29  ;;  %v7905_v29 = vld [vmem:[#allocation2 + $0xb8] sm:$0xf0]  ;;  %v8336_v40 = vor.u32 %v10424_v27, %v8335_v25  ;;  %v10374_v17 = vld [vmem:[#allocation2 + $0x28c] sm:$0xf] }
 0x219   : > { %2386 = vmatpush.bf16.msrb.mxu1 %v8288_v35  ;;  %v10418_v35 = vld [vmem:[#allocation2 + $0x3ec] sm:$0xf]  ;;  %v8017_v13 = vld [vmem:[#allocation2 + $0x198] sm:$0xf0] }
 0x21a   : > { %2347 = vmatpush.bf16.msra.mxu2 %v7856_v36  ;;  %v8321_v36 = vld [vmem:[#allocation2 + $0x3f8] sm:$0xf0]  ;;  %v10402_v27 = vld [vmem:[#allocation2 + $0x36c] sm:$0xf] }
 0x21b   : > { %2361 = vmatpush.bf16.msra.mxu3 %v7984_v39  ;;  %v8080_v39 = vor.u32 %v10360_v24, %v8079_v23  ;;  %v8324_v45 = vor.u32 %v10418_v35, %v8321_v36  ;;  %v8145_v18 = vld [vmem:[#allocation2 + $0x298] sm:$0xf0]  ;;  %v10338_v24 = vld [vmem:[#allocation2 + $0x16c] sm:$0xf] }
 0x21c   : > { %2373 = vmatpush.bf16.msrb.mxu0 %v8144_v37  ;;  %v7908_v37 = vor.u32 %v10314_v28, %v7905_v29  ;;  %v7841_v23 = vld [vmem:[#allocation2 + $0x38] sm:$0xf0]  ;;  %v10370_v29 = vld [vmem:[#allocation2 + $0x26c] sm:$0xf] }
 0x21d   : > { %2387 = vmatpush.bf16.msrb.mxu1 %v8272_v47  ;;  %v10350_v47 = vld [vmem:[#allocation2 + $0x1cc] sm:$0xf]  ;;  %v8001_v25 = vld [vmem:[#allocation2 + $0x178] sm:$0xf0] }
 0x21e   : > { %2348 = vmatpush.bf16.msra.mxu2 %v7840_v49  ;;  %v8196_v49 = vor.u32 %v10386_v41, %v8193_v42  ;;  %v8052_v57 = vor.u32 %v10350_v47, %v8049_v48  ;;  %v8257_v28 = vld [vmem:[#allocation2 + $0x378] sm:$0xf0]  ;;  %v8004_v32 = vor.u32 %v10338_v24, %v8001_v25  ;;  %v10294_v33 = vld [vmem:[#allocation2 + $0xc] sm:$0xf] }
 0x21f   : > { %2362 = vmatpush.bf16.msra.mxu3 %v7968_v50  ;;  %v10414_v50 = vld [vmem:[#allocation2 + $0x3cc] sm:$0xf]  ;;  %v7825_v34 = vld [vmem:[#allocation2 + $0x18] sm:$0xf0]  ;;  %v8260_v35 = vor.u32 %v10402_v27, %v8257_v28 }
 0x220   : > { %2374 = vmatpush.bf16.msrb.mxu0 %v8128_v56  ;;  %v7892_v56 = vor.u32 %v10310_v38, %v7889_v46  ;;  %v8308_v60 = vor.u32 %v10414_v50, %v8305_v51  ;;  %v10334_v36 = vld [vmem:[#allocation2 + $0x14c] sm:$0xf]  ;;  %v8241_v42 = vld [vmem:[#allocation2 + $0x358] sm:$0xf0] }
 0x221   : > { %2388 = vmatpush.bf16.msrb.mxu1 %v8256_v2  ;;  %v8180_v2 = vor.u32 %v10382_v52, %v8177_v53  ;;  %v10366_v38 = vld [vmem:[#allocation2 + $0x24c] sm:$0xf]  ;;  %v7969_v50 = vld [vmem:[#allocation2 + $0x138] sm:$0xf0] }
 0x222   : > { %2349 = vmatpush.bf16.msra.mxu2 %v7824_v5  ;;  %v10378_v5 = vld [vmem:[#allocation2 + $0x2ac] sm:$0xf]  ;;  %v8225_v53 = vld [vmem:[#allocation2 + $0x338] sm:$0xf0] }
 0x223   : > { %2363 = vmatpush.bf16.msra.mxu3 %v7952_v6  ;;  %v8161_v6 = vld [vmem:[#allocation2 + $0x2b8] sm:$0xf0]  ;;  %v10394_v51 = vld [vmem:[#allocation2 + $0x32c] sm:$0xf] }
 0x224   : > { %2375 = vmatpush.bf16.msrb.mxu0 %v8112_v9  ;;  %v10302_v9 = vld [vmem:[#allocation2 + $0x4c] sm:$0xf]  ;;  %v8164_v14 = vor.u32 %v10378_v5, %v8161_v6  ;;  %v8228_v63 = vor.u32 %v10394_v51, %v8225_v53  ;;  %v8209_v6 = vld [vmem:[#allocation2 + $0x318] sm:$0xf0] }
 0x225   : > { %2389 = vmatpush.bf16.msrb.mxu1 %v8240_v16  ;;  %2350 = vmatmul.bf16.vlgmr.msra.gmra.mxu2 %v12727_v55  ;;  %v8273_v16 = vld [vmem:[#allocation2 + $0x398] sm:$0xf0]  ;;  %v7860_v19 = vor.u32 %v10302_v9, %v7857_v11  ;;  %v10362_v58 = vld [vmem:[#allocation2 + $0x22c] sm:$0xf] }
 0x226   : > { %2403 = vmatpush.bf16.msrb.mxu2 %v8368_v10  ;;  %2364 = vmatmul.bf16.vlgmr.msra.gmra.mxu3 %v12733_v0  ;;  %v8292_v10 = vor.u32 %v10410_v3, %v8289_v4  ;;  %v10326_v1 = vld [vmem:[#allocation2 + $0x10c] sm:$0xf] }
 0x227   : > { %2412 = vmatpush.bf16.msrb.mxu3 %v7940_v12  ;;  %v10342_v12 = vld [vmem:[#allocation2 + $0x18c] sm:$0xf] }
 0x228   : > { %2376 = vmatpush.bf16.msrb.mxu0 %v8096_v21  ;;  %v8020_v20 = vor.u32 %v10342_v12, %v8017_v13  ;;  %v10298_v21 = vld [vmem:[#allocation2 + $0x2c] sm:$0xf] }
 0x229   : > { %2390 = vmatpush.bf16.msrb.mxu1 %v8224_v30  ;;  %v8129_v30 = vld [vmem:[#allocation2 + $0x278] sm:$0xf0]  ;;  %v7844_v31 = vor.u32 %v10298_v21, %v7841_v23  ;;  %v10390_v3 = vld [vmem:[#allocation2 + $0x30c] sm:$0xf] }
 0x22a   : > { %2404 = vmatpush.bf16.msrb.mxu2 %v8352_v22  ;;  %v8276_v22 = vor.u32 %v10406_v15, %v8273_v16  ;;  %v8132_v41 = vor.u32 %v10370_v29, %v8129_v30  ;;  %v10358_v9 = vld [vmem:[#allocation2 + $0x20c] sm:$0xf]  ;;  %v8212_v12 = vor.u32 %v10390_v3, %v8209_v6 }
 0x22b   : > { %2413 = vmatpush.bf16.msrb.mxu3 %v7924_v26  ;;  %v8148_v26 = vor.u32 %v10374_v17, %v8145_v18 }
 0x22c   : > { %2377 = vmatpush.bf16.msrb.mxu0 %v8080_v39  ;;  %v7985_v39 = vld [vmem:[#allocation2 + $0x158] sm:$0xf0] }
 0x22d   : > { %2391 = vmatpush.bf16.msrb.mxu1 %v8208_v44  ;;  %v8113_v44 = vld [vmem:[#allocation2 + $0x258] sm:$0xf0]  ;;  %v7988_v46 = vor.u32 %v10334_v36, %v7985_v39 }
 0x22e   : > { %2405 = vmatpush.bf16.msrb.mxu2 %v8336_v40  ;;  %v10398_v40 = vld [vmem:[#allocation2 + $0x34c] sm:$0xf]  ;;  %v8116_v52 = vor.u32 %v10366_v38, %v8113_v44 }
 0x22f   : > { %2414 = vmatpush.bf16.msrb.mxu3 %v7908_v37  ;;  %2378 = vmatmul.bf16.vlgmr.msrb.gmra.mxu0 %v12729_v59  ;;  %v10430_v37 = vld [vmem:[#allocation2 + $0x44c] sm:$0xf]  ;;  %v8244_v47 = vor.u32 %v10398_v40, %v8241_v42 }
 0x230   : > { %2426 = vmatpush.bf16.msra.mxu0 %v8068_v43  ;;  %2392 = vmatmul.bf16.vlgmr.msrb.gmra.mxu1 %v12731_v62  ;;  %v8369_v43 = vld [vmem:[#allocation2 + $0x458] sm:$0xf0] }
 0x231   : > { %2440 = vmatpush.bf16.msra.mxu1 %v8196_v49  ;;  %v8372_v48 = vor.u32 %v10430_v37, %v8369_v43  ;;  %v10330_v49 = vld [vmem:[#allocation2 + $0x12c] sm:$0xf] }
 0x232   : > { %2454 = vmatpush.bf16.msra.mxu2 %v8324_v45  ;;  %v7828_v45 = vor.u32 %v10294_v33, %v7825_v34  ;;  %v7972_v61 = vor.u32 %v10330_v49, %v7969_v50 }
 0x233   : > { %2415 = vmatpush.bf16.msrb.mxu3 %v7892_v56  ;;  %v10426_v56 = vld [vmem:[#allocation2 + $0x42c] sm:$0xf] }
 0x234   : > { %2427 = vmatpush.bf16.msra.mxu0 %v8052_v57  ;;  %v8353_v57 = vld [vmem:[#allocation2 + $0x438] sm:$0xf0] }
 0x235   : > { %2441 = vmatpush.bf16.msra.mxu1 %v8180_v2  ;;  %8375 = vmatmul.msk.bf16.vlgmr.msrb.gmra.mxu2 %vm2198_vm1, %v12744_v54  ;;  %v7953_v2 = vld [vmem:[#allocation2 + $0x118] sm:$0xf0]  ;;  %v8356_v4 = vor.u32 %v10426_v56, %v8353_v57 }
 0x236   : > { %2455 = vmatpush.bf16.msra.mxu2 %v8308_v60  ;;  %v8097_v60 = vld [vmem:[#allocation2 + $0x238] sm:$0xf0]  ;;  %v7956_v11 = vor.u32 %v10326_v1, %v7953_v2 }
 0x237   : > { %2416 = vmatpush.bf16.msrb.mxu3 %v7876_v7  ;;  %v8100_v5 = vor.u32 %v10362_v58, %v8097_v60  ;;  %v10422_v7 = vld [vmem:[#allocation2 + $0x40c] sm:$0xf] }
 0x238   : > { %2428 = vmatpush.bf16.msra.mxu0 %v8036_v8  ;;  %v8337_v8 = vld [vmem:[#allocation2 + $0x418] sm:$0xf0] }
 0x239   : > { %2442 = vmatpush.bf16.msra.mxu1 %v8164_v14  ;;  %v8340_v13 = vor.u32 %v10422_v7, %v8337_v8 }
 0x23a   : > { %2456 = vmatpush.bf16.msra.mxu2 %v8292_v10  ;;  %v8081_v10 = vld [vmem:[#allocation2 + $0x218] sm:$0xf0] }
 0x23b   : > { %2417 = vmatpush.bf16.msrb.mxu3 %v7860_v19  ;;  %v8084_v14 = vor.u32 %v10358_v9, %v8081_v10 }
 0x23c   : > { %2429 = vmatpush.bf16.msra.mxu0 %v8020_v20 }
 0x23d   : > { %2443 = vmatpush.bf16.msra.mxu1 %v8148_v26 }
 0x23e   : > { %2457 = vmatpush.bf16.msra.mxu2 %v8276_v22 }
 0x23f   : > { %2418 = vmatpush.bf16.msrb.mxu3 %v7844_v31 }
 0x240   : > { %2430 = vmatpush.bf16.msra.mxu0 %v8004_v32 }
 0x241   : > { %2444 = vmatpush.bf16.msra.mxu1 %v8132_v41 }
 0x242   : > { %2458 = vmatpush.bf16.msra.mxu2 %v8260_v35 }
 0x243   : > { %2419 = vmatpush.bf16.msrb.mxu3 %v7828_v45 }
 0x244   : > { %2431 = vmatpush.bf16.msra.mxu0 %v7988_v46 }
 0x245   : > { %2445 = vmatpush.bf16.msra.mxu1 %v8116_v52 }
 0x246   : > { %2459 = vmatpush.bf16.msra.mxu2 %v8244_v47  ;;  %2420 = vmatmul.bf16.vlgmr.msrb.gmra.mxu3 %v12727_v55 }
 0x247   : > { %2473 = vmatpush.bf16.msra.mxu3 %v8372_v48  ;;  %v2482_v48 = vld [vmem:[#allocation5] sm:$0xff] }
 0x248   : > { %2432 = vmatpush.bf16.msra.mxu0 %v7972_v61  ;;  %v2486_v51 = vperm.slane %v2482_v48, 4  ;;  %v2484_v53 = vperm.slane %v2482_v48, 0  ;;  %v2506_v1 = vperm.slane %v2482_v48, 5  ;;  %v2504_v3 = vperm.slane %v2482_v48, 1 }
 0x249   : > { %2446 = vmatpush.bf16.msra.mxu1 %v8100_v5  ;;  %v2485_v9 = vperm.slane %v2482_v48, 2 }
 0x24a   : > { %2460 = vmatpush.bf16.msra.mxu2 %v8228_v63  ;;  %v2494_v63 = vperm.slane %v2486_v51, 0  ;;  %v2492_v2 = vperm.slane %v2484_v53, 0 }
 0x24b   : > { %2474 = vmatpush.bf16.msra.mxu3 %v8356_v4 }
 0x24c   : > { %2433 = vmatpush.bf16.msra.mxu0 %v7956_v11 }
 0x24d   : > { %2447 = vmatpush.bf16.msra.mxu1 %v8084_v14 }
 0x24e   : > { %2461 = vmatpush.bf16.msra.mxu2 %v8212_v12 }
 0x24f   : > { %2475 = vmatpush.bf16.msra.mxu3 %v8340_v13  ;;  %2434 = vmatmul.bf16.vlgmr.msra.gmra.mxu0 %v12733_v0  ;;  %v2514_v13 = vperm.slane %v2506_v1, 1 }
 0x250   : > { %2448 = vmatmul.bf16.vlgmr.msra.gmra.mxu1 %v12729_v59 }
 0x251   : > { %2462 = vmatmul.bf16.vlgmr.msra.gmra.mxu2 %v12731_v62 }
 0x256   : > { %8376 = vmatmul.msk.bf16.vlgmr.msra.gmra.mxu3 %vm2198_vm1, %v12744_v54 }
 0x261   : > { %v2225_v15 = vpop.f32.mrf.mxu1 }
 0x263   : > { %v2211_v55 = vpop.f32.mrf.mxu0 }
 0x264   : > { %v2226_v16 = vadd.f32 %v2225_v15, %v2211_v55  ;;  %v2487_v15 = vperm.slane %v2482_v48, 6 }
 0x269   : > { %v2227_v24 = vpop.f32.mrf.mxu1 }
 0x26a   : > { %v2239_v17 = vpop.f32.mrf.mxu2 }
 0x26b   : > { %v2213_v18 = vpop.f32.mrf.mxu0  ;;  %v2240_v19 = vadd.f32 %v2239_v17, %v2226_v16  ;;  %v2253_v20 = vpop.f32.mrf.mxu3  ;;  %v2512_v17 = vperm.slane %v2504_v3, 1  ;;  %v10487_v3 = vld [vmem:[%s13371_s4 + $0x1ac] sm:$0xf0] }
 0x26c   : > { %v2228_v47 = vadd.f32 %v2227_v24, %v2213_v18  ;;  %v2507_v24 = vperm.slane %v2482_v48, 7 }
 0x26d   : > { %v2254_v21 = vadd.f32 %v2253_v20, %v2240_v19  ;;  %v2505_v19 = vperm.slane %v2482_v48, 3  ;;  %v8493_v48 = vld [vmem:[%s13371_s4 + $0xf0] sm:$0xf0] }
 0x272   : > { %v2241_v25 = vpop.f32.mrf.mxu2 }
 0x273   : > { %v2267_v22 = vpop.f32.mrf.mxu0  ;;  %v2255_v62 = vpop.f32.mrf.mxu3  ;;  %v2242_v58 = vadd.f32 %v2241_v25, %v2228_v47 }
 0x274   : > { %v2268_v23 = vadd.f32 %v2267_v22, %v2254_v21  ;;  %v2493_v21 = vperm.slane %v2485_v9, 0  ;;  %v10463_v9 = vld [vmem:[%s13371_s4 + $0xec] sm:$0xf0] }
 0x275   : > { %v2256_v7 = vadd.f32 %v2255_v62, %v2242_v58 }
 0x276   : > { %v2496_v16 = vmul.f32 %v2492_v2, %v2268_v23 }
 0x27b   : > { %v2269_v27 = vpop.f32.mrf.mxu0 }
 0x27c   : > { %v2270_v18 = vadd.f32 %v2269_v27, %v2256_v7  ;;  %v8461_v7 = vld [vmem:[%s13371_s4 + $0xb0] sm:$0xf0] }
 0x281   : > { %v2281_v0 = vpop.f32.mrf.mxu1 }
 0x288   : > { %v2295_v26 = vpop.f32.mrf.mxu2 }
 0x289   : > { %v2283_v59 = vpop.f32.mrf.mxu1  ;;  %v2309_v28 = vpop.f32.mrf.mxu3  ;;  %v2296_v49 = vadd.f32 %v2295_v26, %v2281_v0 }
 0x28b   : > { %v2310_v60 = vadd.f32 %v2309_v28, %v2296_v49  ;;  %v8603_v49 = vld [vmem:[%s13371_s4 + $0x1c0] sm:$0xf] }
 0x28c   : > { %v2323_v54 = vpop.f32.mrf.mxu0 }
 0x28d   : > { %v2324_v8 = vadd.f32 %v2323_v54, %v2310_v60  ;;  %v2500_v54 = vmul.f32 %v2492_v2, %v2270_v18  ;;  %v8587_v2 = vld [vmem:[%s13371_s4 + $0x1a0] sm:$0xf]  ;;  %v10483_v18 = vld [vmem:[%s13371_s4 + $0x18c] sm:$0xf0] }
 0x290   : > { %v2297_v29 = vpop.f32.mrf.mxu2 }
 0x291   : > { %v2337_v30 = vpop.f32.mrf.mxu1  ;;  %v2311_v32 = vpop.f32.mrf.mxu3  ;;  %v2298_v11 = vadd.f32 %v2297_v29, %v2283_v59  ;;  %v2495_v59 = vperm.slane %v2487_v15, 0  ;;  %v2516_v29 = vadd.f32 %v2512_v17, %v2496_v16  ;;  %v8588_v16 = vor.u32 %v10487_v3, %v8587_v2  ;;  %v8589_v3 = vld [vmem:[%s13371_s4 + $0x1b0] sm:$0xf0] }
 0x292   : > { %v2338_v20 = vadd.f32 %v2337_v30, %v2324_v8  ;;  %v8491_v8 = vld [vmem:[%s13371_s4 + $0xe0] sm:$0xf] }
 0x293   : > { %v2312_v25 = vadd.f32 %v2311_v32, %v2298_v11  ;;  %v12772_v32 = vperm.slane %v2507_v24, 1  ;;  %v8445_v24 = vld [vmem:[%s13371_s4 + $0x90] sm:$0xf0] }
 0x294   : > { %v12766_v33 = vpop.f32.mrf.mxu0  ;;  %v2497_v27 = vmul.f32 %v2493_v21, %v2338_v20 }
 0x299   : > { %v12768_v34 = vpop.f32.mrf.mxu1 }
 0x2a8   : > { %v2351_v31 = vpop.f32.mrf.mxu2 }
 0x2a9   : > { %v2365_v35 = vpop.f32.mrf.mxu3 }
 0x2aa   : > { %v2366_v37 = vadd.f32 %v2365_v35, %v2351_v31  ;;  %v12770_v31 = vperm.slane %v2505_v19, 1 }
 0x2ac   : > { %v2379_v39 = vpop.f32.mrf.mxu0 }
 0x2ad   : > { %v2393_v40 = vpop.f32.mrf.mxu1  ;;  %v2380_v38 = vadd.f32 %v2379_v39, %v2366_v37  ;;  %v8619_v37 = vld [vmem:[%s13370_s15 + $0x1e0] sm:$0xf]  ;;  %s11978_s15 = scalar_lea.hbm %s11977_s9, 1 }
 0x2ae   : > { %p11979_p10 = scmp.ne.s32.totalorder %s11977_s9, %s11978_s15 }
 0x2af   : > { %v2394_v50 = vadd.f32 %v2393_v40, %v2380_v38  ;;  %v10461_v38 = vld [vmem:[%s13371_s4 + $0xe4] sm:$0xf] }
 0x2b0   : > { %v2353_v36 = vpop.f32.mrf.mxu2  ;;  %v8496_v53 = vor.u32 %v10461_v38, %v8493_v48  ;;  %v8459_v38 = vld [vmem:[%s13371_s4 + $0xa0] sm:$0xf]  ;;  %p11980_p3 = pnand %p11979_p10, %p12343_p5 }
 0x2b1   : > { %v2367_v41 = vpop.f32.mrf.mxu3 }
 0x2b2   : > { %v2368_v44 = vadd.f32 %v2367_v41, %v2353_v36  ;;  %v2326_v36 = vadd.f32 %v12766_v33, %v2312_v25  ;;  %v2517_v33 = vadd.f32 %v12770_v31, %v2497_v27  ;;  %3085 = vmatpush.bf16.msrb.mxu3 %v8496_v53  ;;  %v8475_v25 = vld [vmem:[%s13371_s4 + $0xc0] sm:$0xf]  ;;  %v10493_v27 = vld [vmem:[%s13371_s4 + $0x1e4] sm:$0xf]  ;;  %p11981_p4 = pneg %p11980_p3 }
 0x2b3   : > { %v8443_v53 = vld [vmem:[%s13371_s4 + $0x80] sm:$0xf] }
 0x2b4   : > { %v2381_v43 = vpop.f32.mrf.mxu0 }
 0x2b5   : > { %v2395_v45 = vpop.f32.mrf.mxu1  ;;  %v2382_v56 = vadd.f32 %v2381_v43, %v2368_v44  ;;  %v10495_v43 = vld [vmem:[%s13371_s4 + $0x1ec] sm:$0xf0]  ;;  %v2520_v44 = vadd.f32 %v2512_v17, %v2500_v54  ;;  %v8571_v17 = vld [vmem:[%s13371_s4 + $0x180] sm:$0xf] }
 0x2b6   : > { %v8620_v47 = vor.u32 %v10495_v43, %v8619_v37  ;;  %v10445_v37 = vld [vmem:[%s13371_s4 + $0x64] sm:$0xf]  ;;  %v8429_v43 = vld [vmem:[%s13371_s4 + $0x70] sm:$0xf0] }
 0x2b7   : > { %v2396_v4 = vadd.f32 %v2395_v45, %v2382_v56  ;;  %v2340_v45 = vadd.f32 %v12768_v34, %v2326_v36  ;;  %v10457_v56 = vld [vmem:[%s13371_s4 + $0xc4] sm:$0xf]  ;;  %v8572_v36 = vor.u32 %v10483_v18, %v8571_v17  ;;  %v10471_v17 = vld [vmem:[%s13371_s4 + $0x12c] sm:$0xf0] }
 0x2b8   : > { %v2407_v42 = vpop.f32.mrf.mxu2  ;;  %3057 = vmatpush.bf16.msrb.mxu1 %v8620_v47 }
 0x2b9   : > { %v2408_v61 = vadd.f32 %v2407_v42, %v2394_v50  ;;  %v10491_v50 = vld [vmem:[%s13371_s4 + $0x1cc] sm:$0xf0] }
 0x2ba   : > { %v8604_v60 = vor.u32 %v10491_v50, %v8603_v49 }
 0x2bb   : > { %v2498_v12 = vmul.f32 %v2494_v63, %v2408_v61 }
 0x2bc   : > { %3058 = vmatpush.bf16.msrb.mxu1 %v8604_v60  ;;  %v10485_v60 = vld [vmem:[%s13371_s4 + $0x1a4] sm:$0xf] }
 0x2bd   : > { %v2518_v0 = vadd.f32 %v2514_v13, %v2498_v12  ;;  %v8492_v12 = vor.u32 %v10463_v9, %v8491_v8 }
 0x2bf   : > { %v2524_v39 = vmax.f32 %v2516_v29, %v2518_v0  ;;  %3043 = vmatpush.bf16.msrb.mxu0 %v8492_v12  ;;  %v8427_v12 = vld [vmem:[%s13371_s4 + $0x60] sm:$0xf] }
 0x2c0   : > { %v2409_v52 = vpop.f32.mrf.mxu2  ;;  %3059 = vmatpush.bf16.msrb.mxu1 %v8588_v16  ;;  %v8523_v16 = vld [vmem:[%s13371_s4 + $0x120] sm:$0xf] }
 0x2c1   : > { %v2410_v14 = vadd.f32 %v2409_v52, %v2396_v4  ;;  %v12786_v34 = vmax.f32 %v2524_v39, 0.0  ;;  %v10453_v4 = vld [vmem:[%s13371_s4 + $0xa4] sm:$0xf]  ;;  %v8555_v39 = vld [vmem:[%s13371_s4 + $0x160] sm:$0xf] }
 0x2c3   : > { %v2502_v26 = vmul.f32 %v2494_v63, %v2410_v14  ;;  %v10503_v14 = vld [vmem:[%s13371_s4 + $0x22c] sm:$0xf0] }
 0x2c4   : > { %3060 = vmatpush.bf16.msrb.mxu1 %v8572_v36  ;;  %v8499_v36 = vld [vmem:[%s13371_s4 + $0xe8] sm:$0xf] }
 0x2c5   : > { %v2522_v40 = vadd.f32 %v2514_v13, %v2502_v26  ;;  %v8651_v13 = vld [vmem:[%s13371_s4 + $0x220] sm:$0xf]  ;;  %v10459_v26 = vld [vmem:[%s13371_s4 + $0xcc] sm:$0xf0] }
 0x2c6   : > { %v8652_v19 = vor.u32 %v10503_v14, %v8651_v13  ;;  %v8476_v54 = vor.u32 %v10459_v26, %v8475_v25  ;;  %v10447_v13 = vld [vmem:[%s13371_s4 + $0x6c] sm:$0xf0] }
 0x2c7   : > { %v2526_v58 = vmax.f32 %v2520_v44, %v2522_v40  ;;  %v10455_v44 = vld [vmem:[%s13371_s4 + $0xac] sm:$0xf0] }
 0x2c8   : > { %3077 = vmatpush.bf16.msrb.mxu2 %v8652_v19  ;;  %3044 = vmatpush.bf16.msrb.mxu0 %v8476_v54  ;;  %v8460_v49 = vor.u32 %v10455_v44, %v8459_v38 }
 0x2c9   : > { %v2421_v46 = vpop.f32.mrf.mxu3  ;;  %v2530_v15 = vmax.f32 %v2526_v58, 0.0  ;;  %v10451_v58 = vld [vmem:[%s13371_s4 + $0x8c] sm:$0xf0] }
 0x2ca   : > { %v8444_v2 = vor.u32 %v10451_v58, %v8443_v53  ;;  %v8611_v53 = vld [vmem:[%s13371_s4 + $0x1c8] sm:$0xf]  ;;  %v10477_v58 = vld [vmem:[%s13371_s4 + $0x164] sm:$0xf] }
 0x2cc   : > { %v2435_v57 = vpop.f32.mrf.mxu0  ;;  %3045 = vmatpush.bf16.msrb.mxu0 %v8460_v49  ;;  %v8411_v49 = vld [vmem:[%s13371_s4 + $0x40] sm:$0xf] }
 0x2cd   : > { %v2449_v5 = vpop.f32.mrf.mxu1  ;;  %v2436_v10 = vadd.f32 %v2435_v57, %v2421_v46  ;;  %v8477_v57 = vld [vmem:[%s13371_s4 + $0xd0] sm:$0xf0] }
 0x2ce   : > { %v8480_v1 = vor.u32 %v10457_v56, %v8477_v57 }
 0x2cf   : > { %v2450_v22 = vadd.f32 %v2449_v5, %v2436_v10  ;;  %v2501_v5 = vmul.f32 %v2493_v21, %v2340_v45  ;;  %v8464_v21 = vor.u32 %v10453_v4, %v8461_v7  ;;  %v10489_v45 = vld [vmem:[%s13371_s4 + $0x1c4] sm:$0xf]  ;;  %v8592_v7 = vor.u32 %v10485_v60, %v8589_v3  ;;  %v8557_v60 = vld [vmem:[%s13371_s4 + $0x170] sm:$0xf0] }
 0x2d0   : > { %3086 = vmatpush.bf16.msrb.mxu3 %v8480_v1  ;;  %v8413_v1 = vld [vmem:[%s13371_s4 + $0x50] sm:$0xf0]  ;;  %3046 = vmatpush.bf16.msrb.mxu0 %v8444_v2  ;;  %v8467_v2 = vld [vmem:[%s13371_s4 + $0xa8] sm:$0xf] }
 0x2d1   : > { %v2423_v6 = vpop.f32.mrf.mxu3  ;;  %v2521_v0 = vadd.f32 %v12770_v31, %v2501_v5  ;;  %v2539_v31 = vrot.slane %v2530_v15, 7 }
 0x2d3   : > { %v12828_v57 = vsel %vm2536_vm2, %v2539_v31, 0.0 }
 0x2d4   : > { %v2463_v55 = vpop.f32.mrf.mxu2  ;;  %v2437_v62 = vpop.f32.mrf.mxu0  ;;  %3087 = vmatpush.bf16.msrb.mxu3 %v8464_v21  ;;  %v8397_v21 = vld [vmem:[%s13371_s4 + $0x30] sm:$0xf0]  ;;  %v2592_v26 = vrot.slane %v12828_v57, 2 }
 0x2d5   : > { %v2464_v28 = vadd.f32 %v2463_v55, %v2450_v22  ;;  %v2438_v30 = vadd.f32 %v2437_v62, %v2423_v6  ;;  %v2451_v41 = vpop.f32.mrf.mxu1  ;;  %v2537_v55 = vrot.slane %v12786_v34, 7  ;;  %v10449_v22 = vld [vmem:[%s13371_s4 + $0x84] sm:$0xf]  ;;  %v8635_v62 = vld [vmem:[%s13371_s4 + $0x200] sm:$0xf]  ;;  %v8432_v34 = vor.u32 %v10445_v37, %v8429_v43 }
 0x2d7   : > { %v2452_v51 = vadd.f32 %v2451_v41, %v2438_v30  ;;  %v8621_v30 = vld [vmem:[%s13371_s4 + $0x1f0] sm:$0xf0] }
 0x2d8   : > { %v8624_v40 = vor.u32 %v10493_v27, %v8621_v30  ;;  %v10467_v27 = vld [vmem:[%s13371_s4 + $0x10c] sm:$0xf0]  ;;  %v10433_v30 = vld [vmem:[%s13371_s4 + $0x4] sm:$0xf] }
 0x2d9   : > { %v2477_v23 = vpop.f32.mrf.mxu3 }
 0x2da   : > { %v2478_v35 = vadd.f32 %v2477_v23, %v2464_v28  ;;  %v10499_v28 = vld [vmem:[%s13371_s4 + $0x20c] sm:$0xf0] }
 0x2db   : > { %v8636_v23 = vor.u32 %v10499_v28, %v8635_v62  ;;  %v8524_v62 = vor.u32 %v10471_v17, %v8523_v16  ;;  %v8579_v16 = vld [vmem:[%s13371_s4 + $0x188] sm:$0xf]  ;;  %v10484_v17 = vld [vmem:[%s13371_s4 + $0x194] sm:$0xf0] }
 0x2dc   : > { %v2499_v42 = vmul.f32 %v2495_v59, %v2478_v35  ;;  %v2465_v46 = vpop.f32.mrf.mxu2  ;;  %v12813_v35 = vsel %vm2536_vm2, 0.0, %v2537_v55 }
 0x2dd   : > { %v2466_v61 = vadd.f32 %v2465_v46, %v2452_v51  ;;  %3078 = vmatpush.bf16.msrb.mxu2 %v8636_v23  ;;  %v8605_v46 = vld [vmem:[%s13371_s4 + $0x1d0] sm:$0xf0]  ;;  %v8539_v51 = vld [vmem:[%s13371_s4 + $0x140] sm:$0xf]  ;;  %v2561_v25 = vrot.slane %v12813_v35, 1 }
 0x2de   : > { %v2519_v52 = vadd.f32 %v12772_v32, %v2499_v42  ;;  %v8448_v42 = vor.u32 %v10449_v22, %v8445_v24  ;;  %v8608_v50 = vor.u32 %v10489_v45, %v8605_v46  ;;  %v8428_v22 = vor.u32 %v10447_v13, %v8427_v12  ;;  %v8507_v23 = vld [vmem:[%s13371_s4 + $0x100] sm:$0xf]  ;;  %v10481_v46 = vld [vmem:[%s13371_s4 + $0x184] sm:$0xf]  ;;  %v10435_v13 = vld [vmem:[%s13371_s4 + $0xc] sm:$0xf0] }
 0x2df   : > { %v8379_v12 = vld [vmem:[%s13371_s4] sm:$0xf] }
 0x2e0   : > { %v2525_v63 = vmax.f32 %v2517_v33, %v2519_v52  ;;  %v10475_v52 = vld [vmem:[%s13371_s4 + $0x14c] sm:$0xf0]  ;;  %3088 = vmatpush.bf16.msrb.mxu3 %v8448_v42  ;;  %3047 = vmatpush.bf16.msrb.mxu0 %v8428_v22 }
 0x2e1   : > { %v2479_v6 = vpop.f32.mrf.mxu3  ;;  %3099 = vmatpush.bf16.msra.mxu2 %v8624_v40  ;;  %v10496_v40 = vld [vmem:[%s13371_s4 + $0x1f4] sm:$0xf0] }
 0x2e2   : > { %v2480_v10 = vadd.f32 %v2479_v6, %v2466_v61  ;;  %v12794_v11 = vmax.f32 %v2525_v63, 0.0  ;;  %v2540_v61 = vsel %vm2536_vm2, %v2537_v55, %v2539_v31  ;;  %v10441_v63 = vld [vmem:[%s13371_s4 + $0x44] sm:$0xf]  ;;  %v2567_v55 = vrot.slane %v12828_v57, 1  ;;  %v8381_v31 = vld [vmem:[%s13371_s4 + $0x10] sm:$0xf0] }
 0x2e3   : > { %v2562_v14 = vrot.slane %v2540_v61, 1  ;;  %v8416_v15 = vor.u32 %v10441_v63, %v8413_v1  ;;  %v8384_v43 = vor.u32 %v10433_v30, %v8381_v31  ;;  %v8395_v63 = vld [vmem:[%s13371_s4 + $0x20] sm:$0xf]  ;;  %v10439_v1 = vld [vmem:[%s13371_s4 + $0x2c] sm:$0xf0] }
 0x2e4   : > { %v2503_v20 = vmul.f32 %v2495_v59, %v2480_v10  ;;  %v2538_v59 = vrot.slane %v12794_v11, 7  ;;  %v8540_v11 = vor.u32 %v10475_v52, %v8539_v51  ;;  %3089 = vmatpush.bf16.msrb.mxu3 %v8432_v34  ;;  %v10460_v52 = vld [vmem:[%s13371_s4 + $0xd4] sm:$0xf0]  ;;  %v8396_v3 = vor.u32 %v10439_v1, %v8395_v63  ;;  %v8419_v31 = vld [vmem:[%s13371_s4 + $0x48] sm:$0xf] }
 0x2e5   : > { %3100 = vmatpush.bf16.msra.mxu2 %v8608_v50  ;;  %v2563_v28 = vsel %vm1345_vm0, %v2561_v25, %v2562_v14  ;;  %v10443_v50 = vld [vmem:[%s13371_s4 + $0x4c] sm:$0xf0]  ;;  %v10448_v25 = vld [vmem:[%s13371_s4 + $0x74] sm:$0xf0] }
 0x2e6   : > { %v2523_v29 = vadd.f32 %v12772_v32, %v2503_v20  ;;  %v10479_v32 = vld [vmem:[%s13371_s4 + $0x16c] sm:$0xf0]  ;;  %v2548_v48 = vsel %vm2536_vm2, 0.0, %v2538_v59  ;;  %v10437_v20 = vld [vmem:[%s13371_s4 + $0x24] sm:$0xf]  ;;  %v8412_v51 = vor.u32 %v10443_v50, %v8411_v49 }
 0x2e7   : > { %v8556_v33 = vor.u32 %v10479_v32, %v8555_v39  ;;  %v2564_v5 = vrot.slane %v2548_v48, 1  ;;  %v8400_v54 = vor.u32 %v10437_v20, %v8397_v21  ;;  %v10464_v39 = vld [vmem:[%s13371_s4 + $0xf4] sm:$0xf0]  ;;  %v8627_v32 = vld [vmem:[%s13371_s4 + $0x1e8] sm:$0xf] }
 0x2e8   : > { %v2527_v41 = vmax.f32 %v2521_v0, %v2523_v29  ;;  %v2590_v0 = vrot.slane %v2540_v61, 2  ;;  %v2568_v29 = vsel %vm1345_vm0, %v2562_v14, %v2567_v55  ;;  %3090 = vmatpush.bf16.msrb.mxu3 %v8416_v15  ;;  %v8500_v38 = vor.u32 %v10464_v39, %v8499_v36  ;;  %3048 = vmatpush.bf16.msrb.mxu0 %v8412_v51  ;;  %v8451_v14 = vld [vmem:[%s13371_s4 + $0x88] sm:$0xf]  ;;  %v10452_v15 = vld [vmem:[%s13371_s4 + $0x94] sm:$0xf0] }
 0x2e9   : > { %3061 = vmatpush.bf16.msrb.mxu1 %v8556_v33  ;;  %3101 = vmatpush.bf16.msra.mxu2 %v8592_v7  ;;  %v8628_v44 = vor.u32 %v10496_v40, %v8627_v32  ;;  %v8483_v33 = vld [vmem:[%s13371_s4 + $0xc8] sm:$0xf]  ;;  %v8560_v61 = vor.u32 %v10477_v58, %v8557_v60  ;;  %v8380_v55 = vor.u32 %v10435_v13, %v8379_v12  ;;  %v10469_v20 = vld [vmem:[%s13371_s4 + $0x124] sm:$0xf]  ;;  %v8525_v21 = vld [vmem:[%s13371_s4 + $0x130] sm:$0xf0] }
 0x2ea   : > { %v2531_v47 = vmax.f32 %v2527_v41, 0.0  ;;  %v11167_v41 = vpack.i.bf16 %v2568_v29, %v2563_v28  ;;  %v2593_v37 = vsel %vm2588_vm3, %v2590_v0, %v2592_v26  ;;  %v8484_v57 = vor.u32 %v10460_v52, %v8483_v33  ;;  %v10501_v28 = vld [vmem:[%s13371_s4 + $0x224] sm:$0xf]  ;;  %v8653_v29 = vld [vmem:[%s13371_s4 + $0x230] sm:$0xf0] }
 0x2eb   : > { %v8528_v22 = vor.u32 %v10469_v20, %v8525_v21  ;;  %v10444_v36 = vld [vmem:[%s13371_s4 + $0x54] sm:$0xf0]  ;;  %v8547_v32 = vld [vmem:[%s13371_s4 + $0x148] sm:$0xf]  ;;  %v10502_v58 = vld [vmem:[%s13371_s4 + $0x22c] sm:$0xf] }
 0x2ec   : > { %v2541_v56 = vrot.slane %v2531_v47, 7  ;;  %3091 = vmatpush.bf16.msrb.mxu3 %v8400_v54  ;;  %v8573_v47 = vld [vmem:[%s13371_s4 + $0x190] sm:$0xf0]  ;;  %3049 = vmatpush.bf16.msrb.mxu0 %v8396_v3  ;;  %v8656_v54 = vor.u32 %v10501_v28, %v8653_v29  ;;  %v8420_v39 = vor.u32 %v10444_v36, %v8419_v31  ;;  %v10476_v40 = vld [vmem:[%s13371_s4 + $0x154] sm:$0xf0] }
 0x2ed   : > { %3062 = vmatpush.bf16.msrb.mxu1 %v8540_v11  ;;  %v10436_v49 = vld [vmem:[%s13371_s4 + $0x14] sm:$0xf0]  ;;  %v8515_v50 = vld [vmem:[%s13371_s4 + $0x108] sm:$0xf]  ;;  %v8661_v60 = vld [vmem:[%s13371_s4 + $0x238] sm:$0xf0] }
 0x2ee   : > { %v2542_v4 = vsel %vm2536_vm2, %v2538_v59, %v2541_v56  ;;  %v2550_v6 = vsel %vm2536_vm2, %v2541_v56, 0.0  ;;  %v2589_v59 = vrot.slane %v12813_v35, 2  ;;  %v8508_v35 = vor.u32 %v10467_v27, %v8507_v23  ;;  %v10492_v56 = vld [vmem:[%s13371_s4 + $0x1d4] sm:$0xf0]  ;;  %v10465_v23 = vld [vmem:[%s13371_s4 + $0x104] sm:$0xf] }
 0x2ef   : > { %v11162_v8 = vpack.i.bf16 %v2542_v4, %v2548_v48  ;;  %v2565_v9 = vrot.slane %v2542_v4, 1  ;;  %v2569_v10 = vrot.slane %v2550_v6, 1  ;;  %v8576_v48 = vor.u32 %v10481_v46, %v8573_v47  ;;  %v10456_v4 = vld [vmem:[%s13371_s4 + $0xb4] sm:$0xf0]  ;;  %v8509_v27 = vld [vmem:[%s13371_s4 + $0x110] sm:$0xf0] }
 0x2f0   : > { %v2591_v42 = vsel %vm2588_vm3, %v2589_v59, %v2590_v0  ;;  %3092 = vmatpush.bf16.msrb.mxu3 %v8384_v43  ;;  %v8612_v34 = vor.u32 %v10492_v56, %v8611_v53  ;;  %v10488_v6 = vld [vmem:[%s13371_s4 + $0x1b4] sm:$0xf0]  ;;  %v8468_v7 = vor.u32 %v10456_v4, %v8467_v2  ;;  %3050 = vmatpush.bf16.msrb.mxu0 %v8380_v55  ;;  %v8563_v0 = vld [vmem:[%s13371_s4 + $0x168] sm:$0xf]  ;;  %v10462_v13 = vld [vmem:[%s13371_s4 + $0xec] sm:$0xf] }
 0x2f1   : > { %11163 = vrot.lane.b32.xlu0 %v11162_v8, %s12141_s18  ;;  %v2566_v18 = vsel %vm1345_vm0, %v2564_v5, %v2565_v9  ;;  %v2570_v19 = vsel %vm1345_vm0, %v2565_v9, %v2569_v10  ;;  %3063 = vmatpush.bf16.msrb.mxu1 %v8524_v62  ;;  %v11177_v45 = vpack.i.bf16 %v2593_v37, %v2591_v42  ;;  %v8595_v5 = vld [vmem:[%s13371_s4 + $0x1a8] sm:$0xf]  ;;  %v10473_v9 = vld [vmem:[%s13371_s4 + $0x144] sm:$0xf]  ;;  %v8541_v10 = vld [vmem:[%s13371_s4 + $0x150] sm:$0xf0] }
 0x2f2   : > { %v11172_v24 = vpack.i.bf16 %v2570_v19, %v2566_v18  ;;  %3102 = vmatpush.bf16.msra.mxu2 %v8576_v48  ;;  %v8596_v8 = vor.u32 %v10488_v6, %v8595_v5  ;;  %v8544_v11 = vor.u32 %v10473_v9, %v8541_v10  ;;  %v8452_v18 = vor.u32 %v10452_v15, %v8451_v14  ;;  %v10480_v62 = vld [vmem:[%s13371_s4 + $0x174] sm:$0xf0]  ;;  %v8637_v37 = vld [vmem:[%s13371_s4 + $0x210] sm:$0xf0]  ;;  %v8403_v43 = vld [vmem:[%s13371_s4 + $0x28] sm:$0xf] }
 0x2f3   : > { %v8580_v19 = vor.u32 %v10484_v17, %v8579_v16  ;;  %v8564_v59 = vor.u32 %v10480_v62, %v8563_v0  ;;  %v8512_v30 = vor.u32 %v10465_v23, %v8509_v27  ;;  %v8548_v42 = vor.u32 %v10476_v40, %v8547_v32  ;;  %v10472_v46 = vld [vmem:[%s13371_s4 + $0x134] sm:$0xf0]  ;;  %v8387_v48 = vld [vmem:[%s13371_s4 + $0x8] sm:$0xf]  ;;  %v8501_v14 = vld [vmem:[%s13371_s4 + $0xf8] sm:$0xf0] }
 0x2f4   : > { %11173 = vrot.lane.b32.xlu1 %v11172_v24, %s12141_s18  ;;  %3141 = vmatpush.bf16.msra.mxu3 %v8628_v44  ;;  %v8435_v24 = vld [vmem:[%s13371_s4 + $0x68] sm:$0xf]  ;;  %v8388_v33 = vor.u32 %v10436_v49, %v8387_v48  ;;  %v10468_v51 = vld [vmem:[%s13371_s4 + $0x114] sm:$0xf0]  ;;  %v10498_v20 = vld [vmem:[%s13371_s4 + $0x20c] sm:$0xf] }
 0x2f5   : > { %3064 = vmatpush.bf16.msrb.mxu1 %v8508_v35  ;;  %v8436_v26 = vor.u32 %v10448_v25, %v8435_v24  ;;  %3119 = vmatpush.bf16.msra.mxu0 %v8656_v54  ;;  %v8531_v44 = vld [vmem:[%s13371_s4 + $0x128] sm:$0xf]  ;;  %v8516_v52 = vor.u32 %v10468_v51, %v8515_v50  ;;  %v8645_v21 = vld [vmem:[%s13371_s4 + $0x218] sm:$0xf0]  ;;  %v8504_v25 = vor.u32 %v10462_v13, %v8501_v14  ;;  %v10454_v54 = vld [vmem:[%s13371_s4 + $0xac] sm:$0xf] }
 0x2f6   : > { %3103 = vmatpush.bf16.msra.mxu2 %v8560_v61  ;;  %v8532_v47 = vor.u32 %v10472_v46, %v8531_v44  ;;  %v8485_v62 = vld [vmem:[%s13371_s4 + $0xd8] sm:$0xf0]  ;;  %v8648_v29 = vor.u32 %v10498_v20, %v8645_v21  ;;  %v10494_v36 = vld [vmem:[%s13371_s4 + $0x1ec] sm:$0xf] }
 0x2f7   : > { %v8469_v23 = vld [vmem:[%s13371_s4 + $0xb8] sm:$0xf0]  ;;  %v10442_v44 = vld [vmem:[%s13371_s4 + $0x4c] sm:$0xf] }
 0x2f8   : > { %3142 = vmatpush.bf16.msra.mxu3 %v8612_v34  ;;  %v10504_v34 = vld [vmem:[%s13371_s4 + $0x234] sm:$0xf0]  ;;  %v8472_v27 = vor.u32 %v10454_v54, %v8469_v23  ;;  %v8453_v31 = vld [vmem:[%s13371_s4 + $0x98] sm:$0xf0]  ;;  %v10486_v46 = vld [vmem:[%s13371_s4 + $0x1ac] sm:$0xf] }
 0x2f9   : > { %11168 = vrot.lane.b32.xlu0 %v11167_v41, %s12141_s18  ;;  %3127 = vmatpush.bf16.msra.mxu1 %v8500_v38  ;;  %v10497_v41 = vld [vmem:[%s13371_s4 + $0x204] sm:$0xf]  ;;  %v10440_v38 = vld [vmem:[%s13371_s4 + $0x34] sm:$0xf0]  ;;  %v10438_v50 = vld [vmem:[%s13371_s4 + $0x2c] sm:$0xf] }
 0x2fa   : > { %3104 = vmatpush.bf16.msra.mxu2 %v8544_v11  ;;  %v8640_v35 = vor.u32 %v10497_v41, %v8637_v37  ;;  %v10446_v41 = vld [vmem:[%s13371_s4 + $0x6c] sm:$0xf] }
 0x2fb   : > { %v10490_v37 = vld [vmem:[%s13371_s4 + $0x1cc] sm:$0xf] }
 0x2fc   : > { %11178 = vrot.lane.b32.xlu1 %v11177_v45, %s12141_s18  ;;  %3143 = vmatpush.bf16.msra.mxu3 %v8596_v8  ;;  %v8404_v45 = vor.u32 %v10440_v38, %v8403_v43  ;;  %v10482_v51 = vld [vmem:[%s13371_s4 + $0x18c] sm:$0xf]  ;;  %s11982_s18 = scalar_lea.hbm %s12303_s17, 2 }
 0x2fd   : > { %3128 = vmatpush.bf16.msra.mxu1 %v8484_v57  ;;  %3120 = vmatpush.bf16.msra.mxu0 %v8640_v35  ;;  %v8659_v57 = vld [vmem:[%s13371_s4 + $0x228] sm:$0xf]  ;;  %v8613_v35 = vld [vmem:[%s13371_s4 + $0x1d8] sm:$0xf0]  ;;  %p11984_p8 = scmp.lt.s32.totalorder %s11982_s18, %s11978_s15 }
 0x2fe   : > { %3105 = vmatpush.bf16.msra.mxu2 %v8528_v22  ;;  %v8660_v6 = vor.u32 %v10504_v34, %v8659_v57  ;;  %v8616_v38 = vor.u32 %v10490_v37, %v8613_v35  ;;  %v10434_v57 = vld [vmem:[%s13371_s4 + $0xc] sm:$0xf]  ;;  %v8389_v34 = vld [vmem:[%s13371_s4 + $0x18] sm:$0xf0] }
 0x2ff   : > { %v3211_v20 = vld [vmem:[#allocation7] sm:$0xff]  ;;  %p11985_p11 = por %p11984_p8, %p11983_p7 }
 0x300   : > { %3144 = vmatpush.bf16.msra.mxu3 %v8580_v19  ;;  %v10500_v19 = vld [vmem:[%s13371_s4 + $0x214] sm:$0xf0]  ;;  %v3213_v21 = vperm.slane %v3211_v20, 0 }
 0x301   : > { %3129 = vmatpush.bf16.msra.mxu1 %v8468_v7  ;;  %v8664_v7 = vor.u32 %v10502_v58, %v8661_v60  ;;  %v10478_v58 = vld [vmem:[%s13371_s4 + $0x16c] sm:$0xf]  ;;  %v8565_v60 = vld [vmem:[%s13371_s4 + $0x178] sm:$0xf0]  ;;  %p11986_p12 = pnand %p11985_p11, %p11981_p4 }
 0x302   : > { %3106 = vmatpush.bf16.msra.mxu2 %v8512_v30  ;;  %v10450_v30 = vld [vmem:[%s13371_s4 + $0x8c] sm:$0xf] }
 0x303   : > { %v8456_v32 = vor.u32 %v10450_v30, %v8453_v31 }
 0x304   : > { %3145 = vmatpush.bf16.msra.mxu3 %v8564_v59 }
 0x305   : > { %3130 = vmatpush.bf16.msra.mxu1 %v8452_v18  ;;  %v8643_v18 = vld [vmem:[%s13371_s4 + $0x208] sm:$0xf] }
 0x306   : > { %v8644_v28 = vor.u32 %v10500_v19, %v8643_v18 }
 0x308   : > { %3146 = vmatpush.bf16.msra.mxu3 %v8548_v42  ;;  %v8437_v42 = vld [vmem:[%s13371_s4 + $0x78] sm:$0xf0] }
 0x309   : > { %3131 = vmatpush.bf16.msra.mxu1 %v8436_v26  ;;  %v10458_v26 = vld [vmem:[%s13371_s4 + $0xcc] sm:$0xf]  ;;  %v8440_v43 = vor.u32 %v10446_v41, %v8437_v42 }
 0x30a   : > { %v8488_v59 = vor.u32 %v10458_v26, %v8485_v62 }
 0x30c   : > { %3147 = vmatpush.bf16.msra.mxu3 %v8532_v47  ;;  %v8597_v47 = vld [vmem:[%s13371_s4 + $0x1b8] sm:$0xf0] }
 0x30d   : > { %3132 = vmatpush.bf16.msra.mxu1 %v8420_v39  ;;  %v8629_v39 = vld [vmem:[%s13371_s4 + $0x1f8] sm:$0xf0]  ;;  %v8600_v49 = vor.u32 %v10486_v46, %v8597_v47 }
 0x30e   : > { %v8632_v40 = vor.u32 %v10494_v36, %v8629_v39 }
 0x310   : > { %3148 = vmatpush.bf16.msra.mxu3 %v8516_v52  ;;  %v8581_v52 = vld [vmem:[%s13371_s4 + $0x198] sm:$0xf0] }
 0x311   : > { %3133 = vmatpush.bf16.msra.mxu1 %v8404_v45  ;;  %v8421_v45 = vld [vmem:[%s13371_s4 + $0x58] sm:$0xf0] }
 0x312   : > { %v8424_v48 = vor.u32 %v10442_v44, %v8421_v45 }
 0x315   : > { %3134 = vmatpush.bf16.msra.mxu1 %v8388_v33  ;;  %v8405_v33 = vld [vmem:[%s13371_s4 + $0x38] sm:$0xf0] }
 0x363   : > { %v11164_v53 = vpop.permute.xlu0 %11163 }
 0x364   : > { %v11166_v61 = vunpack.i.h.bf16 %v11164_v53  ;;  %v11165_v63 = vunpack.i.l.bf16 %v11164_v53  ;;  %v8408_v53 = vor.u32 %v10438_v50, %v8405_v33 }
 0x366   : > { %v11174_v56 = vpop.permute.xlu1 %11173 }
 0x367   : > { %v11176_v2 = vunpack.i.h.bf16 %v11174_v56  ;;  %v11175_v3 = vunpack.i.l.bf16 %v11174_v56  ;;  %v8584_v56 = vor.u32 %v10482_v51, %v8581_v52 }
 0x36b   : > { %v11169_v1 = vpop.permute.xlu0 %11168 }
 0x36c   : > { %v11171_v4 = vunpack.i.h.bf16 %v11169_v1  ;;  %v11170_v5 = vunpack.i.l.bf16 %v11169_v1  ;;  %v10474_v1 = vld [vmem:[%s13371_s4 + $0x14c] sm:$0xf] }
 0x36e   : > { %v2581_v8 = vsel %vm2579_vm4, %v11171_v4, %v11176_v2  ;;  %v2601_v9 = vsel %vm2579_vm4, %v11166_v61, %v11171_v4  ;;  %v2580_v10 = vsel %vm2579_vm4, %v11170_v5, %v11175_v3  ;;  %v2600_v11 = vsel %vm2579_vm4, %v11165_v63, %v11170_v5  ;;  %v11179_v12 = vpop.permute.xlu1 %11178  ;;  %v10470_v4 = vld [vmem:[%s13371_s4 + $0x12c] sm:$0xf]  ;;  %v8533_v5 = vld [vmem:[%s13371_s4 + $0x138] sm:$0xf0] }
 0x36f   : > { %v12924_v55 = vpack.c.bf16 %v2601_v9, %v2600_v11  ;;  %v12926_v15 = vpack.c.bf16 %v2581_v8, %v2580_v10  ;;  %v11181_v16 = vunpack.i.h.bf16 %v11179_v12  ;;  %v11180_v17 = vunpack.i.l.bf16 %v11179_v12  ;;  %v8517_v8 = vld [vmem:[%s13371_s4 + $0x118] sm:$0xf0] }
 0x370   : > { %v8392_v61 = vor.u32 %v10434_v57, %v8389_v34  ;;  %v8568_v63 = vor.u32 %v10478_v58, %v8565_v60  ;;  %v3236_v57 = vperm.slane %v3211_v20, 7 }
 0x371   : > { %v2603_v22 = vsel %vm2579_vm4, %v11176_v2, %v11181_v16  ;;  %v2602_v24 = vsel %vm2579_vm4, %v11175_v3, %v11180_v17  ;;  %3051 = vmatmul.bf16.vlgmr.msrb.gmra.mxu0 %v12924_v55  ;;  %3065 = vmatmul.bf16.vlgmr.msrb.gmra.mxu1 %v12926_v15  ;;  %v8549_v2 = vld [vmem:[%s13371_s4 + $0x158] sm:$0xf0] }
 0x372   : > { %v12936_v0 = vpack.c.bf16 %v2603_v22, %v2602_v24  ;;  %3093 = vmatmul.bf16.vlgmr.msrb.gmra.mxu3 %v12924_v55  ;;  %3161 = vmatpush.bf16.msrb.mxu0 %v8660_v6  ;;  %v8552_v3 = vor.u32 %v10474_v1, %v8549_v2  ;;  %v8536_v6 = vor.u32 %v10470_v4, %v8533_v5 }
 0x373   : > { %3203 = vmatpush.bf16.msrb.mxu1 %v8664_v7  ;;  %v10466_v7 = vld [vmem:[%s13371_s4 + $0x10c] sm:$0xf] }
 0x374   : > { %8665 = vmatmul.msk.bf16.vlgmr.msrb.gmra.mxu2 %vm3039_vm5, %v12936_v0  ;;  %v8520_v9 = vor.u32 %v10466_v7, %v8517_v8  ;;  %v12990_v7 = vperm.slane %v3236_v57, 1 }
 0x375   : > { %3169 = vmatpush.bf16.msrb.mxu2 %v8504_v25 }
 0x376   : > { %3162 = vmatpush.bf16.msrb.mxu0 %v8644_v28  ;;  %v3233_v28 = vperm.slane %v3211_v20, 1 }
 0x377   : > { %3204 = vmatpush.bf16.msrb.mxu1 %v8648_v29  ;;  %v3235_v29 = vperm.slane %v3211_v20, 5 }
 0x378   : > { %v3241_v30 = vperm.slane %v3233_v28, 1  ;;  %v8769_v28 = vld [vmem:[#allocation8 + $0xd0] sm:$0xf0] }
 0x379   : > { %3170 = vmatpush.bf16.msrb.mxu2 %v8488_v59  ;;  %v3243_v36 = vperm.slane %v3235_v29, 1 }
 0x37d   : > { %3171 = vmatpush.bf16.msrb.mxu2 %v8472_v27 }
 0x381   : > { %8666 = vmatmul.msk.bf16.vlgmr.msra.gmra.mxu0 %vm3039_vm5, %v12936_v0  ;;  %3135 = vmatmul.bf16.vlgmr.msra.gmra.mxu1 %v12924_v55 }
 0x382   : > { %3149 = vmatmul.bf16.vlgmr.msra.gmra.mxu3 %v12926_v15  ;;  %3172 = vmatpush.bf16.msrb.mxu2 %v8456_v32 }
 0x383   : > { %3183 = vmatpush.bf16.msra.mxu0 %v8632_v40 }
 0x384   : > { %3107 = vmatmul.bf16.vlgmr.msra.gmra.mxu2 %v12926_v15 }
 0x386   : > { %3173 = vmatpush.bf16.msrb.mxu2 %v8440_v43 }
 0x387   : > { %3184 = vmatpush.bf16.msra.mxu0 %v8616_v38 }
 0x38a   : > { %3174 = vmatpush.bf16.msrb.mxu2 %v8424_v48 }
 0x38b   : > { %3185 = vmatpush.bf16.msra.mxu0 %v8600_v49  ;;  %v3214_v49 = vperm.slane %v3211_v20, 2 }
 0x38d   : > { %v12984_v58 = vperm.slane %v3214_v49, 0 }
 0x38e   : > { %3175 = vmatpush.bf16.msrb.mxu2 %v8408_v53  ;;  %v3234_v53 = vperm.slane %v3211_v20, 3 }
 0x38f   : > { %3186 = vmatpush.bf16.msra.mxu0 %v8584_v56  ;;  %v3216_v56 = vperm.slane %v3211_v20, 6 }
 0x390   : > { %v12986_v4 = vperm.slane %v3234_v53, 1  ;;  %v10521_v53 = vld [vmem:[#allocation8 + $0x84] sm:$0xf] }
 0x391   : > { %8667 = vmatmul.msk.bf16.vlgmr.msrb.gmra.mxu0 %vm3039_vm5, %v12936_v0  ;;  %8668 = vmatmul.msk.bf16.vlgmr.msrb.gmra.mxu1 %vm3039_vm5, %v12936_v0  ;;  %v3215_v0 = vperm.slane %v3211_v20, 4  ;;  %v8767_v20 = vld [vmem:[#allocation8 + $0xc0] sm:$0xf] }
 0x392   : > { %3176 = vmatpush.bf16.msrb.mxu2 %v8392_v61 }
 0x393   : > { %3187 = vmatpush.bf16.msra.mxu0 %v8568_v63  ;;  %v3223_v54 = vperm.slane %v3215_v0, 0  ;;  %v10529_v0 = vld [vmem:[#allocation8 + $0xc4] sm:$0xf] }
 0x395   : > { %3177 = vmatmul.bf16.vlgmr.msrb.gmra.mxu2 %v12924_v55 }
 0x397   : > { %3188 = vmatpush.bf16.msra.mxu0 %v8552_v3 }
 0x39b   : > { %3189 = vmatpush.bf16.msra.mxu0 %v8536_v6  ;;  %v12988_v6 = vperm.slane %v3216_v56, 0  ;;  %v8737_v56 = vld [vmem:[#allocation8 + $0x90] sm:$0xf0] }
 0x39f   : > { %3190 = vmatpush.bf16.msra.mxu0 %v8520_v9 }
 0x3a2   : > { %3191 = vmatmul.bf16.vlgmr.msra.gmra.mxu0 %v12926_v15  ;;  %v3221_v15 = vperm.slane %v3213_v21, 0 }
 0x3ee   : > { %v3052_v10 = vpop.f32.mrf.mxu0  ;;  %v3066_v12 = vpop.f32.mrf.mxu1 }
 0x3ef   : > { %v3067_v24 = vadd.f32 %v3066_v12, %v3052_v10  ;;  %v10535_v12 = vld [vmem:[#allocation8 + $0xec] sm:$0xf0] }
 0x3f5   : > { %v3094_v11 = vpop.f32.mrf.mxu3 }
 0x3f6   : > { %v3054_v13 = vpop.f32.mrf.mxu0  ;;  %v3068_v19 = vpop.f32.mrf.mxu1 }
 0x3f7   : > { %v3080_v14 = vpop.f32.mrf.mxu2  ;;  %v3069_v39 = vadd.f32 %v3068_v19, %v3054_v13  ;;  %v8785_v19 = vld [vmem:[#allocation8 + $0xf0] sm:$0xf0] }
 0x3f8   : > { %v3081_v62 = vadd.f32 %v3080_v14, %v3067_v24 }
 0x3fa   : > { %v3225_v27 = vmul.f32 %v3221_v15, %v3081_v62 }
 0x3fc   : > { %v3245_v41 = vadd.f32 %v3241_v30, %v3225_v27  ;;  %v10527_v27 = vld [vmem:[#allocation8 + $0xac] sm:$0xf0] }
 0x3fd   : > { %v3096_v16 = vpop.f32.mrf.mxu3 }
 0x3fe   : > { %v3122_v17 = vpop.f32.mrf.mxu0  ;;  %v3136_v26 = vpop.f32.mrf.mxu1 }
 0x3ff   : > { %v3082_v18 = vpop.f32.mrf.mxu2 }
 0x400   : > { %v3083_v42 = vadd.f32 %v3082_v18, %v3069_v39  ;;  %v10533_v18 = vld [vmem:[#allocation8 + $0xe4] sm:$0xf] }
 0x401   : > { %v8788_v24 = vor.u32 %v10533_v18, %v8785_v19  ;;  %v8879_v18 = vld [vmem:[#allocation8 + $0x1a0] sm:$0xf] }
 0x402   : > { %v3229_v46 = vmul.f32 %v3221_v15, %v3083_v42 }
 0x403   : > { %3859 = vmatpush.bf16.msrb.mxu0 %v8788_v24 }
 0x404   : > { %v3249_v51 = vadd.f32 %v3241_v30, %v3229_v46  ;;  %v10567_v46 = vld [vmem:[#allocation8 + $0x1ec] sm:$0xf0] }
 0x405   : > { %v3150_v22 = vpop.f32.mrf.mxu3 }
 0x406   : > { %v12982_v55 = vpop.f32.mrf.mxu0  ;;  %v3151_v59 = vadd.f32 %v3150_v22, %v3136_v26  ;;  %v3138_v43 = vpop.f32.mrf.mxu1 }
 0x407   : > { %v3108_v25 = vpop.f32.mrf.mxu2 }
 0x408   : > { %v3109_v48 = vadd.f32 %v3108_v25, %v3094_v11  ;;  %v8783_v11 = vld [vmem:[#allocation8 + $0xe0] sm:$0xf]  ;;  %v10531_v25 = vld [vmem:[#allocation8 + $0xcc] sm:$0xf0] }
 0x40a   : > { %v3123_v34 = vadd.f32 %v3122_v17, %v3109_v48  ;;  %v8784_v17 = vor.u32 %v10535_v12, %v8783_v11  ;;  %v10523_v48 = vld [vmem:[#allocation8 + $0x8c] sm:$0xf0] }
 0x40b   : > { %v10579_v11 = vld [vmem:[#allocation8 + $0x24c] sm:$0xf0] }
 0x40c   : > { %v3226_v8 = vmul.f32 %v12984_v58, %v3123_v34  ;;  %3817 = vmatpush.bf16.msrb.mxu3 %v8784_v17  ;;  %v8895_v34 = vld [vmem:[#allocation8 + $0x1c0] sm:$0xf] }
 0x40d   : > { %v3152_v40 = vpop.f32.mrf.mxu3 }
 0x40e   : > { %v3164_v23 = vpop.f32.mrf.mxu0  ;;  %v3153_v38 = vadd.f32 %v3152_v40, %v3138_v43  ;;  %v3206_v1 = vpop.f32.mrf.mxu1  ;;  %v3246_v29 = vadd.f32 %v12986_v4, %v3226_v8  ;;  %v8753_v40 = vld [vmem:[#allocation8 + $0xb0] sm:$0xf0]  ;;  %v8740_v8 = vor.u32 %v10521_v53, %v8737_v56  ;;  %v10507_v53 = vld [vmem:[#allocation8 + $0xc] sm:$0xf0]  ;;  %v8927_v56 = vld [vmem:[#allocation8 + $0x200] sm:$0xf] }
 0x40f   : > { %v3165_v31 = vadd.f32 %v3164_v23, %v3151_v59  ;;  %v3110_v35 = vpop.f32.mrf.mxu2  ;;  %v8768_v59 = vor.u32 %v10531_v25, %v8767_v20  ;;  %v8751_v23 = vld [vmem:[#allocation8 + $0xa0] sm:$0xf] }
 0x410   : > { %v3111_v13 = vadd.f32 %v3110_v35, %v3096_v16 }
 0x411   : > { %v3227_v32 = vmul.f32 %v3223_v54, %v3165_v31  ;;  %3818 = vmatpush.bf16.msrb.mxu3 %v8768_v59 }
 0x412   : > { %v3125_v30 = vadd.f32 %v12982_v55, %v3111_v13 }
 0x413   : > { %v3247_v37 = vadd.f32 %v3243_v36, %v3227_v32  ;;  %v10525_v32 = vld [vmem:[#allocation8 + $0xa4] sm:$0xf] }
 0x414   : > { %v8756_v55 = vor.u32 %v10525_v32, %v8753_v40  ;;  %v10509_v32 = vld [vmem:[#allocation8 + $0x24] sm:$0xf]  ;;  %v8689_v40 = vld [vmem:[#allocation8 + $0x30] sm:$0xf0] }
 0x415   : > { %v3253_v44 = vmax.f32 %v3245_v41, %v3247_v37 }
 0x416   : > { %v3166_v45 = vpop.f32.mrf.mxu0 }
 0x417   : > { %v3167_v47 = vadd.f32 %v3166_v45, %v3153_v38  ;;  %v3257_v50 = vmax.f32 %v3253_v44, 0.0  ;;  %v8752_v38 = vor.u32 %v10527_v27, %v8751_v23  ;;  %v8735_v44 = vld [vmem:[#allocation8 + $0x80] sm:$0xf] }
 0x418   : > { %v3178_v63 = vpop.f32.mrf.mxu2  ;;  %v8911_v45 = vld [vmem:[#allocation8 + $0x1e0] sm:$0xf] }
 0x419   : > { %v3231_v33 = vmul.f32 %v3223_v54, %v3167_v47  ;;  %v3265_v60 = vrot.slane %v3257_v50, 7  ;;  %v8772_v54 = vor.u32 %v10529_v0, %v8769_v28  ;;  %v3208_v47 = vpop.f32.mrf.mxu1  ;;  %v8912_v49 = vor.u32 %v10567_v46, %v8911_v45  ;;  %v8975_v50 = vld [vmem:[#allocation8 + $0x260] sm:$0xf]  ;;  %3819 = vmatpush.bf16.msrb.mxu3 %v8752_v38 }
 0x41a   : > { %v8943_v0 = vld [vmem:[#allocation8 + $0x220] sm:$0xf] }
 0x41b   : > { %v3251_v52 = vadd.f32 %v3243_v36, %v3231_v33  ;;  %v12994_v9 = vsel %vm2536_vm2, 0.0, %v3265_v60  ;;  %3860 = vmatpush.bf16.msrb.mxu0 %v8772_v54  ;;  %v10583_v33 = vld [vmem:[#allocation8 + $0x26c] sm:$0xf0]  ;;  %3831 = vmatpush.bf16.msra.mxu1 %v8912_v49 }
 0x41c   : > { %v3315_v62 = vrot.slane %v12994_v9, 2  ;;  %v8976_v57 = vor.u32 %v10583_v33, %v8975_v50  ;;  %v8863_v50 = vld [vmem:[#allocation8 + $0x180] sm:$0xf]  ;;  %v10555_v33 = vld [vmem:[#allocation8 + $0x18c] sm:$0xf0] }
 0x41d   : > { %v3255_v61 = vmax.f32 %v3249_v51, %v3251_v52  ;;  %v3230_v51 = vmul.f32 %v12984_v58, %v3125_v30  ;;  %v10517_v58 = vld [vmem:[#allocation8 + $0x64] sm:$0xf]  ;;  %v8687_v30 = vld [vmem:[#allocation8 + $0x20] sm:$0xf] }
 0x41e   : > { %3849 = vmatpush.bf16.msra.mxu2 %v8976_v57 }
 0x41f   : > { %v3259_v2 = vmax.f32 %v3255_v61, 0.0  ;;  %v3192_v3 = vpop.f32.mrf.mxu0  ;;  %3861 = vmatpush.bf16.msrb.mxu0 %v8756_v55  ;;  %v3250_v12 = vadd.f32 %v12986_v4, %v3230_v51  ;;  %v8864_v51 = vor.u32 %v10555_v33, %v8863_v50  ;;  %v8849_v50 = vld [vmem:[#allocation8 + $0x170] sm:$0xf0]  ;;  %v8775_v33 = vld [vmem:[#allocation8 + $0xc8] sm:$0xf] }
 0x420   : > { %v3193_v5 = vadd.f32 %v3192_v3, %v3178_v63  ;;  %v3180_v41 = vpop.f32.mrf.mxu2 }
 0x421   : > { %v3267_v10 = vrot.slane %v3259_v2, 7  ;;  %v8719_v2 = vld [vmem:[#allocation8 + $0x60] sm:$0xf] }
 0x422   : > { %v3207_v14 = vadd.f32 %v3206_v1, %v3193_v5  ;;  %v8736_v1 = vor.u32 %v10523_v48, %v8735_v44  ;;  %v8959_v5 = vld [vmem:[#allocation8 + $0x240] sm:$0xf]  ;;  %v3289_v48 = vrot.slane %v12994_v9, 1  ;;  %v10571_v9 = vld [vmem:[#allocation8 + $0x20c] sm:$0xf0] }
 0x423   : > { %v12997_v21 = vsel %vm2536_vm2, %v3265_v60, %v3267_v10  ;;  %v13000_v22 = vsel %vm2536_vm2, %v3267_v10, 0.0  ;;  %v10563_v60 = vld [vmem:[#allocation8 + $0x1cc] sm:$0xf0]  ;;  %v8960_v17 = vor.u32 %v10579_v11, %v8959_v5  ;;  %3862 = vmatpush.bf16.msrb.mxu0 %v8740_v8  ;;  %v8913_v8 = vld [vmem:[#allocation8 + $0x1f0] sm:$0xf0] }
 0x424   : > { %v3228_v26 = vmul.f32 %v12988_v6, %v3207_v14  ;;  %v3316_v16 = vrot.slane %v12997_v21, 2  ;;  %v3318_v15 = vrot.slane %v13000_v22, 2  ;;  %v8896_v3 = vor.u32 %v10563_v60, %v8895_v34  ;;  %v10519_v10 = vld [vmem:[#allocation8 + $0x6c] sm:$0xf0]  ;;  %v8721_v14 = vld [vmem:[#allocation8 + $0x70] sm:$0xf0]  ;;  %3820 = vmatpush.bf16.msrb.mxu3 %v8736_v1 }
 0x425   : > { %v8720_v25 = vor.u32 %v10519_v10, %v8719_v2  ;;  %3850 = vmatpush.bf16.msra.mxu2 %v8960_v17  ;;  %v3295_v38 = vrot.slane %v13000_v22, 1  ;;  %v10505_v34 = vld [vmem:[#allocation8 + $0x4] sm:$0xf]  ;;  %v8673_v60 = vld [vmem:[#allocation8 + $0x10] sm:$0xf0] }
 0x426   : > { %v3248_v31 = vadd.f32 %v12990_v7, %v3228_v26  ;;  %v3317_v36 = vsel %vm2588_vm3, %v3315_v62, %v3316_v16  ;;  %v3319_v39 = vsel %vm2588_vm3, %v3316_v16, %v3318_v15  ;;  %3832 = vmatpush.bf16.msra.mxu1 %v8896_v3  ;;  %v10575_v26 = vld [vmem:[#allocation8 + $0x22c] sm:$0xf0]  ;;  %v8724_v62 = vor.u32 %v10517_v58, %v8721_v14  ;;  %v8703_v16 = vld [vmem:[#allocation8 + $0x40] sm:$0xf]  ;;  %v10565_v3 = vld [vmem:[#allocation8 + $0x1e4] sm:$0xf] }
 0x427   : > { %v3194_v42 = vpop.f32.mrf.mxu0  ;;  %v11197_v37 = vpack.i.bf16 %v3319_v39, %v3317_v36  ;;  %v10515_v15 = vld [vmem:[#allocation8 + $0x4c] sm:$0xf0]  ;;  %v8944_v4 = vor.u32 %v10575_v26, %v8943_v0  ;;  %v8847_v1 = vld [vmem:[#allocation8 + $0x160] sm:$0xf]  ;;  %v10581_v10 = vld [vmem:[#allocation8 + $0x264] sm:$0xf]  ;;  %v8916_v11 = vor.u32 %v10565_v3, %v8913_v8 }
 0x428   : > { %v3195_v35 = vadd.f32 %v3194_v42, %v3180_v41  ;;  %v3254_v43 = vmax.f32 %v3246_v29, %v3248_v31  ;;  %v8705_v29 = vld [vmem:[#allocation8 + $0x50] sm:$0xf0]  ;;  %3821 = vmatpush.bf16.msrb.mxu3 %v8720_v25  ;;  %v8704_v23 = vor.u32 %v10515_v15, %v8703_v16  ;;  %3863 = vmatpush.bf16.msrb.mxu0 %v8724_v62  ;;  %v10511_v31 = vld [vmem:[#allocation8 + $0x2c] sm:$0xf0]  ;;  %v10584_v14 = vld [vmem:[#allocation8 + $0x274] sm:$0xf0] }
 0x429   : > { %11198 = vrot.lane.b32.xlu1 %v11197_v37, %s12142_s0  ;;  %3851 = vmatpush.bf16.msra.mxu2 %v8944_v4  ;;  %v8688_v44 = vor.u32 %v10511_v31, %v8687_v30  ;;  %v10551_v2 = vld [vmem:[#allocation8 + $0x16c] sm:$0xf0]  ;;  %v8977_v58 = vld [vmem:[#allocation8 + $0x270] sm:$0xf0]  ;;  %v10577_v25 = vld [vmem:[#allocation8 + $0x244] sm:$0xf] }
 0x42a   : > { %v3209_v52 = vadd.f32 %v3208_v47, %v3195_v35  ;;  %v3258_v63 = vmax.f32 %v3254_v43, 0.0  ;;  %v3290_v43 = vrot.slane %v12997_v21, 1  ;;  %v8692_v47 = vor.u32 %v10509_v32, %v8689_v40  ;;  %v8961_v0 = vld [vmem:[#allocation8 + $0x250] sm:$0xf0]  ;;  %v8967_v16 = vld [vmem:[#allocation8 + $0x248] sm:$0xf] }
 0x42b   : > { %v8848_v5 = vor.u32 %v10551_v2, %v8847_v1  ;;  %v8964_v62 = vor.u32 %v10577_v25, %v8961_v0  ;;  %v10580_v15 = vld [vmem:[#allocation8 + $0x254] sm:$0xf0]  ;;  %v8799_v40 = vld [vmem:[#allocation8 + $0x100] sm:$0xf]  ;;  %v8817_v1 = vld [vmem:[#allocation8 + $0x130] sm:$0xf0] }
 0x42c   : > { %v3232_v61 = vmul.f32 %v12988_v6, %v3209_v52  ;;  %v10559_v6 = vld [vmem:[#allocation8 + $0x1ac] sm:$0xf0]  ;;  %v3266_v24 = vrot.slane %v3258_v63, 7  ;;  %3822 = vmatpush.bf16.msrb.mxu3 %v8704_v23  ;;  %v3291_v49 = vsel %vm1345_vm0, %v3289_v48, %v3290_v43  ;;  %v3296_v21 = vsel %vm1345_vm0, %v3290_v43, %v3295_v38  ;;  %v8671_v52 = vld [vmem:[#allocation8] sm:$0xf] }
 0x42d   : > { %v8880_v19 = vor.u32 %v10559_v6, %v8879_v18  ;;  %v11187_v22 = vpack.i.bf16 %v3296_v21, %v3291_v49  ;;  %v8672_v57 = vor.u32 %v10507_v53, %v8671_v52  ;;  %v8676_v63 = vor.u32 %v10505_v34, %v8673_v60  ;;  %v8831_v18 = vld [vmem:[#allocation8 + $0x140] sm:$0xf]  ;;  %v10547_v6 = vld [vmem:[#allocation8 + $0x14c] sm:$0xf0]  ;;  %v10573_v23 = vld [vmem:[#allocation8 + $0x224] sm:$0xf] }
 0x42e   : > { %v3252_v13 = vadd.f32 %v12990_v7, %v3232_v61  ;;  %v10513_v7 = vld [vmem:[#allocation8 + $0x44] sm:$0xf]  ;;  %v3276_v54 = vsel %vm2536_vm2, 0.0, %v3266_v24  ;;  %v8928_v61 = vor.u32 %v10571_v9, %v8927_v56  ;;  %v8968_v4 = vor.u32 %v10580_v15, %v8967_v16  ;;  %v8929_v38 = vld [vmem:[#allocation8 + $0x210] sm:$0xf0] }
 0x42f   : > { %3833 = vmatpush.bf16.msra.mxu1 %v8880_v19  ;;  %v8708_v27 = vor.u32 %v10513_v7, %v8705_v29  ;;  %v3292_v41 = vrot.slane %v3276_v54, 1  ;;  %v10561_v19 = vld [vmem:[#allocation8 + $0x1c4] sm:$0xf]  ;;  %v10543_v7 = vld [vmem:[#allocation8 + $0x12c] sm:$0xf0] }
 0x430   : > { %v3256_v20 = vmax.f32 %v3250_v12, %v3252_v13  ;;  %3823 = vmatpush.bf16.msrb.mxu3 %v8688_v44  ;;  %3852 = vmatpush.bf16.msra.mxu2 %v8928_v61  ;;  %v8980_v12 = vor.u32 %v10581_v10, %v8977_v58  ;;  %v8983_v13 = vld [vmem:[#allocation8 + $0x268] sm:$0xf]  ;;  %v10557_v29 = vld [vmem:[#allocation8 + $0x1a4] sm:$0xf]  ;;  %v10536_v49 = vld [vmem:[#allocation8 + $0xf4] sm:$0xf0] }
 0x431   : > { %3864 = vmatpush.bf16.msrb.mxu0 %v8708_v27  ;;  %v8984_v17 = vor.u32 %v10584_v14, %v8983_v13  ;;  %v8945_v27 = vld [vmem:[#allocation8 + $0x230] sm:$0xf0]  ;;  %v10569_v43 = vld [vmem:[#allocation8 + $0x204] sm:$0xf]  ;;  %v8759_v9 = vld [vmem:[#allocation8 + $0xa8] sm:$0xf] }
 0x432   : > { %v3260_v28 = vmax.f32 %v3256_v20, 0.0  ;;  %v8832_v20 = vor.u32 %v10547_v6, %v8831_v18  ;;  %v8948_v31 = vor.u32 %v10573_v23, %v8945_v27  ;;  %v10545_v56 = vld [vmem:[#allocation8 + $0x144] sm:$0xf]  ;;  %v10528_v34 = vld [vmem:[#allocation8 + $0xb4] sm:$0xf0] }
 0x433   : > { %3834 = vmatpush.bf16.msra.mxu1 %v8864_v51  ;;  %v10532_v51 = vld [vmem:[#allocation8 + $0xd4] sm:$0xf0]  ;;  %v8760_v61 = vor.u32 %v10528_v34, %v8759_v9  ;;  %v8743_v3 = vld [vmem:[#allocation8 + $0x88] sm:$0xf]  ;;  %v10537_v10 = vld [vmem:[#allocation8 + $0x104] sm:$0xf] }
 0x434   : > { %v3269_v59 = vrot.slane %v3260_v28, 7  ;;  %3824 = vmatpush.bf16.msrb.mxu3 %v8672_v57  ;;  %3873 = vmatpush.bf16.msrb.mxu2 %v8916_v11  ;;  %v8815_v28 = vld [vmem:[#allocation8 + $0x120] sm:$0xf]  ;;  %v8776_v53 = vor.u32 %v10532_v51, %v8775_v33  ;;  %v8833_v57 = vld [vmem:[#allocation8 + $0x150] sm:$0xf0] }
 0x435   : > { %3865 = vmatpush.bf16.msrb.mxu0 %v8692_v47  ;;  %v10572_v47 = vld [vmem:[#allocation8 + $0x214] sm:$0xf0]  ;;  %v8836_v60 = vor.u32 %v10545_v56, %v8833_v57  ;;  %v8801_v58 = vld [vmem:[#allocation8 + $0x110] sm:$0xf0]  ;;  %v8727_v13 = vld [vmem:[#allocation8 + $0x68] sm:$0xf] }
 0x436   : > { %v3270_v36 = vsel %vm2536_vm2, %v3266_v24, %v3269_v59  ;;  %v3278_v39 = vsel %vm2536_vm2, %v3269_v59, 0.0  ;;  %v8897_v24 = vld [vmem:[#allocation8 + $0x1d0] sm:$0xf0]  ;;  %v8816_v59 = vor.u32 %v10543_v7, %v8815_v28  ;;  %v8804_v11 = vor.u32 %v10537_v10, %v8801_v58  ;;  %v10520_v14 = vld [vmem:[#allocation8 + $0x74] sm:$0xf0] }
 0x437   : > { %v3297_v42 = vrot.slane %v3278_v39, 1  ;;  %v11182_v37 = vpack.i.bf16 %v3270_v36, %v3276_v54  ;;  %v3293_v35 = vrot.slane %v3270_v36, 1  ;;  %3835 = vmatpush.bf16.msra.mxu1 %v8848_v5  ;;  %v8900_v26 = vor.u32 %v10561_v19, %v8897_v24  ;;  %v8881_v54 = vld [vmem:[#allocation8 + $0x1b0] sm:$0xf0]  ;;  %v8951_v36 = vld [vmem:[#allocation8 + $0x228] sm:$0xf] }
 0x438   : > { %3891 = vmatpush.bf16.msra.mxu3 %v8980_v12  ;;  %v8884_v30 = vor.u32 %v10557_v29, %v8881_v54  ;;  %v10576_v39 = vld [vmem:[#allocation8 + $0x234] sm:$0xf0]  ;;  %v8711_v18 = vld [vmem:[#allocation8 + $0x48] sm:$0xf]  ;;  %v8921_v16 = vld [vmem:[#allocation8 + $0x1f8] sm:$0xf0] }
 0x439   : > { %11183 = vrot.lane.b32.xlu2 %v11182_v37, %s12142_s0  ;;  %v3294_v45 = vsel %vm1345_vm0, %v3292_v41, %v3293_v35  ;;  %v3298_v46 = vsel %vm1345_vm0, %v3293_v35, %v3297_v42  ;;  %3866 = vmatpush.bf16.msrb.mxu0 %v8676_v63  ;;  %v8952_v32 = vor.u32 %v10576_v39, %v8951_v36  ;;  %v10539_v41 = vld [vmem:[#allocation8 + $0x10c] sm:$0xf0]  ;;  %v10553_v42 = vld [vmem:[#allocation8 + $0x184] sm:$0xf]  ;;  %v8865_v35 = vld [vmem:[#allocation8 + $0x190] sm:$0xf0] }
 0x43a   : > { %v11192_v55 = vpack.i.bf16 %v3298_v46, %v3294_v45  ;;  %3874 = vmatpush.bf16.msrb.mxu2 %v8900_v26  ;;  %v8800_v37 = vor.u32 %v10539_v41, %v8799_v40  ;;  %v8868_v44 = vor.u32 %v10553_v42, %v8865_v35  ;;  %v8932_v45 = vor.u32 %v10569_v43, %v8929_v38  ;;  %v8935_v46 = vld [vmem:[#allocation8 + $0x208] sm:$0xf]  ;;  %v10541_v63 = vld [vmem:[#allocation8 + $0x124] sm:$0xf]  ;;  %v10524_v5 = vld [vmem:[#allocation8 + $0x94] sm:$0xf0] }
 0x43b   : > { %3836 = vmatpush.bf16.msra.mxu1 %v8832_v20  ;;  %v8936_v48 = vor.u32 %v10572_v47, %v8935_v46  ;;  %v8820_v2 = vor.u32 %v10541_v63, %v8817_v1  ;;  %v8744_v8 = vor.u32 %v10524_v5, %v8743_v3  ;;  %v10516_v6 = vld [vmem:[#allocation8 + $0x54] sm:$0xf0]  ;;  %v8919_v20 = vld [vmem:[#allocation8 + $0x1e8] sm:$0xf]  ;;  %v10562_v40 = vld [vmem:[#allocation8 + $0x1cc] sm:$0xf] }
 0x43c   : > { %11193 = vrot.lane.b32.xlu0 %v11192_v55, %s12142_s0  ;;  %3892 = vmatpush.bf16.msra.mxu3 %v8964_v62  ;;  %v8791_v55 = vld [vmem:[#allocation8 + $0xe8] sm:$0xf]  ;;  %v8712_v19 = vor.u32 %v10516_v6, %v8711_v18  ;;  %v10512_v25 = vld [vmem:[#allocation8 + $0x34] sm:$0xf0]  ;;  %v10566_v62 = vld [vmem:[#allocation8 + $0x1ec] sm:$0xf] }
 0x43d   : > { %3933 = vmatpush.bf16.msra.mxu0 %v8984_v17  ;;  %v8792_v21 = vor.u32 %v10536_v49, %v8791_v55  ;;  %v8728_v17 = vor.u32 %v10520_v14, %v8727_v13  ;;  %v8695_v24 = vld [vmem:[#allocation8 + $0x28] sm:$0xf]  ;;  %v10568_v26 = vld [vmem:[#allocation8 + $0x1f4] sm:$0xf0]  ;;  %v8924_v27 = vor.u32 %v10566_v62, %v8921_v16  ;;  %v8905_v41 = vld [vmem:[#allocation8 + $0x1d8] sm:$0xf0] }
 0x43e   : > { %3875 = vmatpush.bf16.msrb.mxu2 %v8884_v30  ;;  %v8696_v15 = vor.u32 %v10512_v25, %v8695_v24  ;;  %v8920_v23 = vor.u32 %v10568_v26, %v8919_v20  ;;  %v8903_v30 = vld [vmem:[#allocation8 + $0x1c8] sm:$0xf]  ;;  %v10508_v36 = vld [vmem:[#allocation8 + $0x14] sm:$0xf0]  ;;  %v8908_v35 = vor.u32 %v10562_v40, %v8905_v41  ;;  %v10554_v49 = vld [vmem:[#allocation8 + $0x18c] sm:$0xf] }
 0x43f   : > { %3837 = vmatpush.bf16.msra.mxu1 %v8816_v59  ;;  %v8887_v43 = vld [vmem:[#allocation8 + $0x1a8] sm:$0xf]  ;;  %v10560_v38 = vld [vmem:[#allocation8 + $0x1b4] sm:$0xf0]  ;;  %v10534_v57 = vld [vmem:[#allocation8 + $0xec] sm:$0xf] }
 0x440   : > { %3893 = vmatpush.bf16.msra.mxu3 %v8948_v31  ;;  %v8679_v31 = vld [vmem:[#allocation8 + $0x8] sm:$0xf]  ;;  %v8888_v46 = vor.u32 %v10560_v38, %v8887_v43  ;;  %v10552_v51 = vld [vmem:[#allocation8 + $0x174] sm:$0xf0]  ;;  %v8793_v9 = vld [vmem:[#allocation8 + $0xf8] sm:$0xf0] }
 0x441   : > { %11188 = vrot.lane.b32.xlu2 %v11187_v22, %s12142_s0  ;;  %3934 = vmatpush.bf16.msra.mxu0 %v8968_v4  ;;  %v10549_v22 = vld [vmem:[#allocation8 + $0x164] sm:$0xf]  ;;  %v8680_v42 = vor.u32 %v10508_v36, %v8679_v31  ;;  %v8871_v55 = vld [vmem:[#allocation8 + $0x188] sm:$0xf]  ;;  %v10546_v10 = vld [vmem:[#allocation8 + $0x14c] sm:$0xf]  ;;  %v8796_v58 = vor.u32 %v10534_v57, %v8793_v9 }
 0x442   : > { %3876 = vmatpush.bf16.msrb.mxu2 %v8868_v44  ;;  %v8852_v52 = vor.u32 %v10549_v22, %v8849_v50  ;;  %v10558_v44 = vld [vmem:[#allocation8 + $0x1ac] sm:$0xf]  ;;  %v8855_v33 = vld [vmem:[#allocation8 + $0x168] sm:$0xf]  ;;  %v8985_v13 = vld [vmem:[#allocation8 + $0x278] sm:$0xf0] }
 0x443   : > { %3838 = vmatpush.bf16.msra.mxu1 %v8800_v37  ;;  %v8839_v5 = vld [vmem:[#allocation8 + $0x148] sm:$0xf]  ;;  %v10530_v25 = vld [vmem:[#allocation8 + $0xcc] sm:$0xf]  ;;  %v8777_v26 = vld [vmem:[#allocation8 + $0xd8] sm:$0xf0] }
 0x444   : > { %3894 = vmatpush.bf16.msra.mxu3 %v8932_v45  ;;  %v8889_v45 = vld [vmem:[#allocation8 + $0x1b8] sm:$0xf0]  ;;  %v8823_v16 = vld [vmem:[#allocation8 + $0x128] sm:$0xf]  ;;  %v10540_v36 = vld [vmem:[#allocation8 + $0x114] sm:$0xf0] }
 0x445   : > { %3935 = vmatpush.bf16.msra.mxu0 %v8952_v32  ;;  %v10564_v32 = vld [vmem:[#allocation8 + $0x1d4] sm:$0xf0]  ;;  %v8892_v47 = vor.u32 %v10558_v44, %v8889_v45  ;;  %v8807_v31 = vld [vmem:[#allocation8 + $0x108] sm:$0xf]  ;;  %v8809_v41 = vld [vmem:[#allocation8 + $0x118] sm:$0xf0] }
 0x446   : > { %3877 = vmatpush.bf16.msrb.mxu2 %v8852_v52  ;;  %v8904_v37 = vor.u32 %v10564_v32, %v8903_v30  ;;  %v10550_v52 = vld [vmem:[#allocation8 + $0x16c] sm:$0xf]  ;;  %v8808_v43 = vor.u32 %v10540_v36, %v8807_v31  ;;  %v8745_v44 = vld [vmem:[#allocation8 + $0x98] sm:$0xf0] }
 0x447   : > { %3901 = vmatpush.bf16.msrb.mxu1 %v8792_v21  ;;  %v8873_v21 = vld [vmem:[#allocation8 + $0x198] sm:$0xf0]  ;;  %v10538_v32 = vld [vmem:[#allocation8 + $0x10c] sm:$0xf] }
 0x448   : > { %v8876_v50 = vor.u32 %v10554_v49, %v8873_v21  ;;  %v10522_v38 = vld [vmem:[#allocation8 + $0x8c] sm:$0xf]  ;;  %v8812_v45 = vor.u32 %v10538_v32, %v8809_v41  ;;  %v8729_v21 = vld [vmem:[#allocation8 + $0x78] sm:$0xf0] }
 0x449   : > { %3936 = vmatpush.bf16.msra.mxu0 %v8936_v48  ;;  %v10556_v48 = vld [vmem:[#allocation8 + $0x194] sm:$0xf0]  ;;  %v10518_v49 = vld [vmem:[#allocation8 + $0x6c] sm:$0xf] }
 0x44a   : > { %3878 = vmatpush.bf16.msrb.mxu2 %v8836_v60  ;;  %v8872_v22 = vor.u32 %v10556_v48, %v8871_v55  ;;  %v8856_v60 = vor.u32 %v10552_v51, %v8855_v33  ;;  %v8937_v55 = vld [vmem:[#allocation8 + $0x218] sm:$0xf0]  ;;  %v8748_v48 = vor.u32 %v10522_v38, %v8745_v44  ;;  %v10514_v33 = vld [vmem:[#allocation8 + $0x4c] sm:$0xf] }
 0x44b   : > { %3902 = vmatpush.bf16.msrb.mxu1 %v8776_v53  ;;  %v8857_v53 = vld [vmem:[#allocation8 + $0x178] sm:$0xf0]  ;;  %v10506_v9 = vld [vmem:[#allocation8 + $0xc] sm:$0xf] }
 0x44c   : > { %v8713_v51 = vld [vmem:[#allocation8 + $0x58] sm:$0xf0] }
 0x44e   : > { %3879 = vmatpush.bf16.msrb.mxu2 %v8820_v2 }
 0x44f   : > { %3903 = vmatpush.bf16.msrb.mxu1 %v8760_v61  ;;  %v8860_v61 = vor.u32 %v10550_v52, %v8857_v53  ;;  %v8716_v52 = vor.u32 %v10514_v33, %v8713_v51  ;;  %v10510_v53 = vld [vmem:[#allocation8 + $0x2c] sm:$0xf] }
 0x452   : > { %3880 = vmatpush.bf16.msrb.mxu2 %v8804_v11  ;;  %v8841_v11 = vld [vmem:[#allocation8 + $0x158] sm:$0xf0] }
 0x453   : > { %3904 = vmatpush.bf16.msrb.mxu1 %v8744_v8  ;;  %v10548_v8 = vld [vmem:[#allocation8 + $0x154] sm:$0xf0]  ;;  %v8844_v62 = vor.u32 %v10546_v10, %v8841_v11  ;;  %v3985_v11 = vld [vmem:[#allocation10] sm:$0xff] }
 0x454   : > { %v8840_v24 = vor.u32 %v10548_v8, %v8839_v5  ;;  %v3990_v38 = vperm.slane %v3985_v11, 6 }
 0x456   : > { %v13063_v51 = vperm.slane %v3990_v38, 0 }
 0x457   : > { %3905 = vmatpush.bf16.msrb.mxu1 %v8728_v17 }
 0x45b   : > { %3906 = vmatpush.bf16.msrb.mxu1 %v8712_v19 }
 0x45f   : > { %3907 = vmatpush.bf16.msrb.mxu1 %v8696_v15  ;;  %v10544_v15 = vld [vmem:[#allocation8 + $0x134] sm:$0xf0] }
 0x463   : > { %3908 = vmatpush.bf16.msrb.mxu1 %v8680_v42  ;;  %v10574_v42 = vld [vmem:[#allocation8 + $0x22c] sm:$0xf] }
 0x493   : > { %v11184_v12 = vpop.permute.xlu2 %11183 }
 0x494   : > { %v11186_v4 = vunpack.i.h.bf16 %v11184_v12  ;;  %v11185_v28 = vunpack.i.l.bf16 %v11184_v12  ;;  %v10582_v12 = vld [vmem:[#allocation8 + $0x26c] sm:$0xf] }
 0x49b   : > { %v13029_v0 = vpop.permute.xlu2 %11188  ;;  %v11199_v56 = vpop.permute.xlu1 %11198 }
 0x49c   : > { %v11191_v7 = vunpack.i.h.bf16 %v13029_v0  ;;  %v11190_v29 = vunpack.i.l.bf16 %v13029_v0  ;;  %v11201_v63 = vunpack.i.h.bf16 %v11199_v56  ;;  %v11200_v1 = vunpack.i.l.bf16 %v11199_v56  ;;  %v8825_v0 = vld [vmem:[#allocation8 + $0x138] sm:$0xf0] }
 0x49d   : > { %v8697_v56 = vld [vmem:[#allocation8 + $0x38] sm:$0xf0] }
 0x49e   : > { %v3327_v59 = vsel %vm3039_vm5, %v11186_v4, %v11191_v7  ;;  %v3326_v54 = vsel %vm3039_vm5, %v11185_v28, %v11190_v29  ;;  %v10542_v4 = vld [vmem:[#allocation8 + $0x12c] sm:$0xf]  ;;  %v8988_v28 = vor.u32 %v10582_v12, %v8985_v13  ;;  %v8700_v57 = vor.u32 %v10510_v53, %v8697_v56 }
 0x49f   : > { %v13037_v39 = vpack.c.bf16 %v3327_v59, %v3326_v54  ;;  %v8780_v59 = vor.u32 %v10530_v25, %v8777_v26  ;;  %v8824_v54 = vor.u32 %v10544_v15, %v8823_v16  ;;  %v8828_v30 = vor.u32 %v10542_v4, %v8825_v0 }
 0x4a0   : > { %v4009_v25 = vperm.slane %v3985_v11, 5 }
 0x4a1   : > { %3825 = vmatmul.bf16.vlgmr.msrb.gmra.mxu3 %v13037_v39  ;;  %3867 = vmatmul.bf16.vlgmr.msrb.gmra.mxu0 %v13037_v39 }
 0x4a2   : > { %3915 = vmatpush.bf16.msrb.mxu3 %v8920_v23  ;;  %3957 = vmatpush.bf16.msrb.mxu0 %v8924_v27  ;;  %v10526_v23 = vld [vmem:[#allocation8 + $0xac] sm:$0xf]  ;;  %v8761_v27 = vld [vmem:[#allocation8 + $0xb8] sm:$0xf0]  ;;  %v4017_v0 = vperm.slane %v4009_v25, 1 }
 0x4a6   : > { %3916 = vmatpush.bf16.msrb.mxu3 %v8904_v37  ;;  %3958 = vmatpush.bf16.msrb.mxu0 %v8908_v35  ;;  %v8953_v37 = vld [vmem:[#allocation8 + $0x238] sm:$0xf0]  ;;  %v8764_v35 = vor.u32 %v10526_v23, %v8761_v27 }
 0x4aa   : > { %3917 = vmatpush.bf16.msrb.mxu3 %v8888_v46  ;;  %3959 = vmatpush.bf16.msrb.mxu0 %v8892_v47  ;;  %v8956_v46 = vor.u32 %v10574_v42, %v8953_v37  ;;  %v10570_v47 = vld [vmem:[#allocation8 + $0x20c] sm:$0xf]  ;;  %v3988_v42 = vperm.slane %v3985_v11, 2 }
 0x4ae   : > { %v11194_v34 = vpop.permute.xlu0 %11193  ;;  %3918 = vmatpush.bf16.msrb.mxu3 %v8872_v22  ;;  %3960 = vmatpush.bf16.msrb.mxu0 %v8876_v50  ;;  %v8940_v22 = vor.u32 %v10570_v47, %v8937_v55  ;;  %v8732_v50 = vor.u32 %v10518_v49, %v8729_v21 }
 0x4af   : > { %v11196_v2 = vunpack.i.h.bf16 %v11194_v34  ;;  %v11195_v3 = vunpack.i.l.bf16 %v11194_v34  ;;  %v8681_v34 = vld [vmem:[#allocation8 + $0x18] sm:$0xf0] }
 0x4b1   : > { %v3307_v14 = vsel %vm3039_vm5, %v11190_v29, %v11195_v3  ;;  %v3308_v17 = vsel %vm3039_vm5, %v11191_v7, %v11196_v2  ;;  %v3328_v18 = vsel %vm3039_vm5, %v11195_v3, %v11200_v1  ;;  %v3329_v6 = vsel %vm3039_vm5, %v11196_v2, %v11201_v63  ;;  %v10578_v7 = vld [vmem:[#allocation8 + $0x24c] sm:$0xf]  ;;  %v8969_v29 = vld [vmem:[#allocation8 + $0x258] sm:$0xf0] }
 0x4b2   : > { %v3331_v19 = vpack.c.bf16 %v3308_v17, %v3307_v14  ;;  %v13047_v20 = vpack.c.bf16 %v3329_v6, %v3328_v18  ;;  %3919 = vmatpush.bf16.msrb.mxu3 %v8856_v60  ;;  %3961 = vmatpush.bf16.msrb.mxu0 %v8860_v61  ;;  %v8972_v40 = vor.u32 %v10578_v7, %v8969_v29  ;;  %v3987_v14 = vperm.slane %v3985_v11, 0 }
 0x4b3   : > { %v8684_v60 = vor.u32 %v10506_v9, %v8681_v34  ;;  %v3989_v6 = vperm.slane %v3985_v11, 4  ;;  %v9051_v34 = vld [vmem:[#allocation11 + $0x70] sm:$0xf] }
 0x4b4   : > { %3839 = vmatmul.bf16.vlgmr.msra.gmra.mxu1 %v3331_v19  ;;  %8989 = vmatmul.msk.bf16.vlgmr.msra.gmra.mxu2 %vm3813_vm6, %v13047_v20 }
 0x4b5   : > { %8990 = vmatmul.msk.bf16.vlgmr.msra.gmra.mxu3 %vm3813_vm6, %v13047_v20  ;;  %8991 = vmatmul.msk.bf16.vlgmr.msra.gmra.mxu0 %vm3813_vm6, %v13047_v20  ;;  %v3997_v16 = vperm.slane %v3989_v6, 0  ;;  %v9053_v6 = vld [vmem:[#allocation11 + $0x78] sm:$0xf0] }
 0x4b6   : > { %3943 = vmatpush.bf16.msra.mxu2 %v8796_v58  ;;  %3920 = vmatpush.bf16.msrb.mxu3 %v8840_v24 }
 0x4b7   : > { %3962 = vmatpush.bf16.msrb.mxu0 %v8844_v62  ;;  %3975 = vmatpush.bf16.msra.mxu1 %v8988_v28 }
 0x4ba   : > { %3944 = vmatpush.bf16.msra.mxu2 %v8780_v59  ;;  %3921 = vmatpush.bf16.msrb.mxu3 %v8824_v54 }
 0x4bb   : > { %3963 = vmatpush.bf16.msrb.mxu0 %v8828_v30  ;;  %3976 = vmatpush.bf16.msra.mxu1 %v8972_v40 }
 0x4be   : > { %3945 = vmatpush.bf16.msra.mxu2 %v8764_v35  ;;  %3922 = vmatpush.bf16.msrb.mxu3 %v8808_v43  ;;  %v4008_v43 = vperm.slane %v3985_v11, 3 }
 0x4bf   : > { %3964 = vmatpush.bf16.msrb.mxu0 %v8812_v45  ;;  %3977 = vmatpush.bf16.msra.mxu1 %v8956_v46  ;;  %v4010_v46 = vperm.slane %v3985_v11, 7 }
 0x4c2   : > { %3946 = vmatpush.bf16.msra.mxu2 %v8748_v48  ;;  %v3996_v48 = vperm.slane %v3988_v42, 0  ;;  %v10614_v42 = vld [vmem:[#allocation11 + $0xe4] sm:$0xf0] }
 0x4c3   : > { %3978 = vmatpush.bf16.msra.mxu1 %v8940_v22  ;;  %v13061_v22 = vperm.slane %v4008_v43, 1 }
 0x4c4   : > { %3881 = vmatmul.bf16.vlgmr.msrb.gmra.mxu2 %v3331_v19  ;;  %3909 = vmatmul.bf16.vlgmr.msrb.gmra.mxu1 %v13037_v39 }
 0x4c5   : > { %3923 = vmatmul.bf16.vlgmr.msrb.gmra.mxu3 %v3331_v19  ;;  %3965 = vmatmul.bf16.vlgmr.msrb.gmra.mxu0 %v3331_v19 }
 0x4c6   : > { %3947 = vmatpush.bf16.msra.mxu2 %v8732_v50 }
 0x4ca   : > { %3948 = vmatpush.bf16.msra.mxu2 %v8716_v52 }
 0x4ce   : > { %3949 = vmatpush.bf16.msra.mxu2 %v8700_v57  ;;  %v13065_v57 = vperm.slane %v4010_v46, 1 }
 0x4d2   : > { %3950 = vmatpush.bf16.msra.mxu2 %v8684_v60  ;;  %v10600_v60 = vld [vmem:[#allocation11 + $0x74] sm:$0xf0] }
 0x4d4   : > { %8992 = vmatmul.msk.bf16.vlgmr.msra.gmra.mxu1 %vm3813_vm6, %v13047_v20  ;;  %v3995_v20 = vperm.slane %v3987_v14, 0 }
 0x4d5   : > { %3951 = vmatmul.bf16.vlgmr.msra.gmra.mxu2 %v13037_v39  ;;  %v4007_v39 = vperm.slane %v3985_v11, 1 }
 0x4d7   : > { %v4015_v4 = vperm.slane %v4007_v39, 1 }
 0x51e   : > { %v3868_v63 = vpop.f32.mrf.mxu0 }
 0x524   : > { %v3826_v61 = vpop.f32.mrf.mxu3 }
 0x526   : > { %v3870_v8 = vpop.f32.mrf.mxu0 }
 0x52c   : > { %v3828_v1 = vpop.f32.mrf.mxu3 }
 0x531   : > { %v3840_v2 = vpop.f32.mrf.mxu1 }
 0x532   : > { %v3938_v13 = vpop.f32.mrf.mxu0  ;;  %v3841_v18 = vadd.f32 %v3840_v2, %v3826_v61  ;;  %v9043_v61 = vld [vmem:[#allocation11 + $0x60] sm:$0xf] }
 0x537   : > { %v3854_v3 = vpop.f32.mrf.mxu2 }
 0x538   : > { %v3896_v5 = vpop.f32.mrf.mxu3  ;;  %v3855_v19 = vadd.f32 %v3854_v3, %v3841_v18  ;;  %v9052_v3 = vor.u32 %v10600_v60, %v9051_v34  ;;  %v10599_v18 = vld [vmem:[#allocation11 + $0x74] sm:$0xf] }
 0x539   : > { %v3842_v10 = vpop.f32.mrf.mxu1 }
 0x53a   : > { %v3999_v15 = vmul.f32 %v3995_v20, %v3855_v19  ;;  %v3940_v7 = vpop.f32.mrf.mxu0  ;;  %v3843_v29 = vadd.f32 %v3842_v10, %v3828_v1  ;;  %v9035_v10 = vld [vmem:[#allocation11 + $0x50] sm:$0xf]  ;;  %4395 = vmatpush.bf16.msra.mxu3 %v9052_v3 }
 0x53c   : > { %v4019_v23 = vadd.f32 %v4015_v4, %v3999_v15 }
 0x53f   : > { %v3856_v58 = vpop.f32.mrf.mxu2 }
 0x540   : > { %v13059_v12 = vpop.f32.mrf.mxu3  ;;  %v3857_v27 = vadd.f32 %v3856_v58, %v3843_v29  ;;  %v10596_v58 = vld [vmem:[#allocation11 + $0x54] sm:$0xf0] }
 0x541   : > { %v3910_v17 = vpop.f32.mrf.mxu1  ;;  %v9036_v29 = vor.u32 %v10596_v58, %v9035_v10  ;;  %v9003_v58 = vld [vmem:[#allocation11 + $0x10] sm:$0xf] }
 0x542   : > { %v4003_v37 = vmul.f32 %v3995_v20, %v3857_v27  ;;  %v3966_v47 = vpop.f32.mrf.mxu0  ;;  %v9056_v20 = vor.u32 %v10599_v18, %v9053_v6  ;;  %v10594_v27 = vld [vmem:[#allocation11 + $0x44] sm:$0xf0] }
 0x544   : > { %v4023_v49 = vadd.f32 %v4015_v4, %v4003_v37  ;;  %4437 = vmatpush.bf16.msra.mxu0 %v9056_v20  ;;  %v10595_v37 = vld [vmem:[#allocation11 + $0x54] sm:$0xf] }
 0x547   : > { %v3882_v24 = vpop.f32.mrf.mxu2 }
 0x548   : > { %v3924_v26 = vpop.f32.mrf.mxu3  ;;  %v3883_v41 = vadd.f32 %v3882_v24, %v3868_v63 }
 0x549   : > { %v3925_v62 = vadd.f32 %v3924_v26, %v3910_v17  ;;  %v3912_v54 = vpop.f32.mrf.mxu1 }
 0x54a   : > { %v3897_v55 = vadd.f32 %v3896_v5, %v3883_v41  ;;  %v10598_v5 = vld [vmem:[#allocation11 + $0x64] sm:$0xf0]  ;;  %v3968_v15 = vpop.f32.mrf.mxu0 }
 0x54b   : > { %v3939_v28 = vadd.f32 %v3938_v13, %v3925_v62  ;;  %v9044_v17 = vor.u32 %v10598_v5, %v9043_v61  ;;  %v10616_v62 = vld [vmem:[#allocation11 + $0xf4] sm:$0xf0] }
 0x54c   : > { %v4000_v9 = vmul.f32 %v3996_v48, %v3897_v55  ;;  %v10612_v55 = vld [vmem:[#allocation11 + $0xd4] sm:$0xf0] }
 0x54d   : > { %v4001_v59 = vmul.f32 %v3997_v16, %v3939_v28  ;;  %4396 = vmatpush.bf16.msra.mxu3 %v9044_v17 }
 0x54e   : > { %v4020_v19 = vadd.f32 %v13061_v22, %v4000_v9 }
 0x54f   : > { %v4021_v30 = vadd.f32 %v4017_v0, %v4001_v59  ;;  %v3884_v31 = vpop.f32.mrf.mxu2 }
 0x550   : > { %v3926_v36 = vpop.f32.mrf.mxu3  ;;  %v3885_v63 = vadd.f32 %v3884_v31, %v3870_v8  ;;  %v9115_v8 = vld [vmem:[#allocation11 + $0xf0] sm:$0xf] }
 0x551   : > { %v4027_v32 = vmax.f32 %v4019_v23, %v4021_v30  ;;  %v3927_v40 = vadd.f32 %v3926_v36, %v3912_v54  ;;  %v3980_v50 = vpop.f32.mrf.mxu1  ;;  %v9027_v23 = vld [vmem:[#allocation11 + $0x40] sm:$0xf]  ;;  %v9116_v30 = vor.u32 %v10616_v62, %v9115_v8  ;;  %4397 = vmatpush.bf16.msra.mxu3 %v9036_v29 }
 0x552   : > { %v3899_v39 = vadd.f32 %v13059_v12, %v3885_v63  ;;  %v9045_v12 = vld [vmem:[#allocation11 + $0x68] sm:$0xf0]  ;;  %v9107_v36 = vld [vmem:[#allocation11 + $0xe0] sm:$0xf] }
 0x553   : > { %v3941_v35 = vadd.f32 %v3940_v7, %v3927_v40  ;;  %v4031_v44 = vmax.f32 %v4027_v32, 0.0  ;;  %4409 = vmatpush.bf16.msrb.mxu1 %v9116_v30  ;;  %v9021_v30 = vld [vmem:[#allocation11 + $0x38] sm:$0xf0] }
 0x554   : > { %v4004_v43 = vmul.f32 %v3996_v48, %v3899_v39  ;;  %v10592_v48 = vld [vmem:[#allocation11 + $0x34] sm:$0xf0] }
 0x555   : > { %v4005_v45 = vmul.f32 %v3997_v16, %v3941_v35  ;;  %v4039_v52 = vrot.slane %v4031_v44, 7  ;;  %v10597_v16 = vld [vmem:[#allocation11 + $0x64] sm:$0xf]  ;;  %v9037_v35 = vld [vmem:[#allocation11 + $0x58] sm:$0xf0] }
 0x556   : > { %v9048_v31 = vor.u32 %v10597_v16, %v9045_v12  ;;  %v9040_v46 = vor.u32 %v10595_v37, %v9037_v35  ;;  %v10610_v12 = vld [vmem:[#allocation11 + $0xc4] sm:$0xf0]  ;;  %v9171_v35 = vld [vmem:[#allocation11 + $0x160] sm:$0xf] }
 0x557   : > { %v4025_v21 = vadd.f32 %v4017_v0, %v4005_v45  ;;  %v13069_v14 = vsel %vm2536_vm2, 0.0, %v4039_v52  ;;  %v9108_v45 = vor.u32 %v10614_v42, %v9107_v36 }
 0x558   : > { %v3952_v33 = vpop.f32.mrf.mxu2  ;;  %v4063_v28 = vrot.slane %v13069_v14, 1  ;;  %4438 = vmatpush.bf16.msra.mxu0 %v9048_v31  ;;  %v10615_v31 = vld [vmem:[#allocation11 + $0xf4] sm:$0xf] }
 0x559   : > { %v4029_v53 = vmax.f32 %v4023_v49, %v4025_v21  ;;  %v3967_v56 = vadd.f32 %v3966_v47, %v3952_v33  ;;  %v3982_v32 = vpop.f32.mrf.mxu1  ;;  %v9099_v47 = vld [vmem:[#allocation11 + $0xd0] sm:$0xf]  ;;  %v10593_v33 = vld [vmem:[#allocation11 + $0x44] sm:$0xf]  ;;  %4410 = vmatpush.bf16.msrb.mxu1 %v9108_v45  ;;  %v9013_v45 = vld [vmem:[#allocation11 + $0x28] sm:$0xf0] }
 0x55a   : > { %v9100_v34 = vor.u32 %v10612_v55, %v9099_v47  ;;  %v9109_v47 = vld [vmem:[#allocation11 + $0xe8] sm:$0xf0] }
 0x55b   : > { %v4033_v1 = vmax.f32 %v4029_v53, 0.0  ;;  %v3981_v2 = vadd.f32 %v3980_v50, %v3967_v56  ;;  %v9028_v50 = vor.u32 %v10594_v27, %v9027_v23  ;;  %v9019_v53 = vld [vmem:[#allocation11 + $0x30] sm:$0xf]  ;;  %v4024_v56 = vadd.f32 %v13061_v22, %v4004_v43  ;;  %v10630_v43 = vld [vmem:[#allocation11 + $0x164] sm:$0xf0] }
 0x55c   : > { %4439 = vmatpush.bf16.msra.mxu0 %v9040_v46  ;;  %v9020_v63 = vor.u32 %v10592_v48, %v9019_v53  ;;  %v10613_v46 = vld [vmem:[#allocation11 + $0xe4] sm:$0xf]  ;;  %v10628_v53 = vld [vmem:[#allocation11 + $0x154] sm:$0xf0]  ;;  %v10587_v48 = vld [vmem:[#allocation11 + $0x14] sm:$0xf] }
 0x55d   : > { %v4041_v11 = vrot.slane %v4033_v1, 7  ;;  %v4002_v13 = vmul.f32 %v13063_v51, %v3981_v2  ;;  %4398 = vmatpush.bf16.msra.mxu3 %v9028_v50  ;;  %v9011_v1 = vld [vmem:[#allocation11 + $0x20] sm:$0xf]  ;;  %v10590_v2 = vld [vmem:[#allocation11 + $0x24] sm:$0xf0]  ;;  %4411 = vmatpush.bf16.msrb.mxu1 %v9100_v34 }
 0x55e   : > { %v9012_v22 = vor.u32 %v10590_v2, %v9011_v1  ;;  %v10606_v50 = vld [vmem:[#allocation11 + $0xa4] sm:$0xf0]  ;;  %v10611_v34 = vld [vmem:[#allocation11 + $0xd4] sm:$0xf]  ;;  %v10604_v1 = vld [vmem:[#allocation11 + $0x94] sm:$0xf0] }
 0x55f   : > { %v4022_v24 = vadd.f32 %v13065_v57, %v4002_v13  ;;  %v13075_v25 = vsel %vm2536_vm2, %v4039_v52, %v4041_v11  ;;  %v13078_v26 = vsel %vm2536_vm2, %v4041_v11, 0.0  ;;  %v9029_v52 = vld [vmem:[#allocation11 + $0x48] sm:$0xf0] }
 0x560   : > { %v3954_v4 = vpop.f32.mrf.mxu2  ;;  %v4064_v0 = vrot.slane %v13075_v25, 1  ;;  %v4069_v7 = vrot.slane %v13078_v26, 1  ;;  %v9032_v60 = vor.u32 %v10593_v33, %v9029_v52  ;;  %v4090_v20 = vrot.slane %v13075_v25, 2  ;;  %v9163_v52 = vld [vmem:[#allocation11 + $0x150] sm:$0xf] }
 0x561   : > { %v3969_v59 = vadd.f32 %v3968_v15, %v3954_v4  ;;  %v4028_v54 = vmax.f32 %v4020_v19, %v4022_v24  ;;  %4399 = vmatpush.bf16.msra.mxu3 %v9020_v63  ;;  %v4092_v8 = vrot.slane %v13078_v26, 2  ;;  %v4089_v15 = vrot.slane %v13069_v14, 2  ;;  %v8995_v26 = vld [vmem:[#allocation11] sm:$0xf]  ;;  %v10591_v14 = vld [vmem:[#allocation11 + $0x34] sm:$0xf] }
 0x562   : > { %v4065_v40 = vsel %vm1345_vm0, %v4063_v28, %v4064_v0  ;;  %v4070_v41 = vsel %vm1345_vm0, %v4064_v0, %v4069_v7  ;;  %4440 = vmatpush.bf16.msra.mxu0 %v9032_v60  ;;  %v10586_v0 = vld [vmem:[#allocation11 + $0x4] sm:$0xf0]  ;;  %v9091_v7 = vld [vmem:[#allocation11 + $0xc0] sm:$0xf]  ;;  %v9024_v36 = vor.u32 %v10591_v14, %v9021_v30  ;;  %v9101_v60 = vld [vmem:[#allocation11 + $0xd8] sm:$0xf0] }
 0x563   : > { %v3983_v38 = vadd.f32 %v3982_v32, %v3969_v59  ;;  %v11207_v44 = vpack.i.bf16 %v4070_v41, %v4065_v40  ;;  %v4032_v21 = vmax.f32 %v4028_v54, 0.0  ;;  %v4091_v4 = vsel %vm2588_vm3, %v4089_v15, %v4090_v20  ;;  %v9179_v59 = vld [vmem:[#allocation11 + $0x170] sm:$0xf]  ;;  %v10632_v54 = vld [vmem:[#allocation11 + $0x174] sm:$0xf0] }
 0x564   : > { %v4093_v28 = vsel %vm2588_vm3, %v4090_v20, %v4092_v8  ;;  %v8996_v29 = vor.u32 %v10586_v0, %v8995_v26  ;;  %v9092_v23 = vor.u32 %v10610_v12, %v9091_v7  ;;  %v9180_v27 = vor.u32 %v10632_v54, %v9179_v59  ;;  %v9117_v32 = vld [vmem:[#allocation11 + $0xf8] sm:$0xf0]  ;;  %v9083_v40 = vld [vmem:[#allocation11 + $0xb0] sm:$0xf]  ;;  %v10608_v41 = vld [vmem:[#allocation11 + $0xb4] sm:$0xf0] }
 0x565   : > { %v4006_v49 = vmul.f32 %v13063_v51, %v3983_v38  ;;  %11208 = vrot.lane.b32.xlu0 %v11207_v44, %s12143_s13  ;;  %v4040_v51 = vrot.slane %v4032_v21, 7  ;;  %4400 = vmatpush.bf16.msra.mxu3 %v9012_v22  ;;  %v11217_v25 = vpack.i.bf16 %v4093_v28, %v4091_v4  ;;  %v9120_v42 = vor.u32 %v10615_v31, %v9117_v32  ;;  %v10589_v38 = vld [vmem:[#allocation11 + $0x24] sm:$0xf]  ;;  %v9075_v21 = vld [vmem:[#allocation11 + $0xa0] sm:$0xf] }
 0x566   : > { %4412 = vmatpush.bf16.msrb.mxu1 %v9092_v23  ;;  %4423 = vmatpush.bf16.msrb.mxu2 %v9180_v27  ;;  %v9084_v37 = vor.u32 %v10608_v41, %v9083_v40  ;;  %v9172_v44 = vor.u32 %v10630_v43, %v9171_v35  ;;  %v9016_v55 = vor.u32 %v10589_v38, %v9013_v45  ;;  %v9067_v63 = vld [vmem:[#allocation11 + $0x90] sm:$0xf]  ;;  %v10624_v8 = vld [vmem:[#allocation11 + $0x134] sm:$0xf0]  ;;  %v9181_v15 = vld [vmem:[#allocation11 + $0x178] sm:$0xf0] }
 0x567   : > { %v4026_v9 = vadd.f32 %v13065_v57, %v4006_v49  ;;  %v4050_v10 = vsel %vm2536_vm2, 0.0, %v4040_v51  ;;  %v10588_v57 = vld [vmem:[#allocation11 + $0x14] sm:$0xf0]  ;;  %4441 = vmatpush.bf16.msra.mxu0 %v9024_v36  ;;  %v9112_v49 = vor.u32 %v10613_v46, %v9109_v47  ;;  %v9076_v33 = vor.u32 %v10606_v50, %v9075_v21  ;;  %v9147_v20 = vld [vmem:[#allocation11 + $0x130] sm:$0xf] }
 0x568   : > { %v4066_v17 = vrot.slane %v4050_v10, 1  ;;  %v9004_v39 = vor.u32 %v10588_v57, %v9003_v58  ;;  %v9068_v2 = vor.u32 %v10604_v1, %v9067_v63  ;;  %v8997_v58 = vld [vmem:[#allocation11 + $0x8] sm:$0xf0]  ;;  %v10609_v57 = vld [vmem:[#allocation11 + $0xc4] sm:$0xf] }
 0x569   : > { %v4030_v61 = vmax.f32 %v4024_v56, %v4026_v9  ;;  %v9164_v56 = vor.u32 %v10628_v53, %v9163_v52  ;;  %v9005_v9 = vld [vmem:[#allocation11 + $0x18] sm:$0xf0]  ;;  %v10622_v26 = vld [vmem:[#allocation11 + $0x124] sm:$0xf0]  ;;  %v10605_v0 = vld [vmem:[#allocation11 + $0xa4] sm:$0xf] }
 0x56a   : > { %4401 = vmatpush.bf16.msra.mxu3 %v9004_v39  ;;  %4413 = vmatpush.bf16.msrb.mxu1 %v9084_v37  ;;  %v10607_v39 = vld [vmem:[#allocation11 + $0xb4] sm:$0xf]  ;;  %v10629_v12 = vld [vmem:[#allocation11 + $0x164] sm:$0xf]  ;;  %v9173_v59 = vld [vmem:[#allocation11 + $0x168] sm:$0xf0] }
 0x56b   : > { %v4034_v3 = vmax.f32 %v4030_v61, 0.0  ;;  %4424 = vmatpush.bf16.msrb.mxu2 %v9172_v44  ;;  %4442 = vmatpush.bf16.msra.mxu0 %v9016_v55  ;;  %v9008_v61 = vor.u32 %v10587_v48, %v9005_v9  ;;  %v9176_v54 = vor.u32 %v10629_v12, %v9173_v59  ;;  %v9131_v23 = vld [vmem:[#allocation11 + $0x110] sm:$0xf]  ;;  %v10620_v27 = vld [vmem:[#allocation11 + $0x114] sm:$0xf0]  ;;  %v10644_v59 = vld [vmem:[#allocation14 + $0x58] sm:$0xff] }
 0x56c   : > { %v10627_v30 = vld [vmem:[#allocation11 + $0x154] sm:$0xf]  ;;  %v9165_v31 = vld [vmem:[#allocation11 + $0x158] sm:$0xf0]  ;;  %v9132_v40 = vor.u32 %v10620_v27, %v9131_v23  ;;  %v9123_v37 = vld [vmem:[#allocation11 + $0x100] sm:$0xf] }
 0x56d   : > { %v4043_v5 = vrot.slane %v4034_v3, 7  ;;  %v9155_v3 = vld [vmem:[#allocation11 + $0x140] sm:$0xf]  ;;  %v10603_v36 = vld [vmem:[#allocation11 + $0x94] sm:$0xf]  ;;  %v9168_v41 = vor.u32 %v10627_v30, %v9165_v31  ;;  %v10634_v27 = vld [vmem:[#allocation14 + $0x8] sm:$0xff] }
 0x56e   : > { %4402 = vmatpush.bf16.msra.mxu3 %v8996_v29  ;;  %4414 = vmatpush.bf16.msrb.mxu1 %v9076_v33  ;;  %v9077_v29 = vld [vmem:[#allocation11 + $0xa8] sm:$0xf0]  ;;  %v9069_v32 = vld [vmem:[#allocation11 + $0x98] sm:$0xf0]  ;;  %v10618_v35 = vld [vmem:[#allocation11 + $0x104] sm:$0xf0] }
 0x56f   : > { %v4044_v11 = vsel %vm2536_vm2, %v4040_v51, %v4043_v5  ;;  %v4052_v13 = vsel %vm2536_vm2, %v4043_v5, 0.0  ;;  %v9104_v51 = vor.u32 %v10611_v34, %v9101_v60  ;;  %4425 = vmatpush.bf16.msrb.mxu2 %v9164_v56  ;;  %4443 = vmatpush.bf16.msra.mxu0 %v9008_v61  ;;  %v10626_v5 = vld [vmem:[#allocation11 + $0x144] sm:$0xf0]  ;;  %v9080_v14 = vor.u32 %v10605_v0, %v9077_v29  ;;  %v10601_v43 = vld [vmem:[#allocation11 + $0x84] sm:$0xf]  ;;  %v10636_v29 = vld [vmem:[#allocation14 + $0x18] sm:$0xff] }
 0x570   : > { %v11202_v18 = vpack.i.bf16 %v4044_v11, %v4050_v10  ;;  %v4067_v6 = vrot.slane %v4044_v11, 1  ;;  %v4071_v19 = vrot.slane %v4052_v13, 1  ;;  %v10585_v10 = vld [vmem:[#allocation11 + $0x4] sm:$0xf]  ;;  %v9156_v22 = vor.u32 %v10626_v5, %v9155_v3  ;;  %v9093_v11 = vld [vmem:[#allocation11 + $0xc8] sm:$0xf0] }
 0x571   : > { %v9000_v13 = vor.u32 %v10585_v10, %v8997_v58  ;;  %v9124_v38 = vor.u32 %v10618_v35, %v9123_v37  ;;  %v9061_v44 = vld [vmem:[#allocation11 + $0x88] sm:$0xf0]  ;;  %v10625_v45 = vld [vmem:[#allocation11 + $0x144] sm:$0xf]  ;;  %v9149_v21 = vld [vmem:[#allocation11 + $0x138] sm:$0xf0] }
 0x572   : > { %11203 = vrot.lane.b32.xlu2 %v11202_v18, %s12143_s13  ;;  %v4068_v24 = vsel %vm1345_vm0, %v4066_v17, %v4067_v6  ;;  %v4072_v62 = vsel %vm1345_vm0, %v4067_v6, %v4071_v19  ;;  %4451 = vmatpush.bf16.msrb.mxu3 %v9120_v42  ;;  %v9096_v17 = vor.u32 %v10609_v57, %v9093_v11  ;;  %v9059_v18 = vld [vmem:[#allocation11 + $0x80] sm:$0xf]  ;;  %v10602_v6 = vld [vmem:[#allocation11 + $0x84] sm:$0xf0]  ;;  %v9157_v46 = vld [vmem:[#allocation11 + $0x148] sm:$0xf0] }
 0x573   : > { %v11212_v16 = vpack.i.bf16 %v4072_v62, %v4068_v24  ;;  %4415 = vmatpush.bf16.msrb.mxu1 %v9068_v2  ;;  %4426 = vmatpush.bf16.msrb.mxu2 %v9156_v22  ;;  %v9060_v19 = vor.u32 %v10602_v6, %v9059_v18  ;;  %v9148_v24 = vor.u32 %v10624_v8, %v9147_v20  ;;  %v9085_v62 = vld [vmem:[#allocation11 + $0xb8] sm:$0xf0]  ;;  %v10621_v33 = vld [vmem:[#allocation11 + $0x124] sm:$0xf]  ;;  %v9141_v52 = vld [vmem:[#allocation11 + $0x128] sm:$0xf0] }
 0x574   : > { %4444 = vmatpush.bf16.msra.mxu0 %v9000_v13  ;;  %v9088_v4 = vor.u32 %v10607_v39, %v9085_v62  ;;  %v9072_v42 = vor.u32 %v10603_v36, %v9069_v32  ;;  %v9064_v47 = vor.u32 %v10601_v43, %v9061_v44  ;;  %v9160_v55 = vor.u32 %v10625_v45, %v9157_v46  ;;  %v10619_v48 = vld [vmem:[#allocation11 + $0x114] sm:$0xf]  ;;  %v9133_v56 = vld [vmem:[#allocation11 + $0x118] sm:$0xf0]  ;;  %v10617_v34 = vld [vmem:[#allocation11 + $0x104] sm:$0xf] }
 0x575   : > { %11213 = vrot.lane.b32.xlu1 %v11212_v16, %s12143_s13  ;;  %v10631_v16 = vld [vmem:[#allocation11 + $0x174] sm:$0xf]  ;;  %v9144_v53 = vor.u32 %v10621_v33, %v9141_v52  ;;  %v9136_v9 = vor.u32 %v10619_v48, %v9133_v56  ;;  %v9125_v60 = vld [vmem:[#allocation11 + $0x108] sm:$0xf0]  ;;  %v10637_v0 = vld [vmem:[#allocation14 + $0x20] sm:$0xff] }
 0x576   : > { %4452 = vmatpush.bf16.msrb.mxu3 %v9112_v49  ;;  %v9184_v28 = vor.u32 %v10631_v16, %v9181_v15  ;;  %v10623_v49 = vld [vmem:[#allocation11 + $0x134] sm:$0xf]  ;;  %v9128_v63 = vor.u32 %v10617_v34, %v9125_v60  ;;  %v10640_v16 = vld [vmem:[#allocation14 + $0x38] sm:$0xff]  ;;  %v10642_v31 = vld [vmem:[#allocation14 + $0x48] sm:$0xff] }
 0x577   : > { %4416 = vmatpush.bf16.msrb.mxu1 %v9060_v19  ;;  %4427 = vmatpush.bf16.msrb.mxu2 %v9148_v24  ;;  %v9152_v50 = vor.u32 %v10623_v49, %v9149_v21  ;;  %v10648_v15 = vld [vmem:[#allocation14 + $0x78] sm:$0xff]  ;;  %v10643_v23 = vld [vmem:[#allocation14 + $0x50] sm:$0xff]  ;;  %v10633_v36 = vld [vmem:[#allocation14] sm:$0xff] }
 0x578   : > { %4656 = vmatpush.bf16.msrb.mxu0 %v10648_v15  ;;  %v10641_v32 = vld [vmem:[#allocation14 + $0x40] sm:$0xff] }
 0x57a   : > { %11218 = vrot.lane.b32.xlu2 %v11217_v25, %s12143_s13  ;;  %4453 = vmatpush.bf16.msrb.mxu3 %v9104_v51  ;;  %v9139_v25 = vld [vmem:[#allocation11 + $0x120] sm:$0xf] }
 0x57b   : > { %v9140_v7 = vor.u32 %v10622_v26, %v9139_v25  ;;  %4465 = vmatpush.bf16.msra.mxu1 %v9184_v28  ;;  %v10647_v28 = vld [vmem:[#allocation14 + $0x70] sm:$0xff]  ;;  %v10638_v25 = vld [vmem:[#allocation14 + $0x28] sm:$0xff] }
 0x57c   : > { %4657 = vmatpush.bf16.msrb.mxu0 %v10647_v28  ;;  %v10646_v26 = vld [vmem:[#allocation14 + $0x68] sm:$0xff] }
 0x57d   : > { %4428 = vmatpush.bf16.msrb.mxu2 %v9140_v7  ;;  %v10645_v7 = vld [vmem:[#allocation14 + $0x60] sm:$0xff] }
 0x57e   : > { %4454 = vmatpush.bf16.msrb.mxu3 %v9096_v17 }
 0x57f   : > { %4466 = vmatpush.bf16.msra.mxu1 %v9176_v54  ;;  %v10635_v54 = vld [vmem:[#allocation14 + $0x10] sm:$0xff] }
 0x580   : > { %4658 = vmatpush.bf16.msrb.mxu0 %v10646_v26 }
 0x581   : > { %4429 = vmatpush.bf16.msrb.mxu2 %v9132_v40 }
 0x582   : > { %4455 = vmatpush.bf16.msrb.mxu3 %v9088_v4  ;;  %v10639_v4 = vld [vmem:[#allocation14 + $0x30] sm:$0xff] }
 0x583   : > { %4467 = vmatpush.bf16.msra.mxu1 %v9168_v41 }
 0x584   : > { %4659 = vmatpush.bf16.msrb.mxu0 %v10645_v7 }
 0x585   : > { %4430 = vmatpush.bf16.msrb.mxu2 %v9124_v38 }
 0x586   : > { %4456 = vmatpush.bf16.msrb.mxu3 %v9080_v14 }
 0x587   : > { %4468 = vmatpush.bf16.msra.mxu1 %v9160_v55 }
 0x588   : > { %4660 = vmatpush.bf16.msrb.mxu0 %v10644_v59 }
 0x589   : > { %4642 = vmatpush.bf16.msra.mxu2 %v10640_v16 }
 0x58a   : > { %4457 = vmatpush.bf16.msrb.mxu3 %v9072_v42  ;;  %v4479_v42 = vld [vmem:[#allocation13] sm:$0xf] }
 0x58b   : > { %4469 = vmatpush.bf16.msra.mxu1 %v9152_v50  ;;  %v4482_v35 = vperm.slane %v4479_v42, 2  ;;  %v4481_v38 = vperm.slane %v4479_v42, 0  ;;  %v4491_v50 = vperm.slane %v4479_v42, 1 }
 0x58c   : > { %4661 = vmatpush.bf16.msrb.mxu0 %v10643_v23  ;;  %v10680_v23 = vld [vmem:[#allocation17 + $0xf8] sm:$0xff] }
 0x58d   : > { %4643 = vmatpush.bf16.msra.mxu2 %v10639_v4  ;;  %v4486_v46 = vperm.slane %v4482_v35, 0  ;;  %v4485_v21 = vperm.slane %v4481_v38, 0  ;;  %v4495_v60 = vperm.slane %v4491_v50, 1  ;;  %v10670_v35 = vld [vmem:[#allocation17 + $0xa8] sm:$0xff]  ;;  %v10653_v38 = vld [vmem:[#allocation17 + $0x20] sm:$0xff]  ;;  %v10652_v50 = vld [vmem:[#allocation17 + $0x18] sm:$0xff] }
 0x58e   : > { %4458 = vmatpush.bf16.msrb.mxu3 %v9064_v47  ;;  %v4492_v47 = vperm.slane %v4479_v42, 3  ;;  %v10662_v42 = vld [vmem:[#allocation17 + $0x68] sm:$0xff] }
 0x58f   : > { %4470 = vmatpush.bf16.msra.mxu1 %v9144_v53 }
 0x590   : > { %4662 = vmatpush.bf16.msrb.mxu0 %v10642_v31  ;;  %v4496_v56 = vperm.slane %v4492_v47, 1  ;;  %v10679_v31 = vld [vmem:[#allocation17 + $0xf0] sm:$0xff] }
 0x591   : > { %4644 = vmatpush.bf16.msra.mxu2 %v10638_v25 }
 0x593   : > { %4471 = vmatpush.bf16.msra.mxu1 %v9136_v9 }
 0x594   : > { %4663 = vmatpush.bf16.msrb.mxu0 %v10641_v32  ;;  %v10671_v32 = vld [vmem:[#allocation17 + $0xb0] sm:$0xff] }
 0x595   : > { %4645 = vmatpush.bf16.msra.mxu2 %v10637_v0 }
 0x597   : > { %4472 = vmatpush.bf16.msra.mxu1 %v9128_v63 }
 0x599   : > { %4646 = vmatpush.bf16.msra.mxu2 %v10636_v29 }
 0x59d   : > { %4647 = vmatpush.bf16.msra.mxu2 %v10635_v54  ;;  %v10656_v54 = vld [vmem:[#allocation17 + $0x38] sm:$0xff] }
 0x5a1   : > { %4648 = vmatpush.bf16.msra.mxu2 %v10634_v27  ;;  %v10664_v27 = vld [vmem:[#allocation17 + $0x78] sm:$0xff] }
 0x5a5   : > { %4649 = vmatpush.bf16.msra.mxu2 %v10633_v36  ;;  %v10663_v36 = vld [vmem:[#allocation17 + $0x70] sm:$0xff] }
 0x5cc   : > { %v11204_v61 = vpop.permute.xlu2 %11203 }
 0x5cd   : > { %v11206_v1 = vunpack.i.h.bf16 %v11204_v61  ;;  %v11205_v2 = vunpack.i.l.bf16 %v11204_v61 }
 0x5d4   : > { %v11219_v57 = vpop.permute.xlu2 %11218 }
 0x5d5   : > { %v11221_v13 = vunpack.i.h.bf16 %v11219_v57  ;;  %v11220_v17 = vunpack.i.l.bf16 %v11219_v57 }
 0x5d7   : > { %v11209_v51 = vpop.permute.xlu0 %11208 }
 0x5d8   : > { %v11211_v3 = vunpack.i.h.bf16 %v11209_v51  ;;  %v11210_v5 = vunpack.i.l.bf16 %v11209_v51 }
 0x5da   : > { %v4101_v10 = vsel %vm3813_vm6, %v11206_v1, %v11211_v3  ;;  %v4100_v22 = vsel %vm3813_vm6, %v11205_v2, %v11210_v5 }
 0x5db   : > { %v4104_v58 = vpack.c.bf16 %v4101_v10, %v4100_v22 }
 0x5dd   : > { %4403 = vmatmul.bf16.vlgmr.msra.gmra.mxu3 %v4104_v58  ;;  %4445 = vmatmul.bf16.vlgmr.msra.gmra.mxu0 %v4104_v58 }
 0x5de   : > { %5229 = vmatpush.bf16.msra.mxu3 %v10656_v54  ;;  %5268 = vmatpush.bf16.msra.mxu0 %v10680_v23  ;;  %v10692_v54 = vld [vmem:[#allocation17 + $0x158] sm:$0xff] }
 0x5df   : > { %v10700_v23 = vld [vmem:[#allocation17 + $0x198] sm:$0xff] }
 0x5e2   : > { %5269 = vmatpush.bf16.msra.mxu0 %v10679_v31 }
 0x5e7   : > { %v11214_v11 = vpop.permute.xlu1 %11213 }
 0x5e8   : > { %v11216_v18 = vunpack.i.h.bf16 %v11214_v11  ;;  %v11215_v6 = vunpack.i.l.bf16 %v11214_v11 }
 0x5ea   : > { %v4081_v19 = vsel %vm3813_vm6, %v11210_v5, %v11215_v6  ;;  %v4082_v20 = vsel %vm3813_vm6, %v11211_v3, %v11216_v18  ;;  %v4102_v8 = vsel %vm3813_vm6, %v11215_v6, %v11220_v17  ;;  %v4103_v39 = vsel %vm3813_vm6, %v11216_v18, %v11221_v13 }
 0x5eb   : > { %v4105_v24 = vpack.c.bf16 %v4082_v20, %v4081_v19  ;;  %v4106_v62 = vpack.c.bf16 %v4103_v39, %v4102_v8 }
 0x5ed   : > { %4417 = vmatmul.bf16.vlgmr.msrb.gmra.mxu1 %v4105_v24  ;;  %4431 = vmatmul.bf16.vlgmr.msrb.gmra.mxu2 %v4106_v62 }
 0x5ee   : > { %4459 = vmatmul.bf16.vlgmr.msrb.gmra.mxu3 %v4105_v24  ;;  %v4670_v24 = vld [vmem:[#allocation16] sm:$0x3]  ;;  %5242 = vmatpush.bf16.msrb.mxu1 %v10664_v27  ;;  %v10681_v27 = vld [vmem:[#allocation17 + $0x100] sm:$0xff] }
 0x5ef   : > { %v4671_v16 = vperm.slane %v4670_v24, 0  ;;  %v4674_v28 = vperm.slane %v4670_v24, 1  ;;  %v10685_v24 = vld [vmem:[#allocation17 + $0x120] sm:$0xff] }
 0x5f2   : > { %5243 = vmatpush.bf16.msrb.mxu1 %v10663_v36 }
 0x5f6   : > { %5244 = vmatpush.bf16.msrb.mxu1 %v10662_v42  ;;  %v10689_v42 = vld [vmem:[#allocation17 + $0x140] sm:$0xff] }
 0x5fd   : > { %4473 = vmatmul.bf16.vlgmr.msra.gmra.mxu1 %v4106_v62 }
 0x65a   : > { %v4446_v43 = vpop.f32.mrf.mxu0 }
 0x660   : > { %v4404_v12 = vpop.f32.mrf.mxu3 }
 0x662   : > { %v4448_v51 = vpop.f32.mrf.mxu0 }
 0x668   : > { %v4406_v14 = vpop.f32.mrf.mxu3 }
 0x66a   : > { %v4418_v30 = vpop.f32.mrf.mxu1 }
 0x66b   : > { %v4419_v44 = vadd.f32 %v4418_v30, %v4404_v12  ;;  %v10655_v30 = vld [vmem:[#allocation17 + $0x30] sm:$0xff] }
 0x66c   : > { %5230 = vmatpush.bf16.msra.mxu3 %v10655_v30  ;;  %v10699_v30 = vld [vmem:[#allocation17 + $0x190] sm:$0xff] }
 0x670   : > { %v4432_v40 = vpop.f32.mrf.mxu2 }
 0x671   : > { %v4460_v37 = vpop.f32.mrf.mxu3  ;;  %v4433_v49 = vadd.f32 %v4432_v40, %v4419_v44  ;;  %v10654_v40 = vld [vmem:[#allocation17 + $0x28] sm:$0xff] }
 0x672   : > { %v4420_v41 = vpop.f32.mrf.mxu1  ;;  %v4461_v45 = vadd.f32 %v4460_v37, %v4446_v43  ;;  %5231 = vmatpush.bf16.msra.mxu3 %v10654_v40  ;;  %v10690_v40 = vld [vmem:[#allocation17 + $0x148] sm:$0xff] }
 0x673   : > { %v4421_v53 = vadd.f32 %v4420_v41, %v4406_v14  ;;  %v4487_v34 = vmul.f32 %v4485_v21, %v4433_v49  ;;  %v10672_v14 = vld [vmem:[#allocation17 + $0xb8] sm:$0xff]  ;;  %v10678_v41 = vld [vmem:[#allocation17 + $0xe8] sm:$0xff]  ;;  %v10661_v49 = vld [vmem:[#allocation17 + $0x60] sm:$0xff] }
 0x674   : > { %5255 = vmatpush.bf16.msrb.mxu2 %v10672_v14  ;;  %5270 = vmatpush.bf16.msra.mxu0 %v10678_v41  ;;  %v10691_v14 = vld [vmem:[#allocation17 + $0x150] sm:$0xff]  ;;  %v10698_v41 = vld [vmem:[#allocation17 + $0x188] sm:$0xff] }
 0x675   : > { %v4497_v3 = vadd.f32 %v4495_v60, %v4487_v34  ;;  %5245 = vmatpush.bf16.msrb.mxu1 %v10661_v49 }
 0x676   : > { %5232 = vmatpush.bf16.msra.mxu3 %v10653_v38 }
 0x678   : > { %v4434_v52 = vpop.f32.mrf.mxu2  ;;  %5256 = vmatpush.bf16.msrb.mxu2 %v10671_v32 }
 0x679   : > { %v4462_v9 = vpop.f32.mrf.mxu3  ;;  %v4435_v61 = vadd.f32 %v4434_v52, %v4421_v53  ;;  %v10676_v52 = vld [vmem:[#allocation17 + $0xd8] sm:$0xff] }
 0x67a   : > { %v4474_v55 = vpop.f32.mrf.mxu1  ;;  %v4463_v63 = vadd.f32 %v4462_v9, %v4448_v51  ;;  %5233 = vmatpush.bf16.msra.mxu3 %v10652_v50  ;;  %v10651_v9 = vld [vmem:[#allocation17 + $0x10] sm:$0xff] }
 0x67b   : > { %v4475_v33 = vadd.f32 %v4474_v55, %v4461_v45  ;;  %v4489_v5 = vmul.f32 %v4485_v21, %v4435_v61  ;;  %v10677_v45 = vld [vmem:[#allocation17 + $0xe0] sm:$0xff] }
 0x67c   : > { %5257 = vmatpush.bf16.msrb.mxu2 %v10670_v35  ;;  %v10669_v21 = vld [vmem:[#allocation17 + $0xa0] sm:$0xff]  ;;  %5271 = vmatpush.bf16.msra.mxu0 %v10677_v45 }
 0x67d   : > { %v4488_v48 = vmul.f32 %v4486_v46, %v4475_v33  ;;  %v4499_v57 = vadd.f32 %v4495_v60, %v4489_v5  ;;  %v10659_v5 = vld [vmem:[#allocation17 + $0x50] sm:$0xff] }
 0x67e   : > { %5234 = vmatpush.bf16.msra.mxu3 %v10651_v9 }
 0x67f   : > { %v4498_v1 = vadd.f32 %v4496_v56, %v4488_v48  ;;  %v10660_v48 = vld [vmem:[#allocation17 + $0x58] sm:$0xff] }
 0x680   : > { %5258 = vmatpush.bf16.msrb.mxu2 %v10669_v21  ;;  %5272 = vmatpush.bf16.msra.mxu0 %v10676_v52 }
 0x681   : > { %v4501_v22 = vmax.f32 %v4497_v3, %v4498_v1  ;;  %5246 = vmatpush.bf16.msrb.mxu1 %v10660_v48  ;;  %v10675_v3 = vld [vmem:[#allocation17 + $0xd0] sm:$0xff] }
 0x682   : > { %v4476_v2 = vpop.f32.mrf.mxu1 }
 0x683   : > { %v4477_v10 = vadd.f32 %v4476_v2, %v4463_v63  ;;  %v4503_v13 = vmax.f32 %v4501_v22, 0.0  ;;  %v10650_v63 = vld [vmem:[#allocation17 + $0x8] sm:$0xff]  ;;  %v10649_v2 = vld [vmem:[#allocation17] sm:$0xff] }
 0x684   : > { %5235 = vmatpush.bf16.msra.mxu3 %v10650_v63  ;;  %5273 = vmatpush.bf16.msra.mxu0 %v10675_v3  ;;  %v10674_v22 = vld [vmem:[#allocation17 + $0xc8] sm:$0xff] }
 0x685   : > { %v4490_v58 = vmul.f32 %v4486_v46, %v4477_v10  ;;  %v4507_v6 = vrot.slane %v4503_v13, 1  ;;  %v10667_v10 = vld [vmem:[#allocation17 + $0x90] sm:$0xff]  ;;  %5247 = vmatpush.bf16.msrb.mxu1 %v10659_v5 }
 0x687   : > { %v4500_v11 = vadd.f32 %v4496_v56, %v4490_v58  ;;  %v10668_v56 = vld [vmem:[#allocation17 + $0x98] sm:$0xff] }
 0x688   : > { %5259 = vmatpush.bf16.msrb.mxu2 %v10668_v56  ;;  %5236 = vmatpush.bf16.msra.mxu3 %v10649_v2  ;;  %v10688_v58 = vld [vmem:[#allocation17 + $0x138] sm:$0xff] }
 0x689   : > { %v4502_v17 = vmax.f32 %v4499_v57, %v4500_v11  ;;  %v10658_v57 = vld [vmem:[#allocation17 + $0x48] sm:$0xff]  ;;  %5274 = vmatpush.bf16.msra.mxu0 %v10674_v22 }
 0x68a   : > { %v10666_v11 = vld [vmem:[#allocation17 + $0x88] sm:$0xff]  ;;  %5248 = vmatpush.bf16.msrb.mxu1 %v10658_v57 }
 0x68b   : > { %v4504_v18 = vmax.f32 %v4502_v17, 0.0  ;;  %v10687_v17 = vld [vmem:[#allocation17 + $0x130] sm:$0xff]  ;;  %v5392_v22 = vld [vmem:[#allocation20 + $0x188] sm:$0x33] }
 0x68c   : > { %5260 = vmatpush.bf16.msrb.mxu2 %v10667_v10  ;;  %5281 = vmatpush.bf16.msrb.mxu3 %v10688_v58  ;;  %v5391_v10 = vld [vmem:[#allocation20 + $0x180] sm:$0x33] }
 0x68d   : > { %v4508_v19 = vrot.slane %v4504_v18, 1  ;;  %v4512_v20 = vpack.c.bf16 %v4504_v18, %v4503_v13  ;;  %v10673_v13 = vld [vmem:[#allocation17 + $0xc0] sm:$0xff]  ;;  %v5544_v58 = vunpack.c.l.b16 %v5391_v10  ;;  %v5545_v57 = vunpack.c.h.b16 %v5391_v10 }
 0x68e   : > { %5275 = vmatpush.bf16.msra.mxu0 %v10673_v13  ;;  %v10657_v18 = vld [vmem:[#allocation17 + $0x40] sm:$0xff]  ;;  %v5547_v13 = vunpack.c.h.b16 %v5392_v22 }
 0x68f   : > { %v4509_v8 = vsel %vm1345_vm0, %v4507_v6, %v4508_v19  ;;  %4650 = vmatmul.bf16.vlgmr.msra.gmra.mxu2 %v4512_v20  ;;  %v10665_v6 = vld [vmem:[#allocation17 + $0x80] sm:$0xff]  ;;  %v10696_v20 = vld [vmem:[#allocation17 + $0x178] sm:$0xff]  ;;  %5249 = vmatpush.bf16.msrb.mxu1 %v10657_v18  ;;  %v5601_v18 = vpack.c.b16 %v5545_v57, %v5545_v57 }
 0x690   : > { %v4513_v39 = vpack.c.bf16 %v4508_v19, %v4509_v8  ;;  %5261 = vmatpush.bf16.msrb.mxu2 %v10666_v11  ;;  %5282 = vmatpush.bf16.msrb.mxu3 %v10687_v17  ;;  %v10686_v19 = vld [vmem:[#allocation17 + $0x128] sm:$0xff]  ;;  %v10704_v8 = vld [vmem:[#allocation17 + $0x1b8] sm:$0xff]  ;;  %v5546_v11 = vunpack.c.l.b16 %v5392_v22  ;;  %v5600_v17 = vpack.c.b16 %v5544_v58, %v5544_v58  ;;  %v9524_v10 = vld [vmem:[#allocation20 + $0x40] sm:$0xf] }
 0x691   : > { %v10721_v22 = vld [vmem:[#allocation20 + $0x5c] sm:$0xf0]  ;;  %v10717_v58 = vld [vmem:[#allocation20 + $0x44] sm:$0xf] }
 0x692   : > { %4664 = vmatmul.bf16.vlgmr.msrb.gmra.mxu0 %v4513_v39  ;;  %v10708_v39 = vld [vmem:[#allocation17 + $0x1d8] sm:$0xff]  ;;  %v9525_v57 = vor.u32 %v10721_v22, %v9524_v10 }
 0x693   : > { %5294 = vmatpush.bf16.msra.mxu1 %v10696_v20  ;;  %5324 = vmatpush.bf16.msrb.mxu0 %v10708_v39  ;;  %v5682_v20 = vsel %vm5677_vm7, %v5601_v18, 0  ;;  %v10744_v10 = vld [vmem:[#allocation20 + $0x11c] sm:$0xf] }
 0x694   : > { %5262 = vmatpush.bf16.msrb.mxu2 %v10665_v6  ;;  %5283 = vmatpush.bf16.msrb.mxu3 %v10686_v19  ;;  %v5602_v6 = vpack.c.b16 %v5546_v11, %v5546_v11  ;;  %v5603_v19 = vpack.c.b16 %v5547_v13, %v5547_v13  ;;  %v9526_v11 = vld [vmem:[#allocation20 + $0x60] sm:$0xf0]  ;;  %v9532_v13 = vld [vmem:[#allocation20 + $0x48] sm:$0xf]  ;;  %v9646_v22 = vld [vmem:[#allocation20 + $0x138] sm:$0xf0] }
 0x695   : > { %v9529_v18 = vor.u32 %v10717_v58, %v9526_v11  ;;  %v9604_v11 = vld [vmem:[#allocation20 + $0xd0] sm:$0xf] }
 0x696   : > { %v5688_v39 = vsel %vm5677_vm7, %v5603_v19, 0  ;;  %v10718_v19 = vld [vmem:[#allocation20 + $0x4c] sm:$0xf] }
 0x698   : > { %5307 = vmatpush.bf16.msra.mxu2 %v10704_v8  ;;  %5284 = vmatpush.bf16.msrb.mxu3 %v10685_v24  ;;  %v5685_v8 = vsel %vm5677_vm7, %v5602_v6, 0  ;;  %v9652_v24 = vld [vmem:[#allocation20 + $0x140] sm:$0xf] }
 0x70f   : > { %v4665_v62 = vpop.f32.mrf.mxu0 }
 0x712   : > { %v4651_v15 = vpop.f32.mrf.mxu2 }
 0x713   : > { %v4666_v4 = vadd.f32 %v4665_v62, %v4651_v15  ;;  %v10695_v62 = vld [vmem:[#allocation17 + $0x170] sm:$0xff] }
 0x714   : > { %v10707_v15 = vld [vmem:[#allocation17 + $0x1d0] sm:$0xff]  ;;  %5295 = vmatpush.bf16.msra.mxu1 %v10695_v62  ;;  %v10753_v62 = vld [vmem:[#allocation20 + $0x15c] sm:$0xf0] }
 0x715   : > { %v4672_v25 = vmul.f32 %v4671_v16, %v4666_v4  ;;  %5325 = vmatpush.bf16.msrb.mxu0 %v10707_v15  ;;  %v10684_v4 = vld [vmem:[#allocation17 + $0x118] sm:$0xff]  ;;  %v9653_v15 = vor.u32 %v10753_v62, %v9652_v24 }
 0x716   : > { %5285 = vmatpush.bf16.msrb.mxu3 %v10684_v4  ;;  %v9654_v4 = vld [vmem:[#allocation20 + $0x160] sm:$0xf0]  ;;  %v5394_v62 = vld [vmem:[#allocation20 + $0x198] sm:$0x33] }
 0x717   : > { %v4675_v26 = vadd.f32 %v4674_v28, %v4672_v25  ;;  %v4667_v0 = vpop.f32.mrf.mxu0  ;;  %v10702_v25 = vld [vmem:[#allocation17 + $0x1a8] sm:$0xff] }
 0x719   : > { %4679 = vrot.lane.b32.xlu0 %v4675_v26, %s12143_s13 }
 0x71a   : > { %v4653_v7 = vpop.f32.mrf.mxu2 }
 0x71b   : > { %v4668_v29 = vadd.f32 %v4667_v0, %v4653_v7  ;;  %v10683_v0 = vld [vmem:[#allocation17 + $0x110] sm:$0xff]  ;;  %v10693_v7 = vld [vmem:[#allocation17 + $0x160] sm:$0xff] }
 0x71c   : > { %5286 = vmatpush.bf16.msrb.mxu3 %v10683_v0 }
 0x71d   : > { %v4673_v12 = vmul.f32 %v4671_v16, %v4668_v29  ;;  %v10703_v16 = vld [vmem:[#allocation17 + $0x1b0] sm:$0xff]  ;;  %v10701_v29 = vld [vmem:[#allocation17 + $0x1a0] sm:$0xff] }
 0x71e   : > { %5308 = vmatpush.bf16.msra.mxu2 %v10703_v16  ;;  %v10749_v16 = vld [vmem:[#allocation20 + $0x144] sm:$0xf] }
 0x71f   : > { %v4676_v59 = vadd.f32 %v4674_v28, %v4673_v12  ;;  %v10694_v28 = vld [vmem:[#allocation17 + $0x168] sm:$0xff]  ;;  %v10705_v12 = vld [vmem:[#allocation17 + $0x1c0] sm:$0xff] }
 0x720   : > { %5296 = vmatpush.bf16.msra.mxu1 %v10694_v28  ;;  %v9660_v28 = vld [vmem:[#allocation20 + $0x148] sm:$0xf] }
 0x721   : > { %4681 = vrot.lane.b32.xlu1 %v4676_v59, %s12143_s13 }
 0x722   : > { %5309 = vmatpush.bf16.msra.mxu2 %v10702_v25  ;;  %v10754_v25 = vld [vmem:[#allocation20 + $0x164] sm:$0xf0] }
 0x723   : > { %v9661_v0 = vor.u32 %v10754_v25, %v9660_v28  ;;  %v5550_v28 = vunpack.c.l.b16 %v5394_v62  ;;  %v5551_v25 = vunpack.c.h.b16 %v5394_v62  ;;  %v9572_v62 = vld [vmem:[#allocation20 + $0x90] sm:$0xf] }
 0x724   : > { %5297 = vmatpush.bf16.msra.mxu1 %v10693_v7  ;;  %v10750_v7 = vld [vmem:[#allocation20 + $0x14c] sm:$0xf] }
 0x726   : > { %5310 = vmatpush.bf16.msra.mxu2 %v10701_v29  ;;  %v9662_v29 = vld [vmem:[#allocation20 + $0x168] sm:$0xf0] }
 0x728   : > { %5298 = vmatpush.bf16.msra.mxu1 %v10692_v54  ;;  %v10745_v54 = vld [vmem:[#allocation20 + $0x11c] sm:$0xf0] }
 0x72a   : > { %5311 = vmatpush.bf16.msra.mxu2 %v10700_v23  ;;  %v10741_v23 = vld [vmem:[#allocation20 + $0x104] sm:$0xf] }
 0x72c   : > { %5299 = vmatpush.bf16.msra.mxu1 %v10691_v14  ;;  %v9622_v14 = vld [vmem:[#allocation20 + $0x120] sm:$0xf0] }
 0x72e   : > { %5312 = vmatpush.bf16.msra.mxu2 %v10699_v30  ;;  %v9628_v30 = vld [vmem:[#allocation20 + $0x108] sm:$0xf] }
 0x730   : > { %5300 = vmatpush.bf16.msra.mxu1 %v10690_v40  ;;  %v10742_v40 = vld [vmem:[#allocation20 + $0x10c] sm:$0xf] }
 0x732   : > { %5313 = vmatpush.bf16.msra.mxu2 %v10698_v41  ;;  %v9630_v41 = vld [vmem:[#allocation20 + $0x128] sm:$0xf0] }
 0x734   : > { %5301 = vmatpush.bf16.msra.mxu1 %v10689_v42  ;;  %v9633_v42 = vor.u32 %v10742_v40, %v9630_v41 }
 0x78b   : > { %v4680_v37 = vpop.permute.xlu0 %4679 }
 0x78c   : > { %v4685_v43 = vmax.f32 %v4675_v26, %v4680_v37  ;;  %v10706_v26 = vld [vmem:[#allocation17 + $0x1c8] sm:$0xff]  ;;  %v10697_v37 = vld [vmem:[#allocation17 + $0x180] sm:$0xff] }
 0x78d   : > { %5326 = vmatpush.bf16.msrb.mxu0 %v10706_v26  ;;  %5314 = vmatpush.bf16.msra.mxu2 %v10697_v37  ;;  %v9657_v26 = vor.u32 %v10749_v16, %v9654_v4  ;;  %v9588_v37 = vld [vmem:[#allocation20 + $0xc0] sm:$0xf]  ;;  %v10709_v4 = vld [vmem:[#allocation20 + $0x4] sm:$0xf] }
 0x78e   : > { %v13111_v44 = vmax.f32 %v4685_v43, 0.0  ;;  %v9492_v16 = vld [vmem:[#allocation20] sm:$0xf] }
 0x790   : > { %v4702_v46 = vrot.slane %v13111_v44, 5  ;;  %v4696_v47 = vrot.slane %v13111_v44, 3  ;;  %v4690_v55 = vrot.slane %v13111_v44, 1  ;;  %v4708_v51 = vrot.slane %v13111_v44, 7 }
 0x791   : > { %5327 = vmatpush.bf16.msrb.mxu0 %v10705_v12  ;;  %v4706_v35 = vrot.slane %v13111_v44, 6  ;;  %v9665_v12 = vor.u32 %v10750_v7, %v9662_v29  ;;  %v9500_v7 = vld [vmem:[#allocation20 + $0x8] sm:$0xf] }
 0x792   : > { %4703 = vrot.lane.b32.xlu0 %v4702_v46, %s12143_s13  ;;  %4697 = vrot.lane.b32.xlu1 %v4696_v47, %s12143_s13  ;;  %v4700_v46 = vrot.slane %v13111_v44, 4  ;;  %v4694_v47 = vrot.slane %v13111_v44, 2  ;;  %v10714_v29 = vld [vmem:[#allocation20 + $0x24] sm:$0xf0] }
 0x793   : > { %4691 = vrot.lane.b32.xlu2 %v4690_v55, %s12143_s13  ;;  %v4682_v33 = vpop.permute.xlu1 %4681 }
 0x794   : > { %v4686_v53 = vmax.f32 %v4676_v59, %v4682_v33  ;;  %v10682_v59 = vld [vmem:[#allocation17 + $0x108] sm:$0xff] }
 0x795   : > { %5287 = vmatpush.bf16.msrb.mxu3 %v10682_v59  ;;  %v9620_v59 = vld [vmem:[#allocation20 + $0x100] sm:$0xf] }
 0x796   : > { %v13119_v34 = vmax.f32 %v4686_v53, 0.0 }
 0x798   : > { %v4713_v60 = vrot.slane %v13119_v34, 1  ;;  %v4725_v61 = vrot.slane %v13119_v34, 5  ;;  %v4719_v1 = vrot.slane %v13119_v34, 3  ;;  %v4729_v55 = vrot.slane %v13119_v34, 6 }
 0x799   : > { %5288 = vmatpush.bf16.msrb.mxu3 %v10681_v27  ;;  %v4723_v63 = vrot.slane %v13119_v34, 4  ;;  %v9621_v27 = vor.u32 %v10745_v54, %v9620_v59 }
 0x79a   : > { %4714 = vrot.lane.b32.xlu0 %v4713_v60, %s12143_s13  ;;  %4726 = vrot.lane.b32.xlu1 %v4725_v61, %s12143_s13  ;;  %v4745_v48 = vpack.c.bf16 %v4729_v55, %v4729_v55 }
 0x79b   : > { %4709 = vrot.lane.b32.xlu2 %v4708_v51, %s12143_s13  ;;  %v4717_v51 = vrot.slane %v13119_v34, 2 }
 0x7a3   : > { %4720 = vrot.lane.b32.xlu2 %v4719_v1, %s12143_s13 }
 0x7ed   : > { %v4692_v31 = vpop.permute.xlu2 %4691 }
 0x7ee   : > { %v4731_v36 = vsel %vm3813_vm6, %v13111_v44, %v4692_v31  ;;  %v10746_v31 = vld [vmem:[#allocation20 + $0x124] sm:$0xf0] }
 0x7ef   : > { %v4738_v32 = vpack.c.bf16 %v4731_v36, %v4731_v36  ;;  %v9625_v36 = vor.u32 %v10741_v23, %v9622_v14  ;;  %v10710_v14 = vld [vmem:[#allocation20 + $0xc] sm:$0xf] }
 0x7f1   : > { %5237 = vmatmul.bf16.vlgmr.msra.gmra.mxu3 %v4738_v32  ;;  %v9629_v32 = vor.u32 %v10746_v31, %v9628_v30  ;;  %v9502_v30 = vld [vmem:[#allocation20 + $0x28] sm:$0xf0]  ;;  %v5606_v31 = vpack.c.b16 %v5550_v28, %v5550_v28  ;;  %v9574_v28 = vld [vmem:[#allocation20 + $0xb0] sm:$0xf0] }
 0x7f5   : > { %v4710_v43 = vpop.permute.xlu2 %4709 }
 0x7f6   : > { %v4734_v38 = vsel %vm3813_vm6, %v4706_v35, %v4710_v43  ;;  %v10737_v35 = vld [vmem:[#allocation20 + $0xdc] sm:$0xf0]  ;;  %v10733_v43 = vld [vmem:[#allocation20 + $0xc4] sm:$0xf] }
 0x7f7   : > { %v4741_v45 = vpack.c.bf16 %v4734_v38, %v4734_v38  ;;  %v9589_v38 = vor.u32 %v10737_v35, %v9588_v37  ;;  %v5697_v37 = vsel %vm5677_vm7, %v5606_v31, 0  ;;  %v10719_v31 = vld [vmem:[#allocation20 + $0x54] sm:$0xf] }
 0x7f9   : > { %5276 = vmatmul.bf16.vlgmr.msra.gmra.mxu0 %v4741_v45  ;;  %v9590_v45 = vld [vmem:[#allocation20 + $0xe0] sm:$0xf0] }
 0x7fa   : > { %5716 = vmatpush.bf16.msra.mxu0 %v5682_v20  ;;  %v9593_v55 = vor.u32 %v10733_v43, %v9590_v45  ;;  %v5393_v20 = vld [vmem:[#allocation20 + $0x190] sm:$0x33] }
 0x7fb   : > { %v5549_v24 = vunpack.c.h.b16 %v5393_v20  ;;  %v9668_v43 = vld [vmem:[#allocation20 + $0x150] sm:$0xf]  ;;  %v10751_v45 = vld [vmem:[#allocation20 + $0x154] sm:$0xf] }
 0x7fd   : > { %v4721_v60 = vpop.permute.xlu2 %4720  ;;  %v5605_v59 = vpack.c.b16 %v5549_v24, %v5549_v24  ;;  %v9614_v24 = vld [vmem:[#allocation20 + $0xf8] sm:$0xf0] }
 0x7fe   : > { %v4736_v1 = vsel %vm3813_vm6, %v4717_v51, %v4721_v60  ;;  %5717 = vmatpush.bf16.msra.mxu0 %v9657_v26  ;;  %v10730_v60 = vld [vmem:[#allocation20 + $0xa4] sm:$0xf0] }
 0x7ff   : > { %v4743_v3 = vpack.c.bf16 %v4736_v1, %v4736_v1  ;;  %v10726_v1 = vld [vmem:[#allocation20 + $0x8c] sm:$0xf]  ;;  %v5694_v41 = vsel %vm5677_vm7, %v5605_v59, 0 }
 0x802   : > { %5718 = vmatpush.bf16.msra.mxu0 %v9625_v36  ;;  %v5607_v36 = vpack.c.b16 %v5551_v25, %v5551_v25 }
 0x804   : > { %v4704_v49 = vpop.permute.xlu0 %4703  ;;  %v4698_v21 = vpop.permute.xlu1 %4697  ;;  %v5700_v35 = vsel %vm5677_vm7, %v5607_v36, 0  ;;  %v9542_v36 = vld [vmem:[#allocation20 + $0x70] sm:$0xf0] }
 0x805   : > { %v4733_v50 = vsel %vm3813_vm6, %v4700_v46, %v4704_v49  ;;  %v4732_v33 = vsel %vm3813_vm6, %v4694_v47, %v4698_v21  ;;  %v9596_v46 = vld [vmem:[#allocation20 + $0xc8] sm:$0xf]  ;;  %v10734_v21 = vld [vmem:[#allocation20 + $0xcc] sm:$0xf] }
 0x806   : > { %v4740_v52 = vpack.c.bf16 %v4733_v50, %v4733_v50  ;;  %v4739_v53 = vpack.c.bf16 %v4732_v33, %v4732_v33  ;;  %v10738_v47 = vld [vmem:[#allocation20 + $0xe4] sm:$0xf0]  ;;  %v9598_v50 = vld [vmem:[#allocation20 + $0xe8] sm:$0xf0]  ;;  %5719 = vmatpush.bf16.msra.mxu0 %v9593_v55  ;;  %v9676_v55 = vld [vmem:[#allocation20 + $0x158] sm:$0xf] }
 0x807   : > { %v9597_v49 = vor.u32 %v10738_v47, %v9596_v46  ;;  %v9601_v33 = vor.u32 %v10734_v21, %v9598_v50  ;;  %v9670_v47 = vld [vmem:[#allocation20 + $0x170] sm:$0xf0]  ;;  %v10756_v21 = vld [vmem:[#allocation20 + $0x174] sm:$0xf0]  ;;  %v10752_v50 = vld [vmem:[#allocation20 + $0x15c] sm:$0xf] }
 0x808   : > { %5250 = vmatmul.bf16.vlgmr.msrb.gmra.mxu1 %v4739_v53  ;;  %5263 = vmatmul.bf16.vlgmr.msrb.gmra.mxu2 %v4740_v52  ;;  %v9556_v52 = vld [vmem:[#allocation20 + $0x80] sm:$0xf] }
 0x809   : > { %9489 = vmatmul.msk.bf16.vlgmr.msrb.gmra.mxu0 %vm3813_vm6, %v4745_v48  ;;  %5729 = vmatpush.bf16.msrb.mxu1 %v5685_v8  ;;  %v10729_v53 = vld [vmem:[#allocation20 + $0x9c] sm:$0xf0]  ;;  %v10725_v48 = vld [vmem:[#allocation20 + $0x84] sm:$0xf] }
 0x80a   : > { %5742 = vmatpush.bf16.msrb.mxu2 %v5688_v39  ;;  %v5548_v39 = vunpack.c.l.b16 %v5393_v20 }
 0x80c   : > { %v4715_v56 = vpop.permute.xlu0 %4714  ;;  %v4727_v61 = vpop.permute.xlu1 %4726 }
 0x80d   : > { %v4735_v9 = vsel %vm3813_vm6, %v13119_v34, %v4715_v56  ;;  %v4737_v2 = vsel %vm3813_vm6, %v4723_v63, %v4727_v61  ;;  %v5679_v34 = vsel %vm5677_vm7, %v5600_v17, 0  ;;  %5730 = vmatpush.bf16.msrb.mxu1 %v9661_v0  ;;  %v9557_v56 = vor.u32 %v10729_v53, %v9556_v52  ;;  %v10722_v17 = vld [vmem:[#allocation20 + $0x64] sm:$0xf0]  ;;  %v9494_v0 = vld [vmem:[#allocation20 + $0x20] sm:$0xf0] }
 0x80e   : > { %v4742_v44 = vpack.c.bf16 %v4735_v9, %v4735_v9  ;;  %v4744_v5 = vpack.c.bf16 %v4737_v2, %v4737_v2  ;;  %5703 = vmatpush.bf16.msra.mxu3 %v5679_v34  ;;  %5743 = vmatpush.bf16.msrb.mxu2 %v9665_v12  ;;  %v9558_v9 = vld [vmem:[#allocation20 + $0xa0] sm:$0xf0]  ;;  %v9566_v2 = vld [vmem:[#allocation20 + $0xa8] sm:$0xf0]  ;;  %v9533_v6 = vor.u32 %v10722_v17, %v9532_v13  ;;  %v10739_v13 = vld [vmem:[#allocation20 + $0xec] sm:$0xf0] }
 0x80f   : > { %v9561_v51 = vor.u32 %v10725_v48, %v9558_v9  ;;  %v9534_v34 = vld [vmem:[#allocation20 + $0x68] sm:$0xf0]  ;;  %v5604_v12 = vpack.c.b16 %v5548_v39, %v5548_v39  ;;  %v9497_v23 = vor.u32 %v10709_v4, %v9494_v0  ;;  %v9677_v52 = vor.u32 %v10756_v21, %v9676_v55  ;;  %v9636_v48 = vld [vmem:[#allocation20 + $0x110] sm:$0xf]  ;;  %v10743_v9 = vld [vmem:[#allocation20 + $0x114] sm:$0xf] }
 0x810   : > { %5289 = vmatmul.bf16.vlgmr.msrb.gmra.mxu3 %v4742_v44  ;;  %v9564_v44 = vld [vmem:[#allocation20 + $0x88] sm:$0xf]  ;;  %v9537_v8 = vor.u32 %v10718_v19, %v9534_v34  ;;  %v10735_v17 = vld [vmem:[#allocation20 + $0xd4] sm:$0xf]  ;;  %v9612_v19 = vld [vmem:[#allocation20 + $0xd8] sm:$0xf] }
 0x811   : > { %5731 = vmatpush.bf16.msrb.mxu1 %v9629_v32  ;;  %v9565_v63 = vor.u32 %v10730_v60, %v9564_v44  ;;  %5720 = vmatpush.bf16.msra.mxu0 %v9561_v51  ;;  %v9505_v32 = vor.u32 %v10710_v14, %v9502_v30  ;;  %v5691_v40 = vsel %vm5677_vm7, %v5604_v12, 0  ;;  %v9638_v60 = vld [vmem:[#allocation20 + $0x130] sm:$0xf0]  ;;  %v9644_v51 = vld [vmem:[#allocation20 + $0x118] sm:$0xf] }
 0x812   : > { %5704 = vmatpush.bf16.msra.mxu3 %v9653_v15  ;;  %5744 = vmatpush.bf16.msrb.mxu2 %v9633_v42  ;;  %v10713_v15 = vld [vmem:[#allocation20 + $0x1c] sm:$0xf0]  ;;  %v10740_v34 = vld [vmem:[#allocation20 + $0xf4] sm:$0xf0]  ;;  %v10736_v39 = vld [vmem:[#allocation20 + $0xdc] sm:$0xf] }
 0x813   : > { %v9493_v26 = vor.u32 %v10713_v15, %v9492_v16  ;;  %v9617_v16 = vor.u32 %v10736_v39, %v9614_v24  ;;  %v10731_v15 = vld [vmem:[#allocation20 + $0xac] sm:$0xf0]  ;;  %v10727_v4 = vld [vmem:[#allocation20 + $0x94] sm:$0xf]  ;;  %v9580_v0 = vld [vmem:[#allocation20 + $0x98] sm:$0xf] }
 0x814   : > { %v9577_v12 = vor.u32 %v10727_v4, %v9574_v28  ;;  %v10715_v55 = vld [vmem:[#allocation20 + $0x2c] sm:$0xf0]  ;;  %v5395_v39 = vld [vmem:[#allocation22] sm:$0xff] }
 0x815   : > { %5732 = vmatpush.bf16.msrb.mxu1 %v9597_v49  ;;  %5721 = vmatpush.bf16.msra.mxu0 %v9529_v18  ;;  %v9673_v49 = vor.u32 %v10751_v45, %v9670_v47  ;;  %v9605_v18 = vor.u32 %v10739_v13, %v9604_v11  ;;  %v9545_v45 = vor.u32 %v10719_v31, %v9542_v36  ;;  %v9508_v47 = vld [vmem:[#allocation20 + $0x10] sm:$0xf]  ;;  %v5659_v28 = vperm.slane %v5395_v39, 2 }
 0x816   : > { %5705 = vmatpush.bf16.msra.mxu3 %v9621_v27  ;;  %5745 = vmatpush.bf16.msrb.mxu2 %v9601_v33  ;;  %v9501_v27 = vor.u32 %v10714_v29, %v9500_v7  ;;  %v9678_v33 = vld [vmem:[#allocation20 + $0x178] sm:$0xf0]  ;;  %v10732_v7 = vld [vmem:[#allocation20 + $0xb4] sm:$0xf0] }
 0x817   : > { %v9681_v53 = vor.u32 %v10752_v50, %v9678_v33  ;;  %v10728_v29 = vld [vmem:[#allocation20 + $0x9c] sm:$0xf]  ;;  %v9581_v59 = vor.u32 %v10732_v7, %v9580_v0  ;;  %v9510_v50 = vld [vmem:[#allocation20 + $0x30] sm:$0xf0]  ;;  %v9516_v33 = vld [vmem:[#allocation20 + $0x18] sm:$0xf] }
 0x818   : > { %5302 = vmatmul.bf16.vlgmr.msra.gmra.mxu1 %v4743_v3  ;;  %5315 = vmatmul.bf16.vlgmr.msra.gmra.mxu2 %v4744_v5  ;;  %v9569_v3 = vor.u32 %v10726_v1, %v9566_v2  ;;  %v9641_v2 = vor.u32 %v10743_v9, %v9638_v60  ;;  %v9509_v9 = vor.u32 %v10715_v55, %v9508_v47 }
 0x819   : > { %5733 = vmatpush.bf16.msrb.mxu1 %v9565_v63  ;;  %5722 = vmatpush.bf16.msra.mxu0 %v9497_v23  ;;  %v10748_v63 = vld [vmem:[#allocation20 + $0x134] sm:$0xf0]  ;;  %v9540_v23 = vld [vmem:[#allocation20 + $0x50] sm:$0xf] }
 0x81a   : > { %5706 = vmatpush.bf16.msra.mxu3 %v9589_v38  ;;  %5746 = vmatpush.bf16.msrb.mxu2 %v9569_v3  ;;  %v10755_v38 = vld [vmem:[#allocation20 + $0x16c] sm:$0xf0]  ;;  %v9645_v3 = vor.u32 %v10748_v63, %v9644_v51 }
 0x81b   : > { %v9669_v46 = vor.u32 %v10755_v38, %v9668_v43 }
 0x81d   : > { %5734 = vmatpush.bf16.msrb.mxu1 %v9533_v6  ;;  %5768 = vmatpush.bf16.msrb.mxu0 %v5694_v41  ;;  %v9606_v6 = vld [vmem:[#allocation20 + $0xf0] sm:$0xf0] }
 0x81e   : > { %5707 = vmatpush.bf16.msra.mxu3 %v9557_v56  ;;  %5747 = vmatpush.bf16.msrb.mxu2 %v9537_v8  ;;  %v10747_v56 = vld [vmem:[#allocation20 + $0x12c] sm:$0xf0]  ;;  %v9609_v20 = vor.u32 %v10735_v17, %v9606_v6  ;;  %v9613_v8 = vor.u32 %v10740_v34, %v9612_v19 }
 0x81f   : > { %v9637_v44 = vor.u32 %v10747_v56, %v9636_v48 }
 0x821   : > { %5735 = vmatpush.bf16.msrb.mxu1 %v9501_v27  ;;  %5769 = vmatpush.bf16.msrb.mxu0 %v9673_v49  ;;  %v10723_v27 = vld [vmem:[#allocation20 + $0x6c] sm:$0xf0]  ;;  %v10711_v49 = vld [vmem:[#allocation20 + $0x14] sm:$0xf] }
 0x822   : > { %5708 = vmatpush.bf16.msra.mxu3 %v9525_v57  ;;  %5748 = vmatpush.bf16.msrb.mxu2 %v9505_v32  ;;  %v9649_v57 = vor.u32 %v10744_v10, %v9646_v22  ;;  %v9548_v32 = vld [vmem:[#allocation20 + $0x58] sm:$0xf]  ;;  %v9541_v43 = vor.u32 %v10723_v27, %v9540_v23  ;;  %v9513_v60 = vor.u32 %v10711_v49, %v9510_v50  ;;  %v5660_v50 = vperm.slane %v5395_v39, 3 }
 0x825   : > { %5781 = vmatpush.bf16.msra.mxu1 %v5697_v37  ;;  %5770 = vmatpush.bf16.msrb.mxu0 %v9641_v2  ;;  %v10720_v37 = vld [vmem:[#allocation20 + $0x5c] sm:$0xf] }
 0x826   : > { %5709 = vmatpush.bf16.msra.mxu3 %v9493_v26  ;;  %5794 = vmatpush.bf16.msra.mxu2 %v5700_v35  ;;  %v9573_v26 = vor.u32 %v10731_v15, %v9572_v62  ;;  %v9550_v35 = vld [vmem:[#allocation20 + $0x78] sm:$0xf0]  ;;  %v5658_v15 = vperm.slane %v5395_v39, 1 }
 0x827   : > { %v9553_v21 = vor.u32 %v10720_v37, %v9550_v35 }
 0x829   : > { %5782 = vmatpush.bf16.msra.mxu1 %v9677_v52  ;;  %5771 = vmatpush.bf16.msrb.mxu0 %v9609_v20  ;;  %v10716_v52 = vld [vmem:[#allocation20 + $0x34] sm:$0xf0] }
 0x82a   : > { %5755 = vmatpush.bf16.msrb.mxu3 %v5691_v40  ;;  %5795 = vmatpush.bf16.msra.mxu2 %v9681_v53  ;;  %v9518_v53 = vld [vmem:[#allocation20 + $0x38] sm:$0xf0]  ;;  %v9517_v51 = vor.u32 %v10716_v52, %v9516_v33 }
 0x82d   : > { %5783 = vmatpush.bf16.msra.mxu1 %v9645_v3  ;;  %5772 = vmatpush.bf16.msrb.mxu0 %v9577_v12  ;;  %v5657_v12 = vperm.slane %v5395_v39, 0 }
 0x82e   : > { %5756 = vmatpush.bf16.msrb.mxu3 %v9669_v46  ;;  %5796 = vmatpush.bf16.msra.mxu2 %v9649_v57  ;;  %v5333_v57 = vld [vmem:[#allocation19] sm:$0x3] }
 0x82f   : > { %v5336_v17 = vrot.slane %v5333_v57, 1 }
 0x831   : > { %5784 = vmatpush.bf16.msra.mxu1 %v9613_v8  ;;  %5773 = vmatpush.bf16.msrb.mxu0 %v9545_v45 }
 0x832   : > { %5757 = vmatpush.bf16.msrb.mxu3 %v9637_v44  ;;  %5797 = vmatpush.bf16.msra.mxu2 %v9617_v16 }
 0x835   : > { %5785 = vmatpush.bf16.msra.mxu1 %v9581_v59  ;;  %5774 = vmatpush.bf16.msrb.mxu0 %v9513_v60 }
 0x836   : > { %5758 = vmatpush.bf16.msrb.mxu3 %v9605_v18 }
 0x83a   : > { %5759 = vmatpush.bf16.msrb.mxu3 %v9573_v26  ;;  %v5662_v26 = vperm.slane %v5395_v39, 5 }
 0x83e   : > { %5760 = vmatpush.bf16.msrb.mxu3 %v9541_v43 }
 0x842   : > { %5761 = vmatpush.bf16.msrb.mxu3 %v9509_v9 }
 0x874   : > { %v13149_v61 = vpop.f32.mrf.mxu3 }
 0x876   : > { %v13151_v5 = vpop.f32.mrf.mxu0 }
 0x87c   : > { %v5240_v54 = vpop.f32.mrf.mxu3 }
 0x87d   : > { %v9582_v54 = vld [vmem:[#allocation20 + $0xb8] sm:$0xf0] }
 0x87e   : > { %v5279_v42 = vpop.f32.mrf.mxu0  ;;  %v9585_v30 = vor.u32 %v10728_v29, %v9582_v54  ;;  %v5663_v29 = vperm.slane %v5395_v39, 6 }
 0x87f   : > { %v10724_v42 = vld [vmem:[#allocation20 + $0x74] sm:$0xf0] }
 0x880   : > { %v9549_v46 = vor.u32 %v10724_v42, %v9548_v32  ;;  %5798 = vmatpush.bf16.msra.mxu2 %v9585_v30 }
 0x882   : > { %5786 = vmatpush.bf16.msra.mxu1 %v9549_v46 }
 0x884   : > { %5799 = vmatpush.bf16.msra.mxu2 %v9553_v21 }
 0x885   : > { %v5251_v1 = vpop.f32.mrf.mxu1 }
 0x886   : > { %v13157_v58 = vpop.f32.mrf.mxu0  ;;  %v5252_v40 = vadd.f32 %v5251_v1, %v13149_v61  ;;  %v10712_v61 = vld [vmem:[#allocation20 + $0x1c] sm:$0xf]  ;;  %5787 = vmatpush.bf16.msra.mxu1 %v9517_v51 }
 0x887   : > { %v9521_v1 = vor.u32 %v10712_v61, %v9518_v53 }
 0x889   : > { %5800 = vmatpush.bf16.msra.mxu2 %v9521_v1  ;;  %v10763_v1 = vld [vmem:[#allocation23 + $0x30] sm:$0xff] }
 0x88b   : > { %v5264_v25 = vpop.f32.mrf.mxu2 }
 0x88c   : > { %v5265_v38 = vadd.f32 %v5264_v25, %v5252_v40  ;;  %v5661_v40 = vperm.slane %v5395_v39, 4 }
 0x88d   : > { %v5253_v14 = vpop.f32.mrf.mxu1 }
 0x88e   : > { %v5331_v41 = vpop.f32.mrf.mxu0  ;;  %v5278_v44 = vadd.f32 %v13151_v5, %v5265_v38 }
 0x893   : > { %v5266_v48 = vpop.f32.mrf.mxu2  ;;  %v5290_v56 = vpop.f32.mrf.mxu3 }
 0x894   : > { %v5291_v2 = vadd.f32 %v5290_v56, %v5278_v44 }
 0x895   : > { %v5303_v63 = vpop.f32.mrf.mxu1 }
 0x896   : > { %v5304_v3 = vadd.f32 %v5303_v63, %v5291_v2  ;;  %v10764_v63 = vld [vmem:[#allocation23 + $0x38] sm:$0xff]  ;;  %v10762_v2 = vld [vmem:[#allocation23 + $0x28] sm:$0xff] }
 0x89b   : > { %v5292_v10 = vpop.f32.mrf.mxu3  ;;  %v5316_v22 = vpop.f32.mrf.mxu2 }
 0x89c   : > { %v5317_v11 = vadd.f32 %v5316_v22, %v5304_v3  ;;  %v5664_v3 = vperm.slane %v5395_v39, 7  ;;  %v10761_v10 = vld [vmem:[#allocation23 + $0x20] sm:$0xff] }
 0x89d   : > { %v5305_v5 = vpop.f32.mrf.mxu1 }
 0x89e   : > { %v5330_v13 = vadd.f32 %v13157_v58, %v5317_v11  ;;  %v10760_v5 = vld [vmem:[#allocation23 + $0x18] sm:$0xff] }
 0x8a0   : > { %v5334_v18 = vmul.f32 %v5333_v57, %v5330_v13 }
 0x8a2   : > { %v5338_v6 = vadd.f32 %v5336_v17, %v5334_v18 }
 0x8a3   : > { %v5318_v19 = vpop.f32.mrf.mxu2 }
 0x8a4   : > { %v5339_v34 = vmax.f32 %v5338_v6, 0.0 }
 0x8a6   : > { %v5342_v20 = vpack.c.bf16 %v5339_v34, %v5339_v34  ;;  %5341 = vst.msk [vmem:[%s13165_s6] sm:$0x1] %vm5340_vm8, %v5339_v34 }
 0x8a8   : > { %9682 = vmatmul.msk.bf16.vlgmr.msra.gmra.mxu3 %vm5673_vm9, %v5342_v20  ;;  %9683 = vmatmul.msk.bf16.vlgmr.msra.gmra.mxu0 %vm5673_vm9, %v5342_v20 }
 0x8a9   : > { %9684 = vmatmul.msk.bf16.vlgmr.msrb.gmra.mxu1 %vm5673_vm9, %v5342_v20  ;;  %9685 = vmatmul.msk.bf16.vlgmr.msrb.gmra.mxu2 %vm5673_vm9, %v5342_v20 }
 0x8aa   : > { %5966 = vmatpush.bf16.msra.mxu3 %v10764_v63  ;;  %v10776_v63 = vld [vmem:[#allocation28 + $0x54] sm:$0xf0] }
 0x8ae   : > { %5967 = vmatpush.bf16.msra.mxu3 %v10763_v1  ;;  %v10775_v1 = vld [vmem:[#allocation28 + $0x54] sm:$0xf] }
 0x8b2   : > { %5968 = vmatpush.bf16.msra.mxu3 %v10762_v2  ;;  %v9766_v2 = vld [vmem:[#allocation28 + $0x58] sm:$0xf0] }
 0x8b6   : > { %5969 = vmatpush.bf16.msra.mxu3 %v10761_v10  ;;  %v9769_v10 = vor.u32 %v10775_v1, %v9766_v2  ;;  %v10781_v1 = vld [vmem:[#allocation28 + $0x84] sm:$0xf]  ;;  %v9790_v2 = vld [vmem:[#allocation28 + $0x88] sm:$0xf0] }
 0x8b8   : > { %9686 = vmatmul.msk.bf16.vlgmr.msrb.gmra.mxu3 %vm5673_vm9, %v5342_v20  ;;  %9687 = vmatmul.msk.bf16.vlgmr.msrb.gmra.mxu0 %vm5673_vm9, %v5342_v20 }
 0x8b9   : > { %9688 = vmatmul.msk.bf16.vlgmr.msra.gmra.mxu1 %vm5673_vm9, %v5342_v20  ;;  %9689 = vmatmul.msk.bf16.vlgmr.msra.gmra.mxu2 %vm5673_vm9, %v5342_v20 }
 0x8ba   : > { %5970 = vmatpush.bf16.msra.mxu3 %v10760_v5 }
 0x925   : > { %v5724_v58 = vpop.f32.mrf.mxu0 }
 0x926   : > { %v5737_v8 = vpop.f32.mrf.mxu1  ;;  %v5725_v25 = vadd.f32 %v5724_v58, %v5658_v15 }
 0x927   : > { %v5738_v0 = vadd.f32 %v5737_v8, %v5659_v28 }
 0x928   : > { %v5807_v23 = vmax.f32 %v5725_v25, 0.0 }
 0x929   : > { %v5808_v30 = vmax.f32 %v5738_v0, 0.0 }
 0x92a   : > { %v5822_v42 = vrot.slane %v5807_v23, 5  ;;  %v5820_v13 = vrot.slane %v5807_v23, 6 }
 0x92b   : > { %v5711_v24 = vpop.f32.mrf.mxu3  ;;  %v5829_v35 = vrot.slane %v5808_v30, 3  ;;  %v5827_v17 = vrot.slane %v5808_v30, 4 }
 0x92c   : > { %v5750_v62 = vpop.f32.mrf.mxu2  ;;  %v5712_v36 = vadd.f32 %v5711_v24, %v5657_v12 }
 0x92d   : > { %v5726_v16 = vpop.f32.mrf.mxu0  ;;  %v5751_v48 = vadd.f32 %v5750_v62, %v5660_v50  ;;  %v10779_v50 = vld [vmem:[#allocation28 + $0x74] sm:$0xf] }
 0x92e   : > { %v5739_v4 = vpop.f32.mrf.mxu1  ;;  %v5806_v45 = vmax.f32 %v5712_v36, 0.0 }
 0x92f   : > { %v5809_v60 = vmax.f32 %v5751_v48, 0.0  ;;  %v10759_v4 = vld [vmem:[#allocation23 + $0x10] sm:$0xff] }
 0x930   : > { %v5815_v61 = vrot.slane %v5806_v45, 7  ;;  %5971 = vmatpush.bf16.msra.mxu3 %v10759_v4  ;;  %v9812_v4 = vld [vmem:[#allocation28 + $0xb0] sm:$0xf] }
 0x931   : > { %v5836_v51 = vrot.slane %v5809_v60, 1 }
 0x933   : > { %v5713_v7 = vpop.f32.mrf.mxu3 }
 0x934   : > { %v5752_v59 = vpop.f32.mrf.mxu2  ;;  %v5834_v7 = vrot.slane %v5809_v60, 2 }
 0x935   : > { %v5776_v54 = vpop.f32.mrf.mxu0 }
 0x936   : > { %v5777_v27 = vadd.f32 %v5776_v54, %v5662_v26  ;;  %v5789_v14 = vpop.f32.mrf.mxu1 }
 0x937   : > { %v5790_v31 = vadd.f32 %v5789_v14, %v5663_v29 }
 0x938   : > { %v5811_v32 = vmax.f32 %v5777_v27, 0.0 }
 0x939   : > { %v5812_v41 = vmax.f32 %v5790_v31, 0.0  ;;  %v10758_v31 = vld [vmem:[#allocation23 + $0x8] sm:$0xff] }
 0x93a   : > { %v5848_v37 = vrot.slane %v5811_v32, 5  ;;  %v5846_v19 = vrot.slane %v5811_v32, 6  ;;  %5972 = vmatpush.bf16.msra.mxu3 %v10758_v31  ;;  %v10767_v31 = vld [vmem:[#allocation28 + $0x14] sm:$0xf] }
 0x93b   : > { %v5855_v43 = vrot.slane %v5812_v41, 3  ;;  %v5763_v38 = vpop.f32.mrf.mxu3  ;;  %v5853_v62 = vrot.slane %v5812_v41, 4  ;;  %v12144_v41 = vmov 0.0  }
 0x93c   : > { %v5764_v46 = vadd.f32 %v5763_v38, %v5661_v40  ;;  %v5802_v47 = vpop.f32.mrf.mxu2  ;;  %v11222_v55 = vpack.i.bf16 %v5848_v37, %v5822_v42  ;;  %v13181_v42 = vrot.slane %v12144_v41, 1  ;;  %v9796_v41 = vld [vmem:[#allocation28 + $0x90] sm:$0xf] }
 0x93d   : > { %v5778_v49 = vpop.f32.mrf.mxu0  ;;  %v11227_v21 = vpack.i.bf16 %v5855_v43, %v5829_v35  ;;  %v5803_v22 = vadd.f32 %v5802_v47, %v5664_v3 }
 0x93e   : > { %v5810_v33 = vmax.f32 %v5764_v46, 0.0  ;;  %v5791_v52 = vpop.f32.mrf.mxu1  ;;  %11223 = vrot.lane.b32.xlu1 %v11222_v55, %s12143_s13  ;;  %v10757_v55 = vld [vmem:[#allocation23] sm:$0xff] }
 0x93f   : > { %11228 = vrot.lane.b32.xlu2 %v11227_v21, %s12143_s13  ;;  %v5813_v34 = vmax.f32 %v5803_v22, 0.0  ;;  %5973 = vmatpush.bf16.msra.mxu3 %v10757_v55  ;;  %v9780_v49 = vld [vmem:[#allocation28 + $0x70] sm:$0xf]  ;;  %v10780_v21 = vld [vmem:[#allocation28 + $0x74] sm:$0xf0] }
 0x940   : > { %v5841_v53 = vrot.slane %v5810_v33, 7  ;;  %v9782_v52 = vld [vmem:[#allocation28 + $0x78] sm:$0xf0] }
 0x941   : > { %v5860_v29 = vrot.slane %v5813_v34, 2  ;;  %v9785_v48 = vor.u32 %v10779_v50, %v9782_v52  ;;  %v9814_v52 = vld [vmem:[#allocation28 + $0xb8] sm:$0xf0] }
 0x942   : > { %v11232_v56 = vpack.i.bf16 %v5841_v53, %v5815_v61  ;;  %v9772_v61 = vld [vmem:[#allocation28 + $0x60] sm:$0xf]  ;;  %v10778_v53 = vld [vmem:[#allocation28 + $0x64] sm:$0xf0] }
 0x943   : > { %v5765_v9 = vpop.f32.mrf.mxu3  ;;  %6178 = vmatpush.bf16.msrb.mxu2 %v9785_v48  ;;  %v9806_v48 = vld [vmem:[#allocation28 + $0xa8] sm:$0xf0] }
 0x944   : > { %v5804_v44 = vpop.f32.mrf.mxu2  ;;  %11233 = vrot.lane.b32.xlu0 %v11232_v56, %s12143_s13  ;;  %v10777_v56 = vld [vmem:[#allocation28 + $0x64] sm:$0xf]  ;;  %v9774_v9 = vld [vmem:[#allocation28 + $0x68] sm:$0xf0] }
 0x945   : > { %v9773_v44 = vor.u32 %v10778_v53, %v9772_v61  ;;  %v9777_v60 = vor.u32 %v10777_v56, %v9774_v9  ;;  %v10785_v53 = vld [vmem:[#allocation28 + $0xa4] sm:$0xf]  ;;  %v10783_v9 = vld [vmem:[#allocation28 + $0x94] sm:$0xf] }
 0x946   : > { %v9809_v56 = vor.u32 %v10785_v53, %v9806_v48  ;;  %v9846_v53 = vld [vmem:[#allocation32 + $0x30] sm:$0xf]  ;;  %v10796_v48 = vld [vmem:[#allocation32 + $0x34] sm:$0xf0] }
 0x947   : > { %6179 = vmatpush.bf16.msrb.mxu2 %v9777_v60  ;;  %v5980_v60 = vld [vmem:[#allocation25] sm:$0x3] }
 0x94b   : > { %6180 = vmatpush.bf16.msrb.mxu2 %v9769_v10  ;;  %v9793_v10 = vor.u32 %v10781_v1, %v9790_v2  ;;  %v9950_v1 = vld [vmem:[#allocation32 + $0x100] sm:$0xf]  ;;  %v10822_v2 = vld [vmem:[#allocation32 + $0x104] sm:$0xf0] }
 0x94c   : > { %5837 = vrot.lane.b32.xlu0 %v5836_v51, %s12143_s13  ;;  %v9764_v51 = vld [vmem:[#allocation28 + $0x50] sm:$0xf] }
 0x94d   : > { %v9765_v3 = vor.u32 %v10776_v63, %v9764_v51  ;;  %v5981_v63 = vperm.slane %v5980_v60, 0 }
 0x999   : > { %v11229_v20 = vpop.permute.xlu2 %11228 }
 0x99a   : > { %v11231_v28 = vunpack.i.h.bf16 %v11229_v20  ;;  %v11230_v25 = vunpack.i.l.bf16 %v11229_v20  ;;  %v9758_v20 = vld [vmem:[#allocation28 + $0x48] sm:$0xf0] }
 0x9b0   : > { %v11224_v57 = vpop.permute.xlu1 %11223 }
 0x9b1   : > { %v11226_v58 = vunpack.i.h.bf16 %v11224_v57  ;;  %v11225_v8 = vunpack.i.l.bf16 %v11224_v57 }
 0x9b6   : > { %v11234_v11 = vpop.permute.xlu0 %11233 }
 0x9b7   : > { %v11236_v18 = vunpack.i.h.bf16 %v11234_v11  ;;  %v11235_v6 = vunpack.i.l.bf16 %v11234_v11 }
 0x9b9   : > { %v5872_v39 = vsel %vm2536_vm2, %v5810_v33, %v11236_v18  ;;  %v5862_v24 = vsel %vm2536_vm2, %v5806_v45, %v11235_v6  ;;  %v9781_v33 = vor.u32 %v10780_v21, %v9780_v49  ;;  %v9756_v18 = vld [vmem:[#allocation28 + $0x40] sm:$0xf]  ;;  %v10774_v6 = vld [vmem:[#allocation28 + $0x44] sm:$0xf0] }
 0x9ba   : > { %v5873_v16 = vsel %vm5677_vm7, %v5872_v39, %v5846_v19  ;;  %v5863_v15 = vsel %vm5677_vm7, %v5862_v24, %v5820_v13  ;;  %v10773_v19 = vld [vmem:[#allocation28 + $0x44] sm:$0xf]  ;;  %v9757_v34 = vor.u32 %v10774_v6, %v9756_v18  ;;  %v10772_v39 = vld [vmem:[#allocation28 + $0x34] sm:$0xf0]  ;;  %v10771_v24 = vld [vmem:[#allocation28 + $0x34] sm:$0xf] }
 0x9bb   : > { %v5874_v26 = vsel %vm5864_vm10, %v5873_v16, %v11226_v58  ;;  %v5865_v0 = vsel %vm5864_vm10, %v5863_v15, %v11225_v8  ;;  %6150 = vmatpush.bf16.msra.mxu0 %v9781_v33  ;;  %v9761_v58 = vor.u32 %v10773_v19, %v9758_v20  ;;  %v9748_v8 = vld [vmem:[#allocation28 + $0x30] sm:$0xf]  ;;  %v9750_v16 = vld [vmem:[#allocation28 + $0x38] sm:$0xf0]  ;;  %v9788_v49 = vld [vmem:[#allocation28 + $0x80] sm:$0xf] }
 0x9bc   : > { %v5867_v12 = vsel %vm5866_vm11, %v5865_v0, %v5827_v17  ;;  %v5875_v59 = vsel %vm5866_vm11, %v5874_v26, %v5853_v62  ;;  %v9749_v62 = vor.u32 %v10772_v39, %v9748_v8  ;;  %v9753_v15 = vor.u32 %v10771_v24, %v9750_v16  ;;  %v9740_v26 = vld [vmem:[#allocation28 + $0x20] sm:$0xf]  ;;  %v10770_v0 = vld [vmem:[#allocation28 + $0x24] sm:$0xf0]  ;;  %v10787_v33 = vld [vmem:[#allocation28 + $0xb4] sm:$0xf] }
 0x9bd   : > { %v5869_v54 = vsel %vm5868_vm12, %v5867_v12, %v11230_v25  ;;  %v5876_v23 = vsel %vm5868_vm12, %v5875_v59, %v11231_v28  ;;  %6181 = vmatpush.bf16.msrb.mxu2 %v9761_v58  ;;  %v10788_v28 = vld [vmem:[#allocation28 + $0xb4] sm:$0xf0]  ;;  %v9742_v12 = vld [vmem:[#allocation28 + $0x28] sm:$0xf0]  ;;  %v10782_v21 = vld [vmem:[#allocation28 + $0x84] sm:$0xf0]  ;;  %v9817_v61 = vor.u32 %v10787_v33, %v9814_v52 }
 0x9be   : > { %v5838_v27 = vpop.permute.xlu0 %5837  ;;  %v5870_v14 = vsel %vm2588_vm3, %v5869_v54, %v5834_v7  ;;  %v5877_v30 = vsel %vm2588_vm3, %v5876_v23, %v5860_v29  ;;  %v9813_v25 = vor.u32 %v10788_v28, %v9812_v4  ;;  %v10769_v7 = vld [vmem:[#allocation28 + $0x24] sm:$0xf]  ;;  %v9741_v29 = vor.u32 %v10770_v0, %v9740_v26  ;;  %v9804_v54 = vld [vmem:[#allocation28 + $0xa0] sm:$0xf]  ;;  %v10786_v23 = vld [vmem:[#allocation28 + $0xa4] sm:$0xf0] }
 0x9bf   : > { %v5871_v36 = vsel %vm1345_vm0, %v5870_v14, %v5838_v27  ;;  %v5881_v32 = vrot.slane %v5877_v30, 7  ;;  %6151 = vmatpush.bf16.msra.mxu0 %v9773_v44  ;;  %v9745_v59 = vor.u32 %v10769_v7, %v9742_v12  ;;  %v9805_v27 = vor.u32 %v10786_v23, %v9804_v54  ;;  %v9732_v14 = vld [vmem:[#allocation28 + $0x10] sm:$0xf]  ;;  %v10768_v30 = vld [vmem:[#allocation28 + $0x14] sm:$0xf0] }
 0x9c0   : > { %v5880_v40 = vrot.slane %v5871_v36, 7  ;;  %6168 = vmatpush.bf16.msrb.mxu1 %v9813_v25  ;;  %v9733_v36 = vor.u32 %v10768_v30, %v9732_v14  ;;  %v9789_v50 = vor.u32 %v10782_v21, %v9788_v49  ;;  %v9798_v44 = vld [vmem:[#allocation28 + $0x98] sm:$0xf0]  ;;  %v9880_v6 = vld [vmem:[#allocation32 + $0x78] sm:$0xf0] }
 0x9c1   : > { %6182 = vmatpush.bf16.msrb.mxu2 %v9753_v15  ;;  %v9801_v51 = vor.u32 %v10783_v9, %v9798_v44  ;;  %v9870_v19 = vld [vmem:[#allocation32 + $0x60] sm:$0xf]  ;;  %v10801_v8 = vld [vmem:[#allocation32 + $0x64] sm:$0xf]  ;;  %v9872_v39 = vld [vmem:[#allocation32 + $0x68] sm:$0xf0] }
 0x9c2   : > { %v5882_v37 = vsel %vm2536_vm2, %v5880_v40, %v5881_v32  ;;  %v5885_v35 = vsel %vm2536_vm2, 0.0, %v5880_v40  ;;  %v9734_v32 = vld [vmem:[#allocation28 + $0x18] sm:$0xf0]  ;;  %v5989_v15 = vld [vmem:[#allocation26] sm:$0xff]  ;;  %v9875_v4 = vor.u32 %v10801_v8, %v9872_v39  ;;  %v10797_v49 = vld [vmem:[#allocation32 + $0x44] sm:$0xf] }
 0x9c3   : > { %v5888_v43 = vrot.slane %v5885_v35, 1  ;;  %v5889_v38 = vrot.slane %v5882_v37, 1  ;;  %6152 = vmatpush.bf16.msra.mxu0 %v9765_v3  ;;  %v9737_v40 = vor.u32 %v10767_v31, %v9734_v32  ;;  %v5990_v25 = vld [vmem:[#allocation26 + $0x8] sm:$0xff]  ;;  %v9856_v21 = vld [vmem:[#allocation32 + $0x48] sm:$0xf0] }
 0x9c4   : > { %6169 = vmatpush.bf16.msrb.mxu1 %v9805_v27  ;;  %v10828_v12 = vld [vmem:[#allocation32 + $0x134] sm:$0xf0]  ;;  %v9958_v33 = vld [vmem:[#allocation32 + $0x110] sm:$0xf]  ;;  %v10817_v8 = vld [vmem:[#allocation32 + $0xe4] sm:$0xf] }
 0x9c5   : > { %v5890_v45 = vsel %vm1345_vm0, %v5888_v43, %v5889_v38  ;;  %v5892_v46 = vsel %vm1345_vm0, %v5889_v38, %v13181_v42  ;;  %6183 = vmatpush.bf16.msrb.mxu2 %v9745_v59  ;;  %v9724_v43 = vld [vmem:[#allocation28] sm:$0xf]  ;;  %v10766_v38 = vld [vmem:[#allocation28 + $0x4] sm:$0xf0]  ;;  %v10800_v32 = vld [vmem:[#allocation32 + $0x54] sm:$0xf0] }
 0x9c6   : > { %v11237_v47 = vpack.i.bf16 %v5892_v46, %v5890_v45  ;;  %v10765_v45 = vld [vmem:[#allocation28 + $0x4] sm:$0xf]  ;;  %v9725_v46 = vor.u32 %v10766_v38, %v9724_v43  ;;  %v10826_v38 = vld [vmem:[#allocation32 + $0x124] sm:$0xf0]  ;;  %v10824_v52 = vld [vmem:[#allocation32 + $0x114] sm:$0xf0] }
 0x9c7   : > { %6153 = vmatpush.bf16.msra.mxu0 %v9757_v34  ;;  %v10802_v34 = vld [vmem:[#allocation32 + $0x64] sm:$0xf0]  ;;  %v9966_v43 = vld [vmem:[#allocation32 + $0x120] sm:$0xf]  ;;  %v9942_v9 = vld [vmem:[#allocation32 + $0xf0] sm:$0xf] }
 0x9c8   : > { %11238 = vrot.lane.b32.xlu1 %v11237_v47, %s12143_s13  ;;  %v9726_v47 = vld [vmem:[#allocation28 + $0x8] sm:$0xf0]  ;;  %v9871_v16 = vor.u32 %v10802_v34, %v9870_v19  ;;  %v10820_v44 = vld [vmem:[#allocation32 + $0xf4] sm:$0xf0]  ;;  %v10793_v19 = vld [vmem:[#allocation32 + $0x24] sm:$0xf] }
 0x9c9   : > { %6184 = vmatpush.bf16.msrb.mxu2 %v9737_v40  ;;  %v9729_v55 = vor.u32 %v10765_v45, %v9726_v47  ;;  %v10799_v40 = vld [vmem:[#allocation32 + $0x54] sm:$0xf]  ;;  %v9967_v45 = vor.u32 %v10826_v38, %v9966_v43  ;;  %v10798_v47 = vld [vmem:[#allocation32 + $0x44] sm:$0xf0]  ;;  %v9840_v34 = vld [vmem:[#allocation32 + $0x28] sm:$0xf0] }
 0x9ca   : > { %v9936_v39 = vld [vmem:[#allocation32 + $0xe8] sm:$0xf0]  ;;  %v9910_v43 = vld [vmem:[#allocation32 + $0xb0] sm:$0xf]  ;;  %v10812_v38 = vld [vmem:[#allocation32 + $0xb4] sm:$0xf0] }
 0x9cb   : > { %6154 = vmatpush.bf16.msra.mxu0 %v9749_v62 }
 0x9cd   : > { %6185 = vmatpush.bf16.msrb.mxu2 %v9729_v55 }
 0x9cf   : > { %6155 = vmatpush.bf16.msra.mxu0 %v9741_v29  ;;  %v9974_v29 = vld [vmem:[#allocation32 + $0x130] sm:$0xf] }
 0x9d0   : > { %v9975_v30 = vor.u32 %v10828_v12, %v9974_v29  ;;  %v10815_v29 = vld [vmem:[#allocation32 + $0xd4] sm:$0xf]  ;;  %v9928_v12 = vld [vmem:[#allocation32 + $0xd8] sm:$0xf0] }
 0x9d3   : > { %6156 = vmatpush.bf16.msra.mxu0 %v9733_v36  ;;  %v9862_v36 = vld [vmem:[#allocation32 + $0x50] sm:$0xf] }
 0x9d7   : > { %6157 = vmatpush.bf16.msra.mxu0 %v9725_v46  ;;  %v9854_v46 = vld [vmem:[#allocation32 + $0x40] sm:$0xf] }
 0x9d8   : > { %v9855_v55 = vor.u32 %v10798_v47, %v9854_v46  ;;  %v10827_v46 = vld [vmem:[#allocation32 + $0x134] sm:$0xf]  ;;  %v9976_v47 = vld [vmem:[#allocation32 + $0x138] sm:$0xf0] }
 0xa3a   : > { %v11239_v22 = vpop.permute.xlu1 %11238 }
 0xa3b   : > { %v11241_v57 = vunpack.i.h.bf16 %v11239_v22  ;;  %v11240_v11 = vunpack.i.l.bf16 %v11239_v22 }
 0xa3d   : > { %v5900_v5 = vsel %vm3813_vm6, %v5882_v37, %v11241_v57  ;;  %v5899_v13 = vsel %vm3813_vm6, %v5885_v35, %v11240_v11  ;;  %v10784_v37 = vld [vmem:[#allocation28 + $0x94] sm:$0xf0]  ;;  %v5984_v57 = vperm.slane %v5980_v60, 1 }
 0xa3e   : > { %v5901_v17 = vpack.c.bf16 %v5900_v5, %v5899_v13  ;;  %v9797_v35 = vor.u32 %v10784_v37, %v9796_v41  ;;  %v9878_v5 = vld [vmem:[#allocation32 + $0x70] sm:$0xf]  ;;  %v10804_v13 = vld [vmem:[#allocation32 + $0x74] sm:$0xf0]  ;;  %v9863_v41 = vor.u32 %v10800_v32, %v9862_v36  ;;  %v9864_v37 = vld [vmem:[#allocation32 + $0x58] sm:$0xf0] }
 0xa3f   : > { %v9879_v18 = vor.u32 %v10804_v13, %v9878_v5  ;;  %v10795_v60 = vld [vmem:[#allocation32 + $0x34] sm:$0xf]  ;;  %v9838_v5 = vld [vmem:[#allocation32 + $0x20] sm:$0xf]  ;;  %v10794_v13 = vld [vmem:[#allocation32 + $0x24] sm:$0xf0] }
 0xa40   : > { %5974 = vmatmul.bf16.vlgmr.msra.gmra.mxu3 %v5901_v17  ;;  %6170 = vmatpush.bf16.msrb.mxu1 %v9797_v35  ;;  %v10803_v17 = vld [vmem:[#allocation32 + $0x74] sm:$0xf]  ;;  %v9867_v35 = vor.u32 %v10799_v40, %v9864_v37  ;;  %v9824_v32 = vld [vmem:[#allocation32 + $0x8] sm:$0xf0] }
 0xa41   : > { %v9883_v58 = vor.u32 %v10803_v17, %v9880_v6  ;;  %6494 = vmatpush.bf16.msrb.mxu3 %v9879_v18  ;;  %v9934_v17 = vld [vmem:[#allocation32 + $0xe0] sm:$0xf]  ;;  %v9839_v18 = vor.u32 %v10794_v13, %v9838_v5  ;;  %v10818_v6 = vld [vmem:[#allocation32 + $0xe4] sm:$0xf0]  ;;  %v9920_v37 = vld [vmem:[#allocation32 + $0xc8] sm:$0xf0] }
 0xa43   : > { %6536 = vmatpush.bf16.msra.mxu2 %v9883_v58  ;;  %v9843_v58 = vor.u32 %v10793_v19, %v9840_v34  ;;  %v9886_v34 = vld [vmem:[#allocation32 + $0x80] sm:$0xf] }
 0xa44   : > { %6171 = vmatpush.bf16.msrb.mxu1 %v9789_v50  ;;  %v9859_v50 = vor.u32 %v10797_v49, %v9856_v21  ;;  %v13196_v49 = vld [vmem:[#allocation29] sm:$0xf]  ;;  %v10811_v21 = vld [vmem:[#allocation32 + $0xb4] sm:$0xf] }
 0xa45   : > { %6495 = vmatpush.bf16.msrb.mxu3 %v9871_v16  ;;  %v10792_v16 = vld [vmem:[#allocation32 + $0x14] sm:$0xf0]  ;;  %v6218_v13 = vperm.slane %v13196_v49, 1 }
 0xa47   : > { %6537 = vmatpush.bf16.msra.mxu2 %v9875_v4 }
 0xa48   : > { %6196 = vmatpush.bf16.msra.mxu1 %v9817_v61  ;;  %v9959_v61 = vor.u32 %v10824_v52, %v9958_v33  ;;  %v9902_v52 = vld [vmem:[#allocation32 + $0xa0] sm:$0xf] }
 0xa49   : > { %6496 = vmatpush.bf16.msrb.mxu3 %v9863_v41  ;;  %v10813_v41 = vld [vmem:[#allocation32 + $0xc4] sm:$0xf] }
 0xa4b   : > { %6538 = vmatpush.bf16.msra.mxu2 %v9867_v35  ;;  %v9923_v35 = vor.u32 %v10813_v41, %v9920_v37 }
 0xa4c   : > { %6197 = vmatpush.bf16.msra.mxu1 %v9809_v56  ;;  %v9847_v56 = vor.u32 %v10796_v48, %v9846_v53  ;;  %v10825_v53 = vld [vmem:[#allocation32 + $0x124] sm:$0xf] }
 0xa4d   : > { %6497 = vmatpush.bf16.msrb.mxu3 %v9855_v55  ;;  %v9979_v55 = vor.u32 %v10827_v46, %v9976_v47 }
 0xa4f   : > { %6539 = vmatpush.bf16.msra.mxu2 %v9859_v50  ;;  %v9912_v50 = vld [vmem:[#allocation32 + $0xb8] sm:$0xf0] }
 0xa50   : > { %6198 = vmatpush.bf16.msra.mxu1 %v9801_v51  ;;  %v9943_v51 = vor.u32 %v10820_v44, %v9942_v9  ;;  %v9915_v33 = vor.u32 %v10811_v21, %v9912_v50  ;;  %v6208_v44 = vperm.slane %v13196_v49, 0 }
 0xa51   : > { %6498 = vmatpush.bf16.msrb.mxu3 %v9847_v56  ;;  %v9968_v56 = vld [vmem:[#allocation32 + $0x128] sm:$0xf0] }
 0xa52   : > { %6508 = vmatpush.bf16.msrb.mxu0 %v9943_v51  ;;  %v9971_v9 = vor.u32 %v10825_v53, %v9968_v56  ;;  %v9904_v51 = vld [vmem:[#allocation32 + $0xa8] sm:$0xf0]  ;;  %v6212_v5 = vperm.slane %v6208_v44, 0  ;;  %v6235_v44 = vld [vmem:[#allocation31 + $0x18] sm:$0xff] }
 0xa54   : > { %6199 = vmatpush.bf16.msra.mxu1 %v9793_v10  ;;  %v9951_v10 = vor.u32 %v10822_v2, %v9950_v1  ;;  %v9894_v1 = vld [vmem:[#allocation32 + $0x90] sm:$0xf]  ;;  %v10808_v2 = vld [vmem:[#allocation32 + $0x94] sm:$0xf0] }
 0xa55   : > { %6499 = vmatpush.bf16.msrb.mxu3 %v9839_v18  ;;  %v9896_v18 = vld [vmem:[#allocation32 + $0x98] sm:$0xf0] }
 0xac3   : > { %v5975_v3 = vpop.f32.mrf.mxu3 }
 0xac4   : > { %v5982_v22 = vmul.f32 %v5981_v63, %v5975_v3 }
 0xac6   : > { %v5985_v11 = vadd.f32 %v5984_v57, %v5982_v22  ;;  %v10819_v22 = vld [vmem:[#allocation32 + $0xf4] sm:$0xf] }
 0xac8   : > { %v5987_v24 = vmax.f32 %v5985_v11, 0.0 }
 0xaca   : > { %v5991_v26 = vmul.f32 %v5989_v15, %v5987_v24  ;;  %v9939_v24 = vor.u32 %v10817_v8, %v9936_v39  ;;  %v9926_v15 = vld [vmem:[#allocation32 + $0xd0] sm:$0xf] }
 0xacb   : > { %v5977_v20 = vpop.f32.mrf.mxu3 }
 0xacc   : > { %v5983_v62 = vmul.f32 %v5981_v63, %v5977_v20  ;;  %v5995_v59 = vrot.slane %v5991_v26, 1  ;;  %v9848_v63 = vld [vmem:[#allocation32 + $0x38] sm:$0xf0]  ;;  %v9935_v20 = vor.u32 %v10818_v6, %v9934_v17  ;;  %v10807_v17 = vld [vmem:[#allocation32 + $0x94] sm:$0xf] }
 0xacd   : > { %v9851_v3 = vor.u32 %v10795_v60, %v9848_v63  ;;  %v10809_v60 = vld [vmem:[#allocation32 + $0xa4] sm:$0xf]  ;;  %v9899_v19 = vor.u32 %v10807_v17, %v9896_v18  ;;  %v10104_v17 = vld [vmem:[#allocation37 + $0xf0] sm:$0xf] }
 0xace   : > { %v5986_v28 = vadd.f32 %v5984_v57, %v5983_v62  ;;  %v9944_v57 = vld [vmem:[#allocation32 + $0xf8] sm:$0xf0]  ;;  %6509 = vmatpush.bf16.msrb.mxu0 %v9935_v20  ;;  %v9830_v62 = vld [vmem:[#allocation32 + $0x10] sm:$0xf]  ;;  %v9907_v63 = vor.u32 %v10809_v60, %v9904_v51  ;;  %v10806_v20 = vld [vmem:[#allocation32 + $0x84] sm:$0xf0] }
 0xacf   : > { %v9947_v11 = vor.u32 %v10819_v22, %v9944_v57  ;;  %6540 = vmatpush.bf16.msra.mxu2 %v9851_v3  ;;  %v9831_v4 = vor.u32 %v10792_v16, %v9830_v62  ;;  %v10823_v3 = vld [vmem:[#allocation32 + $0x114] sm:$0xf]  ;;  %v9960_v22 = vld [vmem:[#allocation32 + $0x118] sm:$0xf0]  ;;  %v9887_v39 = vor.u32 %v10806_v20, %v9886_v34  ;;  %v10034_v34 = vld [vmem:[#allocation37 + $0x68] sm:$0xf0] }
 0xad0   : > { %v5988_v0 = vmax.f32 %v5986_v28, 0.0  ;;  %v10816_v28 = vld [vmem:[#allocation32 + $0xd4] sm:$0xf0] }
 0xad1   : > { %6500 = vmatpush.bf16.msrb.mxu3 %v9831_v4  ;;  %v10805_v4 = vld [vmem:[#allocation32 + $0x84] sm:$0xf] }
 0xad2   : > { %v5992_v7 = vmul.f32 %v5990_v25, %v5988_v0  ;;  %v10791_v25 = vld [vmem:[#allocation32 + $0x14] sm:$0xf]  ;;  %v9927_v0 = vor.u32 %v10816_v28, %v9926_v15  ;;  %v6222_v15 = vperm.slane %v6218_v13, 1  ;;  %v9888_v28 = vld [vmem:[#allocation32 + $0x88] sm:$0xf0] }
 0xad3   : > { %6541 = vmatpush.bf16.msra.mxu2 %v9843_v58  ;;  %v10821_v58 = vld [vmem:[#allocation32 + $0x104] sm:$0xf]  ;;  %v10842_v13 = vld [vmem:[#allocation37 + $0x64] sm:$0xf0] }
 0xad4   : > { %v5996_v54 = vrot.slane %v5992_v7, 1  ;;  %v6001_v23 = vpack.c.bf16 %v5992_v7, %v5991_v26  ;;  %v9832_v26 = vld [vmem:[#allocation32 + $0x18] sm:$0xf0]  ;;  %6510 = vmatpush.bf16.msrb.mxu0 %v9927_v0 }
 0xad5   : > { %v9835_v7 = vor.u32 %v10791_v25, %v9832_v26  ;;  %v9891_v25 = vor.u32 %v10805_v4, %v9888_v28  ;;  %v10026_v4 = vld [vmem:[#allocation37 + $0x58] sm:$0xf0] }
 0xad6   : > { %v5997_v27 = vsel %vm1345_vm0, %v5995_v59, %v5996_v54  ;;  %v5998_v14 = vsel %vm1345_vm0, %v5996_v54, %v13181_v42  ;;  %6158 = vmatmul.bf16.vlgmr.msra.gmra.mxu0 %v6001_v23  ;;  %6186 = vmatmul.bf16.vlgmr.msrb.gmra.mxu2 %v6001_v23  ;;  %v9931_v59 = vor.u32 %v10815_v29, %v9928_v12  ;;  %v9822_v54 = vld [vmem:[#allocation32] sm:$0xf]  ;;  %v10790_v23 = vld [vmem:[#allocation32 + $0x4] sm:$0xf0] }
 0xad7   : > { %v6002_v31 = vpack.c.bf16 %v5998_v14, %v5997_v27  ;;  %6542 = vmatpush.bf16.msra.mxu2 %v9835_v7  ;;  %v9823_v27 = vor.u32 %v10790_v23, %v9822_v54  ;;  %v9918_v14 = vld [vmem:[#allocation32 + $0xc0] sm:$0xf] }
 0xad8   : > { %v6232_v54 = vld [vmem:[#allocation31] sm:$0xff] }
 0xad9   : > { %9818 = vmatmul.msk.bf16.vlgmr.msrb.gmra.mxu1 %vm3813_vm6, %v6002_v31  ;;  %6501 = vmatpush.bf16.msrb.mxu3 %v9823_v27  ;;  %v6209_v27 = vperm.slane %v13196_v49, 2 }
 0xada   : > { %6526 = vmatpush.bf16.msrb.mxu1 %v9975_v30  ;;  %v10814_v30 = vld [vmem:[#allocation32 + $0xc4] sm:$0xf0] }
 0xadb   : > { %v9919_v36 = vor.u32 %v10814_v30, %v9918_v14  ;;  %v6234_v30 = vld [vmem:[#allocation31 + $0x10] sm:$0xff]  ;;  %v6213_v37 = vperm.slane %v6209_v27, 0 }
 0xadc   : > { %v10120_v27 = vld [vmem:[#allocation37 + $0x110] sm:$0xf] }
 0xadd   : > { %6511 = vmatpush.bf16.msrb.mxu0 %v9919_v36  ;;  %6568 = vmatpush.bf16.msra.mxu3 %v9979_v55 }
 0xade   : > { %6527 = vmatpush.bf16.msrb.mxu1 %v9967_v45  ;;  %v9911_v45 = vor.u32 %v10812_v38, %v9910_v43 }
 0xae1   : > { %6512 = vmatpush.bf16.msrb.mxu0 %v9911_v45  ;;  %6569 = vmatpush.bf16.msra.mxu3 %v9971_v9  ;;  %v6233_v9 = vld [vmem:[#allocation31 + $0x8] sm:$0xff] }
 0xae2   : > { %6528 = vmatpush.bf16.msrb.mxu1 %v9959_v61  ;;  %v10810_v61 = vld [vmem:[#allocation32 + $0xa4] sm:$0xf0] }
 0xae3   : > { %v9903_v48 = vor.u32 %v10810_v61, %v9902_v52 }
 0xae5   : > { %6513 = vmatpush.bf16.msrb.mxu0 %v9903_v48 }
 0xae6   : > { %6529 = vmatpush.bf16.msrb.mxu1 %v9951_v10  ;;  %v9895_v10 = vor.u32 %v10808_v2, %v9894_v1  ;;  %v10040_v2 = vld [vmem:[#allocation37 + $0x70] sm:$0xf] }
 0xae9   : > { %9819 = vmatmul.msk.bf16.vlgmr.msra.gmra.mxu1 %vm3813_vm6, %v6002_v31  ;;  %v10789_v31 = vld [vmem:[#allocation32 + $0x4] sm:$0xf]  ;;  %6514 = vmatpush.bf16.msrb.mxu0 %v9895_v10  ;;  %v10843_v10 = vld [vmem:[#allocation37 + $0x74] sm:$0xf] }
 0xaea   : > { %6550 = vmatpush.bf16.msra.mxu1 %v9947_v11  ;;  %v9827_v40 = vor.u32 %v10789_v31, %v9824_v32  ;;  %v9963_v11 = vor.u32 %v10823_v3, %v9960_v22  ;;  %v10844_v3 = vld [vmem:[#allocation37 + $0x74] sm:$0xf0] }
 0xaeb   : > { %v10041_v22 = vor.u32 %v10844_v3, %v10040_v2  ;;  %v9992_v2 = vld [vmem:[#allocation37 + $0x10] sm:$0xf]  ;;  %v10832_v3 = vld [vmem:[#allocation37 + $0x14] sm:$0xf0] }
 0xaec   : > { %6543 = vmatpush.bf16.msra.mxu2 %v9827_v40  ;;  %6570 = vmatpush.bf16.msra.mxu3 %v9963_v11 }
 0xaed   : > { %6515 = vmatpush.bf16.msrb.mxu0 %v9887_v39  ;;  %v10840_v39 = vld [vmem:[#allocation37 + $0x54] sm:$0xf0] }
 0xaee   : > { %6551 = vmatpush.bf16.msra.mxu1 %v9939_v24  ;;  %v9952_v24 = vld [vmem:[#allocation32 + $0x108] sm:$0xf0] }
 0xaef   : > { %v9955_v62 = vor.u32 %v10821_v58, %v9952_v24  ;;  %v10096_v24 = vld [vmem:[#allocation37 + $0xe0] sm:$0xf] }
 0xaf1   : > { %6571 = vmatpush.bf16.msra.mxu3 %v9955_v62  ;;  %6842 = vmatpush.bf16.msra.mxu0 %v10041_v22  ;;  %v9993_v22 = vor.u32 %v10832_v3, %v9992_v2 }
 0xaf2   : > { %6552 = vmatpush.bf16.msra.mxu1 %v9931_v59 }
 0xaf6   : > { %6553 = vmatpush.bf16.msra.mxu1 %v9923_v35  ;;  %v6219_v35 = vperm.slane %v13196_v49, 3 }
 0xaf8   : > { %v6223_v21 = vperm.slane %v6219_v35, 1  ;;  %v10835_v35 = vld [vmem:[#allocation37 + $0x34] sm:$0xf] }
 0xafa   : > { %6554 = vmatpush.bf16.msra.mxu1 %v9915_v33 }
 0xafe   : > { %6555 = vmatpush.bf16.msra.mxu1 %v9907_v63 }
 0xb02   : > { %6556 = vmatpush.bf16.msra.mxu1 %v9899_v19  ;;  %v10841_v19 = vld [vmem:[#allocation37 + $0x64] sm:$0xf] }
 0xb03   : > { %v10037_v58 = vor.u32 %v10841_v19, %v10034_v34  ;;  %v9984_v34 = vld [vmem:[#allocation37] sm:$0xf] }
 0xb06   : > { %6557 = vmatpush.bf16.msra.mxu1 %v9891_v25 }
 0xb53   : > { %v6159_v57 = vpop.f32.mrf.mxu0 }
 0xb56   : > { %v6173_v6 = vpop.f32.mrf.mxu1 }
 0xb57   : > { %v6174_v8 = vadd.f32 %v6173_v6, %v6159_v57  ;;  %v10042_v57 = vld [vmem:[#allocation37 + $0x78] sm:$0xf0]  ;;  %v10860_v6 = vld [vmem:[#allocation37 + $0xf4] sm:$0xf0] }
 0xb58   : > { %v10045_v11 = vor.u32 %v10843_v10, %v10042_v57  ;;  %v10105_v20 = vor.u32 %v10860_v6, %v10104_v17  ;;  %v10064_v10 = vld [vmem:[#allocation37 + $0xa0] sm:$0xf]  ;;  %v10850_v57 = vld [vmem:[#allocation37 + $0xa4] sm:$0xf0]  ;;  %v10090_v6 = vld [vmem:[#allocation37 + $0xd8] sm:$0xf0] }
 0xb59   : > { %v6214_v16 = vmul.f32 %v6212_v5, %v6174_v8  ;;  %v6187_v14 = vpop.f32.mrf.mxu2  ;;  %v10024_v8 = vld [vmem:[#allocation37 + $0x50] sm:$0xf] }
 0xb5a   : > { %6856 = vmatpush.bf16.msrb.mxu2 %v10105_v20  ;;  %v10025_v62 = vor.u32 %v10840_v39, %v10024_v8  ;;  %v10830_v20 = vld [vmem:[#allocation37 + $0x4] sm:$0xf0] }
 0xb5b   : > { %v6224_v26 = vadd.f32 %v6222_v15, %v6214_v16  ;;  %v6161_v0 = vpop.f32.mrf.mxu0  ;;  %v10858_v16 = vld [vmem:[#allocation37 + $0xe4] sm:$0xf0]  ;;  %v9985_v39 = vor.u32 %v10830_v20, %v9984_v34 }
 0xb5c   : > { %v10097_v28 = vor.u32 %v10858_v16, %v10096_v24  ;;  %v10848_v24 = vld [vmem:[#allocation37 + $0x94] sm:$0xf0]  ;;  %v9986_v16 = vld [vmem:[#allocation37 + $0x8] sm:$0xf0] }
 0xb5d   : > { %v6228_v12 = vmax.f32 %v6224_v26, 0.0  ;;  %v10016_v26 = vld [vmem:[#allocation37 + $0x40] sm:$0xf] }
 0xb5e   : > { %v6175_v7 = vpop.f32.mrf.mxu1  ;;  %6857 = vmatpush.bf16.msrb.mxu2 %v10097_v28  ;;  %v10853_v28 = vld [vmem:[#allocation37 + $0xc4] sm:$0xf] }
 0xb5f   : > { %v6176_v29 = vadd.f32 %v6175_v7, %v6161_v0  ;;  %v6236_v31 = vmul.f32 %v6232_v54, %v6228_v12  ;;  %v10838_v0 = vld [vmem:[#allocation37 + $0x44] sm:$0xf0]  ;;  %v10856_v12 = vld [vmem:[#allocation37 + $0xd4] sm:$0xf0] }
 0xb60   : > { %v10017_v7 = vor.u32 %v10838_v0, %v10016_v26 }
 0xb61   : > { %v6216_v59 = vmul.f32 %v6212_v5, %v6176_v29  ;;  %v6242_v43 = vrot.slane %v6236_v31, 1  ;;  %v6189_v33 = vpop.f32.mrf.mxu2  ;;  %v10032_v5 = vld [vmem:[#allocation37 + $0x60] sm:$0xf]  ;;  %v10088_v29 = vld [vmem:[#allocation37 + $0xd0] sm:$0xf] }
 0xb62   : > { %v10033_v18 = vor.u32 %v10842_v13, %v10032_v5  ;;  %v10089_v54 = vor.u32 %v10856_v12, %v10088_v29  ;;  %v9994_v5 = vld [vmem:[#allocation37 + $0x18] sm:$0xf0]  ;;  %v10065_v13 = vor.u32 %v10850_v57, %v10064_v10  ;;  %v10846_v29 = vld [vmem:[#allocation37 + $0x84] sm:$0xf0] }
 0xb63   : > { %v6226_v23 = vadd.f32 %v6222_v15, %v6216_v59  ;;  %v10839_v15 = vld [vmem:[#allocation37 + $0x54] sm:$0xf]  ;;  %v10837_v59 = vld [vmem:[#allocation37 + $0x44] sm:$0xf] }
 0xb64   : > { %6843 = vmatpush.bf16.msra.mxu0 %v10033_v18  ;;  %v10029_v25 = vor.u32 %v10839_v15, %v10026_v4  ;;  %6858 = vmatpush.bf16.msrb.mxu2 %v10089_v54  ;;  %v10855_v18 = vld [vmem:[#allocation37 + $0xd4] sm:$0xf]  ;;  %v10074_v54 = vld [vmem:[#allocation37 + $0xb8] sm:$0xf0] }
 0xb65   : > { %v6230_v36 = vmax.f32 %v6226_v23, 0.0  ;;  %v10018_v23 = vld [vmem:[#allocation37 + $0x48] sm:$0xf0]  ;;  %v10093_v19 = vor.u32 %v10855_v18, %v10090_v6 }
 0xb66   : > { %v6201_v32 = vpop.f32.mrf.mxu1 }
 0xb67   : > { %v6238_v40 = vmul.f32 %v6234_v30, %v6230_v36  ;;  %v6202_v41 = vadd.f32 %v6201_v32, %v6187_v14  ;;  %v10021_v14 = vor.u32 %v10837_v59, %v10018_v23  ;;  %v10864_v30 = vld [vmem:[#allocation37 + $0x114] sm:$0xf0]  ;;  %v10008_v36 = vld [vmem:[#allocation37 + $0x30] sm:$0xf]  ;;  %v10851_v59 = vld [vmem:[#allocation37 + $0xb4] sm:$0xf] }
 0xb68   : > { %6844 = vmatpush.bf16.msra.mxu0 %v10025_v62  ;;  %v10836_v32 = vld [vmem:[#allocation37 + $0x34] sm:$0xf0]  ;;  %v10829_v62 = vld [vmem:[#allocation37 + $0x4] sm:$0xf]  ;;  %v6578_v23 = vld [vmem:[#allocation34] sm:$0xf] }
 0xb69   : > { %v6243_v38 = vrot.slane %v6238_v40, 1  ;;  %v6248_v45 = vpack.c.bf16 %v6238_v40, %v6236_v31  ;;  %v6215_v55 = vmul.f32 %v6213_v37, %v6202_v41  ;;  %v10121_v31 = vor.u32 %v10864_v30, %v10120_v27  ;;  %v10080_v41 = vld [vmem:[#allocation37 + $0xc0] sm:$0xf]  ;;  %v10849_v30 = vld [vmem:[#allocation37 + $0xa4] sm:$0xf] }
 0xb6a   : > { %v10009_v40 = vor.u32 %v10836_v32, %v10008_v36  ;;  %v9989_v4 = vor.u32 %v10829_v62, %v9986_v16  ;;  %v10077_v27 = vor.u32 %v10851_v59, %v10074_v54  ;;  %v10863_v36 = vld [vmem:[#allocation37 + $0x114] sm:$0xf]  ;;  %v10122_v32 = vld [vmem:[#allocation37 + $0x118] sm:$0xf0]  ;;  %v6591_v3 = vperm.slane %v6578_v23, 3 }
 0xb6b   : > { %v6244_v46 = vsel %vm1345_vm0, %v6242_v43, %v6243_v38  ;;  %v6245_v47 = vsel %vm1345_vm0, %v6243_v38, %v13181_v42  ;;  %6502 = vmatmul.bf16.vlgmr.msrb.gmra.mxu3 %v6248_v45  ;;  %6544 = vmatmul.bf16.vlgmr.msra.gmra.mxu2 %v6248_v45  ;;  %v6225_v61 = vadd.f32 %v6223_v21, %v6215_v55  ;;  %v10010_v38 = vld [vmem:[#allocation37 + $0x38] sm:$0xf0]  ;;  %v10112_v45 = vld [vmem:[#allocation37 + $0x100] sm:$0xf]  ;;  %v10859_v55 = vld [vmem:[#allocation37 + $0xf4] sm:$0xf] }
 0xb6c   : > { %v6250_v50 = vpack.c.bf16 %v6245_v47, %v6244_v46  ;;  %6845 = vmatpush.bf16.msra.mxu0 %v10017_v7  ;;  %6876 = vmatpush.bf16.msrb.mxu3 %v10121_v31  ;;  %v10013_v46 = vor.u32 %v10835_v35, %v10010_v38  ;;  %v10862_v47 = vld [vmem:[#allocation37 + $0x104] sm:$0xf0]  ;;  %v10048_v7 = vld [vmem:[#allocation37 + $0x80] sm:$0xf]  ;;  %v10066_v31 = vld [vmem:[#allocation37 + $0xa8] sm:$0xf0] }
 0xb6d   : > { %v6229_v48 = vmax.f32 %v6225_v61, 0.0  ;;  %v10834_v61 = vld [vmem:[#allocation37 + $0x24] sm:$0xf0]  ;;  %v10049_v12 = vor.u32 %v10846_v29, %v10048_v7  ;;  %v10861_v35 = vld [vmem:[#allocation37 + $0x104] sm:$0xf]  ;;  %v6606_v16 = vld [vmem:[#allocation35 + $0x10] sm:$0xff] }
 0xb6e   : > { %v6203_v52 = vpop.f32.mrf.mxu1  ;;  %9980 = vmatmul.msk.bf16.vlgmr.msrb.gmra.mxu1 %vm3813_vm6, %v6250_v50  ;;  %v6607_v29 = vld [vmem:[#allocation35 + $0x18] sm:$0xff] }
 0xb6f   : > { %v6204_v53 = vadd.f32 %v6203_v52, %v6189_v33  ;;  %v6237_v51 = vmul.f32 %v6233_v9, %v6229_v48  ;;  %6884 = vmatpush.bf16.msrb.mxu1 %v10045_v11  ;;  %v10000_v33 = vld [vmem:[#allocation37 + $0x20] sm:$0xf]  ;;  %v10833_v9 = vld [vmem:[#allocation37 + $0x24] sm:$0xf]  ;;  %v10831_v11 = vld [vmem:[#allocation37 + $0x14] sm:$0xf] }
 0xb70   : > { %6846 = vmatpush.bf16.msra.mxu0 %v10009_v40  ;;  %v10001_v48 = vor.u32 %v10834_v61, %v10000_v33  ;;  %v9997_v17 = vor.u32 %v10831_v11, %v9994_v5  ;;  %v6580_v40 = vperm.slane %v6578_v23, 0 }
 0xb71   : > { %v6217_v49 = vmul.f32 %v6213_v37, %v6204_v53  ;;  %v10854_v37 = vld [vmem:[#allocation37 + $0xc4] sm:$0xf0]  ;;  %v10072_v53 = vld [vmem:[#allocation37 + $0xb0] sm:$0xf] }
 0xb72   : > { %v10081_v43 = vor.u32 %v10854_v37, %v10080_v41  ;;  %v10069_v41 = vor.u32 %v10849_v30, %v10066_v31  ;;  %v10125_v37 = vor.u32 %v10863_v36, %v10122_v32  ;;  %v6584_v33 = vperm.slane %v6580_v40, 0  ;;  %v6926_v40 = vld [vmem:[#allocation38] sm:$0xf] }
 0xb73   : > { %v6227_v56 = vadd.f32 %v6223_v21, %v6217_v49  ;;  %6885 = vmatpush.bf16.msrb.mxu1 %v10037_v58  ;;  %v10113_v21 = vor.u32 %v10862_v47, %v10112_v45  ;;  %v10852_v49 = vld [vmem:[#allocation37 + $0xb4] sm:$0xf0]  ;;  %v10056_v58 = vld [vmem:[#allocation37 + $0x90] sm:$0xf]  ;;  %v10847_v45 = vld [vmem:[#allocation37 + $0x94] sm:$0xf] }
 0xb74   : > { %6859 = vmatpush.bf16.msrb.mxu2 %v10081_v43  ;;  %6847 = vmatpush.bf16.msra.mxu0 %v10001_v48  ;;  %v10057_v15 = vor.u32 %v10848_v24, %v10056_v58  ;;  %v10114_v43 = vld [vmem:[#allocation37 + $0x108] sm:$0xf0]  ;;  %v6604_v58 = vld [vmem:[#allocation35] sm:$0xff] }
 0xb75   : > { %v6231_v60 = vmax.f32 %v6227_v56, 0.0  ;;  %6877 = vmatpush.bf16.msrb.mxu3 %v10113_v21  ;;  %v10073_v56 = vor.u32 %v10852_v49, %v10072_v53  ;;  %v10117_v47 = vor.u32 %v10861_v35, %v10114_v43  ;;  %v6581_v53 = vperm.slane %v6578_v23, 2  ;;  %v10845_v49 = vld [vmem:[#allocation37 + $0x84] sm:$0xf]  ;;  %v10050_v48 = vld [vmem:[#allocation37 + $0x88] sm:$0xf0] }
 0xb76   : > { %v6938_v43 = vperm.slane %v6926_v40, 1 }
 0xb77   : > { %v6239_v63 = vmul.f32 %v6235_v44, %v6231_v60  ;;  %6886 = vmatpush.bf16.msrb.mxu1 %v10029_v25  ;;  %v10002_v44 = vld [vmem:[#allocation37 + $0x28] sm:$0xf0]  ;;  %v6585_v2 = vperm.slane %v6581_v53, 0  ;;  %v6952_v53 = vld [vmem:[%s13372_s28] sm:$0xff] }
 0xb78   : > { %v10005_v60 = vor.u32 %v10833_v9, %v10002_v44  ;;  %6860 = vmatpush.bf16.msrb.mxu2 %v10073_v56  ;;  %6848 = vmatpush.bf16.msra.mxu0 %v9993_v22  ;;  %v10082_v25 = vld [vmem:[#allocation37 + $0xc8] sm:$0xf0] }
 0xb79   : > { %v6249_v1 = vpack.c.bf16 %v6239_v63, %v6237_v51  ;;  %v10857_v51 = vld [vmem:[#allocation37 + $0xe4] sm:$0xf]  ;;  %v10098_v63 = vld [vmem:[#allocation37 + $0xe8] sm:$0xf0]  ;;  %v10085_v0 = vor.u32 %v10853_v28, %v10082_v25 }
 0xb7b   : > { %6516 = vmatmul.bf16.vlgmr.msrb.gmra.mxu0 %v6249_v1  ;;  %9981 = vmatmul.msk.bf16.vlgmr.msra.gmra.mxu3 %vm3813_vm6, %v6250_v50  ;;  %v10106_v50 = vld [vmem:[#allocation37 + $0xf8] sm:$0xf0] }
 0xb7c   : > { %6887 = vmatpush.bf16.msrb.mxu1 %v10021_v14  ;;  %v10109_v52 = vor.u32 %v10859_v55, %v10106_v50  ;;  %6861 = vmatpush.bf16.msrb.mxu2 %v10065_v13  ;;  %v6595_v13 = vperm.slane %v6591_v3, 1 }
 0xb7d   : > { %6849 = vmatpush.bf16.msra.mxu0 %v9985_v39 }
 0xb7e   : > { %6558 = vmatmul.bf16.vlgmr.msra.gmra.mxu1 %v6249_v1  ;;  %6898 = vmatpush.bf16.msra.mxu3 %v10109_v52  ;;  %v10101_v1 = vor.u32 %v10857_v51, %v10098_v63  ;;  %v6590_v52 = vperm.slane %v6578_v23, 1  ;;  %v10053_v63 = vor.u32 %v10845_v49, %v10050_v48 }
 0xb80   : > { %6888 = vmatpush.bf16.msrb.mxu1 %v10013_v46  ;;  %6862 = vmatpush.bf16.msrb.mxu2 %v10057_v15  ;;  %v10058_v46 = vld [vmem:[#allocation37 + $0x98] sm:$0xf0]  ;;  %v6594_v51 = vperm.slane %v6590_v52, 1 }
 0xb81   : > { %6918 = vmatpush.bf16.msrb.mxu0 %v10125_v37  ;;  %v10061_v61 = vor.u32 %v10847_v45, %v10058_v46  ;;  %v6928_v37 = vperm.slane %v6926_v40, 0 }
 0xb82   : > { %6899 = vmatpush.bf16.msra.mxu3 %v10101_v1 }
 0xb84   : > { %6889 = vmatpush.bf16.msrb.mxu1 %v10005_v60  ;;  %6863 = vmatpush.bf16.msrb.mxu2 %v10049_v12 }
 0xb85   : > { %6919 = vmatpush.bf16.msrb.mxu0 %v10117_v47  ;;  %v6942_v47 = vperm.slane %v6938_v43, 1  ;;  %v10162_v43 = vld [vmem:[#allocation40 + $0x40] sm:$0xf] }
 0xb86   : > { %6900 = vmatpush.bf16.msra.mxu3 %v10093_v19 }
 0xb88   : > { %6890 = vmatpush.bf16.msrb.mxu1 %v9997_v17 }
 0xb8a   : > { %6901 = vmatpush.bf16.msra.mxu3 %v10085_v0 }
 0xb8c   : > { %6891 = vmatpush.bf16.msrb.mxu1 %v9989_v4 }
 0xb8e   : > { %6902 = vmatpush.bf16.msra.mxu3 %v10077_v27 }
 0xb92   : > { %6903 = vmatpush.bf16.msra.mxu3 %v10069_v41 }
 0xb96   : > { %6904 = vmatpush.bf16.msra.mxu3 %v10061_v61 }
 0xb9a   : > { %6905 = vmatpush.bf16.msra.mxu3 %v10053_v63 }
 0xbeb   : > { %v6531_v8 = vpop.f32.mrf.mxu1 }
 0xbee   : > { %v6503_v26 = vpop.f32.mrf.mxu3  ;;  %v6545_v21 = vpop.f32.mrf.mxu2 }
 0xbf3   : > { %v6533_v14 = vpop.f32.mrf.mxu1 }
 0xbf6   : > { %v6505_v38 = vpop.f32.mrf.mxu3  ;;  %v6547_v17 = vpop.f32.mrf.mxu2 }
 0xbf8   : > { %v6517_v55 = vpop.f32.mrf.mxu0 }
 0xbf9   : > { %v6518_v50 = vadd.f32 %v6517_v55, %v6503_v26  ;;  %v6605_v26 = vld [vmem:[#allocation35 + $0x8] sm:$0xff] }
 0xbfb   : > { %v6532_v56 = vadd.f32 %v6531_v8, %v6518_v50  ;;  %v6559_v9 = vpop.f32.mrf.mxu1 }
 0xbfc   : > { %v6560_v44 = vadd.f32 %v6559_v9, %v6545_v21  ;;  %v6929_v9 = vperm.slane %v6926_v40, 2 }
 0xbfd   : > { %v6586_v60 = vmul.f32 %v6584_v33, %v6532_v56 }
 0xbfe   : > { %v6573_v1 = vpop.f32.mrf.mxu3 }
 0xbff   : > { %v6574_v10 = vadd.f32 %v6573_v1, %v6560_v44  ;;  %v6596_v57 = vadd.f32 %v6594_v51, %v6586_v60 }
 0xc00   : > { %v6519_v22 = vpop.f32.mrf.mxu0 }
 0xc01   : > { %v6520_v11 = vadd.f32 %v6519_v22, %v6505_v38  ;;  %v6587_v5 = vmul.f32 %v6585_v2, %v6574_v10  ;;  %v6600_v34 = vmax.f32 %v6596_v57, 0.0  ;;  %v6954_v10 = vld [vmem:[%s13372_s28 + $0x10] sm:$0xff]  ;;  %v6933_v57 = vperm.slane %v6929_v9, 0 }
 0xc03   : > { %v6534_v18 = vadd.f32 %v6533_v14, %v6520_v11  ;;  %v6561_v6 = vpop.f32.mrf.mxu1  ;;  %v6597_v8 = vadd.f32 %v6595_v13, %v6587_v5  ;;  %v6608_v15 = vmul.f32 %v6604_v58, %v6600_v34  ;;  %v10188_v34 = vld [vmem:[#allocation40 + $0x78] sm:$0xf0] }
 0xc04   : > { %v6562_v19 = vadd.f32 %v6561_v6, %v6547_v17  ;;  %v10880_v17 = vld [vmem:[#allocation40 + $0x74] sm:$0xf0] }
 0xc05   : > { %v6588_v20 = vmul.f32 %v6584_v33, %v6534_v18  ;;  %v6601_v25 = vmax.f32 %v6597_v8, 0.0  ;;  %v6614_v12 = vrot.slane %v6608_v15, 1 }
 0xc06   : > { %v6575_v39 = vpop.f32.mrf.mxu3 }
 0xc07   : > { %v6598_v24 = vadd.f32 %v6594_v51, %v6588_v20  ;;  %v6576_v62 = vadd.f32 %v6575_v39, %v6562_v19  ;;  %v6609_v27 = vmul.f32 %v6605_v26, %v6601_v25  ;;  %v6939_v51 = vperm.slane %v6926_v40, 3  ;;  %v10879_v19 = vld [vmem:[#allocation40 + $0x74] sm:$0xf]  ;;  %v10178_v20 = vld [vmem:[#allocation40 + $0x60] sm:$0xf] }
 0xc08   : > { %v10191_v8 = vor.u32 %v10879_v19, %v10188_v34  ;;  %v10878_v39 = vld [vmem:[#allocation40 + $0x64] sm:$0xf0]  ;;  %v10876_v25 = vld [vmem:[#allocation40 + $0x54] sm:$0xf0]  ;;  %v10250_v34 = vld [vmem:[#allocation40 + $0xf0] sm:$0xf] }
 0xc09   : > { %v6602_v4 = vmax.f32 %v6598_v24, 0.0  ;;  %v6589_v28 = vmul.f32 %v6585_v2, %v6576_v62  ;;  %v6943_v5 = vperm.slane %v6939_v51, 1  ;;  %v10877_v24 = vld [vmem:[#allocation40 + $0x64] sm:$0xf]  ;;  %v10180_v62 = vld [vmem:[#allocation40 + $0x68] sm:$0xf0] }
 0xc0b   : > { %v6610_v0 = vmul.f32 %v6606_v16, %v6602_v4  ;;  %v6599_v7 = vadd.f32 %v6595_v13, %v6589_v28  ;;  %v10186_v13 = vld [vmem:[#allocation40 + $0x70] sm:$0xf]  ;;  %v10179_v4 = vor.u32 %v10878_v39, %v10178_v20  ;;  %v10896_v20 = vld [vmem:[#allocation40 + $0xf4] sm:$0xf0] }
 0xc0c   : > { %v10187_v6 = vor.u32 %v10880_v17, %v10186_v13  ;;  %v10170_v28 = vld [vmem:[#allocation40 + $0x50] sm:$0xf]  ;;  %v10872_v39 = vld [vmem:[#allocation40 + $0x34] sm:$0xf0] }
 0xc0d   : > { %v6615_v59 = vrot.slane %v6610_v0, 1  ;;  %v6620_v54 = vpack.c.bf16 %v6610_v0, %v6608_v15  ;;  %v6603_v23 = vmax.f32 %v6599_v7, 0.0  ;;  %v10183_v0 = vor.u32 %v10877_v24, %v10180_v62  ;;  %v10871_v24 = vld [vmem:[#allocation40 + $0x34] sm:$0xf] }
 0xc0e   : > { %7275 = vmatpush.bf16.msra.mxu2 %v10187_v6 }
 0xc0f   : > { %v6616_v14 = vsel %vm1345_vm0, %v6614_v12, %v6615_v59  ;;  %v6617_v30 = vsel %vm1345_vm0, %v6615_v59, %v13181_v42  ;;  %v6611_v31 = vmul.f32 %v6607_v29, %v6603_v23  ;;  %6850 = vmatmul.bf16.vlgmr.msra.gmra.mxu0 %v6620_v54  ;;  %6892 = vmatmul.bf16.vlgmr.msrb.gmra.mxu1 %v6620_v54  ;;  %v6932_v42 = vperm.slane %v6928_v37, 0  ;;  %v10875_v29 = vld [vmem:[#allocation40 + $0x54] sm:$0xf]  ;;  %v10172_v12 = vld [vmem:[#allocation40 + $0x58] sm:$0xf0]  ;;  %v6953_v37 = vld [vmem:[%s13372_s28 + $0x8] sm:$0xff] }
 0xc10   : > { %v6622_v36 = vpack.c.bf16 %v6617_v30, %v6616_v14  ;;  %v10171_v30 = vor.u32 %v10876_v25, %v10170_v28  ;;  %v10904_v28 = vld [vmem:[#allocation40 + $0x134] sm:$0xf0] }
 0xc11   : > { %v6621_v32 = vpack.c.bf16 %v6611_v31, %v6609_v27 }
 0xc12   : > { %10126 = vmatmul.msk.bf16.vlgmr.msrb.gmra.mxu3 %vm3039_vm5, %v6622_v36  ;;  %7276 = vmatpush.bf16.msra.mxu2 %v10179_v4  ;;  %v10282_v4 = vld [vmem:[#allocation40 + $0x130] sm:$0xf] }
 0xc13   : > { %6864 = vmatmul.bf16.vlgmr.msrb.gmra.mxu2 %v6621_v32  ;;  %7317 = vmatpush.bf16.msrb.mxu3 %v10191_v8  ;;  %v10154_v8 = vld [vmem:[#allocation40 + $0x30] sm:$0xf]  ;;  %v10283_v25 = vor.u32 %v10904_v28, %v10282_v4 }
 0xc14   : > { %v10155_v62 = vor.u32 %v10872_v39, %v10154_v8  ;;  %v10884_v8 = vld [vmem:[#allocation40 + $0x94] sm:$0xf0]  ;;  %v10891_v39 = vld [vmem:[#allocation40 + $0xd4] sm:$0xf] }
 0xc15   : > { %7307 = vmatpush.bf16.msra.mxu1 %v10283_v25  ;;  %v10194_v25 = vld [vmem:[#allocation40 + $0x80] sm:$0xf] }
 0xc16   : > { %7277 = vmatpush.bf16.msra.mxu2 %v10171_v30  ;;  %v10902_v30 = vld [vmem:[#allocation40 + $0x124] sm:$0xf0] }
 0xc17   : > { %7318 = vmatpush.bf16.msrb.mxu3 %v10183_v0  ;;  %v10894_v0 = vld [vmem:[#allocation40 + $0xe4] sm:$0xf0] }
 0xc1f   : > { %10127 = vmatmul.msk.bf16.vlgmr.msrb.gmra.mxu0 %vm3039_vm5, %v6622_v36 }
 0xc22   : > { %6906 = vmatmul.bf16.vlgmr.msra.gmra.mxu3 %v6621_v32 }
 0xc8c   : > { %v6851_v41 = vpop.f32.mrf.mxu0  ;;  %v6893_v44 = vpop.f32.mrf.mxu1 }
 0xc94   : > { %v6853_v55 = vpop.f32.mrf.mxu0  ;;  %v6895_v59 = vpop.f32.mrf.mxu1 }
 0xc95   : > { %v6879_v35 = vpop.f32.mrf.mxu3 }
 0xc96   : > { %v6865_v38 = vpop.f32.mrf.mxu2 }
 0xc97   : > { %v6866_v45 = vadd.f32 %v6865_v38, %v6851_v41  ;;  %v10874_v38 = vld [vmem:[#allocation40 + $0x44] sm:$0xf0] }
 0xc99   : > { %v6880_v46 = vadd.f32 %v6879_v35, %v6866_v45  ;;  %v10175_v35 = vor.u32 %v10875_v29, %v10172_v12  ;;  %v10870_v12 = vld [vmem:[#allocation40 + $0x24] sm:$0xf0] }
 0xc9b   : > { %v6934_v21 = vmul.f32 %v6932_v42, %v6880_v46  ;;  %7319 = vmatpush.bf16.msrb.mxu3 %v10175_v35  ;;  %v10867_v35 = vld [vmem:[#allocation40 + $0x14] sm:$0xf] }
 0xc9c   : > { %v6921_v63 = vpop.f32.mrf.mxu0 }
 0xc9d   : > { %v6944_v50 = vadd.f32 %v6942_v47, %v6934_v21  ;;  %v6881_v33 = vpop.f32.mrf.mxu3 }
 0xc9e   : > { %v6867_v52 = vpop.f32.mrf.mxu2 }
 0xc9f   : > { %v6948_v61 = vmax.f32 %v6944_v50, 0.0  ;;  %v6868_v49 = vadd.f32 %v6867_v52, %v6853_v55  ;;  %v10164_v55 = vld [vmem:[#allocation40 + $0x48] sm:$0xf0]  ;;  %v10163_v52 = vor.u32 %v10874_v38, %v10162_v43  ;;  %v10140_v38 = vld [vmem:[#allocation40 + $0x18] sm:$0xf0] }
 0xca1   : > { %v6882_v48 = vadd.f32 %v6881_v33, %v6868_v49  ;;  %v6956_v56 = vmul.f32 %v6952_v53, %v6948_v61  ;;  %v6955_v49 = vld [vmem:[%s13372_s28 + $0x18] sm:$0xff]  ;;  %7278 = vmatpush.bf16.msra.mxu2 %v10163_v52  ;;  %v10866_v52 = vld [vmem:[#allocation40 + $0x4] sm:$0xf0] }
 0xca3   : > { %v6936_v60 = vmul.f32 %v6932_v42, %v6882_v48  ;;  %v6964_v3 = vrot.slane %v6956_v56, 7 }
 0xca4   : > { %v6923_v41 = vpop.f32.mrf.mxu0 }
 0xca5   : > { %v6946_v1 = vadd.f32 %v6942_v47, %v6936_v60  ;;  %v6907_v2 = vpop.f32.mrf.mxu3  ;;  %v13215_v15 = vsel %vm2536_vm2, 0.0, %v6964_v3  ;;  %v10873_v47 = vld [vmem:[#allocation40 + $0x44] sm:$0xf]  ;;  %7279 = vmatpush.bf16.msra.mxu2 %v10155_v62  ;;  %v10899_v62 = vld [vmem:[#allocation40 + $0x114] sm:$0xf] }
 0xca6   : > { %v6908_v22 = vadd.f32 %v6907_v2, %v6893_v44  ;;  %v6988_v14 = vrot.slane %v13215_v15, 1  ;;  %v10167_v61 = vor.u32 %v10873_v47, %v10164_v55  ;;  %v7014_v17 = vrot.slane %v13215_v15, 2  ;;  %v10226_v55 = vld [vmem:[#allocation40 + $0xc0] sm:$0xf] }
 0xca7   : > { %v6950_v11 = vmax.f32 %v6946_v1, 0.0 }
 0xca8   : > { %v6922_v18 = vadd.f32 %v6921_v63, %v6908_v22  ;;  %7320 = vmatpush.bf16.msrb.mxu3 %v10167_v61  ;;  %v10865_v61 = vld [vmem:[#allocation40 + $0x4] sm:$0xf] }
 0xca9   : > { %v6958_v58 = vmul.f32 %v6954_v10, %v6950_v11 }
 0xcaa   : > { %v6935_v16 = vmul.f32 %v6933_v57, %v6922_v18 }
 0xcab   : > { %v6966_v26 = vrot.slane %v6958_v58, 7  ;;  %v10251_v58 = vor.u32 %v10896_v20, %v10250_v34 }
 0xcac   : > { %v6945_v7 = vadd.f32 %v6943_v5, %v6935_v16  ;;  %v10156_v16 = vld [vmem:[#allocation40 + $0x38] sm:$0xf0] }
 0xcad   : > { %v6909_v54 = vpop.f32.mrf.mxu3  ;;  %v6967_v23 = vsel %vm2536_vm2, %v6964_v3, %v6966_v26  ;;  %v6976_v27 = vsel %vm2536_vm2, %v6966_v26, 0.0  ;;  %7289 = vmatpush.bf16.msra.mxu0 %v10251_v58  ;;  %v10159_v15 = vor.u32 %v10871_v24, %v10156_v16  ;;  %v10242_v26 = vld [vmem:[#allocation40 + $0xe0] sm:$0xf]  ;;  %v10202_v58 = vld [vmem:[#allocation40 + $0x90] sm:$0xf] }
 0xcae   : > { %v6949_v31 = vmax.f32 %v6945_v7, 0.0  ;;  %v6910_v36 = vadd.f32 %v6909_v54, %v6895_v59  ;;  %v6989_v32 = vrot.slane %v6967_v23, 1  ;;  %v6994_v40 = vrot.slane %v6976_v27, 1  ;;  %v10146_v7 = vld [vmem:[#allocation40 + $0x20] sm:$0xf] }
 0xcaf   : > { %v7015_v22 = vrot.slane %v6967_v23, 2  ;;  %v10243_v29 = vor.u32 %v10894_v0, %v10242_v26  ;;  %v10869_v59 = vld [vmem:[#allocation40 + $0x24] sm:$0xf]  ;;  %v10148_v54 = vld [vmem:[#allocation40 + $0x28] sm:$0xf0]  ;;  %7321 = vmatpush.bf16.msrb.mxu3 %v10159_v15  ;;  %v10147_v23 = vor.u32 %v10870_v12, %v10146_v7  ;;  %v10203_v4 = vor.u32 %v10884_v8, %v10202_v58 }
 0xcb0   : > { %v6924_v45 = vadd.f32 %v6923_v41, %v6910_v36  ;;  %v6990_v42 = vsel %vm1345_vm0, %v6988_v14, %v6989_v32  ;;  %v6995_v46 = vsel %vm1345_vm0, %v6989_v32, %v6994_v40  ;;  %v6957_v33 = vmul.f32 %v6953_v37, %v6949_v31  ;;  %v10274_v14 = vld [vmem:[#allocation40 + $0x120] sm:$0xf]  ;;  %v10234_v36 = vld [vmem:[#allocation40 + $0xd0] sm:$0xf]  ;;  %v10892_v32 = vld [vmem:[#allocation40 + $0xd4] sm:$0xf0] }
 0xcb1   : > { %v11247_v21 = vpack.i.bf16 %v6995_v46, %v6990_v42  ;;  %v7016_v18 = vsel %vm2588_vm3, %v7014_v17, %v7015_v22  ;;  %7290 = vmatpush.bf16.msra.mxu0 %v10243_v29  ;;  %7280 = vmatpush.bf16.msra.mxu2 %v10147_v23  ;;  %v10275_v31 = vor.u32 %v10902_v30, %v10274_v14  ;;  %v10138_v41 = vld [vmem:[#allocation40 + $0x10] sm:$0xf]  ;;  %v10868_v37 = vld [vmem:[#allocation40 + $0x14] sm:$0xf0]  ;;  %v10236_v24 = vld [vmem:[#allocation40 + $0xd8] sm:$0xf0] }
 0xcb2   : > { %v6937_v50 = vmul.f32 %v6933_v57, %v6924_v45  ;;  %v6965_v56 = vrot.slane %v6957_v33, 7  ;;  %v7017_v57 = vrot.slane %v6976_v27, 2  ;;  %v10151_v27 = vor.u32 %v10869_v59, %v10148_v54  ;;  %v10266_v42 = vld [vmem:[#allocation40 + $0x110] sm:$0xf]  ;;  %v10900_v46 = vld [vmem:[#allocation40 + $0x114] sm:$0xf0] }
 0xcb3   : > { %11248 = vrot.lane.b32.xlu0 %v11247_v21, %s12142_s0  ;;  %v10235_v40 = vor.u32 %v10892_v32, %v10234_v36  ;;  %7308 = vmatpush.bf16.msra.mxu1 %v10275_v31  ;;  %v10139_v43 = vor.u32 %v10868_v37, %v10138_v41  ;;  %v10143_v45 = vor.u32 %v10867_v35, %v10140_v38  ;;  %v10890_v21 = vld [vmem:[#allocation40 + $0xc4] sm:$0xf0]  ;;  %v10130_v33 = vld [vmem:[#allocation40] sm:$0xf]  ;;  %v10268_v16 = vld [vmem:[#allocation40 + $0x118] sm:$0xf0] }
 0xcb4   : > { %v6947_v53 = vadd.f32 %v6943_v5, %v6937_v50  ;;  %v6975_v60 = vsel %vm2536_vm2, 0.0, %v6965_v56  ;;  %v7018_v6 = vsel %vm2588_vm3, %v7015_v22, %v7017_v57  ;;  %7322 = vmatpush.bf16.msrb.mxu3 %v10151_v27  ;;  %v10267_v47 = vor.u32 %v10900_v46, %v10266_v42  ;;  %v10882_v26 = vld [vmem:[#allocation40 + $0x84] sm:$0xf0]  ;;  %v10889_v0 = vld [vmem:[#allocation40 + $0xc4] sm:$0xf] }
 0xcb5   : > { %v6991_v1 = vrot.slane %v6975_v60, 1  ;;  %v11257_v19 = vpack.i.bf16 %v7018_v6, %v7016_v18  ;;  %7291 = vmatpush.bf16.msra.mxu0 %v10235_v40  ;;  %7281 = vmatpush.bf16.msra.mxu2 %v10139_v43  ;;  %v10227_v50 = vor.u32 %v10890_v21, %v10226_v55  ;;  %v10244_v18 = vld [vmem:[#allocation40 + $0xe8] sm:$0xf0]  ;;  %v10901_v6 = vld [vmem:[#allocation40 + $0x124] sm:$0xf]  ;;  %v10239_v28 = vor.u32 %v10891_v39, %v10236_v24 }
 0xcb6   : > { %v6951_v48 = vmax.f32 %v6947_v53, 0.0  ;;  %v10131_v53 = vor.u32 %v10866_v52, %v10130_v33  ;;  %v10271_v15 = vor.u32 %v10899_v62, %v10268_v16  ;;  %v10195_v7 = vor.u32 %v10882_v26, %v10194_v25  ;;  %v10228_v29 = vld [vmem:[#allocation40 + $0xc8] sm:$0xf0]  ;;  %v10897_v12 = vld [vmem:[#allocation40 + $0x104] sm:$0xf] }
 0xcb7   : > { %7309 = vmatpush.bf16.msra.mxu1 %v10267_v47  ;;  %v10260_v59 = vld [vmem:[#allocation40 + $0x108] sm:$0xf0]  ;;  %v10231_v54 = vor.u32 %v10889_v0, %v10228_v29  ;;  %v10887_v27 = vld [vmem:[#allocation40 + $0xb4] sm:$0xf]  ;;  %v10220_v14 = vld [vmem:[#allocation40 + $0xb8] sm:$0xf0] }
 0xcb8   : > { %v6959_v9 = vmul.f32 %v6955_v49, %v6951_v48  ;;  %7323 = vmatpush.bf16.msrb.mxu3 %v10143_v45  ;;  %v10132_v49 = vld [vmem:[#allocation40 + $0x8] sm:$0xf0]  ;;  %v10263_v23 = vor.u32 %v10897_v12, %v10260_v59  ;;  %v10223_v30 = vor.u32 %v10887_v27, %v10220_v14  ;;  %v10885_v31 = vld [vmem:[#allocation40 + $0xa4] sm:$0xf]  ;;  %v10883_v40 = vld [vmem:[#allocation40 + $0x94] sm:$0xf] }
 0xcb9   : > { %7292 = vmatpush.bf16.msra.mxu0 %v10227_v50  ;;  %v10135_v48 = vor.u32 %v10865_v61, %v10132_v49  ;;  %7282 = vmatpush.bf16.msra.mxu2 %v10131_v53  ;;  %v10212_v36 = vld [vmem:[#allocation40 + $0xa8] sm:$0xf0]  ;;  %v10204_v41 = vld [vmem:[#allocation40 + $0x98] sm:$0xf0]  ;;  %v10881_v35 = vld [vmem:[#allocation40 + $0x84] sm:$0xf] }
 0xcba   : > { %v6968_v44 = vrot.slane %v6959_v9, 7  ;;  %v10898_v9 = vld [vmem:[#allocation40 + $0x104] sm:$0xf0]  ;;  %v10215_v32 = vor.u32 %v10885_v31, %v10212_v36  ;;  %v10207_v37 = vor.u32 %v10883_v40, %v10204_v41  ;;  %v10196_v43 = vld [vmem:[#allocation40 + $0x88] sm:$0xf0] }
 0xcbb   : > { %v10199_v42 = vor.u32 %v10881_v35, %v10196_v43 }
 0xcbc   : > { %v6969_v51 = vsel %vm2536_vm2, %v6965_v56, %v6968_v44  ;;  %v6977_v63 = vsel %vm2536_vm2, %v6968_v44, 0.0  ;;  %v10258_v56 = vld [vmem:[#allocation40 + $0x100] sm:$0xf]  ;;  %7324 = vmatpush.bf16.msrb.mxu3 %v10135_v48 }
 0xcbd   : > { %v11242_v2 = vpack.i.bf16 %v6969_v51, %v6975_v60  ;;  %v6992_v3 = vrot.slane %v6969_v51, 1  ;;  %v6996_v10 = vrot.slane %v6977_v63, 1  ;;  %v10259_v44 = vor.u32 %v10898_v9, %v10258_v56  ;;  %v10218_v60 = vld [vmem:[#allocation40 + $0xb0] sm:$0xf]  ;;  %v10888_v51 = vld [vmem:[#allocation40 + $0xb4] sm:$0xf0] }
 0xcbe   : > { %v10895_v63 = vld [vmem:[#allocation40 + $0xf4] sm:$0xf] }
 0xcbf   : > { %11243 = vrot.lane.b32.xlu2 %v11242_v2, %s12142_s0  ;;  %v6993_v11 = vsel %vm1345_vm0, %v6991_v1, %v6992_v3  ;;  %v6997_v5 = vsel %vm1345_vm0, %v6992_v3, %v6996_v10  ;;  %v10219_v1 = vor.u32 %v10888_v51, %v10218_v60  ;;  %v10252_v2 = vld [vmem:[#allocation40 + $0xf8] sm:$0xf0]  ;;  %v10903_v3 = vld [vmem:[#allocation40 + $0x134] sm:$0xf]  ;;  %7310 = vmatpush.bf16.msra.mxu1 %v10259_v44 }
 0xcc0   : > { %v11252_v13 = vpack.i.bf16 %v6997_v5, %v6993_v11  ;;  %v10284_v10 = vld [vmem:[#allocation40 + $0x138] sm:$0xf0]  ;;  %v10255_v22 = vor.u32 %v10895_v63, %v10252_v2  ;;  %v10210_v11 = vld [vmem:[#allocation40 + $0xa0] sm:$0xf]  ;;  %v10886_v5 = vld [vmem:[#allocation40 + $0xa4] sm:$0xf0] }
 0xcc1   : > { %v10287_v57 = vor.u32 %v10903_v3, %v10284_v10  ;;  %7293 = vmatpush.bf16.msra.mxu0 %v10219_v1  ;;  %v10211_v17 = vor.u32 %v10886_v5, %v10210_v11 }
 0xcc2   : > { %11253 = vrot.lane.b32.xlu1 %v11252_v13, %s12142_s0  ;;  %v10893_v13 = vld [vmem:[#allocation40 + $0xe4] sm:$0xf] }
 0xcc3   : > { %7331 = vmatpush.bf16.msrb.mxu1 %v10255_v22  ;;  %7349 = vmatpush.bf16.msrb.mxu2 %v10287_v57  ;;  %v10247_v34 = vor.u32 %v10893_v13, %v10244_v18 }
 0xcc5   : > { %7294 = vmatpush.bf16.msra.mxu0 %v10211_v17 }
 0xcc7   : > { %11258 = vrot.lane.b32.xlu2 %v11257_v19, %s12142_s0  ;;  %v10276_v19 = vld [vmem:[#allocation40 + $0x128] sm:$0xf0]  ;;  %7332 = vmatpush.bf16.msrb.mxu1 %v10247_v34 }
 0xcc8   : > { %v10279_v20 = vor.u32 %v10901_v6, %v10276_v19 }
 0xcc9   : > { %7295 = vmatpush.bf16.msra.mxu0 %v10203_v4 }
 0xcca   : > { %7350 = vmatpush.bf16.msrb.mxu2 %v10279_v20 }
 0xccb   : > { %7333 = vmatpush.bf16.msrb.mxu1 %v10239_v28 }
 0xccd   : > { %7296 = vmatpush.bf16.msra.mxu0 %v10195_v7 }
 0xcce   : > { %7351 = vmatpush.bf16.msrb.mxu2 %v10271_v15 }
 0xccf   : > { %7334 = vmatpush.bf16.msrb.mxu1 %v10231_v54 }
 0xcd2   : > { %7352 = vmatpush.bf16.msrb.mxu2 %v10263_v23 }
 0xcd3   : > { %7335 = vmatpush.bf16.msrb.mxu1 %v10223_v30 }
 0xcd7   : > { %7336 = vmatpush.bf16.msrb.mxu1 %v10215_v32 }
 0xcdb   : > { %7337 = vmatpush.bf16.msrb.mxu1 %v10207_v37 }
 0xcdf   : > { %7338 = vmatpush.bf16.msrb.mxu1 %v10199_v42 }
 0xd19   : > { %v11244_v38 = vpop.permute.xlu2 %11243 }
 0xd1a   : > { %v11246_v46 = vunpack.i.h.bf16 %v11244_v38  ;;  %v11245_v47 = vunpack.i.l.bf16 %v11244_v38 }
 0xd21   : > { %v11259_v61 = vpop.permute.xlu2 %11258 }
 0xd22   : > { %v11261_v49 = vunpack.i.h.bf16 %v11259_v61  ;;  %v11260_v48 = vunpack.i.l.bf16 %v11259_v61 }
 0xd25   : > { %v11249_v45 = vpop.permute.xlu0 %11248 }
 0xd26   : > { %v11251_v55 = vunpack.i.h.bf16 %v11249_v45  ;;  %v11250_v21 = vunpack.i.l.bf16 %v11249_v45 }
 0xd28   : > { %v7026_v50 = vsel %vm3039_vm5, %v11246_v46, %v11251_v55  ;;  %v7025_v33 = vsel %vm3039_vm5, %v11245_v47, %v11250_v21 }
 0xd29   : > { %v7029_v52 = vpack.c.bf16 %v7026_v50, %v7025_v33 }
 0xd2b   : > { %7283 = vmatmul.bf16.vlgmr.msra.gmra.mxu2 %v7029_v52  ;;  %7325 = vmatmul.bf16.vlgmr.msrb.gmra.mxu3 %v7029_v52 }
 0xd34   : > { %v11254_v53 = vpop.permute.xlu1 %11253 }
 0xd35   : > { %v11256_v56 = vunpack.i.h.bf16 %v11254_v53  ;;  %v11255_v9 = vunpack.i.l.bf16 %v11254_v53 }
 0xd37   : > { %v7006_v44 = vsel %vm3039_vm5, %v11250_v21, %v11255_v9  ;;  %v7007_v60 = vsel %vm3039_vm5, %v11251_v55, %v11256_v56  ;;  %v7027_v51 = vsel %vm3039_vm5, %v11255_v9, %v11260_v48  ;;  %v7028_v63 = vsel %vm3039_vm5, %v11256_v56, %v11261_v49 }
 0xd38   : > { %v7030_v1 = vpack.c.bf16 %v7007_v60, %v7006_v44  ;;  %v7031_v2 = vpack.c.bf16 %v7028_v63, %v7027_v51 }
 0xd3a   : > { %7297 = vmatmul.bf16.vlgmr.msra.gmra.mxu0 %v7030_v1  ;;  %10288 = vmatmul.msk.bf16.vlgmr.msra.gmra.mxu1 %vm3813_vm6, %v7031_v2 }
 0xd3b   : > { %10289 = vmatmul.msk.bf16.vlgmr.msrb.gmra.mxu2 %vm3813_vm6, %v7031_v2 }
 0xd4a   : > { %7339 = vmatmul.bf16.vlgmr.msrb.gmra.mxu1 %v7030_v1 }
 0xd4b   : > { %11989 = shalt.err (!%p11986_p12)
}
 0xd4c   : > { %s13373_s22 = sld [smem:[#allocation76_spill]]  ;;  %v7359_v3 = vld [vmem:[%s12293_s27] sm:$0xf]  ;;  %s10292_s0 = sshll.u32 %s12705_s11, 5 }
 0xd4d   : > { %11006 = dma.vmem_to_hbm [thread:$0]  (%p12343_p5), %s7405_s3, 16, %s7407_s1, %s7391_s23   ;;  %v7361_v22 = vperm.slane %v7359_v3, 0  ;;  %v7371_v57 = vperm.slane %v7359_v3, 1  ;;  %v7362_v16 = vperm.slane %v7359_v3, 2  ;;  %v7372_v15 = vperm.slane %v7359_v3, 3 }
 0xd4f   : > { %v7365_v17 = vperm.slane %v7361_v22, 0  ;;  %v7375_v6 = vperm.slane %v7371_v57, 1  ;;  %v7366_v7 = vperm.slane %v7362_v16, 0  ;;  %v7376_v12 = vperm.slane %v7372_v15, 1 }
 0xd52   : > { %s1331_s13 = scalar_lea.vmem %s13373_s22, %s10292_s0 }
 0xdae   : > { %v7284_v10 = vpop.f32.mrf.mxu2  ;;  %v7326_v4 = vpop.f32.mrf.mxu3 }
 0xdb6   : > { %v7286_v34 = vpop.f32.mrf.mxu2  ;;  %v7328_v23 = vpop.f32.mrf.mxu3 }
 0xdb7   : > { %v7298_v11 = vpop.f32.mrf.mxu0  ;;  %v7312_v5 = vpop.f32.mrf.mxu1 }
 0xdb8   : > { %v7299_v13 = vadd.f32 %v7298_v11, %v7284_v10 }
 0xdba   : > { %v7313_v18 = vadd.f32 %v7312_v5, %v7299_v13 }
 0xdbc   : > { %v7367_v19 = vmul.f32 %v7365_v17, %v7313_v18 }
 0xdbe   : > { %v7377_v20 = vadd.f32 %v7375_v6, %v7367_v19  ;;  %v7354_v25 = vpop.f32.mrf.mxu2 }
 0xdbf   : > { %v7300_v58 = vpop.f32.mrf.mxu0  ;;  %v7314_v8 = vpop.f32.mrf.mxu1 }
 0xdc0   : > { %7381 = vst [vmem:[%s1331_s13] sm:$0xff] %v7377_v20  ;;  %v7301_v39 = vadd.f32 %v7300_v58, %v7286_v34 }
 0xdc2   : > { %v7315_v24 = vadd.f32 %v7314_v8, %v7301_v39 }
 0xdc4   : > { %v7369_v62 = vmul.f32 %v7365_v17, %v7315_v24 }
 0xdc6   : > { %v7379_v28 = vadd.f32 %v7375_v6, %v7369_v62  ;;  %v7356_v30 = vpop.f32.mrf.mxu2 }
 0xdc7   : > { %v7340_v26 = vpop.f32.mrf.mxu1 }
 0xdc8   : > { %7383 = vst [vmem:[%s1331_s13 + $0x10] sm:$0xff] %v7379_v28  ;;  %v7341_v0 = vadd.f32 %v7340_v26, %v7326_v4 }
 0xdca   : > { %v7355_v29 = vadd.f32 %v7354_v25, %v7341_v0 }
 0xdcc   : > { %v7368_v59 = vmul.f32 %v7366_v7, %v7355_v29 }
 0xdce   : > { %v7378_v54 = vadd.f32 %v7376_v12, %v7368_v59 }
 0xdcf   : > { %v7342_v27 = vpop.f32.mrf.mxu1 }
 0xdd0   : > { %7382 = vst [vmem:[%s1331_s13 + $0x8] sm:$0xff] %v7378_v54  ;;  %v7343_v14 = vadd.f32 %v7342_v27, %v7328_v23 }
 0xdd2   : > { %v7357_v31 = vadd.f32 %v7356_v30, %v7343_v14 }
 0xdd4   : > { %v7370_v36 = vmul.f32 %v7366_v7, %v7357_v31 }
 0xdd6   : > { %v7380_v32 = vadd.f32 %v7376_v12, %v7370_v36 }
 0xdd8   : > { %7384 = vst [vmem:[%s1331_s13 + $0x18] sm:$0xff] %v7380_v32 }
 0xdd9 PF: > { %s13374_s7 = sld [smem:[#allocation79_spill]] }
 0xdda   : > { %s13375_s11 = sld [smem:[#allocation77_spill]] }
 0xddf   : > { %p11062_p5 = scmp.ge.s32.totalorder %s13374_s7, 2 }
 0xde0   : > { %s7426_s6 = sand.u32 1, %s13375_s11  }
 0xde1   : > { %p11009_p13 = pnand %p11062_p5, %p12347_p6  ;;  %s7427_s29 = scalar_lea.sflag [#allocation4], %s7426_s6 }
 0xde3   : > { %p11010_p0 = pneg %p11009_p13 }
 0xde5   : > { %12059 = dma.done.wait (%p11010_p0), %s7427_s29, 16  }
 0xde6   : > { %12061 = vsyncadd (%p11010_p0), %s7427_s29, 4294967280  ;;  %s13377_s18 = sld [smem:[#allocation80_spill]]  ;;  %s13380_s15 = smov %s12068_s16 }
 0xde7   : > { %s13378_s3 = sld [smem:[#allocation78_spill]] }
 0xde8   : > { %s13379_s0 = sld [smem:[#allocation81_spill]] }
 0xdec   : > { %p85_p1 = scmp.ge.s32.totalorder %s13377_s18, 4  }
 0xded   : > { %s13381_s16 = smov %s13378_s3 }
 0xdee   :  { %87 = sbr.rel (!%p85_p1) target bundleno = 70 (0x46), region = 314 }
 0xdf3   :  { %7432 = vsyncpa [#allocation3], 1 }
 0xdf4   :  { %7434 = vsyncpa [#allocation3 + $0x1], 1 }
 0xdf5   :  { %7435 = vsyncpa [#allocation6], 1 }
 0xdf6   :  { %7436 = vsyncpa [#allocation9], 1 }
 0xdf7   :  { %7437 = vsyncpa [#allocation12], 1 }
 0xdf8   :  { %7438 = vsyncpa [#allocation15], 1 }
 0xdf9   :  { %7439 = vsyncpa [#allocation18], 1 }
 0xdfa   :  { %7440 = vsyncpa [#allocation21], 1 }
 0xdfb   :  { %7441 = vsyncpa [#allocation24], 1 }
 0xdfc   :  { %7442 = vsyncpa [#allocation27], 1 }
 0xdfd   :  { %7443 = vsyncpa [#allocation30], 1 }
 0xdfe   :  { %7444 = vsyncpa [#allocation33], 1 }
 0xdff   :  { %7445 = vsyncpa [#allocation36], 1 }
 0xe00   :  { %7446 = vsyncpa [#allocation39], 1 }
 0xe01   :  { %7447 = vsyncpa [#allocation4], 1 }
 0xe02   :  { %7449 = vsyncpa [#allocation4 + $0x1], 1 }

</bundles_post_ra>
